<compile_context>
chip_gen: v5e
topology: v5e:2x2
jax: 0.10.0
libtpu: 0.0.40
codegen_flags: <defaults>
</compile_context>

<pallas_src>
import numpy as np
import jax
import jax.numpy as jnp
from jax.experimental import pallas as pl
from jax.experimental.pallas import tpu as pltpu

_TB = 32                  # images per grid step
_NPH = 13                 # pooled rows / cols per image
_KIN = 4 * 28             # conv matmul K: 4 overlapping row-streams x 28 pixels
_NCONV = 2048             # conv matmul N: (even/odd:2) * (dx:2) * (pw pad 16) * (c:32)
_HALF1 = 1024             # even/odd output-row split
_HALF2 = 512              # dx (x-phase) split = 16 * 32
_MROWS = _NPH * _TB       # conv matmul M per block: row = ph*_TB + b
_NOUT = 128               # fc2 output padded to a lane-dense 128


# ----------------------------------------------------------------------------
# Single fused kernel: conv + bias + ReLU + 2x2 max-pool + fc1 + ReLU + fc2
# + log-softmax for a tile of _TB images.
# ----------------------------------------------------------------------------
def _net_kernel(xs_ref, wc_ref, brow_ref, w1_ref, b1_ref, w2_ref, b2_ref,
                out_ref):
    # xs_ref  : (416, 112) bf16   row = ph*_TB + b, cols = [row 2ph|2ph+1|2ph+2|2ph+3]
    # wc_ref  : (112, 2048) bf16  banded conv weights; lanes [0:1024]=even rows,
    #                             [1024:2048]=odd rows; within a half: dx*512+pw*32+c
    # brow_ref: (1, 512) f32      conv bias tiled over pw (zero in pad columns)
    # w1_ref  : (13, 512, 128) bf16  fc1 weights permuted to kernel feature order
    # b1_ref  : (1, 128) f32
    # w2_ref  : (128, 128) f32    fc2 padded to 128 outputs (zeros beyond col 10)
    # b2_ref  : (1, 128) f32      real bias in [:10], -1e30 in the pad lanes
    # out_ref : (TB, 128) f32     lane-dense log-probabilities (cols >=10 are junk)
    f32 = jnp.float32

    # One K=112, N=2048 bf16 MXU matmul produces both even and odd conv rows.
    conv = jnp.dot(xs_ref[...], wc_ref[...], preferred_element_type=f32)  # (416, 2048)

    # 2x2 max-pool: even/odd row max, then dx lane-half max (aligned static
    # lane slices).  Applying (+bias, ReLU) after the max is exact (monotone).
    ypool = jnp.maximum(conv[:, :_HALF1], conv[:, _HALF1:])       # (416, 1024)
    xpool = jnp.maximum(ypool[:, :_HALF2], ypool[:, _HALF2:])     # (416, 512)
    act = jnp.maximum(xpool + brow_ref[...], 0.0)                 # conv bias + ReLU
    act_bf = act.astype(jnp.bfloat16)                             # single hoisted cast

    # TODO(synk): Dropout2d layers are identity in eval mode; training-mode
    # channel dropout (PRNG masks) is not implemented here.

    # fc1: accumulate over the 13 pooled-row groups (aligned 32-row slices),
    # bf16 operands with f32 accumulation on the MXU.
    h = jnp.zeros((_TB, 128), f32)
    for ph in range(_NPH):
        h = h + jnp.dot(act_bf[ph * _TB:(ph + 1) * _TB, :], w1_ref[ph],
                        preferred_element_type=f32)
    h = jnp.maximum(h + b1_ref[...], 0.0)

    # fc2 + log-softmax over 128 lanes (pad lanes carry -1e30 logits -> exp==0).
    logits = jnp.dot(h, w2_ref[...], preferred_element_type=f32) + b2_ref[...]
    m = jnp.max(logits, axis=1, keepdims=True)
    lse = jnp.log(jnp.sum(jnp.exp(logits - m), axis=1, keepdims=True)) + m
    out_ref[...] = logits - lse


# ----------------------------------------------------------------------------
# Trace-time weight preparation (tiny, done once under jit).
# ----------------------------------------------------------------------------
def _prep_weights(params):
    wc, bc, w1, b1, w2, b2 = params

    # Banded conv weights: wk[ki, x_in, dx*512 + pw*32 + c] = wc[c, 0, ki, kj]
    # where x_in = 2*pw + dx + kj; zero elsewhere (incl. pw >= 13 pad columns).
    sel = np.zeros((3, 28, 2, 16), np.float32)
    for kj in range(3):
        for dx in range(2):
            for pw in range(_NPH):
                sel[kj, 2 * pw + dx + kj, dx, pw] = 1.0
    w9 = wc.reshape(32, 3, 3)                                    # (c, ki, kj)
    wk = jnp.einsum('jxdp,ckj->kxdpc', jnp.asarray(sel), w9)     # (ki, x_in, dx, pw, c)
    wk = wk.reshape(3, 28, 1024)

    # Combined K=112 slab: rows are the four streams (image rows 2ph..2ph+3),
    # even conv row (y=2ph) uses streams 0..2 with kernel rows 0..2,
    # odd conv row (y=2ph+1) uses streams 1..3 with kernel rows 0..2.
    z = jnp.zeros((28, 1024), wk.dtype)
    w_even = jnp.concatenate([wk[0], wk[1], wk[2], z], axis=0)   # (112, 1024)
    w_odd = jnp.concatenate([z, wk[0], wk[1], wk[2]], axis=0)    # (112, 1024)
    wcomb = jnp.concatenate([w_even, w_odd], axis=1).astype(jnp.bfloat16)  # (112, 2048)

    # conv bias tiled over pw, zeros in the pw-pad columns
    brow = jnp.pad(jnp.tile(bc, _NPH), (0, _HALF2 - 32 * _NPH)).reshape(1, _HALF2)

    # fc1 weights: torch flatten row order (c*169 + 13*ph + pw) ->
    # kernel feature order (ph ; pw*32 + c), zero rows in the pw padding.
    w1t = w1.reshape(32, _NPH, _NPH, 128).transpose(1, 2, 0, 3)  # (ph, pw, c, f)
    w1p = jnp.pad(w1t, ((0, 0), (0, 3), (0, 0), (0, 0))).reshape(_NPH, _HALF2, 128)
    w1p = w1p.astype(jnp.bfloat16)

    # fc2 padded to 128 lane-dense outputs; pad lanes get -1e30 bias so the
    # in-kernel 128-wide log-softmax is exactly the 10-wide one on cols [:10].
    w2p = jnp.pad(w2, ((0, 0), (0, _NOUT - 10)))
    b2p = jnp.concatenate(
        [b2, jnp.full((_NOUT - 10,), -1e30, jnp.float32)]).reshape(1, _NOUT)

    return wcomb, brow, w1p, b1.reshape(1, 128), w2p, b2p


@jax.jit
def net_forward(x, params):
    """x: (B, 1, 28, 28) float32 (NCHW, like PyTorch). Returns (B, 10) log-probs."""
    wcomb, brow, w1p, b1r, w2p, b2r = _prep_weights(params)
    B = x.shape[0]
    nblk = (B + _TB - 1) // _TB
    Bp = nblk * _TB

    img = x.reshape(B, 28, 28).astype(jnp.bfloat16)
    if Bp != B:
        img = jnp.pad(img, ((0, Bp - B), (0, 0), (0, 0)))

    # Overlapping 4-row windows at stride 2: window ph covers image rows
    # 2ph..2ph+3.  One gather + one transpose, all in bf16.
    ridx = (2 * np.arange(_NPH, dtype=np.int32)[:, None]
            + np.arange(4, dtype=np.int32)[None, :]).reshape(-1)          # (52,)
    win = img[:, ridx, :].reshape(nblk, _TB, _NPH, _KIN)                  # (nblk,TB,13,112)
    xs = win.transpose(0, 2, 1, 3).reshape(nblk * _MROWS, _KIN)           # row = ph*TB + b

    out = pl.pallas_call(
        _net_kernel,
        out_shape=jax.ShapeDtypeStruct((Bp, _NOUT), jnp.float32),
        grid=(nblk,),
        in_specs=[
            pl.BlockSpec((_MROWS, _KIN), lambda i: (i, 0)),
            pl.BlockSpec((_KIN, _NCONV), lambda i: (0, 0)),
            pl.BlockSpec((1, _HALF2), lambda i: (0, 0)),
            pl.BlockSpec((_NPH, _HALF2, 128), lambda i: (0, 0, 0)),
            pl.BlockSpec((1, 128), lambda i: (0, 0)),
            pl.BlockSpec((_NOUT, _NOUT), lambda i: (0, 0)),
            pl.BlockSpec((1, _NOUT), lambda i: (0, 0)),
        ],
        out_specs=pl.BlockSpec((_TB, _NOUT), lambda i: (i, 0)),
        compiler_params=pltpu.CompilerParams(
            dimension_semantics=("parallel",),
            vmem_limit_bytes=32 * 1024 * 1024),
    )(xs, wcomb, brow, w1p, b1r, w2p, b2r)
    return out[:B, :10]


# ----------------------------------------------------------------------------
# Deterministic parameter init (PyTorch-style uniform(-1/sqrt(fan_in), ..)).
# ----------------------------------------------------------------------------
def init_params(key):
    ks = jax.random.split(key, 6)

    def u(k, shape, fan_in):
        bound = 1.0 / np.sqrt(fan_in)
        return jax.random.uniform(k, shape, jnp.float32, -bound, bound)

    wc = u(ks[0], (32, 1, 3, 3), 9)       # conv weight, OIHW
    bc = u(ks[1], (32,), 9)
    w1 = u(ks[2], (5408, 128), 5408)      # stored (in, out); torch stores (out, in)
    b1 = u(ks[3], (128,), 5408)
    w2 = u(ks[4], (128, 10), 128)
    b2 = u(ks[5], (10,), 128)
    return wc, bc, w1, b1, w2, b2


def reference_forward(x, params):
    wc, bc, w1, b1, w2, b2 = params
    B = x.shape[0]
    y = jax.lax.conv_general_dilated(
        x, wc, (1, 1), "VALID",
        dimension_numbers=("NCHW", "OIHW", "NCHW"))
    y = jnp.maximum(y + bc.reshape(1, 32, 1, 1), 0.0)            # (B,32,26,26)
    y = y.reshape(B, 32, 13, 2, 13, 2).max(axis=(3, 5))          # (B,32,13,13)
    y = y.reshape(B, 5408)
    h = jnp.maximum(y @ w1 + b1, 0.0)
    logits = h @ w2 + b2
    return jax.nn.log_softmax(logits, axis=1)


if __name__ == "__main__":
    key = jax.random.PRNGKey(0)
    kx, kp = jax.random.split(key)
    x = jax.random.normal(kx, (2, 1, 28, 28), jnp.float32)   # MNIST-shaped input
    params = init_params(kp)

    out = jax.block_until_ready(net_forward(x, params))
    ref = jax.block_until_ready(reference_forward(x, params))

    assert out.shape == (2, 10) and out.dtype == jnp.float32
    assert np.allclose(np.asarray(out), np.asarray(ref), rtol=2e-2, atol=2e-2), (
        "Pallas output mismatch vs JAX reference")
    print("KERNEL_OK")
</pallas_src>

<mosaic_0001>
module attributes {stable_mosaic.version = 11 : i64} {
  func.func @_net_kernel(%arg0: i32, %arg1: memref<416x112xbf16, #tpu.memory_space<vmem>>, %arg2: memref<112x2048xbf16, #tpu.memory_space<vmem>>, %arg3: memref<1x512xf32, #tpu.memory_space<vmem>>, %arg4: memref<13x512x128xbf16, #tpu.memory_space<vmem>>, %arg5: memref<1x128xf32, #tpu.memory_space<vmem>>, %arg6: memref<128x128xf32, #tpu.memory_space<vmem>>, %arg7: memref<1x128xf32, #tpu.memory_space<vmem>>, %arg8: memref<32x128xf32, #tpu.memory_space<vmem>>) attributes {dimension_semantics = [#tpu.dimension_semantics<parallel>], iteration_bounds = array<i64: 1>, scalar_prefetch = 0 : i64, scratch_operands = 0 : i64, tpu.core_type = #tpu.core_type<tc>, window_params = [{transform_indices = @transform_0, window_bounds = array<i64: 416, 112>}, {pipeline_mode = #tpu.pipeline_mode<synchronous>, transform_indices = @transform_1, window_bounds = array<i64: 112, 2048>}, {pipeline_mode = #tpu.pipeline_mode<synchronous>, transform_indices = @transform_2, window_bounds = array<i64: 1, 512>}, {pipeline_mode = #tpu.pipeline_mode<synchronous>, transform_indices = @transform_3, window_bounds = array<i64: 13, 512, 128>}, {pipeline_mode = #tpu.pipeline_mode<synchronous>, transform_indices = @transform_4, window_bounds = array<i64: 1, 128>}, {pipeline_mode = #tpu.pipeline_mode<synchronous>, transform_indices = @transform_5, window_bounds = array<i64: 128, 128>}, {pipeline_mode = #tpu.pipeline_mode<synchronous>, transform_indices = @transform_6, window_bounds = array<i64: 1, 128>}, {transform_indices = @transform_7, window_bounds = array<i64: 32, 128>}]} {
    %c0 = arith.constant 0 : index
    %c0_0 = arith.constant 0 : index
    %0 = vector.load %arg1[%c0, %c0_0] : memref<416x112xbf16, #tpu.memory_space<vmem>>, vector<416x112xbf16>
    %c0_1 = arith.constant 0 : index
    %c0_2 = arith.constant 0 : index
    %1 = vector.load %arg2[%c0_1, %c0_2] : memref<112x2048xbf16, #tpu.memory_space<vmem>>, vector<112x2048xbf16>
    %cst = arith.constant dense<0.000000e+00> : vector<416x2048xf32>
    %2 = tpu.matmul %0, %1, %cst {dimension_numbers = #tpu.dot_dimension_numbers<[1], [0], [0], [1], [0, 0, 1, 1], [], []>} : vector<416x112xbf16>, vector<112x2048xbf16>, vector<416x2048xf32> -> vector<416x2048xf32>
    %3 = vector.extract_strided_slice %2 {offsets = [0, 0], sizes = [416, 1024], strides = [1, 1]} : vector<416x2048xf32> to vector<416x1024xf32>
    %4 = vector.extract_strided_slice %2 {offsets = [0, 1024], sizes = [416, 1024], strides = [1, 1]} : vector<416x2048xf32> to vector<416x1024xf32>
    %5 = arith.maximumf %3, %4 : vector<416x1024xf32>
    %6 = vector.extract_strided_slice %5 {offsets = [0, 0], sizes = [416, 512], strides = [1, 1]} : vector<416x1024xf32> to vector<416x512xf32>
    %7 = vector.extract_strided_slice %5 {offsets = [0, 512], sizes = [416, 512], strides = [1, 1]} : vector<416x1024xf32> to vector<416x512xf32>
    %8 = arith.maximumf %6, %7 : vector<416x512xf32>
    %c0_3 = arith.constant 0 : index
    %c0_4 = arith.constant 0 : index
    %9 = vector.load %arg3[%c0_3, %c0_4] : memref<1x512xf32, #tpu.memory_space<vmem>>, vector<1x512xf32>
    %10 = vector.broadcast %9 : vector<1x512xf32> to vector<416x512xf32>
    %11 = arith.addf %8, %10 : vector<416x512xf32>
    %cst_5 = arith.constant 0.000000e+00 : f32
    %12 = vector.broadcast %cst_5 : f32 to vector<416x512xf32>
    %13 = arith.maximumf %11, %12 : vector<416x512xf32>
    %14 = arith.truncf %13 : vector<416x512xf32> to vector<416x512xbf16>
    %cst_6 = arith.constant 0.000000e+00 : f32
    %15 = vector.broadcast %cst_6 : f32 to vector<32x128xf32>
    %16 = vector.extract_strided_slice %14 {offsets = [0, 0], sizes = [32, 512], strides = [1, 1]} : vector<416x512xbf16> to vector<32x512xbf16>
    %c0_7 = arith.constant 0 : index
    %c0_8 = arith.constant 0 : index
    %c0_9 = arith.constant 0 : index
    %17 = vector.load %arg4[%c0_7, %c0_8, %c0_9] : memref<13x512x128xbf16, #tpu.memory_space<vmem>>, vector<1x512x128xbf16>
    %18 = vector.shape_cast %17 : vector<1x512x128xbf16> to vector<512x128xbf16>
    %cst_10 = arith.constant dense<0.000000e+00> : vector<32x128xf32>
    %19 = tpu.matmul %16, %18, %cst_10 {dimension_numbers = #tpu.dot_dimension_numbers<[1], [0], [0], [1], [0, 0, 1, 1], [], []>} : vector<32x512xbf16>, vector<512x128xbf16>, vector<32x128xf32> -> vector<32x128xf32>
    %20 = arith.addf %15, %19 : vector<32x128xf32>
    %21 = vector.extract_strided_slice %14 {offsets = [32, 0], sizes = [32, 512], strides = [1, 1]} : vector<416x512xbf16> to vector<32x512xbf16>
    %c1 = arith.constant 1 : index
    %c0_11 = arith.constant 0 : index
    %c0_12 = arith.constant 0 : index
    %22 = vector.load %arg4[%c1, %c0_11, %c0_12] : memref<13x512x128xbf16, #tpu.memory_space<vmem>>, vector<1x512x128xbf16>
    %23 = vector.shape_cast %22 : vector<1x512x128xbf16> to vector<512x128xbf16>
    %cst_13 = arith.constant dense<0.000000e+00> : vector<32x128xf32>
    %24 = tpu.matmul %21, %23, %cst_13 {dimension_numbers = #tpu.dot_dimension_numbers<[1], [0], [0], [1], [0, 0, 1, 1], [], []>} : vector<32x512xbf16>, vector<512x128xbf16>, vector<32x128xf32> -> vector<32x128xf32>
    %25 = arith.addf %20, %24 : vector<32x128xf32>
    %26 = vector.extract_strided_slice %14 {offsets = [64, 0], sizes = [32, 512], strides = [1, 1]} : vector<416x512xbf16> to vector<32x512xbf16>
    %c2 = arith.constant 2 : index
    %c0_14 = arith.constant 0 : index
    %c0_15 = arith.constant 0 : index
    %27 = vector.load %arg4[%c2, %c0_14, %c0_15] : memref<13x512x128xbf16, #tpu.memory_space<vmem>>, vector<1x512x128xbf16>
    %28 = vector.shape_cast %27 : vector<1x512x128xbf16> to vector<512x128xbf16>
    %cst_16 = arith.constant dense<0.000000e+00> : vector<32x128xf32>
    %29 = tpu.matmul %26, %28, %cst_16 {dimension_numbers = #tpu.dot_dimension_numbers<[1], [0], [0], [1], [0, 0, 1, 1], [], []>} : vector<32x512xbf16>, vector<512x128xbf16>, vector<32x128xf32> -> vector<32x128xf32>
    %30 = arith.addf %25, %29 : vector<32x128xf32>
    %31 = vector.extract_strided_slice %14 {offsets = [96, 0], sizes = [32, 512], strides = [1, 1]} : vector<416x512xbf16> to vector<32x512xbf16>
    %c3 = arith.constant 3 : index
    %c0_17 = arith.constant 0 : index
    %c0_18 = arith.constant 0 : index
    %32 = vector.load %arg4[%c3, %c0_17, %c0_18] : memref<13x512x128xbf16, #tpu.memory_space<vmem>>, vector<1x512x128xbf16>
    %33 = vector.shape_cast %32 : vector<1x512x128xbf16> to vector<512x128xbf16>
    %cst_19 = arith.constant dense<0.000000e+00> : vector<32x128xf32>
    %34 = tpu.matmul %31, %33, %cst_19 {dimension_numbers = #tpu.dot_dimension_numbers<[1], [0], [0], [1], [0, 0, 1, 1], [], []>} : vector<32x512xbf16>, vector<512x128xbf16>, vector<32x128xf32> -> vector<32x128xf32>
    %35 = arith.addf %30, %34 : vector<32x128xf32>
    %36 = vector.extract_strided_slice %14 {offsets = [128, 0], sizes = [32, 512], strides = [1, 1]} : vector<416x512xbf16> to vector<32x512xbf16>
    %c4 = arith.constant 4 : index
    %c0_20 = arith.constant 0 : index
    %c0_21 = arith.constant 0 : index
    %37 = vector.load %arg4[%c4, %c0_20, %c0_21] : memref<13x512x128xbf16, #tpu.memory_space<vmem>>, vector<1x512x128xbf16>
    %38 = vector.shape_cast %37 : vector<1x512x128xbf16> to vector<512x128xbf16>
    %cst_22 = arith.constant dense<0.000000e+00> : vector<32x128xf32>
    %39 = tpu.matmul %36, %38, %cst_22 {dimension_numbers = #tpu.dot_dimension_numbers<[1], [0], [0], [1], [0, 0, 1, 1], [], []>} : vector<32x512xbf16>, vector<512x128xbf16>, vector<32x128xf32> -> vector<32x128xf32>
    %40 = arith.addf %35, %39 : vector<32x128xf32>
    %41 = vector.extract_strided_slice %14 {offsets = [160, 0], sizes = [32, 512], strides = [1, 1]} : vector<416x512xbf16> to vector<32x512xbf16>
    %c5 = arith.constant 5 : index
    %c0_23 = arith.constant 0 : index
    %c0_24 = arith.constant 0 : index
    %42 = vector.load %arg4[%c5, %c0_23, %c0_24] : memref<13x512x128xbf16, #tpu.memory_space<vmem>>, vector<1x512x128xbf16>
    %43 = vector.shape_cast %42 : vector<1x512x128xbf16> to vector<512x128xbf16>
    %cst_25 = arith.constant dense<0.000000e+00> : vector<32x128xf32>
    %44 = tpu.matmul %41, %43, %cst_25 {dimension_numbers = #tpu.dot_dimension_numbers<[1], [0], [0], [1], [0, 0, 1, 1], [], []>} : vector<32x512xbf16>, vector<512x128xbf16>, vector<32x128xf32> -> vector<32x128xf32>
    %45 = arith.addf %40, %44 : vector<32x128xf32>
    %46 = vector.extract_strided_slice %14 {offsets = [192, 0], sizes = [32, 512], strides = [1, 1]} : vector<416x512xbf16> to vector<32x512xbf16>
    %c6 = arith.constant 6 : index
    %c0_26 = arith.constant 0 : index
    %c0_27 = arith.constant 0 : index
    %47 = vector.load %arg4[%c6, %c0_26, %c0_27] : memref<13x512x128xbf16, #tpu.memory_space<vmem>>, vector<1x512x128xbf16>
    %48 = vector.shape_cast %47 : vector<1x512x128xbf16> to vector<512x128xbf16>
    %cst_28 = arith.constant dense<0.000000e+00> : vector<32x128xf32>
    %49 = tpu.matmul %46, %48, %cst_28 {dimension_numbers = #tpu.dot_dimension_numbers<[1], [0], [0], [1], [0, 0, 1, 1], [], []>} : vector<32x512xbf16>, vector<512x128xbf16>, vector<32x128xf32> -> vector<32x128xf32>
    %50 = arith.addf %45, %49 : vector<32x128xf32>
    %51 = vector.extract_strided_slice %14 {offsets = [224, 0], sizes = [32, 512], strides = [1, 1]} : vector<416x512xbf16> to vector<32x512xbf16>
    %c7 = arith.constant 7 : index
    %c0_29 = arith.constant 0 : index
    %c0_30 = arith.constant 0 : index
    %52 = vector.load %arg4[%c7, %c0_29, %c0_30] : memref<13x512x128xbf16, #tpu.memory_space<vmem>>, vector<1x512x128xbf16>
    %53 = vector.shape_cast %52 : vector<1x512x128xbf16> to vector<512x128xbf16>
    %cst_31 = arith.constant dense<0.000000e+00> : vector<32x128xf32>
    %54 = tpu.matmul %51, %53, %cst_31 {dimension_numbers = #tpu.dot_dimension_numbers<[1], [0], [0], [1], [0, 0, 1, 1], [], []>} : vector<32x512xbf16>, vector<512x128xbf16>, vector<32x128xf32> -> vector<32x128xf32>
    %55 = arith.addf %50, %54 : vector<32x128xf32>
    %56 = vector.extract_strided_slice %14 {offsets = [256, 0], sizes = [32, 512], strides = [1, 1]} : vector<416x512xbf16> to vector<32x512xbf16>
    %c8 = arith.constant 8 : index
    %c0_32 = arith.constant 0 : index
    %c0_33 = arith.constant 0 : index
    %57 = vector.load %arg4[%c8, %c0_32, %c0_33] : memref<13x512x128xbf16, #tpu.memory_space<vmem>>, vector<1x512x128xbf16>
    %58 = vector.shape_cast %57 : vector<1x512x128xbf16> to vector<512x128xbf16>
    %cst_34 = arith.constant dense<0.000000e+00> : vector<32x128xf32>
    %59 = tpu.matmul %56, %58, %cst_34 {dimension_numbers = #tpu.dot_dimension_numbers<[1], [0], [0], [1], [0, 0, 1, 1], [], []>} : vector<32x512xbf16>, vector<512x128xbf16>, vector<32x128xf32> -> vector<32x128xf32>
    %60 = arith.addf %55, %59 : vector<32x128xf32>
    %61 = vector.extract_strided_slice %14 {offsets = [288, 0], sizes = [32, 512], strides = [1, 1]} : vector<416x512xbf16> to vector<32x512xbf16>
    %c9 = arith.constant 9 : index
    %c0_35 = arith.constant 0 : index
    %c0_36 = arith.constant 0 : index
    %62 = vector.load %arg4[%c9, %c0_35, %c0_36] : memref<13x512x128xbf16, #tpu.memory_space<vmem>>, vector<1x512x128xbf16>
    %63 = vector.shape_cast %62 : vector<1x512x128xbf16> to vector<512x128xbf16>
    %cst_37 = arith.constant dense<0.000000e+00> : vector<32x128xf32>
    %64 = tpu.matmul %61, %63, %cst_37 {dimension_numbers = #tpu.dot_dimension_numbers<[1], [0], [0], [1], [0, 0, 1, 1], [], []>} : vector<32x512xbf16>, vector<512x128xbf16>, vector<32x128xf32> -> vector<32x128xf32>
    %65 = arith.addf %60, %64 : vector<32x128xf32>
    %66 = vector.extract_strided_slice %14 {offsets = [320, 0], sizes = [32, 512], strides = [1, 1]} : vector<416x512xbf16> to vector<32x512xbf16>
    %c10 = arith.constant 10 : index
    %c0_38 = arith.constant 0 : index
    %c0_39 = arith.constant 0 : index
    %67 = vector.load %arg4[%c10, %c0_38, %c0_39] : memref<13x512x128xbf16, #tpu.memory_space<vmem>>, vector<1x512x128xbf16>
    %68 = vector.shape_cast %67 : vector<1x512x128xbf16> to vector<512x128xbf16>
    %cst_40 = arith.constant dense<0.000000e+00> : vector<32x128xf32>
    %69 = tpu.matmul %66, %68, %cst_40 {dimension_numbers = #tpu.dot_dimension_numbers<[1], [0], [0], [1], [0, 0, 1, 1], [], []>} : vector<32x512xbf16>, vector<512x128xbf16>, vector<32x128xf32> -> vector<32x128xf32>
    %70 = arith.addf %65, %69 : vector<32x128xf32>
    %71 = vector.extract_strided_slice %14 {offsets = [352, 0], sizes = [32, 512], strides = [1, 1]} : vector<416x512xbf16> to vector<32x512xbf16>
    %c11 = arith.constant 11 : index
    %c0_41 = arith.constant 0 : index
    %c0_42 = arith.constant 0 : index
    %72 = vector.load %arg4[%c11, %c0_41, %c0_42] : memref<13x512x128xbf16, #tpu.memory_space<vmem>>, vector<1x512x128xbf16>
    %73 = vector.shape_cast %72 : vector<1x512x128xbf16> to vector<512x128xbf16>
    %cst_43 = arith.constant dense<0.000000e+00> : vector<32x128xf32>
    %74 = tpu.matmul %71, %73, %cst_43 {dimension_numbers = #tpu.dot_dimension_numbers<[1], [0], [0], [1], [0, 0, 1, 1], [], []>} : vector<32x512xbf16>, vector<512x128xbf16>, vector<32x128xf32> -> vector<32x128xf32>
    %75 = arith.addf %70, %74 : vector<32x128xf32>
    %76 = vector.extract_strided_slice %14 {offsets = [384, 0], sizes = [32, 512], strides = [1, 1]} : vector<416x512xbf16> to vector<32x512xbf16>
    %c12 = arith.constant 12 : index
    %c0_44 = arith.constant 0 : index
    %c0_45 = arith.constant 0 : index
    %77 = vector.load %arg4[%c12, %c0_44, %c0_45] : memref<13x512x128xbf16, #tpu.memory_space<vmem>>, vector<1x512x128xbf16>
    %78 = vector.shape_cast %77 : vector<1x512x128xbf16> to vector<512x128xbf16>
    %cst_46 = arith.constant dense<0.000000e+00> : vector<32x128xf32>
    %79 = tpu.matmul %76, %78, %cst_46 {dimension_numbers = #tpu.dot_dimension_numbers<[1], [0], [0], [1], [0, 0, 1, 1], [], []>} : vector<32x512xbf16>, vector<512x128xbf16>, vector<32x128xf32> -> vector<32x128xf32>
    %80 = arith.addf %75, %79 : vector<32x128xf32>
    %c0_47 = arith.constant 0 : index
    %c0_48 = arith.constant 0 : index
    %81 = vector.load %arg5[%c0_47, %c0_48] : memref<1x128xf32, #tpu.memory_space<vmem>>, vector<1x128xf32>
    %82 = vector.broadcast %81 : vector<1x128xf32> to vector<32x128xf32>
    %83 = arith.addf %80, %82 : vector<32x128xf32>
    %cst_49 = arith.constant 0.000000e+00 : f32
    %84 = vector.broadcast %cst_49 : f32 to vector<32x128xf32>
    %85 = arith.maximumf %83, %84 : vector<32x128xf32>
    %c0_50 = arith.constant 0 : index
    %c0_51 = arith.constant 0 : index
    %86 = vector.load %arg6[%c0_50, %c0_51] : memref<128x128xf32, #tpu.memory_space<vmem>>, vector<128x128xf32>
    %cst_52 = arith.constant dense<0.000000e+00> : vector<32x128xf32>
    %87 = tpu.matmul %85, %86, %cst_52 {dimension_numbers = #tpu.dot_dimension_numbers<[1], [0], [0], [1], [0, 0, 1, 1], [], []>} : vector<32x128xf32>, vector<128x128xf32>, vector<32x128xf32> -> vector<32x128xf32>
    %c0_53 = arith.constant 0 : index
    %c0_54 = arith.constant 0 : index
    %88 = vector.load %arg7[%c0_53, %c0_54] : memref<1x128xf32, #tpu.memory_space<vmem>>, vector<1x128xf32>
    %89 = vector.broadcast %88 : vector<1x128xf32> to vector<32x128xf32>
    %90 = arith.addf %87, %89 : vector<32x128xf32>
    %cst_55 = arith.constant dense<0xFF800000> : vector<32xf32>
    %91 = vector.multi_reduction <maximumf>, %90, %cst_55 [1] : vector<32x128xf32> to vector<32xf32>
    %92 = vector.shape_cast %91 : vector<32xf32> to vector<32x1xf32>
    %93 = vector.broadcast %92 : vector<32x1xf32> to vector<32x128xf32>
    %94 = arith.subf %90, %93 : vector<32x128xf32>
    %95 = math.exp %94 : vector<32x128xf32>
    %cst_56 = arith.constant dense<0.000000e+00> : vector<32xf32>
    %96 = vector.multi_reduction <add>, %95, %cst_56 [1] : vector<32x128xf32> to vector<32xf32>
    %97 = vector.shape_cast %96 : vector<32xf32> to vector<32x1xf32>
    %98 = math.log %97 : vector<32x1xf32>
    %99 = arith.addf %98, %92 : vector<32x1xf32>
    %100 = vector.broadcast %99 : vector<32x1xf32> to vector<32x128xf32>
    %101 = arith.subf %90, %100 : vector<32x128xf32>
    %c0_57 = arith.constant 0 : index
    %c0_58 = arith.constant 0 : index
    %102 = vector.load %arg8[%c0_57, %c0_58] : memref<32x128xf32, #tpu.memory_space<vmem>>, vector<32x128xf32>
    tpu.vector_store %arg8[%c0_57, %c0_58], %101 {strides = array<i32>} : memref<32x128xf32, #tpu.memory_space<vmem>>, vector<32x128xf32>,
    return
  }
  func.func @transform_0(%arg0: i32) -> (i32, i32) {
    %c0_i32 = arith.constant 0 : i32
    %c0_i32_0 = arith.constant 0 : i32
    return %arg0, %c0_i32 : i32, i32
  }
  func.func @transform_1(%arg0: i32) -> (i32, i32) {
    %c0_i32 = arith.constant 0 : i32
    %c0_i32_0 = arith.constant 0 : i32
    %c0_i32_1 = arith.constant 0 : i32
    return %c0_i32, %c0_i32_0 : i32, i32
  }
  func.func @transform_2(%arg0: i32) -> (i32, i32) {
    %c0_i32 = arith.constant 0 : i32
    %c0_i32_0 = arith.constant 0 : i32
    %c0_i32_1 = arith.constant 0 : i32
    return %c0_i32, %c0_i32_0 : i32, i32
  }
  func.func @transform_3(%arg0: i32) -> (i32, i32, i32) {
    %c0_i32 = arith.constant 0 : i32
    %c0_i32_0 = arith.constant 0 : i32
    %c0_i32_1 = arith.constant 0 : i32
    %c0_i32_2 = arith.constant 0 : i32
    return %c0_i32, %c0_i32_0, %c0_i32_1 : i32, i32, i32
  }
  func.func @transform_4(%arg0: i32) -> (i32, i32) {
    %c0_i32 = arith.constant 0 : i32
    %c0_i32_0 = arith.constant 0 : i32
    %c0_i32_1 = arith.constant 0 : i32
    return %c0_i32, %c0_i32_0 : i32, i32
  }
  func.func @transform_5(%arg0: i32) -> (i32, i32) {
    %c0_i32 = arith.constant 0 : i32
    %c0_i32_0 = arith.constant 0 : i32
    %c0_i32_1 = arith.constant 0 : i32
    return %c0_i32, %c0_i32_0 : i32, i32
  }
  func.func @transform_6(%arg0: i32) -> (i32, i32) {
    %c0_i32 = arith.constant 0 : i32
    %c0_i32_0 = arith.constant 0 : i32
    %c0_i32_1 = arith.constant 0 : i32
    return %c0_i32, %c0_i32_0 : i32, i32
  }
  func.func @transform_7(%arg0: i32) -> (i32, i32) {
    %c0_i32 = arith.constant 0 : i32
    %c0_i32_0 = arith.constant 0 : i32
    return %arg0, %c0_i32 : i32, i32
  }
}

</mosaic_0001>

<bundles_post_ra>
// kernel: tile.8
= control target key start
LH: loop header
LB: loop body
LE: loop exit
PB: predicated region body
PF: predicated region fallthrough
CT: control target
= control target key end

     0   :  { %s28_s0 = inlined_call_operand.vmem [shape: f32[32], index: 0, kind: input, shape index: {}]   ;;  %s29_s1 = inlined_call_operand.vmem [shape: f32[13,32], index: 1, kind: output, shape index: {}]  }
   0x1   :  { %v4_v0 = vld [vmem:[%s28_s0] ss:$0 sm:$0xff] }
   0x2   :  { %5 = vst [vmem:[%s29_s1] sm:$0xff] %v4_v0 }
   0x3   :  { %8 = vst [vmem:[%s29_s1 + $0x8] sm:$0xff] %v4_v0 }

// kernel: tile.9
= control target key start
LH: loop header
LB: loop body
LE: loop exit
PB: predicated region body
PF: predicated region fallthrough
CT: control target
= control target key end

     0   :  { %s35_s8 = smov 96   ;;  %s36_s11 = smov 32   ;;  %vm3_vm0 = vcmask 261120   ;;  %vm9_vm1 = vcmask 1048320   ;;  %vm15_vm2 = vcmask 785920   ;;  %vm21_vm3 = vcmask 523520   ;;  %s63_s0 = inlined_call_operand.vmem [shape: f32[13,32], index: 0, kind: input, shape index: {}]   ;;  %s64_s1 = inlined_call_operand.vmem [shape: f32[416], index: 1, kind: output, shape index: {}]  }
   0x1   :  { %v29_v0 = vld [vmem:[%s63_s0 + $0x3] ss:$4 sm:$0x7]   ;;  %v31_v1 = vld [vmem:[%s63_s0 + $0x1] ss:$4 sm:$0x7]  }
   0x2   :  { %7 = vrot.lane.b32.xlu0 %v29_v0, %s35_s8  ;;  %19 = vrot.lane.b32.xlu1 %v31_v1, %s36_s11  ;;  %v30_v2 = vld [vmem:[%s63_s0 + $0x2] ss:$4 sm:$0x7]   ;;  %s37_s14 = smov 64  }
   0x3   :  { %v2_v3 = vld [vmem:[%s63_s0] ss:$4 sm:$0xf]  }
   0x4   :  { %4 = vst.msk [vmem:[#allocation0] sm:$0xf] %vm3_vm0, %v2_v3  }
   0xa   :  { %13 = vrot.lane.b32.xlu0 %v30_v2, %s37_s14 }
  0x74   :  { %v8_v4 = vpop.permute.xlu0 %7   ;;  %v20_v5 = vpop.permute.xlu1 %19  }
  0x75   :  { %10 = vst.msk [vmem:[#allocation0] sm:$0x7] %vm9_vm1, %v8_v4  }
  0x7c   :  { %v14_v6 = vpop.permute.xlu0 %13  }
  0x7d   :  { %16 = vst.msk [vmem:[#allocation0] sm:$0x7] %vm15_vm2, %v14_v6  }
  0x7e   :  { %22 = vst.msk [vmem:[#allocation0] sm:$0x7] %vm21_vm3, %v20_v5  }
  0x85   :  { %v25_v7 = vld [vmem:[#allocation0] sm:$0xf] }
  0x86   :  { %28 = vst [vmem:[%s64_s1] sm:$0xf] %v25_v7 }

// kernel: net_forward.1
= control target key start
LH: loop header
LB: loop body
LE: loop exit
PB: predicated region body
PF: predicated region fallthrough
CT: control target
= control target key end

     0   :  { %vm881_vm0 = vcmask 916480   ;;  %s19064_s1 = inlined_call_operand.vmem [shape: bf16[112,2048], index: 1, kind: input, shape index: {}]   ;;  %s19065_s0 = inlined_call_operand.vmem [shape: bf16[416,112], index: 0, kind: input, shape index: {}]   ;;  %s19066_s3 = inlined_call_operand.vmem [shape: bf16[13,512,128], index: 3, kind: input, shape index: {}]   ;;  %s19067_s2 = inlined_call_operand.vmem [shape: f32[1,512], index: 2, kind: input, shape index: {}]   ;;  %s19068_s4 = inlined_call_operand.vmem [shape: f32[1,128], index: 4, kind: input, shape index: {}]   ;;  %s19069_s6 = inlined_call_operand.vmem [shape: f32[1,128], index: 6, kind: input, shape index: {}]   ;;  %s19070_s5 = inlined_call_operand.vmem [shape: f32[128,128], index: 5, kind: input, shape index: {}]   ;;  %s19071_s7 = inlined_call_operand.vmem [shape: f32[32,128], index: 7, kind: output, shape index: {}]  }
   0x1   :  { %v9833_v0 = vld [vmem:[%s19064_s1 + $0x300] sm:$0xf]  ;;  %v12865_v2 = vld [vmem:[%s19064_s1 + $0x304] sm:$0xf]  ;;  %v9841_v5 = vld [vmem:[%s19064_s1 + $0x308] sm:$0xf] }
   0x2   :  { %v12873_v1 = vld [vmem:[%s19064_s1 + $0x33c] sm:$0xf0]  ;;  %v9835_v4 = vld [vmem:[%s19064_s1 + $0x340] sm:$0xf0]  ;;  %v12874_v6 = vld [vmem:[%s19064_s1 + $0x344] sm:$0xf0] }
   0x3   :  { %v9834_v3 = vor.u32 %v12873_v1, %v9833_v0  ;;  %v9838_v7 = vor.u32 %v12865_v2, %v9835_v4  ;;  %v9842_v8 = vor.u32 %v12874_v6, %v9841_v5  ;;  %v12866_v9 = vld [vmem:[%s19064_s1 + $0x30c] sm:$0xf]  ;;  %v9769_v11 = vld [vmem:[%s19064_s1 + $0x280] sm:$0xf]  ;;  %v12849_v14 = vld [vmem:[%s19064_s1 + $0x284] sm:$0xf] }
   0x4   :  { %v9843_v10 = vld [vmem:[%s19064_s1 + $0x348] sm:$0xf0]  ;;  %v12857_v13 = vld [vmem:[%s19064_s1 + $0x2bc] sm:$0xf0]  ;;  %v9771_v15 = vld [vmem:[%s19064_s1 + $0x2c0] sm:$0xf0] }
   0x5   :  { %961 = vmatpush.bf16.msra.mxu0 %v9834_v3  ;;  %v9846_v12 = vor.u32 %v12866_v9, %v9843_v10  ;;  %1100 = vmatpush.bf16.msra.mxu1 %v9838_v7  ;;  %v9770_v16 = vor.u32 %v12857_v13, %v9769_v11  ;;  %v9774_v17 = vor.u32 %v12849_v14, %v9771_v15  ;;  %v9777_v18 = vld [vmem:[%s19064_s1 + $0x288] sm:$0xf]  ;;  %v12850_v20 = vld [vmem:[%s19064_s1 + $0x28c] sm:$0xf]  ;;  %v9705_v23 = vld [vmem:[%s19064_s1 + $0x200] sm:$0xf] }
   0x6   :  { %1239 = vmatpush.bf16.msra.mxu2 %v9842_v8  ;;  %v12858_v19 = vld [vmem:[%s19064_s1 + $0x2c4] sm:$0xf0]  ;;  %v9779_v22 = vld [vmem:[%s19064_s1 + $0x2c8] sm:$0xf0]  ;;  %v12841_v24 = vld [vmem:[%s19064_s1 + $0x23c] sm:$0xf0] }
   0x7   :  { %1378 = vmatpush.bf16.msra.mxu3 %v9846_v12  ;;  %v9778_v21 = vor.u32 %v12858_v19, %v9777_v18  ;;  %v9782_v25 = vor.u32 %v12850_v20, %v9779_v22  ;;  %v12833_v26 = vld [vmem:[%s19064_s1 + $0x204] sm:$0xf]  ;;  %v9713_v28 = vld [vmem:[%s19064_s1 + $0x208] sm:$0xf]  ;;  %v9706_v29 = vor.u32 %v12841_v24, %v9705_v23  ;;  %v12834_v31 = vld [vmem:[%s19064_s1 + $0x20c] sm:$0xf] }
   0x8   :  { %v9707_v27 = vld [vmem:[%s19064_s1 + $0x240] sm:$0xf0]  ;;  %v12842_v30 = vld [vmem:[%s19064_s1 + $0x244] sm:$0xf0]  ;;  %v9715_v32 = vld [vmem:[%s19064_s1 + $0x248] sm:$0xf0] }
   0x9   :  { %962 = vmatpush.bf16.msra.mxu0 %v9770_v16  ;;  %1101 = vmatpush.bf16.msra.mxu1 %v9774_v17  ;;  %v9710_v33 = vor.u32 %v12833_v26, %v9707_v27  ;;  %v9714_v34 = vor.u32 %v12842_v30, %v9713_v28  ;;  %v9641_v35 = vld [vmem:[%s19064_s1 + $0x180] sm:$0xf]  ;;  %v12817_v37 = vld [vmem:[%s19064_s1 + $0x184] sm:$0xf]  ;;  %v9718_v38 = vor.u32 %v12834_v31, %v9715_v32  ;;  %v9649_v40 = vld [vmem:[%s19064_s1 + $0x188] sm:$0xf] }
   0xa   :  { %1240 = vmatpush.bf16.msra.mxu2 %v9778_v21  ;;  %v12825_v36 = vld [vmem:[%s19064_s1 + $0x1bc] sm:$0xf0]  ;;  %v9643_v39 = vld [vmem:[%s19064_s1 + $0x1c0] sm:$0xf0]  ;;  %v12826_v41 = vld [vmem:[%s19064_s1 + $0x1c4] sm:$0xf0] }
   0xb   :  { %1379 = vmatpush.bf16.msra.mxu3 %v9782_v25  ;;  %v12818_v42 = vld [vmem:[%s19064_s1 + $0x18c] sm:$0xf]  ;;  %v9642_v44 = vor.u32 %v12825_v36, %v9641_v35  ;;  %v9646_v45 = vor.u32 %v12817_v37, %v9643_v39  ;;  %v9650_v46 = vor.u32 %v12826_v41, %v9649_v40  ;;  %v9577_v47 = vld [vmem:[%s19064_s1 + $0x100] sm:$0xf]  ;;  %v12801_v49 = vld [vmem:[%s19064_s1 + $0x104] sm:$0xf] }
   0xc   :  { %v9651_v43 = vld [vmem:[%s19064_s1 + $0x1c8] sm:$0xf0]  ;;  %v12809_v48 = vld [vmem:[%s19064_s1 + $0x13c] sm:$0xf0]  ;;  %v9579_v51 = vld [vmem:[%s19064_s1 + $0x140] sm:$0xf0] }
   0xd   :  { %963 = vmatpush.bf16.msra.mxu0 %v9706_v29  ;;  %1102 = vmatpush.bf16.msra.mxu1 %v9710_v33  ;;  %v9654_v50 = vor.u32 %v12818_v42, %v9651_v43  ;;  %v9585_v52 = vld [vmem:[%s19064_s1 + $0x108] sm:$0xf]  ;;  %v12802_v54 = vld [vmem:[%s19064_s1 + $0x10c] sm:$0xf]  ;;  %v9578_v56 = vor.u32 %v12809_v48, %v9577_v47  ;;  %v9582_v57 = vor.u32 %v12801_v49, %v9579_v51  ;;  %v9513_v59 = vld [vmem:[%s19064_s1 + $0x80] sm:$0xf] }
   0xe   :  { %1241 = vmatpush.bf16.msra.mxu2 %v9714_v34  ;;  %v12810_v53 = vld [vmem:[%s19064_s1 + $0x144] sm:$0xf0]  ;;  %v9587_v55 = vld [vmem:[%s19064_s1 + $0x148] sm:$0xf0]  ;;  %v12793_v60 = vld [vmem:[%s19064_s1 + $0xbc] sm:$0xf0] }
   0xf   :  { %1380 = vmatpush.bf16.msra.mxu3 %v9718_v38  ;;  %v9586_v58 = vor.u32 %v12810_v53, %v9585_v52  ;;  %v12785_v61 = vld [vmem:[%s19064_s1 + $0x84] sm:$0xf]  ;;  %v9590_v62 = vor.u32 %v12802_v54, %v9587_v55  ;;  %v9521_v0 = vld [vmem:[%s19064_s1 + $0x88] sm:$0xf]  ;;  %v12786_v2 = vld [vmem:[%s19064_s1 + $0x8c] sm:$0xf]  ;;  %v9514_v4 = vor.u32 %v12793_v60, %v9513_v59 }
  0x10   :  { %v9515_v63 = vld [vmem:[%s19064_s1 + $0xc0] sm:$0xf0]  ;;  %v12794_v1 = vld [vmem:[%s19064_s1 + $0xc4] sm:$0xf0]  ;;  %v9523_v3 = vld [vmem:[%s19064_s1 + $0xc8] sm:$0xf0] }
  0x11   :  { %964 = vmatpush.bf16.msra.mxu0 %v9642_v44  ;;  %1103 = vmatpush.bf16.msra.mxu1 %v9646_v45  ;;  %v9449_v5 = vld [vmem:[%s19064_s1] sm:$0xf]  ;;  %v9518_v6 = vor.u32 %v12785_v61, %v9515_v63  ;;  %v9522_v7 = vor.u32 %v12794_v1, %v9521_v0  ;;  %v12769_v9 = vld [vmem:[%s19064_s1 + $0x4] sm:$0xf]  ;;  %v9526_v11 = vor.u32 %v12786_v2, %v9523_v3  ;;  %v9457_v12 = vld [vmem:[%s19064_s1 + $0x8] sm:$0xf] }
  0x12   :  { %1242 = vmatpush.bf16.msra.mxu2 %v9650_v46  ;;  %v12777_v8 = vld [vmem:[%s19064_s1 + $0x3c] sm:$0xf0]  ;;  %v9451_v10 = vld [vmem:[%s19064_s1 + $0x40] sm:$0xf0]  ;;  %v12778_v13 = vld [vmem:[%s19064_s1 + $0x44] sm:$0xf0] }
  0x13   :  { %1381 = vmatpush.bf16.msra.mxu3 %v9654_v50  ;;  %v12770_v14 = vld [vmem:[%s19064_s1 + $0xc] sm:$0xf]  ;;  %v9857_v16 = vld [vmem:[%s19064_s1 + $0x318] sm:$0xf]  ;;  %v9450_v18 = vor.u32 %v12777_v8, %v9449_v5  ;;  %v12868_v19 = vld [vmem:[%s19064_s1 + $0x31c] sm:$0xf]  ;;  %v9454_v21 = vor.u32 %v12769_v9, %v9451_v10  ;;  %v9458_v22 = vor.u32 %v12778_v13, %v9457_v12 }
  0x14   :  { %v9459_v15 = vld [vmem:[%s19064_s1 + $0x48] sm:$0xf0]  ;;  %v12876_v17 = vld [vmem:[%s19064_s1 + $0x354] sm:$0xf0]  ;;  %v9859_v20 = vld [vmem:[%s19064_s1 + $0x358] sm:$0xf0] }
  0x15   :  { %965 = vmatpush.bf16.msra.mxu0 %v9578_v56  ;;  %1104 = vmatpush.bf16.msra.mxu1 %v9582_v57  ;;  %v9462_v23 = vor.u32 %v12770_v14, %v9459_v15  ;;  %v9858_v24 = vor.u32 %v12876_v17, %v9857_v16  ;;  %v9849_v25 = vld [vmem:[%s19064_s1 + $0x310] sm:$0xf]  ;;  %v13633_v27 = vld [vmem:[%s19065_s0] sm:$0xff]  ;;  %v9862_v28 = vor.u32 %v12868_v19, %v9859_v20  ;;  %v12867_v29 = vld [vmem:[%s19064_s1 + $0x314] sm:$0xf] }
  0x16   :  { %1243 = vmatpush.bf16.msra.mxu2 %v9586_v58  ;;  %v12875_v26 = vld [vmem:[%s19064_s1 + $0x34c] sm:$0xf0]  ;;  %v9851_v30 = vld [vmem:[%s19064_s1 + $0x350] sm:$0xf0]  ;;  %v13652_v33 = vld [vmem:[%s19065_s0 + $0x8] sm:$0xff] }
  0x17   :  { %1382 = vmatpush.bf16.msra.mxu3 %v9590_v62  ;;  %v9850_v31 = vor.u32 %v12875_v26, %v9849_v25  ;;  %v9854_v32 = vor.u32 %v12867_v29, %v9851_v30  ;;  %v9793_v34 = vld [vmem:[%s19064_s1 + $0x298] sm:$0xf]  ;;  %v12852_v36 = vld [vmem:[%s19064_s1 + $0x29c] sm:$0xf]  ;;  %v13677_v40 = vld [vmem:[%s19065_s0 + $0x10] sm:$0xff] }
  0x18   :  { %v12860_v35 = vld [vmem:[%s19064_s1 + $0x2d4] sm:$0xf0]  ;;  %v9795_v38 = vld [vmem:[%s19064_s1 + $0x2d8] sm:$0xf0]  ;;  %v9785_v41 = vld [vmem:[%s19064_s1 + $0x290] sm:$0xf] }
  0x19   :  { %966 = vmatpush.bf16.msra.mxu0 %v9514_v4  ;;  %1105 = vmatpush.bf16.msra.mxu1 %v9518_v6  ;;  %v9794_v37 = vor.u32 %v12860_v35, %v9793_v34  ;;  %v9798_v39 = vor.u32 %v12852_v36, %v9795_v38  ;;  %v12859_v42 = vld [vmem:[%s19064_s1 + $0x2cc] sm:$0xf0]  ;;  %v12851_v43 = vld [vmem:[%s19064_s1 + $0x294] sm:$0xf]  ;;  %v13702_v47 = vld [vmem:[%s19065_s0 + $0x18] sm:$0xff] }
  0x1a   :  { %1244 = vmatpush.bf16.msra.mxu2 %v9522_v7  ;;  %v9786_v44 = vor.u32 %v12859_v42, %v9785_v41  ;;  %v9787_v45 = vld [vmem:[%s19064_s1 + $0x2d0] sm:$0xf0]  ;;  %v13715_v48 = vld [vmem:[%s19065_s0 + $0x20] sm:$0xff]  ;;  %v13728_v49 = vld [vmem:[%s19065_s0 + $0x28] sm:$0xff] }
  0x1b   :  { %1383 = vmatpush.bf16.msra.mxu3 %v9526_v11  ;;  %v9790_v46 = vor.u32 %v12851_v43, %v9787_v45  ;;  %v9729_v50 = vld [vmem:[%s19064_s1 + $0x218] sm:$0xf]  ;;  %v12836_v52 = vld [vmem:[%s19064_s1 + $0x21c] sm:$0xf]  ;;  %v9721_v55 = vld [vmem:[%s19064_s1 + $0x210] sm:$0xf] }
  0x1c   :  { %v12844_v51 = vld [vmem:[%s19064_s1 + $0x254] sm:$0xf0]  ;;  %v9731_v54 = vld [vmem:[%s19064_s1 + $0x258] sm:$0xf0]  ;;  %v12843_v56 = vld [vmem:[%s19064_s1 + $0x24c] sm:$0xf0] }
  0x1d   :  { %967 = vmatpush.bf16.msra.mxu0 %v9450_v18  ;;  %1106 = vmatpush.bf16.msra.mxu1 %v9454_v21  ;;  %v9730_v53 = vor.u32 %v12844_v51, %v9729_v50  ;;  %v9734_v57 = vor.u32 %v12836_v52, %v9731_v54  ;;  %v9722_v58 = vor.u32 %v12843_v56, %v9721_v55  ;;  %v12835_v59 = vld [vmem:[%s19064_s1 + $0x214] sm:$0xf]  ;;  %v13778_v63 = vld [vmem:[%s19065_s0 + $0x38] sm:$0xff]  ;;  %v13791_v0 = vld [vmem:[%s19065_s0 + $0x40] sm:$0xff] }
  0x1e   :  { %1245 = vmatpush.bf16.msra.mxu2 %v9458_v22  ;;  %v9723_v60 = vld [vmem:[%s19064_s1 + $0x250] sm:$0xf0]  ;;  %v13818_v8 = vld [vmem:[%s19065_s0 + $0x48] sm:$0xff]  ;;  %v9665_v15 = vld [vmem:[%s19064_s1 + $0x198] sm:$0xf] }
  0x1f   :  { %1384 = vmatpush.bf16.msra.mxu3 %v9462_v23  ;;  %v9726_v61 = vor.u32 %v12835_v59, %v9723_v60  ;;  %v13765_v62 = vld [vmem:[%s19065_s0 + $0x30] sm:$0xff]  ;;  %v12828_v16 = vld [vmem:[%s19064_s1 + $0x1d4] sm:$0xf0]  ;;  %v12820_v19 = vld [vmem:[%s19064_s1 + $0x19c] sm:$0xf] }
  0x20   :  { %9895 = vmatmul.msk.bf16.vlgmr.msra.gmra.mxu0 %vm881_vm0, %v13633_v27  ;;  %9921 = vmatmul.msk.bf16.vlgmr.msra.gmra.mxu1 %vm881_vm0, %v13633_v27  ;;  %v9666_v18 = vor.u32 %v12828_v16, %v9665_v15  ;;  %v9667_v20 = vld [vmem:[%s19064_s1 + $0x1d8] sm:$0xf0]  ;;  %v9657_v21 = vld [vmem:[%s19064_s1 + $0x190] sm:$0xf]  ;;  %v9659_v25 = vld [vmem:[%s19064_s1 + $0x1d0] sm:$0xf0] }
  0x21   :  { %9947 = vmatmul.msk.bf16.vlgmr.msra.gmra.mxu2 %vm881_vm0, %v13633_v27  ;;  %1517 = vmatpush.bf16.msrb.mxu0 %v9850_v31  ;;  %v9670_v22 = vor.u32 %v12820_v19, %v9667_v20  ;;  %v12827_v23 = vld [vmem:[%s19064_s1 + $0x1cc] sm:$0xf0]  ;;  %v13900_v41 = vld [vmem:[%s19065_s0 + $0x58] sm:$0xff]  ;;  %v13958_v15 = vld [vmem:[%s19065_s0 + $0x68] sm:$0xff] }
  0x22   :  { %1795 = vmatpush.bf16.msrb.mxu2 %v9858_v24  ;;  %9973 = vmatmul.msk.bf16.vlgmr.msra.gmra.mxu3 %vm881_vm0, %v13633_v27  ;;  %v12819_v24 = vld [vmem:[%s19064_s1 + $0x194] sm:$0xf]  ;;  %v9658_v26 = vor.u32 %v12827_v23, %v9657_v21  ;;  %v9601_v20 = vld [vmem:[%s19064_s1 + $0x118] sm:$0xf]  ;;  %v12804_v23 = vld [vmem:[%s19064_s1 + $0x11c] sm:$0xf] }
  0x23   :  { %1934 = vmatpush.bf16.msrb.mxu3 %v9862_v28  ;;  %1656 = vmatpush.bf16.msrb.mxu1 %v9854_v32  ;;  %v9662_v28 = vor.u32 %v12819_v24, %v9659_v25  ;;  %v13871_v30 = vld [vmem:[%s19065_s0 + $0x50] sm:$0xff]  ;;  %v12812_v21 = vld [vmem:[%s19064_s1 + $0x154] sm:$0xf0]  ;;  %v9603_v24 = vld [vmem:[%s19064_s1 + $0x158] sm:$0xf0] }
  0x24   :  { %v9593_v25 = vld [vmem:[%s19064_s1 + $0x110] sm:$0xf] }
  0x25   :  { %1518 = vmatpush.bf16.msrb.mxu0 %v9786_v44 }
  0x26   :  { %1796 = vmatpush.bf16.msrb.mxu2 %v9794_v37 }
  0x27   :  { %1935 = vmatpush.bf16.msrb.mxu3 %v9798_v39  ;;  %1657 = vmatpush.bf16.msrb.mxu1 %v9790_v46 }
  0x29   :  { %1519 = vmatpush.bf16.msrb.mxu0 %v9722_v58 }
  0x2a   :  { %1797 = vmatpush.bf16.msrb.mxu2 %v9730_v53  ;;  %v13929_v53 = vld [vmem:[%s19065_s0 + $0x60] sm:$0xff] }
  0x2b   :  { %1936 = vmatpush.bf16.msrb.mxu3 %v9734_v57  ;;  %1658 = vmatpush.bf16.msrb.mxu1 %v9726_v61 }
  0x2d   :  { %1520 = vmatpush.bf16.msrb.mxu0 %v9658_v26  ;;  %v9606_v26 = vor.u32 %v12804_v23, %v9603_v24 }
  0x2e   :  { %1798 = vmatpush.bf16.msrb.mxu2 %v9666_v18 }
  0x2f   :  { %1937 = vmatpush.bf16.msrb.mxu3 %v9670_v22  ;;  %1659 = vmatpush.bf16.msrb.mxu1 %v9662_v28  ;;  %v9602_v22 = vor.u32 %v12812_v21, %v9601_v20  ;;  %v12811_v28 = vld [vmem:[%s19064_s1 + $0x14c] sm:$0xf0]  ;;  %v12803_v20 = vld [vmem:[%s19064_s1 + $0x114] sm:$0xf] }
  0x30   :  { %9896 = vmatmul.msk.bf16.gmra.mxu0 %vm881_vm0, %v13652_v33  ;;  %9922 = vmatmul.msk.bf16.gmra.mxu1 %vm881_vm0, %v13652_v33  ;;  %v9595_v21 = vld [vmem:[%s19064_s1 + $0x150] sm:$0xf0] }
  0x31   :  { %9948 = vmatmul.msk.bf16.gmra.mxu2 %vm881_vm0, %v13652_v33 }
  0x32   :  { %9974 = vmatmul.msk.bf16.gmra.mxu3 %vm881_vm0, %v13652_v33  ;;  %1799 = vmatpush.bf16.msrb.mxu2 %v9602_v22 }
  0x33   :  { %1938 = vmatpush.bf16.msrb.mxu3 %v9606_v26 }
  0x40   :  { %9897 = vmatmul.msk.bf16.gmra.mxu0 %vm881_vm0, %v13677_v40  ;;  %9923 = vmatmul.msk.bf16.gmra.mxu1 %vm881_vm0, %v13677_v40 }
  0x41   :  { %9949 = vmatmul.msk.bf16.gmra.mxu2 %vm881_vm0, %v13677_v40 }
  0x42   :  { %9975 = vmatmul.msk.bf16.gmra.mxu3 %vm881_vm0, %v13677_v40 }
  0x50   :  { %9898 = vmatmul.msk.bf16.gmra.mxu0 %vm881_vm0, %v13702_v47  ;;  %9924 = vmatmul.msk.bf16.gmra.mxu1 %vm881_vm0, %v13702_v47 }
  0x51   :  { %9950 = vmatmul.msk.bf16.gmra.mxu2 %vm881_vm0, %v13702_v47 }
  0x52   :  { %9976 = vmatmul.msk.bf16.gmra.mxu3 %vm881_vm0, %v13702_v47 }
  0x60   :  { %9899 = vmatmul.msk.bf16.gmra.mxu0 %vm881_vm0, %v13715_v48  ;;  %9925 = vmatmul.msk.bf16.gmra.mxu1 %vm881_vm0, %v13715_v48 }
  0x61   :  { %9951 = vmatmul.msk.bf16.gmra.mxu2 %vm881_vm0, %v13715_v48 }
  0x62   :  { %9977 = vmatmul.msk.bf16.gmra.mxu3 %vm881_vm0, %v13715_v48 }
  0x70   :  { %9900 = vmatmul.msk.bf16.gmra.mxu0 %vm881_vm0, %v13728_v49  ;;  %9926 = vmatmul.msk.bf16.gmra.mxu1 %vm881_vm0, %v13728_v49 }
  0x71   :  { %9952 = vmatmul.msk.bf16.gmra.mxu2 %vm881_vm0, %v13728_v49 }
  0x72   :  { %9978 = vmatmul.msk.bf16.gmra.mxu3 %vm881_vm0, %v13728_v49 }
  0x80   :  { %9901 = vmatmul.msk.bf16.gmra.mxu0 %vm881_vm0, %v13765_v62  ;;  %9927 = vmatmul.msk.bf16.gmra.mxu1 %vm881_vm0, %v13765_v62 }
  0x81   :  { %9953 = vmatmul.msk.bf16.gmra.mxu2 %vm881_vm0, %v13765_v62 }
  0x82   :  { %9979 = vmatmul.msk.bf16.gmra.mxu3 %vm881_vm0, %v13765_v62 }
  0x90   :  { %9902 = vmatmul.msk.bf16.gmra.mxu0 %vm881_vm0, %v13778_v63  ;;  %9928 = vmatmul.msk.bf16.gmra.mxu1 %vm881_vm0, %v13778_v63 }
  0x91   :  { %9954 = vmatmul.msk.bf16.gmra.mxu2 %vm881_vm0, %v13778_v63 }
  0x92   :  { %9980 = vmatmul.msk.bf16.gmra.mxu3 %vm881_vm0, %v13778_v63 }
  0x9d   :  { %v13793_v1 = vpop.f32.mrf.mxu0  ;;  %v13795_v2 = vpop.f32.mrf.mxu1 }
  0xa0   :  { %9903 = vmatmul.msk.bf16.gmra.mxu0 %vm881_vm0, %v13791_v0  ;;  %9929 = vmatmul.msk.bf16.gmra.mxu1 %vm881_vm0, %v13791_v0 }
  0xa1   :  { %9955 = vmatmul.msk.bf16.gmra.mxu2 %vm881_vm0, %v13791_v0 }
  0xa2   :  { %9981 = vmatmul.msk.bf16.gmra.mxu3 %vm881_vm0, %v13791_v0 }
  0xa4   :  { %v13805_v3 = vpop.f32.mrf.mxu2 }
  0xa5   :  { %v13807_v4 = vpop.f32.mrf.mxu3  ;;  %v13809_v5 = vpop.f32.mrf.mxu0 }
  0xa6   :  { %v13811_v6 = vpop.f32.mrf.mxu1 }
  0xac   :  { %v13813_v7 = vpop.f32.mrf.mxu2 }
  0xad   :  { %v13820_v9 = vpop.f32.mrf.mxu3  ;;  %v13822_v10 = vpop.f32.mrf.mxu0 }
  0xae   :  { %v13824_v11 = vpop.f32.mrf.mxu1 }
  0xb0   :  { %9904 = vmatmul.msk.bf16.gmra.mxu0 %vm881_vm0, %v13818_v8  ;;  %9930 = vmatmul.msk.bf16.gmra.mxu1 %vm881_vm0, %v13818_v8 }
  0xb1   :  { %9956 = vmatmul.msk.bf16.gmra.mxu2 %vm881_vm0, %v13818_v8 }
  0xb2   :  { %9982 = vmatmul.msk.bf16.gmra.mxu3 %vm881_vm0, %v13818_v8 }
  0xb4   :  { %v13834_v12 = vpop.f32.mrf.mxu2 }
  0xb5   :  { %v13836_v13 = vpop.f32.mrf.mxu3  ;;  %v13838_v14 = vpop.f32.mrf.mxu0 }
  0xb6   :  { %v13846_v17 = vpop.f32.mrf.mxu1 }
  0xbc   :  { %v13866_v29 = vpop.f32.mrf.mxu2 }
  0xbd   :  { %19074 = vst [vmem:[#allocation2_spill] sm:$0xff] %v13866_v29  ;;  %v13873_v31 = vpop.f32.mrf.mxu3  ;;  %v13875_v32 = vpop.f32.mrf.mxu0 }
  0xbe   :  { %19075 = vst [vmem:[#allocation3_spill] sm:$0xff] %v13873_v31  ;;  %v13877_v34 = vpop.f32.mrf.mxu1 }
  0xbf   :  { %19076 = vst [vmem:[#allocation4_spill] sm:$0xff] %v13875_v32 }
  0xc0   :  { %19077 = vst [vmem:[#allocation5_spill] sm:$0xff] %v13877_v34  ;;  %9905 = vmatmul.msk.bf16.gmra.mxu0 %vm881_vm0, %v13871_v30  ;;  %9931 = vmatmul.msk.bf16.gmra.mxu1 %vm881_vm0, %v13871_v30  ;;  %v9689_v34 = vld [vmem:[%s19064_s1 + $0x1b0] sm:$0xf] }
  0xc1   :  { %9957 = vmatmul.msk.bf16.gmra.mxu2 %vm881_vm0, %v13871_v30 }
  0xc2   :  { %9983 = vmatmul.msk.bf16.gmra.mxu3 %vm881_vm0, %v13871_v30 }
  0xc4   :  { %v13887_v35 = vpop.f32.mrf.mxu2 }
  0xc5   :  { %19078 = vst [vmem:[#allocation6_spill] sm:$0xff] %v13887_v35  ;;  %v13889_v36 = vpop.f32.mrf.mxu3  ;;  %v13891_v37 = vpop.f32.mrf.mxu0  ;;  %v12824_v35 = vld [vmem:[%s19064_s1 + $0x1bc] sm:$0xf] }
  0xc6   :  { %19079 = vst [vmem:[#allocation7_spill] sm:$0xff] %v13889_v36  ;;  %v13893_v38 = vpop.f32.mrf.mxu1 }
  0xc7   :  { %19080 = vst [vmem:[#allocation8_spill] sm:$0xff] %v13891_v37 }
  0xc8   :  { %19081 = vst [vmem:[#allocation9_spill] sm:$0xff] %v13893_v38 }
  0xcc   :  { %v13895_v39 = vpop.f32.mrf.mxu2 }
  0xcd   :  { %19082 = vst [vmem:[#allocation10_spill] sm:$0xff] %v13895_v39  ;;  %v13902_v42 = vpop.f32.mrf.mxu3  ;;  %v13904_v43 = vpop.f32.mrf.mxu0 }
  0xce   :  { %19083 = vst [vmem:[#allocation11_spill] sm:$0xff] %v13902_v42  ;;  %v13906_v44 = vpop.f32.mrf.mxu1 }
  0xcf   :  { %19084 = vst [vmem:[#allocation12_spill] sm:$0xff] %v13904_v43 }
  0xd0   :  { %19085 = vst [vmem:[#allocation13_spill] sm:$0xff] %v13906_v44  ;;  %9906 = vmatmul.msk.bf16.gmra.mxu0 %vm881_vm0, %v13900_v41  ;;  %9932 = vmatmul.msk.bf16.gmra.mxu1 %vm881_vm0, %v13900_v41 }
  0xd1   :  { %9958 = vmatmul.msk.bf16.gmra.mxu2 %vm881_vm0, %v13900_v41 }
  0xd2   :  { %9984 = vmatmul.msk.bf16.gmra.mxu3 %vm881_vm0, %v13900_v41 }
  0xd4   :  { %v13916_v45 = vpop.f32.mrf.mxu2 }
  0xd5   :  { %19086 = vst [vmem:[#allocation14_spill] sm:$0xff] %v13916_v45  ;;  %v13918_v46 = vpop.f32.mrf.mxu3  ;;  %v13920_v50 = vpop.f32.mrf.mxu0  ;;  %v12829_v45 = vld [vmem:[%s19064_s1 + $0x1dc] sm:$0xf0] }
  0xd6   :  { %19087 = vst [vmem:[#allocation15_spill] sm:$0xff] %v13918_v46  ;;  %v13922_v51 = vpop.f32.mrf.mxu1 }
  0xd7   :  { %19088 = vst [vmem:[#allocation16_spill] sm:$0xff] %v13920_v50 }
  0xd8   :  { %19089 = vst [vmem:[#allocation17_spill] sm:$0xff] %v13922_v51  ;;  %v9865_v51 = vld [vmem:[%s19064_s1 + $0x320] sm:$0xf] }
  0xdc   :  { %v13924_v52 = vpop.f32.mrf.mxu2 }
  0xdd   :  { %19090 = vst [vmem:[#allocation18_spill] sm:$0xff] %v13924_v52  ;;  %v13931_v54 = vpop.f32.mrf.mxu3  ;;  %v13933_v55 = vpop.f32.mrf.mxu0 }
  0xde   :  { %19091 = vst [vmem:[#allocation19_spill] sm:$0xff] %v13931_v54  ;;  %v13935_v56 = vpop.f32.mrf.mxu1 }
  0xdf   :  { %19092 = vst [vmem:[#allocation20_spill] sm:$0xff] %v13933_v55 }
  0xe0   :  { %19093 = vst [vmem:[#allocation21_spill] sm:$0xff] %v13935_v56  ;;  %9907 = vmatmul.msk.bf16.gmra.mxu0 %vm881_vm0, %v13929_v53  ;;  %9933 = vmatmul.msk.bf16.gmra.mxu1 %vm881_vm0, %v13929_v53  ;;  %v12771_v56 = vld [vmem:[%s19064_s1 + $0x14] sm:$0xf] }
  0xe1   :  { %9959 = vmatmul.msk.bf16.gmra.mxu2 %vm881_vm0, %v13929_v53 }
  0xe2   :  { %9985 = vmatmul.msk.bf16.gmra.mxu3 %vm881_vm0, %v13929_v53 }
  0xe4   :  { %v13945_v57 = vpop.f32.mrf.mxu2 }
  0xe5   :  { %19094 = vst [vmem:[#allocation22_spill] sm:$0xff] %v13945_v57  ;;  %v13947_v58 = vpop.f32.mrf.mxu3  ;;  %v13949_v59 = vpop.f32.mrf.mxu0 }
  0xe6   :  { %19095 = vst [vmem:[#allocation23_spill] sm:$0xff] %v13947_v58  ;;  %v13951_v60 = vpop.f32.mrf.mxu1 }
  0xe7   :  { %19096 = vst [vmem:[#allocation24_spill] sm:$0xff] %v13949_v59 }
  0xe8   :  { %19097 = vst [vmem:[#allocation25_spill] sm:$0xff] %v13951_v60  ;;  %v14011_v60 = vld [vmem:[%s19065_s0 + $0x70] sm:$0xff] }
  0xec   :  { %v13953_v61 = vpop.f32.mrf.mxu2 }
  0xed   :  { %19098 = vst [vmem:[#allocation26_spill] sm:$0xff] %v13953_v61  ;;  %v13960_v16 = vpop.f32.mrf.mxu3  ;;  %v13962_v18 = vpop.f32.mrf.mxu0 }
  0xee   :  { %19099 = vst [vmem:[#allocation27_spill] sm:$0xff] %v13960_v16  ;;  %v13964_v19 = vpop.f32.mrf.mxu1 }
  0xef   :  { %19100 = vst [vmem:[#allocation28_spill] sm:$0xff] %v13962_v18  ;;  %v9598_v18 = vor.u32 %v12803_v20, %v9595_v21 }
  0xf0   :  { %19101 = vst [vmem:[#allocation29_spill] sm:$0xff] %v13964_v19  ;;  %9908 = vmatmul.msk.bf16.gmra.mxu0 %vm881_vm0, %v13958_v15  ;;  %9934 = vmatmul.msk.bf16.gmra.mxu1 %vm881_vm0, %v13958_v15  ;;  %v9594_v19 = vor.u32 %v12811_v28, %v9593_v25 }
  0xf1   :  { %9960 = vmatmul.msk.bf16.gmra.mxu2 %vm881_vm0, %v13958_v15  ;;  %1660 = vmatpush.bf16.msrb.mxu1 %v9598_v18 }
  0xf2   :  { %9986 = vmatmul.msk.bf16.gmra.mxu3 %vm881_vm0, %v13958_v15  ;;  %1521 = vmatpush.bf16.msrb.mxu0 %v9594_v19 }
  0xf4   :  { %v13998_v22 = vpop.f32.mrf.mxu2 }
  0xf5   :  { %19102 = vst [vmem:[#allocation30_spill] sm:$0xff] %v13998_v22  ;;  %v14000_v16 = vpop.f32.mrf.mxu3  ;;  %v14002_v61 = vpop.f32.mrf.mxu0 }
  0xf6   :  { %19103 = vst [vmem:[#allocation31_spill] sm:$0xff] %v14000_v16  ;;  %v14004_v23 = vpop.f32.mrf.mxu1  ;;  %v9531_v16 = vld [vmem:[%s19064_s1 + $0xd0] sm:$0xf0] }
  0xf7   :  { %19104 = vst [vmem:[#allocation32_spill] sm:$0xff] %v14002_v61 }
  0xf8   :  { %19105 = vst [vmem:[#allocation33_spill] sm:$0xff] %v14004_v23 }
  0xfc   :  { %v14006_v24 = vpop.f32.mrf.mxu2 }
  0xfd   :  { %19106 = vst [vmem:[#allocation34_spill] sm:$0xff] %v14006_v24  ;;  %v14013_v59 = vpop.f32.mrf.mxu3  ;;  %v14015_v25 = vpop.f32.mrf.mxu0 }
  0xfe   :  { %19107 = vst [vmem:[#allocation35_spill] sm:$0xff] %v14013_v59  ;;  %v14017_v28 = vpop.f32.mrf.mxu1 }
  0xff   :  { %19108 = vst [vmem:[#allocation36_spill] sm:$0xff] %v14015_v25 }
 0x100   :  { %19109 = vst [vmem:[#allocation37_spill] sm:$0xff] %v14017_v28  ;;  %9909 = vmatmul.msk.bf16.gmra.mxu0 %vm881_vm0, %v14011_v60  ;;  %9935 = vmatmul.msk.bf16.gmra.mxu1 %vm881_vm0, %v14011_v60  ;;  %v14040_v28 = vld [vmem:[%s19065_s0 + $0x78] sm:$0xff] }
 0x101   :  { %9961 = vmatmul.msk.bf16.gmra.mxu2 %vm881_vm0, %v14011_v60 }
 0x102   :  { %9987 = vmatmul.msk.bf16.gmra.mxu3 %vm881_vm0, %v14011_v60 }
 0x104   :  { %v14027_v18 = vpop.f32.mrf.mxu2 }
 0x105   :  { %19110 = vst [vmem:[#allocation38_spill] sm:$0xff] %v14027_v18  ;;  %v14029_v19 = vpop.f32.mrf.mxu3  ;;  %v14031_v26 = vpop.f32.mrf.mxu0 }
 0x106   :  { %19111 = vst [vmem:[#allocation39_spill] sm:$0xff] %v14029_v19  ;;  %v14033_v20 = vpop.f32.mrf.mxu1 }
 0x107   :  { %19112 = vst [vmem:[#allocation40_spill] sm:$0xff] %v14031_v26  ;;  %v14069_v26 = vld [vmem:[%s19065_s0 + $0x80] sm:$0xff] }
 0x108   :  { %19113 = vst [vmem:[#allocation41_spill] sm:$0xff] %v14033_v20 }
 0x10c   :  { %v14035_v21 = vpop.f32.mrf.mxu2 }
 0x10d   :  { %19114 = vst [vmem:[#allocation42_spill] sm:$0xff] %v14035_v21  ;;  %v14042_v25 = vpop.f32.mrf.mxu3  ;;  %v14044_v59 = vpop.f32.mrf.mxu0 }
 0x10e   :  { %19115 = vst [vmem:[#allocation43_spill] sm:$0xff] %v14042_v25  ;;  %v14046_v24 = vpop.f32.mrf.mxu1 }
 0x10f   :  { %19116 = vst [vmem:[#allocation44_spill] sm:$0xff] %v14044_v59 }
 0x110   :  { %19117 = vst [vmem:[#allocation45_spill] sm:$0xff] %v14046_v24  ;;  %9910 = vmatmul.msk.bf16.gmra.mxu0 %vm881_vm0, %v14040_v28  ;;  %9936 = vmatmul.msk.bf16.gmra.mxu1 %vm881_vm0, %v14040_v28 }
 0x111   :  { %9962 = vmatmul.msk.bf16.gmra.mxu2 %vm881_vm0, %v14040_v28 }
 0x112   :  { %9988 = vmatmul.msk.bf16.gmra.mxu3 %vm881_vm0, %v14040_v28 }
 0x114   :  { %v14056_v21 = vpop.f32.mrf.mxu2 }
 0x115   :  { %19118 = vst [vmem:[#allocation46_spill] sm:$0xff] %v14056_v21  ;;  %v14058_v20 = vpop.f32.mrf.mxu3  ;;  %v14060_v25 = vpop.f32.mrf.mxu0 }
 0x116   :  { %19119 = vst [vmem:[#allocation47_spill] sm:$0xff] %v14058_v20  ;;  %v14062_v59 = vpop.f32.mrf.mxu1 }
 0x117   :  { %19120 = vst [vmem:[#allocation48_spill] sm:$0xff] %v14060_v25  ;;  %v12796_v25 = vld [vmem:[%s19064_s1 + $0xd4] sm:$0xf0] }
 0x118   :  { %19121 = vst [vmem:[#allocation49_spill] sm:$0xff] %v14062_v59 }
 0x11c   :  { %v14064_v24 = vpop.f32.mrf.mxu2 }
 0x11d   :  { %19122 = vst [vmem:[#allocation50_spill] sm:$0xff] %v14064_v24  ;;  %v14071_v19 = vpop.f32.mrf.mxu3  ;;  %v14073_v18 = vpop.f32.mrf.mxu0 }
 0x11e   :  { %19123 = vst [vmem:[#allocation51_spill] sm:$0xff] %v14071_v19  ;;  %v14075_v23 = vpop.f32.mrf.mxu1 }
 0x11f   :  { %19124 = vst [vmem:[#allocation52_spill] sm:$0xff] %v14073_v18 }
 0x120   :  { %19125 = vst [vmem:[#allocation53_spill] sm:$0xff] %v14075_v23  ;;  %9911 = vmatmul.msk.bf16.gmra.mxu0 %vm881_vm0, %v14069_v26  ;;  %9937 = vmatmul.msk.bf16.gmra.mxu1 %vm881_vm0, %v14069_v26  ;;  %v9537_v23 = vld [vmem:[%s19064_s1 + $0x98] sm:$0xf] }
 0x121   :  { %9963 = vmatmul.msk.bf16.gmra.mxu2 %vm881_vm0, %v14069_v26  ;;  %v9538_v20 = vor.u32 %v12796_v25, %v9537_v23  ;;  %v9539_v23 = vld [vmem:[%s19064_s1 + $0xd8] sm:$0xf0] }
 0x122   :  { %9989 = vmatmul.msk.bf16.gmra.mxu3 %vm881_vm0, %v14069_v26 }
 0x123   :  { %1800 = vmatpush.bf16.msrb.mxu2 %v9538_v20 }
 0x124   :  { %v14085_v24 = vpop.f32.mrf.mxu2 }
 0x125   :  { %19126 = vst [vmem:[#allocation54_spill] sm:$0xff] %v14085_v24  ;;  %v14087_v59 = vpop.f32.mrf.mxu3  ;;  %v14089_v19 = vpop.f32.mrf.mxu0  ;;  %v12788_v24 = vld [vmem:[%s19064_s1 + $0x9c] sm:$0xf] }
 0x126   :  { %19127 = vst [vmem:[#allocation55_spill] sm:$0xff] %v14087_v59  ;;  %v14091_v18 = vpop.f32.mrf.mxu1  ;;  %v14104_v59 = vld [vmem:[%s19065_s0 + $0x88] sm:$0xff]  ;;  %v9542_v20 = vor.u32 %v12788_v24, %v9539_v23 }
 0x127   :  { %19128 = vst [vmem:[#allocation56_spill] sm:$0xff] %v14089_v19 }
 0x128   :  { %19129 = vst [vmem:[#allocation57_spill] sm:$0xff] %v14091_v18  ;;  %1939 = vmatpush.bf16.msrb.mxu3 %v9542_v20 }
 0x12c   :  { %v14099_v21 = vpop.f32.mrf.mxu2 }
 0x12d   :  { %19130 = vst [vmem:[#allocation58_spill] sm:$0xff] %v14099_v21  ;;  %v14106_v19 = vpop.f32.mrf.mxu3  ;;  %v14108_v18 = vpop.f32.mrf.mxu0  ;;  %v9529_v21 = vld [vmem:[%s19064_s1 + $0x90] sm:$0xf] }
 0x12e   :  { %19131 = vst [vmem:[#allocation59_spill] sm:$0xff] %v14106_v19  ;;  %v14116_v25 = vpop.f32.mrf.mxu1  ;;  %v12795_v19 = vld [vmem:[%s19064_s1 + $0xcc] sm:$0xf0] }
 0x12f   :  { %19132 = vst [vmem:[#allocation60_spill] sm:$0xff] %v14108_v18  ;;  %v12787_v18 = vld [vmem:[%s19064_s1 + $0x94] sm:$0xf]  ;;  %v9530_v61 = vor.u32 %v12795_v19, %v9529_v21 }
 0x130   :  { %19133 = vst [vmem:[#allocation61_spill] sm:$0xff] %v14116_v25  ;;  %9912 = vmatmul.msk.bf16.gmra.mxu0 %vm881_vm0, %v14104_v59  ;;  %v9534_v24 = vor.u32 %v12787_v18, %v9531_v16  ;;  %9938 = vmatmul.msk.bf16.gmra.mxu1 %vm881_vm0, %v14104_v59  ;;  %v14151_v18 = vld [vmem:[%s19065_s0 + $0x90] sm:$0xff] }
 0x131   :  { %9964 = vmatmul.msk.bf16.gmra.mxu2 %vm881_vm0, %v14104_v59  ;;  %1522 = vmatpush.bf16.msrb.mxu0 %v9530_v61 }
 0x132   :  { %9990 = vmatmul.msk.bf16.gmra.mxu3 %vm881_vm0, %v14104_v59  ;;  %1661 = vmatpush.bf16.msrb.mxu1 %v9534_v24 }
 0x134   :  { %v14138_v19 = vpop.f32.mrf.mxu2 }
 0x135   :  { %19134 = vst [vmem:[#allocation62_spill] sm:$0xff] %v14138_v19  ;;  %v14140_v21 = vpop.f32.mrf.mxu3  ;;  %v14142_v23 = vpop.f32.mrf.mxu0 }
 0x136   :  { %19135 = vst [vmem:[#allocation63_spill] sm:$0xff] %v14140_v21  ;;  %v14144_v25 = vpop.f32.mrf.mxu1 }
 0x137   :  { %19136 = vst [vmem:[#allocation64_spill] sm:$0xff] %v14142_v23 }
 0x138   :  { %19137 = vst [vmem:[#allocation65_spill] sm:$0xff] %v14144_v25  ;;  %v14180_v25 = vld [vmem:[%s19065_s0 + $0x98] sm:$0xff] }
 0x13c   :  { %v14146_v16 = vpop.f32.mrf.mxu2 }
 0x13d   :  { %19138 = vst [vmem:[#allocation66_spill] sm:$0xff] %v14146_v16  ;;  %v14153_v20 = vpop.f32.mrf.mxu3  ;;  %v14155_v22 = vpop.f32.mrf.mxu0 }
 0x13e   :  { %19139 = vst [vmem:[#allocation67_spill] sm:$0xff] %v14153_v20  ;;  %v14157_v61 = vpop.f32.mrf.mxu1 }
 0x13f   :  { %19140 = vst [vmem:[#allocation68_spill] sm:$0xff] %v14155_v22 }
 0x140   :  { %19141 = vst [vmem:[#allocation69_spill] sm:$0xff] %v14157_v61  ;;  %9913 = vmatmul.msk.bf16.gmra.mxu0 %vm881_vm0, %v14151_v18  ;;  %9939 = vmatmul.msk.bf16.gmra.mxu1 %vm881_vm0, %v14151_v18 }
 0x141   :  { %9965 = vmatmul.msk.bf16.gmra.mxu2 %vm881_vm0, %v14151_v18 }
 0x142   :  { %9991 = vmatmul.msk.bf16.gmra.mxu3 %vm881_vm0, %v14151_v18 }
 0x144   :  { %v14167_v24 = vpop.f32.mrf.mxu2 }
 0x145   :  { %19142 = vst [vmem:[#allocation70_spill] sm:$0xff] %v14167_v24  ;;  %v14169_v16 = vpop.f32.mrf.mxu3  ;;  %v14171_v20 = vpop.f32.mrf.mxu0 }
 0x146   :  { %19143 = vst [vmem:[#allocation71_spill] sm:$0xff] %v14169_v16  ;;  %v14173_v22 = vpop.f32.mrf.mxu1 }
 0x147   :  { %19144 = vst [vmem:[#allocation72_spill] sm:$0xff] %v14171_v20  ;;  %v14209_v20 = vld [vmem:[%s19065_s0 + $0xa0] sm:$0xff] }
 0x148   :  { %19145 = vst [vmem:[#allocation73_spill] sm:$0xff] %v14173_v22 }
 0x14c   :  { %v14175_v61 = vpop.f32.mrf.mxu2 }
 0x14d   :  { %19146 = vst [vmem:[#allocation74_spill] sm:$0xff] %v14175_v61  ;;  %v14182_v23 = vpop.f32.mrf.mxu3  ;;  %v14184_v21 = vpop.f32.mrf.mxu0 }
 0x14e   :  { %19147 = vst [vmem:[#allocation75_spill] sm:$0xff] %v14182_v23  ;;  %v14186_v19 = vpop.f32.mrf.mxu1 }
 0x14f   :  { %19148 = vst [vmem:[#allocation76_spill] sm:$0xff] %v14184_v21 }
 0x150   :  { %19149 = vst [vmem:[#allocation77_spill] sm:$0xff] %v14186_v19  ;;  %9914 = vmatmul.msk.bf16.gmra.mxu0 %vm881_vm0, %v14180_v25  ;;  %9940 = vmatmul.msk.bf16.gmra.mxu1 %vm881_vm0, %v14180_v25 }
 0x151   :  { %9966 = vmatmul.msk.bf16.gmra.mxu2 %vm881_vm0, %v14180_v25 }
 0x152   :  { %9992 = vmatmul.msk.bf16.gmra.mxu3 %vm881_vm0, %v14180_v25 }
 0x154   :  { %v14196_v61 = vpop.f32.mrf.mxu2 }
 0x155   :  { %19150 = vst [vmem:[#allocation78_spill] sm:$0xff] %v14196_v61  ;;  %v14198_v22 = vpop.f32.mrf.mxu3  ;;  %v14200_v23 = vpop.f32.mrf.mxu0 }
 0x156   :  { %19151 = vst [vmem:[#allocation79_spill] sm:$0xff] %v14198_v22  ;;  %v14202_v21 = vpop.f32.mrf.mxu1  ;;  %v12772_v22 = vld [vmem:[%s19064_s1 + $0x1c] sm:$0xf] }
 0x157   :  { %19152 = vst [vmem:[#allocation80_spill] sm:$0xff] %v14200_v23  ;;  %v12780_v23 = vld [vmem:[%s19064_s1 + $0x54] sm:$0xf0] }
 0x158   :  { %19153 = vst [vmem:[#allocation81_spill] sm:$0xff] %v14202_v21 }
 0x15c   :  { %v14204_v19 = vpop.f32.mrf.mxu2 }
 0x15d   :  { %19154 = vst [vmem:[#allocation82_spill] sm:$0xff] %v14204_v19  ;;  %v14211_v16 = vpop.f32.mrf.mxu3  ;;  %v14213_v24 = vpop.f32.mrf.mxu0 }
 0x15e   :  { %19155 = vst [vmem:[#allocation83_spill] sm:$0xff] %v14211_v16  ;;  %v14215_v58 = vpop.f32.mrf.mxu1 }
 0x15f   :  { %19156 = vst [vmem:[#allocation84_spill] sm:$0xff] %v14213_v24 }
 0x160   :  { %19157 = vst [vmem:[#allocation85_spill] sm:$0xff] %v14215_v58  ;;  %9915 = vmatmul.msk.bf16.gmra.mxu0 %vm881_vm0, %v14209_v20  ;;  %9941 = vmatmul.msk.bf16.gmra.mxu1 %vm881_vm0, %v14209_v20  ;;  %v9473_v58 = vld [vmem:[%s19064_s1 + $0x18] sm:$0xf] }
 0x161   :  { %9967 = vmatmul.msk.bf16.gmra.mxu2 %vm881_vm0, %v14209_v20  ;;  %v9474_v61 = vor.u32 %v12780_v23, %v9473_v58  ;;  %v9467_v58 = vld [vmem:[%s19064_s1 + $0x50] sm:$0xf0] }
 0x162   :  { %9993 = vmatmul.msk.bf16.gmra.mxu3 %vm881_vm0, %v14209_v20  ;;  %v9470_v23 = vor.u32 %v12771_v56, %v9467_v58 }
 0x163   :  { %1801 = vmatpush.bf16.msrb.mxu2 %v9474_v61 }
 0x164   :  { %v14225_v19 = vpop.f32.mrf.mxu2  ;;  %1662 = vmatpush.bf16.msrb.mxu1 %v9470_v23  ;;  %v14291_v23 = vld [vmem:[%s19065_s0 + $0xb0] sm:$0xff] }
 0x165   :  { %19158 = vst [vmem:[#allocation86_spill] sm:$0xff] %v14225_v19  ;;  %v14227_v21 = vpop.f32.mrf.mxu3  ;;  %v14229_v16 = vpop.f32.mrf.mxu0 }
 0x166   :  { %19159 = vst [vmem:[#allocation87_spill] sm:$0xff] %v14227_v21  ;;  %v14231_v24 = vpop.f32.mrf.mxu1  ;;  %v9475_v21 = vld [vmem:[%s19064_s1 + $0x58] sm:$0xf0] }
 0x167   :  { %19160 = vst [vmem:[#allocation88_spill] sm:$0xff] %v14229_v16  ;;  %v12779_v16 = vld [vmem:[%s19064_s1 + $0x4c] sm:$0xf0]  ;;  %v9478_v19 = vor.u32 %v12772_v22, %v9475_v21  ;;  %v14262_v22 = vld [vmem:[%s19065_s0 + $0xa8] sm:$0xff] }
 0x168   :  { %19161 = vst [vmem:[#allocation89_spill] sm:$0xff] %v14231_v24  ;;  %v9465_v24 = vld [vmem:[%s19064_s1 + $0x10] sm:$0xf] }
 0x169   :  { %v9466_v57 = vor.u32 %v12779_v16, %v9465_v24  ;;  %1940 = vmatpush.bf16.msrb.mxu3 %v9478_v19 }
 0x16b   :  { %1523 = vmatpush.bf16.msrb.mxu0 %v9466_v57 }
 0x16c   :  { %v14257_v55 = vpop.f32.mrf.mxu2 }
 0x16d   :  { %19162 = vst [vmem:[#allocation90_spill] sm:$0xff] %v14257_v55  ;;  %v14264_v21 = vpop.f32.mrf.mxu3  ;;  %v14266_v16 = vpop.f32.mrf.mxu0 }
 0x16e   :  { %19163 = vst [vmem:[#allocation91_spill] sm:$0xff] %v14264_v21  ;;  %v14268_v24 = vpop.f32.mrf.mxu1 }
 0x16f   :  { %19164 = vst [vmem:[#allocation92_spill] sm:$0xff] %v14266_v16 }
 0x170   :  { %19165 = vst [vmem:[#allocation93_spill] sm:$0xff] %v14268_v24  ;;  %9916 = vmatmul.msk.bf16.gmra.mxu0 %vm881_vm0, %v14262_v22  ;;  %9942 = vmatmul.msk.bf16.gmra.mxu1 %vm881_vm0, %v14262_v22 }
 0x171   :  { %9968 = vmatmul.msk.bf16.gmra.mxu2 %vm881_vm0, %v14262_v22 }
 0x172   :  { %9994 = vmatmul.msk.bf16.gmra.mxu3 %vm881_vm0, %v14262_v22 }
 0x174   :  { %v14278_v56 = vpop.f32.mrf.mxu2 }
 0x175   :  { %19166 = vst [vmem:[#allocation94_spill] sm:$0xff] %v14278_v56  ;;  %v14280_v57 = vpop.f32.mrf.mxu3  ;;  %v14282_v19 = vpop.f32.mrf.mxu0 }
 0x176   :  { %19167 = vst [vmem:[#allocation95_spill] sm:$0xff] %v14280_v57  ;;  %v14284_v61 = vpop.f32.mrf.mxu1 }
 0x177   :  { %19168 = vst [vmem:[#allocation96_spill] sm:$0xff] %v14282_v19  ;;  %v14320_v19 = vld [vmem:[%s19065_s0 + $0xb8] sm:$0xff] }
 0x178   :  { %19169 = vst [vmem:[#allocation97_spill] sm:$0xff] %v14284_v61 }
 0x17c   :  { %v14286_v58 = vpop.f32.mrf.mxu2 }
 0x17d   :  { %19170 = vst [vmem:[#allocation98_spill] sm:$0xff] %v14286_v58  ;;  %v14293_v24 = vpop.f32.mrf.mxu3  ;;  %v14295_v16 = vpop.f32.mrf.mxu0 }
 0x17e   :  { %19171 = vst [vmem:[#allocation99_spill] sm:$0xff] %v14293_v24  ;;  %v14297_v21 = vpop.f32.mrf.mxu1 }
 0x17f   :  { %19172 = vst [vmem:[#allocation100_spill] sm:$0xff] %v14295_v16 }
 0x180   :  { %19173 = vst [vmem:[#allocation101_spill] sm:$0xff] %v14297_v21  ;;  %9917 = vmatmul.msk.bf16.gmra.mxu0 %vm881_vm0, %v14291_v23  ;;  %9943 = vmatmul.msk.bf16.gmra.mxu1 %vm881_vm0, %v14291_v23 }
 0x181   :  { %9969 = vmatmul.msk.bf16.gmra.mxu2 %vm881_vm0, %v14291_v23 }
 0x182   :  { %9995 = vmatmul.msk.bf16.gmra.mxu3 %vm881_vm0, %v14291_v23 }
 0x184   :  { %v14307_v58 = vpop.f32.mrf.mxu2 }
 0x185   :  { %19174 = vst [vmem:[#allocation102_spill] sm:$0xff] %v14307_v58  ;;  %v14309_v61 = vpop.f32.mrf.mxu3  ;;  %v14311_v24 = vpop.f32.mrf.mxu0 }
 0x186   :  { %19175 = vst [vmem:[#allocation103_spill] sm:$0xff] %v14309_v61  ;;  %v14313_v16 = vpop.f32.mrf.mxu1 }
 0x187   :  { %19176 = vst [vmem:[#allocation104_spill] sm:$0xff] %v14311_v24  ;;  %v14349_v24 = vld [vmem:[%s19065_s0 + $0xc0] sm:$0xff] }
 0x188   :  { %19177 = vst [vmem:[#allocation105_spill] sm:$0xff] %v14313_v16 }
 0x18c   :  { %v14315_v21 = vpop.f32.mrf.mxu2 }
 0x18d   :  { %19178 = vst [vmem:[#allocation106_spill] sm:$0xff] %v14315_v21  ;;  %v14322_v57 = vpop.f32.mrf.mxu3  ;;  %v14324_v56 = vpop.f32.mrf.mxu0 }
 0x18e   :  { %19179 = vst [vmem:[#allocation107_spill] sm:$0xff] %v14322_v57  ;;  %v14326_v55 = vpop.f32.mrf.mxu1 }
 0x18f   :  { %19180 = vst [vmem:[#allocation108_spill] sm:$0xff] %v14324_v56 }
 0x190   :  { %19181 = vst [vmem:[#allocation109_spill] sm:$0xff] %v14326_v55  ;;  %9918 = vmatmul.msk.bf16.gmra.mxu0 %vm881_vm0, %v14320_v19  ;;  %9944 = vmatmul.msk.bf16.gmra.mxu1 %vm881_vm0, %v14320_v19 }
 0x191   :  { %9970 = vmatmul.msk.bf16.gmra.mxu2 %vm881_vm0, %v14320_v19 }
 0x192   :  { %9996 = vmatmul.msk.bf16.gmra.mxu3 %vm881_vm0, %v14320_v19 }
 0x194   :  { %v14336_v21 = vpop.f32.mrf.mxu2 }
 0x195   :  { %19182 = vst [vmem:[#allocation110_spill] sm:$0xff] %v14336_v21  ;;  %v14338_v16 = vpop.f32.mrf.mxu3  ;;  %v14340_v57 = vpop.f32.mrf.mxu0 }
 0x196   :  { %19183 = vst [vmem:[#allocation111_spill] sm:$0xff] %v14338_v16  ;;  %v14342_v56 = vpop.f32.mrf.mxu1 }
 0x197   :  { %19184 = vst [vmem:[#allocation112_spill] sm:$0xff] %v14340_v57 }
 0x198   :  { %19185 = vst [vmem:[#allocation113_spill] sm:$0xff] %v14342_v56  ;;  %v9875_v56 = vld [vmem:[%s19064_s1 + $0x368] sm:$0xf0] }
 0x19c   :  { %v14344_v55 = vpop.f32.mrf.mxu2 }
 0x19d   :  { %19186 = vst [vmem:[#allocation114_spill] sm:$0xff] %v14344_v55  ;;  %v14351_v61 = vpop.f32.mrf.mxu3  ;;  %v14353_v58 = vpop.f32.mrf.mxu0 }
 0x19e   :  { %19187 = vst [vmem:[#allocation115_spill] sm:$0xff] %v14351_v61  ;;  %v14355_v54 = vpop.f32.mrf.mxu1  ;;  %v9873_v61 = vld [vmem:[%s19064_s1 + $0x328] sm:$0xf] }
 0x19f   :  { %19188 = vst [vmem:[#allocation116_spill] sm:$0xff] %v14353_v58  ;;  %v12870_v58 = vld [vmem:[%s19064_s1 + $0x32c] sm:$0xf] }
 0x1a0   :  { %19189 = vst [vmem:[#allocation117_spill] sm:$0xff] %v14355_v54  ;;  %9919 = vmatmul.msk.bf16.gmra.mxu0 %vm881_vm0, %v14349_v24  ;;  %9945 = vmatmul.msk.bf16.gmra.mxu1 %vm881_vm0, %v14349_v24  ;;  %v12878_v54 = vld [vmem:[%s19064_s1 + $0x364] sm:$0xf0]  ;;  %v9878_v16 = vor.u32 %v12870_v58, %v9875_v56 }
 0x1a1   :  { %9971 = vmatmul.msk.bf16.gmra.mxu2 %vm881_vm0, %v14349_v24  ;;  %v9874_v55 = vor.u32 %v12878_v54, %v9873_v61  ;;  %v12877_v54 = vld [vmem:[%s19064_s1 + $0x35c] sm:$0xf0]  ;;  %v12869_v61 = vld [vmem:[%s19064_s1 + $0x324] sm:$0xf] }
 0x1a2   :  { %9997 = vmatmul.msk.bf16.gmra.mxu3 %vm881_vm0, %v14349_v24  ;;  %v9866_v56 = vor.u32 %v12877_v54, %v9865_v51 }
 0x1a3   :  { %2351 = vmatpush.bf16.msra.mxu2 %v9874_v55  ;;  %2490 = vmatpush.bf16.msra.mxu3 %v9878_v16  ;;  %v9867_v55 = vld [vmem:[%s19064_s1 + $0x360] sm:$0xf0] }
 0x1a4   :  { %v14377_v57 = vpop.f32.mrf.mxu2  ;;  %v9870_v58 = vor.u32 %v12869_v61, %v9867_v55  ;;  %2073 = vmatpush.bf16.msra.mxu0 %v9866_v56 }
 0x1a5   :  { %19190 = vst [vmem:[#allocation118_spill] sm:$0xff] %v14377_v57  ;;  %v14379_v21 = vpop.f32.mrf.mxu3  ;;  %v14381_v52 = vpop.f32.mrf.mxu0 }
 0x1a6   :  { %19191 = vst [vmem:[#allocation119_spill] sm:$0xff] %v14379_v21  ;;  %v14392_v50 = vpop.f32.mrf.mxu1  ;;  %2212 = vmatpush.bf16.msra.mxu1 %v9870_v58  ;;  %v14402_v21 = vld [vmem:[%s19065_s0 + $0xc8] sm:$0xff] }
 0x1a7   :  { %19192 = vst [vmem:[#allocation120_spill] sm:$0xff] %v14381_v52 }
 0x1a8   :  { %19193 = vst [vmem:[#allocation121_spill] sm:$0xff] %v14392_v50 }
 0x1ac   :  { %v14397_v52 = vpop.f32.mrf.mxu2 }
 0x1ad   :  { %19194 = vst [vmem:[#allocation122_spill] sm:$0xff] %v14397_v52  ;;  %v14404_v57 = vpop.f32.mrf.mxu3  ;;  %v14406_v46 = vpop.f32.mrf.mxu0 }
 0x1ae   :  { %19195 = vst [vmem:[#allocation123_spill] sm:$0xff] %v14404_v57  ;;  %v14408_v16 = vpop.f32.mrf.mxu1 }
 0x1af   :  { %19196 = vst [vmem:[#allocation124_spill] sm:$0xff] %v14406_v46 }
 0x1b0   :  { %19197 = vst [vmem:[#allocation125_spill] sm:$0xff] %v14408_v16  ;;  %9920 = vmatmul.msk.bf16.gmra.mxu0 %vm881_vm0, %v14402_v21  ;;  %9946 = vmatmul.msk.bf16.gmra.mxu1 %vm881_vm0, %v14402_v21 }
 0x1b1   :  { %9972 = vmatmul.msk.bf16.gmra.mxu2 %vm881_vm0, %v14402_v21 }
 0x1b2   :  { %9998 = vmatmul.msk.bf16.gmra.mxu3 %vm881_vm0, %v14402_v21 }
 0x1b4   :  { %v14418_v51 = vpop.f32.mrf.mxu2 }
 0x1b5   :  { %19198 = vst [vmem:[#allocation126_spill] sm:$0xff] %v14418_v51  ;;  %v14420_v54 = vpop.f32.mrf.mxu3  ;;  %v14422_v61 = vpop.f32.mrf.mxu0 }
 0x1b6   :  { %19199 = vst [vmem:[#allocation127_spill] sm:$0xff] %v14420_v54  ;;  %v14424_v56 = vpop.f32.mrf.mxu1 }
 0x1b7   :  { %19200 = vst [vmem:[#allocation128_spill] sm:$0xff] %v14422_v61 }
 0x1b8   :  { %19201 = vst [vmem:[#allocation129_spill] sm:$0xff] %v14424_v56 }
 0x1bc   :  { %v14426_v55 = vpop.f32.mrf.mxu2 }
 0x1bd   :  { %19202 = vst [vmem:[#allocation130_spill] sm:$0xff] %v14426_v55  ;;  %v14428_v58 = vpop.f32.mrf.mxu3  ;;  %v14430_v16 = vpop.f32.mrf.mxu0 }
 0x1be   :  { %19203 = vst [vmem:[#allocation131_spill] sm:$0xff] %v14428_v58  ;;  %v14432_v46 = vpop.f32.mrf.mxu1 }
 0x1bf   :  { %19204 = vst [vmem:[#allocation132_spill] sm:$0xff] %v14430_v16 }
 0x1c0   :  { %19205 = vst [vmem:[#allocation133_spill] sm:$0xff] %v14432_v46  ;;  %9999 = vmatmul.msk.bf16.vlgmr.msrb.gmra.mxu0 %vm881_vm0, %v13633_v27  ;;  %10025 = vmatmul.msk.bf16.vlgmr.msrb.gmra.mxu1 %vm881_vm0, %v13633_v27 }
 0x1c1   :  { %10051 = vmatmul.msk.bf16.vlgmr.msrb.gmra.mxu2 %vm881_vm0, %v13633_v27 }
 0x1c2   :  { %10077 = vmatmul.msk.bf16.vlgmr.msrb.gmra.mxu3 %vm881_vm0, %v13633_v27 }
 0x1c4   :  { %v14442_v56 = vpop.f32.mrf.mxu2 }
 0x1c5   :  { %19206 = vst [vmem:[#allocation134_spill] sm:$0xff] %v14442_v56  ;;  %v14444_v55 = vpop.f32.mrf.mxu3  ;;  %v14446_v58 = vpop.f32.mrf.mxu0 }
 0x1c6   :  { %19207 = vst [vmem:[#allocation135_spill] sm:$0xff] %v14444_v55  ;;  %v14448_v16 = vpop.f32.mrf.mxu1  ;;  %v9809_v55 = vld [vmem:[%s19064_s1 + $0x2a8] sm:$0xf] }
 0x1c7   :  { %19208 = vst [vmem:[#allocation136_spill] sm:$0xff] %v14446_v58 }
 0x1c8   :  { %19209 = vst [vmem:[#allocation137_spill] sm:$0xff] %v14448_v16 }
 0x1cc   :  { %v14450_v46 = vpop.f32.mrf.mxu2 }
 0x1cd   :  { %19210 = vst [vmem:[#allocation138_spill] sm:$0xff] %v14450_v46  ;;  %v14452_v61 = vpop.f32.mrf.mxu3  ;;  %v14454_v54 = vpop.f32.mrf.mxu0 }
 0x1ce   :  { %19211 = vst [vmem:[#allocation139_spill] sm:$0xff] %v14452_v61  ;;  %v14456_v51 = vpop.f32.mrf.mxu1 }
 0x1cf   :  { %19212 = vst [vmem:[#allocation140_spill] sm:$0xff] %v14454_v54 }
 0x1d0   :  { %19213 = vst [vmem:[#allocation141_spill] sm:$0xff] %v14456_v51  ;;  %10000 = vmatmul.msk.bf16.gmra.mxu0 %vm881_vm0, %v13652_v33  ;;  %10026 = vmatmul.msk.bf16.gmra.mxu1 %vm881_vm0, %v13652_v33 }
 0x1d1   :  { %10052 = vmatmul.msk.bf16.gmra.mxu2 %vm881_vm0, %v13652_v33 }
 0x1d2   :  { %10078 = vmatmul.msk.bf16.gmra.mxu3 %vm881_vm0, %v13652_v33  ;;  %v12862_v33 = vld [vmem:[%s19064_s1 + $0x2e4] sm:$0xf0] }
 0x1d4   :  { %v14466_v27 = vpop.f32.mrf.mxu2 }
 0x1d5   :  { %19214 = vst [vmem:[#allocation142_spill] sm:$0xff] %v14466_v27  ;;  %v14468_v46 = vpop.f32.mrf.mxu3  ;;  %v14470_v61 = vpop.f32.mrf.mxu0 }
 0x1d6   :  { %19215 = vst [vmem:[#allocation143_spill] sm:$0xff] %v14468_v46  ;;  %v14472_v54 = vpop.f32.mrf.mxu1  ;;  %v9810_v46 = vor.u32 %v12862_v33, %v9809_v55  ;;  %v9801_v55 = vld [vmem:[%s19064_s1 + $0x2a0] sm:$0xf]  ;;  %v9803_v33 = vld [vmem:[%s19064_s1 + $0x2e0] sm:$0xf0] }
 0x1d7   :  { %19216 = vst [vmem:[#allocation144_spill] sm:$0xff] %v14470_v61 }
 0x1d8   :  { %19217 = vst [vmem:[#allocation145_spill] sm:$0xff] %v14472_v54  ;;  %v12854_v54 = vld [vmem:[%s19064_s1 + $0x2ac] sm:$0xf]  ;;  %2352 = vmatpush.bf16.msra.mxu2 %v9810_v46  ;;  %v12853_v46 = vld [vmem:[%s19064_s1 + $0x2a4] sm:$0xf] }
 0x1dc   :  { %v14474_v51 = vpop.f32.mrf.mxu2 }
 0x1dd   :  { %19218 = vst [vmem:[#allocation146_spill] sm:$0xff] %v14474_v51  ;;  %v14476_v16 = vpop.f32.mrf.mxu3  ;;  %v14478_v58 = vpop.f32.mrf.mxu0 }
 0x1de   :  { %19219 = vst [vmem:[#allocation147_spill] sm:$0xff] %v14476_v16  ;;  %v14486_v27 = vpop.f32.mrf.mxu1  ;;  %v9811_v16 = vld [vmem:[%s19064_s1 + $0x2e8] sm:$0xf0] }
 0x1df   :  { %19220 = vst [vmem:[#allocation148_spill] sm:$0xff] %v14478_v58  ;;  %v9814_v58 = vor.u32 %v12854_v54, %v9811_v16  ;;  %v12861_v16 = vld [vmem:[%s19064_s1 + $0x2dc] sm:$0xf0] }
 0x1e0   :  { %19221 = vst [vmem:[#allocation149_spill] sm:$0xff] %v14486_v27  ;;  %10001 = vmatmul.msk.bf16.gmra.mxu0 %vm881_vm0, %v13677_v40  ;;  %10027 = vmatmul.msk.bf16.gmra.mxu1 %vm881_vm0, %v13677_v40  ;;  %v9802_v54 = vor.u32 %v12861_v16, %v9801_v55 }
 0x1e1   :  { %10053 = vmatmul.msk.bf16.gmra.mxu2 %vm881_vm0, %v13677_v40  ;;  %2491 = vmatpush.bf16.msra.mxu3 %v9814_v58 }
 0x1e2   :  { %10079 = vmatmul.msk.bf16.gmra.mxu3 %vm881_vm0, %v13677_v40  ;;  %v9806_v40 = vor.u32 %v12853_v46, %v9803_v33  ;;  %2074 = vmatpush.bf16.msra.mxu0 %v9802_v54 }
 0x1e4   :  { %v14514_v27 = vpop.f32.mrf.mxu2  ;;  %2213 = vmatpush.bf16.msra.mxu1 %v9806_v40 }
 0x1e5   :  { %19222 = vst [vmem:[#allocation150_spill] sm:$0xff] %v14514_v27  ;;  %v14516_v51 = vpop.f32.mrf.mxu3  ;;  %v14518_v61 = vpop.f32.mrf.mxu0  ;;  %v9673_v27 = vld [vmem:[%s19064_s1 + $0x1a0] sm:$0xf] }
 0x1e6   :  { %19223 = vst [vmem:[#allocation151_spill] sm:$0xff] %v14516_v51  ;;  %v14520_v56 = vpop.f32.mrf.mxu1  ;;  %v9683_v51 = vld [vmem:[%s19064_s1 + $0x1e8] sm:$0xf0]  ;;  %v9674_v44 = vor.u32 %v12829_v45, %v9673_v27 }
 0x1e7   :  { %19224 = vst [vmem:[#allocation152_spill] sm:$0xff] %v14518_v61 }
 0x1e8   :  { %19225 = vst [vmem:[#allocation153_spill] sm:$0xff] %v14520_v56 }
 0x1ec   :  { %v14522_v57 = vpop.f32.mrf.mxu2 }
 0x1ed   :  { %19226 = vst [vmem:[#allocation154_spill] sm:$0xff] %v14522_v57  ;;  %v14524_v52 = vpop.f32.mrf.mxu3  ;;  %v14526_v58 = vpop.f32.mrf.mxu0  ;;  %v12830_v57 = vld [vmem:[%s19064_s1 + $0x1e4] sm:$0xf0] }
 0x1ee   :  { %19227 = vst [vmem:[#allocation155_spill] sm:$0xff] %v14524_v52  ;;  %v14528_v55 = vpop.f32.mrf.mxu1 }
 0x1ef   :  { %19228 = vst [vmem:[#allocation156_spill] sm:$0xff] %v14526_v58 }
 0x1f0   :  { %19229 = vst [vmem:[#allocation157_spill] sm:$0xff] %v14528_v55  ;;  %10002 = vmatmul.msk.bf16.gmra.mxu0 %vm881_vm0, %v13702_v47  ;;  %10028 = vmatmul.msk.bf16.gmra.mxu1 %vm881_vm0, %v13702_v47 }
 0x1f1   :  { %10054 = vmatmul.msk.bf16.gmra.mxu2 %vm881_vm0, %v13702_v47 }
 0x1f2   :  { %10080 = vmatmul.msk.bf16.gmra.mxu3 %vm881_vm0, %v13702_v47 }
 0x1f4   :  { %v14538_v16 = vpop.f32.mrf.mxu2 }
 0x1f5   :  { %19230 = vst [vmem:[#allocation158_spill] sm:$0xff] %v14538_v16  ;;  %v14540_v46 = vpop.f32.mrf.mxu3  ;;  %v14542_v54 = vpop.f32.mrf.mxu0  ;;  %v9681_v16 = vld [vmem:[%s19064_s1 + $0x1a8] sm:$0xf] }
 0x1f6   :  { %19231 = vst [vmem:[#allocation159_spill] sm:$0xff] %v14540_v46  ;;  %v14544_v33 = vpop.f32.mrf.mxu1  ;;  %v9682_v61 = vor.u32 %v12830_v57, %v9681_v16  ;;  %v12821_v57 = vld [vmem:[%s19064_s1 + $0x1a4] sm:$0xf] }
 0x1f7   :  { %19232 = vst [vmem:[#allocation160_spill] sm:$0xff] %v14542_v54  ;;  %v9675_v16 = vld [vmem:[%s19064_s1 + $0x1e0] sm:$0xf0] }
 0x1f8   :  { %19233 = vst [vmem:[#allocation161_spill] sm:$0xff] %v14544_v33  ;;  %v9678_v43 = vor.u32 %v12821_v57, %v9675_v16 }
 0x1fc   :  { %v14546_v40 = vpop.f32.mrf.mxu2 }
 0x1fd   :  { %19234 = vst [vmem:[#allocation162_spill] sm:$0xff] %v14546_v40  ;;  %v14548_v55 = vpop.f32.mrf.mxu3  ;;  %v14550_v58 = vpop.f32.mrf.mxu0 }
 0x1fe   :  { %19235 = vst [vmem:[#allocation163_spill] sm:$0xff] %v14548_v55  ;;  %v14552_v52 = vpop.f32.mrf.mxu1 }
 0x1ff   :  { %19236 = vst [vmem:[#allocation164_spill] sm:$0xff] %v14550_v58 }
 0x200   :  { %19237 = vst [vmem:[#allocation165_spill] sm:$0xff] %v14552_v52  ;;  %10003 = vmatmul.msk.bf16.gmra.mxu0 %vm881_vm0, %v13715_v48  ;;  %10029 = vmatmul.msk.bf16.gmra.mxu1 %vm881_vm0, %v13715_v48 }
 0x201   :  { %10055 = vmatmul.msk.bf16.gmra.mxu2 %vm881_vm0, %v13715_v48 }
 0x202   :  { %10081 = vmatmul.msk.bf16.gmra.mxu3 %vm881_vm0, %v13715_v48 }
 0x204   :  { %v14562_v47 = vpop.f32.mrf.mxu2 }
 0x205   :  { %19238 = vst [vmem:[#allocation166_spill] sm:$0xff] %v14562_v47  ;;  %v14564_v40 = vpop.f32.mrf.mxu3  ;;  %v14566_v55 = vpop.f32.mrf.mxu0  ;;  %v9737_v47 = vld [vmem:[%s19064_s1 + $0x220] sm:$0xf] }
 0x206   :  { %19239 = vst [vmem:[#allocation167_spill] sm:$0xff] %v14564_v40  ;;  %v14568_v58 = vpop.f32.mrf.mxu1 }
 0x207   :  { %19240 = vst [vmem:[#allocation168_spill] sm:$0xff] %v14566_v55 }
 0x208   :  { %19241 = vst [vmem:[#allocation169_spill] sm:$0xff] %v14568_v58  ;;  %v12846_v58 = vld [vmem:[%s19064_s1 + $0x264] sm:$0xf0] }
 0x20c   :  { %v14570_v52 = vpop.f32.mrf.mxu2 }
 0x20d   :  { %19242 = vst [vmem:[#allocation170_spill] sm:$0xff] %v14570_v52  ;;  %v14572_v33 = vpop.f32.mrf.mxu3  ;;  %v14574_v54 = vpop.f32.mrf.mxu0 }
 0x20e   :  { %19243 = vst [vmem:[#allocation171_spill] sm:$0xff] %v14572_v33  ;;  %v14576_v46 = vpop.f32.mrf.mxu1 }
 0x20f   :  { %19244 = vst [vmem:[#allocation172_spill] sm:$0xff] %v14574_v54 }
 0x210   :  { %19245 = vst [vmem:[#allocation173_spill] sm:$0xff] %v14576_v46  ;;  %10004 = vmatmul.msk.bf16.gmra.mxu0 %vm881_vm0, %v13728_v49  ;;  %10030 = vmatmul.msk.bf16.gmra.mxu1 %vm881_vm0, %v13728_v49  ;;  %v9745_v46 = vld [vmem:[%s19064_s1 + $0x228] sm:$0xf] }
 0x211   :  { %10056 = vmatmul.msk.bf16.gmra.mxu2 %vm881_vm0, %v13728_v49  ;;  %v9746_v55 = vor.u32 %v12846_v58, %v9745_v46  ;;  %v12845_v58 = vld [vmem:[%s19064_s1 + $0x25c] sm:$0xf0] }
 0x212   :  { %10082 = vmatmul.msk.bf16.gmra.mxu3 %vm881_vm0, %v13728_v49  ;;  %v12838_v49 = vld [vmem:[%s19064_s1 + $0x22c] sm:$0xf]  ;;  %v9738_v46 = vor.u32 %v12845_v58, %v9737_v47 }
 0x213   :  { %2353 = vmatpush.bf16.msra.mxu2 %v9746_v55 }
 0x214   :  { %v14586_v48 = vpop.f32.mrf.mxu2  ;;  %2075 = vmatpush.bf16.msra.mxu0 %v9738_v46 }
 0x215   :  { %19246 = vst [vmem:[#allocation174_spill] sm:$0xff] %v14586_v48  ;;  %v14588_v52 = vpop.f32.mrf.mxu3  ;;  %v14590_v33 = vpop.f32.mrf.mxu0 }
 0x216   :  { %19247 = vst [vmem:[#allocation175_spill] sm:$0xff] %v14588_v52  ;;  %v14592_v54 = vpop.f32.mrf.mxu1  ;;  %v9747_v52 = vld [vmem:[%s19064_s1 + $0x268] sm:$0xf0] }
 0x217   :  { %19248 = vst [vmem:[#allocation176_spill] sm:$0xff] %v14590_v33  ;;  %v9750_v33 = vor.u32 %v12838_v49, %v9747_v52  ;;  %v12837_v52 = vld [vmem:[%s19064_s1 + $0x224] sm:$0xf]  ;;  %2354 = vmatpush.bf16.msra.mxu2 %v9682_v61 }
 0x218   :  { %19249 = vst [vmem:[#allocation177_spill] sm:$0xff] %v14592_v54  ;;  %2076 = vmatpush.bf16.msra.mxu0 %v9674_v44 }
 0x219   :  { %2492 = vmatpush.bf16.msra.mxu3 %v9750_v33  ;;  %v9739_v33 = vld [vmem:[%s19064_s1 + $0x260] sm:$0xf0] }
 0x21a   :  { %v9742_v49 = vor.u32 %v12837_v52, %v9739_v33 }
 0x21c   :  { %v14606_v54 = vpop.f32.mrf.mxu2  ;;  %2214 = vmatpush.bf16.msra.mxu1 %v9742_v49 }
 0x21d   :  { %19250 = vst [vmem:[#allocation178_spill] sm:$0xff] %v14606_v54  ;;  %v14608_v48 = vpop.f32.mrf.mxu3  ;;  %v14610_v40 = vpop.f32.mrf.mxu0 }
 0x21e   :  { %19251 = vst [vmem:[#allocation179_spill] sm:$0xff] %v14608_v48  ;;  %v14621_v55 = vpop.f32.mrf.mxu1 }
 0x21f   :  { %19252 = vst [vmem:[#allocation180_spill] sm:$0xff] %v14610_v40 }
 0x220   :  { %19253 = vst [vmem:[#allocation181_spill] sm:$0xff] %v14621_v55  ;;  %10005 = vmatmul.msk.bf16.gmra.mxu0 %vm881_vm0, %v13765_v62  ;;  %10031 = vmatmul.msk.bf16.gmra.mxu1 %vm881_vm0, %v13765_v62 }
 0x221   :  { %10057 = vmatmul.msk.bf16.gmra.mxu2 %vm881_vm0, %v13765_v62  ;;  %2215 = vmatpush.bf16.msra.mxu1 %v9678_v43 }
 0x222   :  { %10083 = vmatmul.msk.bf16.gmra.mxu3 %vm881_vm0, %v13765_v62 }
 0x224   :  { %v14634_v47 = vpop.f32.mrf.mxu2 }
 0x225   :  { %19254 = vst [vmem:[#allocation182_spill] sm:$0xff] %v14634_v47  ;;  %v14636_v58 = vpop.f32.mrf.mxu3  ;;  %v14638_v55 = vpop.f32.mrf.mxu0 }
 0x226   :  { %19255 = vst [vmem:[#allocation183_spill] sm:$0xff] %v14636_v58  ;;  %v14640_v52 = vpop.f32.mrf.mxu1 }
 0x227   :  { %19256 = vst [vmem:[#allocation184_spill] sm:$0xff] %v14638_v55 }
 0x228   :  { %19257 = vst [vmem:[#allocation185_spill] sm:$0xff] %v14640_v52 }
 0x22c   :  { %v14642_v33 = vpop.f32.mrf.mxu2 }
 0x22d   :  { %19258 = vst [vmem:[#allocation186_spill] sm:$0xff] %v14642_v33  ;;  %v14644_v40 = vpop.f32.mrf.mxu3  ;;  %v14646_v48 = vpop.f32.mrf.mxu0 }
 0x22e   :  { %19259 = vst [vmem:[#allocation187_spill] sm:$0xff] %v14644_v40  ;;  %v14648_v54 = vpop.f32.mrf.mxu1 }
 0x22f   :  { %19260 = vst [vmem:[#allocation188_spill] sm:$0xff] %v14646_v48 }
 0x230   :  { %19261 = vst [vmem:[#allocation189_spill] sm:$0xff] %v14648_v54  ;;  %10006 = vmatmul.msk.bf16.gmra.mxu0 %vm881_vm0, %v13778_v63  ;;  %10032 = vmatmul.msk.bf16.gmra.mxu1 %vm881_vm0, %v13778_v63 }
 0x231   :  { %10058 = vmatmul.msk.bf16.gmra.mxu2 %vm881_vm0, %v13778_v63 }
 0x232   :  { %10084 = vmatmul.msk.bf16.gmra.mxu3 %vm881_vm0, %v13778_v63 }
 0x234   :  { %v14658_v62 = vpop.f32.mrf.mxu2 }
 0x235   :  { %19262 = vst [vmem:[#allocation190_spill] sm:$0xff] %v14658_v62  ;;  %v14660_v46 = vpop.f32.mrf.mxu3  ;;  %v14662_v49 = vpop.f32.mrf.mxu0 }
 0x236   :  { %19263 = vst [vmem:[#allocation191_spill] sm:$0xff] %v14660_v46  ;;  %v14664_v48 = vpop.f32.mrf.mxu1 }
 0x237   :  { %19264 = vst [vmem:[#allocation192_spill] sm:$0xff] %v14662_v49 }
 0x238   :  { %19265 = vst [vmem:[#allocation193_spill] sm:$0xff] %v14664_v48 }
 0x23c   :  { %v14666_v54 = vpop.f32.mrf.mxu2 }
 0x23d   :  { %19266 = vst [vmem:[#allocation194_spill] sm:$0xff] %v14666_v54  ;;  %v14668_v40 = vpop.f32.mrf.mxu3  ;;  %v14670_v33 = vpop.f32.mrf.mxu0 }
 0x23e   :  { %19267 = vst [vmem:[#allocation195_spill] sm:$0xff] %v14668_v40  ;;  %v14672_v52 = vpop.f32.mrf.mxu1 }
 0x240   :  { %10007 = vmatmul.msk.bf16.gmra.mxu0 %vm881_vm0, %v13791_v0  ;;  %10033 = vmatmul.msk.bf16.gmra.mxu1 %vm881_vm0, %v13791_v0 }
 0x241   :  { %10059 = vmatmul.msk.bf16.gmra.mxu2 %vm881_vm0, %v13791_v0 }
 0x242   :  { %10085 = vmatmul.msk.bf16.gmra.mxu3 %vm881_vm0, %v13791_v0 }
 0x244   :  { %v14682_v63 = vpop.f32.mrf.mxu2 }
 0x245   :  { %v14684_v54 = vpop.f32.mrf.mxu3  ;;  %v14686_v40 = vpop.f32.mrf.mxu0 }
 0x246   :  { %v14688_v48 = vpop.f32.mrf.mxu1 }
 0x24c   :  { %v14690_v49 = vpop.f32.mrf.mxu2 }
 0x24d   :  { %v14692_v46 = vpop.f32.mrf.mxu3  ;;  %v14694_v62 = vpop.f32.mrf.mxu0 }
 0x24e   :  { %v14696_v55 = vpop.f32.mrf.mxu1 }
 0x250   :  { %10008 = vmatmul.msk.bf16.gmra.mxu0 %vm881_vm0, %v13818_v8  ;;  %10034 = vmatmul.msk.bf16.gmra.mxu1 %vm881_vm0, %v13818_v8 }
 0x251   :  { %10060 = vmatmul.msk.bf16.gmra.mxu2 %vm881_vm0, %v13818_v8 }
 0x252   :  { %10086 = vmatmul.msk.bf16.gmra.mxu3 %vm881_vm0, %v13818_v8  ;;  %v12822_v8 = vld [vmem:[%s19064_s1 + $0x1ac] sm:$0xf] }
 0x253   :  { %v9686_v50 = vor.u32 %v12822_v8, %v9683_v51 }
 0x254   :  { %v14706_v0 = vpop.f32.mrf.mxu2 }
 0x255   :  { %v14708_v58 = vpop.f32.mrf.mxu3  ;;  %v14710_v47 = vpop.f32.mrf.mxu0  ;;  %2493 = vmatpush.bf16.msra.mxu3 %v9686_v50 }
 0x256   :  { %19268 = vst [vmem:[#allocation196_spill] sm:$0xff] %v14708_v58  ;;  %v14718_v56 = vpop.f32.mrf.mxu1 }
 0x257   :  { %19269 = vst [vmem:[#allocation197_spill] sm:$0xff] %v14710_v47 }
 0x258   :  { %19270 = vst [vmem:[#allocation198_spill] sm:$0xff] %v14718_v56  ;;  %v15591_v56 = vld [vmem:[%s19065_s0 + $0x50] sm:$0xff] }
 0x259   :  { %19469 = vst [vmem:[#allocation397_spill] sm:$0xff] %v15591_v56 }
 0x25c   :  { %v14738_v42 = vpop.f32.mrf.mxu2 }
 0x25d   :  { %19271 = vst [vmem:[#allocation199_spill] sm:$0xff] %v14738_v42  ;;  %v14740_v51 = vpop.f32.mrf.mxu3  ;;  %v14742_v8 = vpop.f32.mrf.mxu0 }
 0x25e   :  { %19272 = vst [vmem:[#allocation200_spill] sm:$0xff] %v14740_v51  ;;  %v14744_v39 = vpop.f32.mrf.mxu1  ;;  %v12831_v51 = vld [vmem:[%s19064_s1 + $0x1ec] sm:$0xf0] }
 0x25f   :  { %19273 = vst [vmem:[#allocation201_spill] sm:$0xff] %v14742_v8  ;;  %v9690_v32 = vor.u32 %v12831_v51, %v9689_v34 }
 0x260   :  { %19274 = vst [vmem:[#allocation202_spill] sm:$0xff] %v14744_v39  ;;  %10009 = vmatmul.msk.bf16.gmra.mxu0 %vm881_vm0, %v13871_v30  ;;  %10035 = vmatmul.msk.bf16.gmra.mxu1 %vm881_vm0, %v13871_v30  ;;  %v9699_v39 = vld [vmem:[%s19064_s1 + $0x1f8] sm:$0xf0] }
 0x261   :  { %10061 = vmatmul.msk.bf16.gmra.mxu2 %vm881_vm0, %v13871_v30  ;;  %v9702_v8 = vor.u32 %v12824_v35, %v9699_v39 }
 0x262   :  { %10087 = vmatmul.msk.bf16.gmra.mxu3 %vm881_vm0, %v13871_v30 }
 0x264   :  { %v14754_v43 = vpop.f32.mrf.mxu2 }
 0x265   :  { %19275 = vst [vmem:[#allocation203_spill] sm:$0xff] %v14754_v43  ;;  %v14756_v44 = vpop.f32.mrf.mxu3  ;;  %v14758_v45 = vpop.f32.mrf.mxu0 }
 0x266   :  { %19276 = vst [vmem:[#allocation204_spill] sm:$0xff] %v14756_v44  ;;  %v14760_v50 = vpop.f32.mrf.mxu1 }
 0x267   :  { %19277 = vst [vmem:[#allocation205_spill] sm:$0xff] %v14758_v45 }
 0x268   :  { %19278 = vst [vmem:[#allocation206_spill] sm:$0xff] %v14760_v50 }
 0x26c   :  { %v14762_v61 = vpop.f32.mrf.mxu2 }
 0x26d   :  { %19279 = vst [vmem:[#allocation207_spill] sm:$0xff] %v14762_v61  ;;  %v14764_v27 = vpop.f32.mrf.mxu3  ;;  %v14766_v57 = vpop.f32.mrf.mxu0 }
 0x26e   :  { %19280 = vst [vmem:[#allocation208_spill] sm:$0xff] %v14764_v27  ;;  %v14768_v16 = vpop.f32.mrf.mxu1 }
 0x26f   :  { %19281 = vst [vmem:[#allocation209_spill] sm:$0xff] %v14766_v57 }
 0x270   :  { %19282 = vst [vmem:[#allocation210_spill] sm:$0xff] %v14768_v16  ;;  %10010 = vmatmul.msk.bf16.gmra.mxu0 %vm881_vm0, %v13900_v41  ;;  %10036 = vmatmul.msk.bf16.gmra.mxu1 %vm881_vm0, %v13900_v41 }
 0x271   :  { %10062 = vmatmul.msk.bf16.gmra.mxu2 %vm881_vm0, %v13900_v41 }
 0x272   :  { %10088 = vmatmul.msk.bf16.gmra.mxu3 %vm881_vm0, %v13900_v41 }
 0x274   :  { %v14778_v30 = vpop.f32.mrf.mxu2 }
 0x275   :  { %19283 = vst [vmem:[#allocation211_spill] sm:$0xff] %v14778_v30  ;;  %v14780_v61 = vpop.f32.mrf.mxu3  ;;  %v14782_v27 = vpop.f32.mrf.mxu0 }
 0x276   :  { %19284 = vst [vmem:[#allocation212_spill] sm:$0xff] %v14780_v61  ;;  %v14784_v57 = vpop.f32.mrf.mxu1 }
 0x277   :  { %19285 = vst [vmem:[#allocation213_spill] sm:$0xff] %v14782_v27 }
 0x278   :  { %19286 = vst [vmem:[#allocation214_spill] sm:$0xff] %v14784_v57 }
 0x27c   :  { %v14786_v16 = vpop.f32.mrf.mxu2 }
 0x27d   :  { %19287 = vst [vmem:[#allocation215_spill] sm:$0xff] %v14786_v16  ;;  %v14788_v50 = vpop.f32.mrf.mxu3  ;;  %v14790_v45 = vpop.f32.mrf.mxu0 }
 0x27e   :  { %19288 = vst [vmem:[#allocation216_spill] sm:$0xff] %v14788_v50  ;;  %v14792_v44 = vpop.f32.mrf.mxu1 }
 0x27f   :  { %19289 = vst [vmem:[#allocation217_spill] sm:$0xff] %v14790_v45 }
 0x280   :  { %19290 = vst [vmem:[#allocation218_spill] sm:$0xff] %v14792_v44  ;;  %10011 = vmatmul.msk.bf16.gmra.mxu0 %vm881_vm0, %v13929_v53  ;;  %10037 = vmatmul.msk.bf16.gmra.mxu1 %vm881_vm0, %v13929_v53 }
 0x281   :  { %10063 = vmatmul.msk.bf16.gmra.mxu2 %vm881_vm0, %v13929_v53 }
 0x282   :  { %10089 = vmatmul.msk.bf16.gmra.mxu3 %vm881_vm0, %v13929_v53  ;;  %v9617_v53 = vld [vmem:[%s19064_s1 + $0x128] sm:$0xf] }
 0x284   :  { %v14802_v41 = vpop.f32.mrf.mxu2 }
 0x285   :  { %19291 = vst [vmem:[#allocation219_spill] sm:$0xff] %v14802_v41  ;;  %v14804_v16 = vpop.f32.mrf.mxu3  ;;  %v14806_v50 = vpop.f32.mrf.mxu0 }
 0x286   :  { %19292 = vst [vmem:[#allocation220_spill] sm:$0xff] %v14804_v16  ;;  %v14808_v45 = vpop.f32.mrf.mxu1  ;;  %v12814_v16 = vld [vmem:[%s19064_s1 + $0x164] sm:$0xf0] }
 0x287   :  { %19293 = vst [vmem:[#allocation221_spill] sm:$0xff] %v14806_v50  ;;  %v9618_v41 = vor.u32 %v12814_v16, %v9617_v53  ;;  %v9619_v16 = vld [vmem:[%s19064_s1 + $0x168] sm:$0xf0]  ;;  %v9609_v53 = vld [vmem:[%s19064_s1 + $0x120] sm:$0xf] }
 0x288   :  { %19294 = vst [vmem:[#allocation222_spill] sm:$0xff] %v14808_v45 }
 0x289   :  { %2355 = vmatpush.bf16.msra.mxu2 %v9618_v41  ;;  %v9611_v41 = vld [vmem:[%s19064_s1 + $0x160] sm:$0xf0] }
 0x28c   :  { %v14810_v44 = vpop.f32.mrf.mxu2 }
 0x28d   :  { %19295 = vst [vmem:[#allocation223_spill] sm:$0xff] %v14810_v44  ;;  %v14812_v57 = vpop.f32.mrf.mxu3  ;;  %v14814_v27 = vpop.f32.mrf.mxu0 }
 0x28e   :  { %19296 = vst [vmem:[#allocation224_spill] sm:$0xff] %v14812_v57  ;;  %v14816_v61 = vpop.f32.mrf.mxu1  ;;  %v12813_v57 = vld [vmem:[%s19064_s1 + $0x15c] sm:$0xf0] }
 0x28f   :  { %19297 = vst [vmem:[#allocation225_spill] sm:$0xff] %v14814_v27  ;;  %v9610_v45 = vor.u32 %v12813_v57, %v9609_v53 }
 0x290   :  { %19298 = vst [vmem:[#allocation226_spill] sm:$0xff] %v14816_v61  ;;  %10012 = vmatmul.msk.bf16.gmra.mxu0 %vm881_vm0, %v13958_v15  ;;  %10038 = vmatmul.msk.bf16.gmra.mxu1 %vm881_vm0, %v13958_v15  ;;  %v12806_v61 = vld [vmem:[%s19064_s1 + $0x12c] sm:$0xf] }
 0x291   :  { %10064 = vmatmul.msk.bf16.gmra.mxu2 %vm881_vm0, %v13958_v15  ;;  %v9622_v27 = vor.u32 %v12806_v61, %v9619_v16  ;;  %2077 = vmatpush.bf16.msra.mxu0 %v9610_v45 }
 0x292   :  { %10090 = vmatmul.msk.bf16.gmra.mxu3 %vm881_vm0, %v13958_v15  ;;  %v12805_v15 = vld [vmem:[%s19064_s1 + $0x124] sm:$0xf] }
 0x293   :  { %v9614_v50 = vor.u32 %v12805_v15, %v9611_v41  ;;  %2494 = vmatpush.bf16.msra.mxu3 %v9622_v27 }
 0x294   :  { %v14850_v44 = vpop.f32.mrf.mxu2 }
 0x295   :  { %19299 = vst [vmem:[#allocation227_spill] sm:$0xff] %v14850_v44  ;;  %v14852_v30 = vpop.f32.mrf.mxu3  ;;  %v14854_v43 = vpop.f32.mrf.mxu0  ;;  %2216 = vmatpush.bf16.msra.mxu1 %v9614_v50 }
 0x296   :  { %19300 = vst [vmem:[#allocation228_spill] sm:$0xff] %v14852_v30  ;;  %v14856_v61 = vpop.f32.mrf.mxu1  ;;  %v12832_v30 = vld [vmem:[%s19064_s1 + $0x1f4] sm:$0xf0] }
 0x297   :  { %19301 = vst [vmem:[#allocation229_spill] sm:$0xff] %v14854_v43  ;;  %v9697_v43 = vld [vmem:[%s19064_s1 + $0x1b8] sm:$0xf] }
 0x298   :  { %19302 = vst [vmem:[#allocation230_spill] sm:$0xff] %v14856_v61  ;;  %v9698_v44 = vor.u32 %v12832_v30, %v9697_v43  ;;  %v12823_v43 = vld [vmem:[%s19064_s1 + $0x1b4] sm:$0xf] }
 0x299   :  { %v9691_v30 = vld [vmem:[%s19064_s1 + $0x1f0] sm:$0xf0] }
 0x29a   :  { %v9694_v42 = vor.u32 %v12823_v43, %v9691_v30 }
 0x29c   :  { %v14858_v16 = vpop.f32.mrf.mxu2 }
 0x29d   :  { %19303 = vst [vmem:[#allocation231_spill] sm:$0xff] %v14858_v16  ;;  %v14860_v38 = vpop.f32.mrf.mxu3  ;;  %v14862_v37 = vpop.f32.mrf.mxu0 }
 0x29e   :  { %19304 = vst [vmem:[#allocation232_spill] sm:$0xff] %v14860_v38  ;;  %v14864_v36 = vpop.f32.mrf.mxu1 }
 0x29f   :  { %19305 = vst [vmem:[#allocation233_spill] sm:$0xff] %v14862_v37 }
 0x2a0   :  { %19306 = vst [vmem:[#allocation234_spill] sm:$0xff] %v14864_v36  ;;  %10013 = vmatmul.msk.bf16.gmra.mxu0 %vm881_vm0, %v14011_v60  ;;  %10039 = vmatmul.msk.bf16.gmra.mxu1 %vm881_vm0, %v14011_v60 }
 0x2a1   :  { %10065 = vmatmul.msk.bf16.gmra.mxu2 %vm881_vm0, %v14011_v60 }
 0x2a2   :  { %10091 = vmatmul.msk.bf16.gmra.mxu3 %vm881_vm0, %v14011_v60 }
 0x2a4   :  { %v14874_v45 = vpop.f32.mrf.mxu2 }
 0x2a5   :  { %19307 = vst [vmem:[#allocation235_spill] sm:$0xff] %v14874_v45  ;;  %v14876_v50 = vpop.f32.mrf.mxu3  ;;  %v14878_v27 = vpop.f32.mrf.mxu0  ;;  %v15538_v45 = vld [vmem:[%s19065_s0 + $0x48] sm:$0xff] }
 0x2a6   :  { %19308 = vst [vmem:[#allocation236_spill] sm:$0xff] %v14876_v50  ;;  %v14880_v57 = vpop.f32.mrf.mxu1 }
 0x2a7   :  { %19309 = vst [vmem:[#allocation237_spill] sm:$0xff] %v14878_v27 }
 0x2a8   :  { %19310 = vst [vmem:[#allocation238_spill] sm:$0xff] %v14880_v57 }
 0x2ac   :  { %v14882_v53 = vpop.f32.mrf.mxu2 }
 0x2ad   :  { %19311 = vst [vmem:[#allocation239_spill] sm:$0xff] %v14882_v53  ;;  %v14884_v15 = vpop.f32.mrf.mxu3  ;;  %v14886_v41 = vpop.f32.mrf.mxu0 }
 0x2ae   :  { %19312 = vst [vmem:[#allocation240_spill] sm:$0xff] %v14884_v15  ;;  %v14888_v36 = vpop.f32.mrf.mxu1 }
 0x2af   :  { %19313 = vst [vmem:[#allocation241_spill] sm:$0xff] %v14886_v41 }
 0x2b0   :  { %19314 = vst [vmem:[#allocation242_spill] sm:$0xff] %v14888_v36  ;;  %10014 = vmatmul.msk.bf16.gmra.mxu0 %vm881_vm0, %v14040_v28  ;;  %10040 = vmatmul.msk.bf16.gmra.mxu1 %vm881_vm0, %v14040_v28 }
 0x2b1   :  { %10066 = vmatmul.msk.bf16.gmra.mxu2 %vm881_vm0, %v14040_v28 }
 0x2b2   :  { %10092 = vmatmul.msk.bf16.gmra.mxu3 %vm881_vm0, %v14040_v28 }
 0x2b4   :  { %v14898_v60 = vpop.f32.mrf.mxu2 }
 0x2b5   :  { %19315 = vst [vmem:[#allocation243_spill] sm:$0xff] %v14898_v60  ;;  %v14900_v53 = vpop.f32.mrf.mxu3  ;;  %v14902_v15 = vpop.f32.mrf.mxu0 }
 0x2b6   :  { %19316 = vst [vmem:[#allocation244_spill] sm:$0xff] %v14900_v53  ;;  %v14904_v41 = vpop.f32.mrf.mxu1 }
 0x2b7   :  { %19317 = vst [vmem:[#allocation245_spill] sm:$0xff] %v14902_v15 }
 0x2b8   :  { %19318 = vst [vmem:[#allocation246_spill] sm:$0xff] %v14904_v41  ;;  %v12798_v41 = vld [vmem:[%s19064_s1 + $0xe4] sm:$0xf0] }
 0x2bc   :  { %v14906_v36 = vpop.f32.mrf.mxu2 }
 0x2bd   :  { %19319 = vst [vmem:[#allocation247_spill] sm:$0xff] %v14906_v36  ;;  %v14908_v57 = vpop.f32.mrf.mxu3  ;;  %v14910_v27 = vpop.f32.mrf.mxu0 }
 0x2be   :  { %19320 = vst [vmem:[#allocation248_spill] sm:$0xff] %v14908_v57  ;;  %v14912_v50 = vpop.f32.mrf.mxu1 }
 0x2bf   :  { %19321 = vst [vmem:[#allocation249_spill] sm:$0xff] %v14910_v27 }
 0x2c0   :  { %19322 = vst [vmem:[#allocation250_spill] sm:$0xff] %v14912_v50  ;;  %10015 = vmatmul.msk.bf16.gmra.mxu0 %vm881_vm0, %v14069_v26  ;;  %10041 = vmatmul.msk.bf16.gmra.mxu1 %vm881_vm0, %v14069_v26  ;;  %v9553_v50 = vld [vmem:[%s19064_s1 + $0xa8] sm:$0xf] }
 0x2c1   :  { %10067 = vmatmul.msk.bf16.gmra.mxu2 %vm881_vm0, %v14069_v26  ;;  %v9554_v15 = vor.u32 %v12798_v41, %v9553_v50  ;;  %v9545_v50 = vld [vmem:[%s19064_s1 + $0xa0] sm:$0xf]  ;;  %v12789_v41 = vld [vmem:[%s19064_s1 + $0xa4] sm:$0xf] }
 0x2c2   :  { %10093 = vmatmul.msk.bf16.gmra.mxu3 %vm881_vm0, %v14069_v26 }
 0x2c3   :  { %2356 = vmatpush.bf16.msra.mxu2 %v9554_v15  ;;  %v12797_v15 = vld [vmem:[%s19064_s1 + $0xdc] sm:$0xf0] }
 0x2c4   :  { %v14922_v28 = vpop.f32.mrf.mxu2 }
 0x2c5   :  { %19323 = vst [vmem:[#allocation251_spill] sm:$0xff] %v14922_v28  ;;  %v14924_v36 = vpop.f32.mrf.mxu3  ;;  %v14926_v57 = vpop.f32.mrf.mxu0 }
 0x2c6   :  { %19324 = vst [vmem:[#allocation252_spill] sm:$0xff] %v14924_v36  ;;  %v14928_v27 = vpop.f32.mrf.mxu1 }
 0x2c7   :  { %19325 = vst [vmem:[#allocation253_spill] sm:$0xff] %v14926_v57  ;;  %v9555_v57 = vld [vmem:[%s19064_s1 + $0xe8] sm:$0xf0] }
 0x2c8   :  { %19326 = vst [vmem:[#allocation254_spill] sm:$0xff] %v14928_v27  ;;  %v12790_v27 = vld [vmem:[%s19064_s1 + $0xac] sm:$0xf] }
 0x2c9   :  { %v9558_v60 = vor.u32 %v12790_v27, %v9555_v57 }
 0x2cb   :  { %2495 = vmatpush.bf16.msra.mxu3 %v9558_v60 }
 0x2cc   :  { %v14936_v53 = vpop.f32.mrf.mxu2 }
 0x2cd   :  { %19327 = vst [vmem:[#allocation255_spill] sm:$0xff] %v14936_v53  ;;  %v14938_v26 = vpop.f32.mrf.mxu3  ;;  %v14940_v28 = vpop.f32.mrf.mxu0 }
 0x2ce   :  { %19328 = vst [vmem:[#allocation256_spill] sm:$0xff] %v14938_v26  ;;  %v14948_v36 = vpop.f32.mrf.mxu1  ;;  %v9547_v26 = vld [vmem:[%s19064_s1 + $0xe0] sm:$0xf0] }
 0x2cf   :  { %19329 = vst [vmem:[#allocation257_spill] sm:$0xff] %v14940_v28  ;;  %v9546_v28 = vor.u32 %v12797_v15, %v9545_v50  ;;  %v9550_v27 = vor.u32 %v12789_v41, %v9547_v26 }
 0x2d0   :  { %19330 = vst [vmem:[#allocation258_spill] sm:$0xff] %v14948_v36  ;;  %10016 = vmatmul.msk.bf16.gmra.mxu0 %vm881_vm0, %v14104_v59  ;;  %10042 = vmatmul.msk.bf16.gmra.mxu1 %vm881_vm0, %v14104_v59 }
 0x2d1   :  { %10068 = vmatmul.msk.bf16.gmra.mxu2 %vm881_vm0, %v14104_v59  ;;  %2078 = vmatpush.bf16.msra.mxu0 %v9546_v28 }
 0x2d2   :  { %10094 = vmatmul.msk.bf16.gmra.mxu3 %vm881_vm0, %v14104_v59  ;;  %2217 = vmatpush.bf16.msra.mxu1 %v9550_v27 }
 0x2d4   :  { %v14970_v57 = vpop.f32.mrf.mxu2 }
 0x2d5   :  { %19331 = vst [vmem:[#allocation259_spill] sm:$0xff] %v14970_v57  ;;  %v14972_v50 = vpop.f32.mrf.mxu3  ;;  %v14974_v15 = vpop.f32.mrf.mxu0 }
 0x2d6   :  { %19332 = vst [vmem:[#allocation260_spill] sm:$0xff] %v14972_v50  ;;  %v14976_v36 = vpop.f32.mrf.mxu1 }
 0x2d7   :  { %19333 = vst [vmem:[#allocation261_spill] sm:$0xff] %v14974_v15 }
 0x2d8   :  { %19334 = vst [vmem:[#allocation262_spill] sm:$0xff] %v14976_v36 }
 0x2dc   :  { %v14978_v60 = vpop.f32.mrf.mxu2 }
 0x2dd   :  { %19335 = vst [vmem:[#allocation263_spill] sm:$0xff] %v14978_v60  ;;  %v14980_v26 = vpop.f32.mrf.mxu3  ;;  %v14982_v41 = vpop.f32.mrf.mxu0 }
 0x2de   :  { %19336 = vst [vmem:[#allocation264_spill] sm:$0xff] %v14980_v26  ;;  %v14984_v53 = vpop.f32.mrf.mxu1 }
 0x2df   :  { %19337 = vst [vmem:[#allocation265_spill] sm:$0xff] %v14982_v41 }
 0x2e0   :  { %19338 = vst [vmem:[#allocation266_spill] sm:$0xff] %v14984_v53  ;;  %10017 = vmatmul.msk.bf16.gmra.mxu0 %vm881_vm0, %v14151_v18  ;;  %10043 = vmatmul.msk.bf16.gmra.mxu1 %vm881_vm0, %v14151_v18 }
 0x2e1   :  { %10069 = vmatmul.msk.bf16.gmra.mxu2 %vm881_vm0, %v14151_v18 }
 0x2e2   :  { %10095 = vmatmul.msk.bf16.gmra.mxu3 %vm881_vm0, %v14151_v18 }
 0x2e4   :  { %v14994_v59 = vpop.f32.mrf.mxu2 }
 0x2e5   :  { %19339 = vst [vmem:[#allocation267_spill] sm:$0xff] %v14994_v59  ;;  %v14996_v28 = vpop.f32.mrf.mxu3  ;;  %v14998_v27 = vpop.f32.mrf.mxu0 }
 0x2e6   :  { %19340 = vst [vmem:[#allocation268_spill] sm:$0xff] %v14996_v28  ;;  %v15000_v41 = vpop.f32.mrf.mxu1 }
 0x2e7   :  { %19341 = vst [vmem:[#allocation269_spill] sm:$0xff] %v14998_v27 }
 0x2e8   :  { %19342 = vst [vmem:[#allocation270_spill] sm:$0xff] %v15000_v41 }
 0x2ec   :  { %v15002_v53 = vpop.f32.mrf.mxu2 }
 0x2ed   :  { %19343 = vst [vmem:[#allocation271_spill] sm:$0xff] %v15002_v53  ;;  %v15004_v26 = vpop.f32.mrf.mxu3  ;;  %v15006_v60 = vpop.f32.mrf.mxu0 }
 0x2ee   :  { %19344 = vst [vmem:[#allocation272_spill] sm:$0xff] %v15004_v26  ;;  %v15008_v36 = vpop.f32.mrf.mxu1 }
 0x2ef   :  { %19345 = vst [vmem:[#allocation273_spill] sm:$0xff] %v15006_v60 }
 0x2f0   :  { %19346 = vst [vmem:[#allocation274_spill] sm:$0xff] %v15008_v36  ;;  %10018 = vmatmul.msk.bf16.gmra.mxu0 %vm881_vm0, %v14180_v25  ;;  %10044 = vmatmul.msk.bf16.gmra.mxu1 %vm881_vm0, %v14180_v25 }
 0x2f1   :  { %10070 = vmatmul.msk.bf16.gmra.mxu2 %vm881_vm0, %v14180_v25 }
 0x2f2   :  { %10096 = vmatmul.msk.bf16.gmra.mxu3 %vm881_vm0, %v14180_v25 }
 0x2f4   :  { %v15018_v18 = vpop.f32.mrf.mxu2 }
 0x2f5   :  { %19347 = vst [vmem:[#allocation275_spill] sm:$0xff] %v15018_v18  ;;  %v15020_v53 = vpop.f32.mrf.mxu3  ;;  %v15022_v26 = vpop.f32.mrf.mxu0  ;;  %v12773_v18 = vld [vmem:[%s19064_s1 + $0x24] sm:$0xf] }
 0x2f6   :  { %19348 = vst [vmem:[#allocation276_spill] sm:$0xff] %v15020_v53  ;;  %v15024_v60 = vpop.f32.mrf.mxu1 }
 0x2f7   :  { %19349 = vst [vmem:[#allocation277_spill] sm:$0xff] %v15022_v26 }
 0x2f8   :  { %19350 = vst [vmem:[#allocation278_spill] sm:$0xff] %v15024_v60  ;;  %v12782_v60 = vld [vmem:[%s19064_s1 + $0x64] sm:$0xf0] }
 0x2fc   :  { %v15026_v36 = vpop.f32.mrf.mxu2 }
 0x2fd   :  { %19351 = vst [vmem:[#allocation279_spill] sm:$0xff] %v15026_v36  ;;  %v15028_v41 = vpop.f32.mrf.mxu3  ;;  %v15030_v27 = vpop.f32.mrf.mxu0 }
 0x2fe   :  { %19352 = vst [vmem:[#allocation280_spill] sm:$0xff] %v15028_v41  ;;  %v15032_v28 = vpop.f32.mrf.mxu1 }
 0x2ff   :  { %19353 = vst [vmem:[#allocation281_spill] sm:$0xff] %v15030_v27 }
 0x300   :  { %19354 = vst [vmem:[#allocation282_spill] sm:$0xff] %v15032_v28  ;;  %10019 = vmatmul.msk.bf16.gmra.mxu0 %vm881_vm0, %v14209_v20  ;;  %10045 = vmatmul.msk.bf16.gmra.mxu1 %vm881_vm0, %v14209_v20  ;;  %v9489_v28 = vld [vmem:[%s19064_s1 + $0x28] sm:$0xf] }
 0x301   :  { %10071 = vmatmul.msk.bf16.gmra.mxu2 %vm881_vm0, %v14209_v20  ;;  %v9490_v26 = vor.u32 %v12782_v60, %v9489_v28  ;;  %v9483_v60 = vld [vmem:[%s19064_s1 + $0x60] sm:$0xf0] }
 0x302   :  { %10097 = vmatmul.msk.bf16.gmra.mxu3 %vm881_vm0, %v14209_v20  ;;  %v12774_v20 = vld [vmem:[%s19064_s1 + $0x2c] sm:$0xf]  ;;  %v9486_v28 = vor.u32 %v12773_v18, %v9483_v60 }
 0x303   :  { %2357 = vmatpush.bf16.msra.mxu2 %v9490_v26 }
 0x304   :  { %v15042_v25 = vpop.f32.mrf.mxu2  ;;  %2218 = vmatpush.bf16.msra.mxu1 %v9486_v28 }
 0x305   :  { %19355 = vst [vmem:[#allocation283_spill] sm:$0xff] %v15042_v25  ;;  %v15044_v36 = vpop.f32.mrf.mxu3  ;;  %v15046_v41 = vpop.f32.mrf.mxu0 }
 0x306   :  { %19356 = vst [vmem:[#allocation284_spill] sm:$0xff] %v15044_v36  ;;  %v15048_v27 = vpop.f32.mrf.mxu1  ;;  %v9491_v36 = vld [vmem:[%s19064_s1 + $0x68] sm:$0xf0] }
 0x307   :  { %19357 = vst [vmem:[#allocation285_spill] sm:$0xff] %v15046_v41  ;;  %v12781_v41 = vld [vmem:[%s19064_s1 + $0x5c] sm:$0xf0]  ;;  %v9494_v25 = vor.u32 %v12774_v20, %v9491_v36 }
 0x308   :  { %19358 = vst [vmem:[#allocation286_spill] sm:$0xff] %v15048_v27  ;;  %v9481_v27 = vld [vmem:[%s19064_s1 + $0x20] sm:$0xf] }
 0x309   :  { %v9482_v53 = vor.u32 %v12781_v41, %v9481_v27  ;;  %2496 = vmatpush.bf16.msra.mxu3 %v9494_v25 }
 0x30b   :  { %2079 = vmatpush.bf16.msra.mxu0 %v9482_v53 }
 0x30c   :  { %v15074_v59 = vpop.f32.mrf.mxu2 }
 0x30d   :  { %19359 = vst [vmem:[#allocation287_spill] sm:$0xff] %v15074_v59  ;;  %v15076_v15 = vpop.f32.mrf.mxu3  ;;  %v15078_v50 = vpop.f32.mrf.mxu0 }
 0x30e   :  { %19360 = vst [vmem:[#allocation288_spill] sm:$0xff] %v15076_v15  ;;  %v15080_v36 = vpop.f32.mrf.mxu1 }
 0x30f   :  { %19361 = vst [vmem:[#allocation289_spill] sm:$0xff] %v15078_v50 }
 0x310   :  { %19362 = vst [vmem:[#allocation290_spill] sm:$0xff] %v15080_v36  ;;  %10020 = vmatmul.msk.bf16.gmra.mxu0 %vm881_vm0, %v14262_v22  ;;  %10046 = vmatmul.msk.bf16.gmra.mxu1 %vm881_vm0, %v14262_v22 }
 0x311   :  { %10072 = vmatmul.msk.bf16.gmra.mxu2 %vm881_vm0, %v14262_v22 }
 0x312   :  { %10098 = vmatmul.msk.bf16.gmra.mxu3 %vm881_vm0, %v14262_v22 }
 0x314   :  { %v15090_v53 = vpop.f32.mrf.mxu2 }
 0x315   :  { %19363 = vst [vmem:[#allocation291_spill] sm:$0xff] %v15090_v53  ;;  %v15092_v26 = vpop.f32.mrf.mxu3  ;;  %v15094_v41 = vpop.f32.mrf.mxu0 }
 0x316   :  { %19364 = vst [vmem:[#allocation292_spill] sm:$0xff] %v15092_v26  ;;  %v15096_v27 = vpop.f32.mrf.mxu1 }
 0x317   :  { %19365 = vst [vmem:[#allocation293_spill] sm:$0xff] %v15094_v41 }
 0x318   :  { %19366 = vst [vmem:[#allocation294_spill] sm:$0xff] %v15096_v27 }
 0x31c   :  { %v15098_v18 = vpop.f32.mrf.mxu2 }
 0x31d   :  { %19367 = vst [vmem:[#allocation295_spill] sm:$0xff] %v15098_v18  ;;  %v15100_v25 = vpop.f32.mrf.mxu3  ;;  %v15102_v20 = vpop.f32.mrf.mxu0 }
 0x31e   :  { %19368 = vst [vmem:[#allocation296_spill] sm:$0xff] %v15100_v25  ;;  %v15104_v60 = vpop.f32.mrf.mxu1 }
 0x31f   :  { %19369 = vst [vmem:[#allocation297_spill] sm:$0xff] %v15102_v20 }
 0x320   :  { %19370 = vst [vmem:[#allocation298_spill] sm:$0xff] %v15104_v60  ;;  %10021 = vmatmul.msk.bf16.gmra.mxu0 %vm881_vm0, %v14291_v23  ;;  %10047 = vmatmul.msk.bf16.gmra.mxu1 %vm881_vm0, %v14291_v23 }
 0x321   :  { %10073 = vmatmul.msk.bf16.gmra.mxu2 %vm881_vm0, %v14291_v23 }
 0x322   :  { %10099 = vmatmul.msk.bf16.gmra.mxu3 %vm881_vm0, %v14291_v23 }
 0x324   :  { %v15114_v22 = vpop.f32.mrf.mxu2 }
 0x325   :  { %19371 = vst [vmem:[#allocation299_spill] sm:$0xff] %v15114_v22  ;;  %v15116_v28 = vpop.f32.mrf.mxu3  ;;  %v15118_v25 = vpop.f32.mrf.mxu0 }
 0x326   :  { %19372 = vst [vmem:[#allocation300_spill] sm:$0xff] %v15116_v28  ;;  %v15120_v20 = vpop.f32.mrf.mxu1 }
 0x327   :  { %19373 = vst [vmem:[#allocation301_spill] sm:$0xff] %v15118_v25 }
 0x328   :  { %19374 = vst [vmem:[#allocation302_spill] sm:$0xff] %v15120_v20 }
 0x32c   :  { %v15122_v60 = vpop.f32.mrf.mxu2 }
 0x32d   :  { %19375 = vst [vmem:[#allocation303_spill] sm:$0xff] %v15122_v60  ;;  %v15124_v18 = vpop.f32.mrf.mxu3  ;;  %v15126_v27 = vpop.f32.mrf.mxu0 }
 0x32e   :  { %19376 = vst [vmem:[#allocation304_spill] sm:$0xff] %v15124_v18  ;;  %v15128_v41 = vpop.f32.mrf.mxu1 }
 0x32f   :  { %19377 = vst [vmem:[#allocation305_spill] sm:$0xff] %v15126_v27 }
 0x330   :  { %19378 = vst [vmem:[#allocation306_spill] sm:$0xff] %v15128_v41  ;;  %10022 = vmatmul.msk.bf16.gmra.mxu0 %vm881_vm0, %v14320_v19  ;;  %10048 = vmatmul.msk.bf16.gmra.mxu1 %vm881_vm0, %v14320_v19 }
 0x331   :  { %10074 = vmatmul.msk.bf16.gmra.mxu2 %vm881_vm0, %v14320_v19 }
 0x332   :  { %10100 = vmatmul.msk.bf16.gmra.mxu3 %vm881_vm0, %v14320_v19  ;;  %v9889_v19 = vld [vmem:[%s19064_s1 + $0x338] sm:$0xf] }
 0x334   :  { %v15138_v23 = vpop.f32.mrf.mxu2 }
 0x335   :  { %19379 = vst [vmem:[#allocation307_spill] sm:$0xff] %v15138_v23  ;;  %v15140_v60 = vpop.f32.mrf.mxu3  ;;  %v15142_v18 = vpop.f32.mrf.mxu0  ;;  %v9881_v23 = vld [vmem:[%s19064_s1 + $0x330] sm:$0xf] }
 0x336   :  { %19380 = vst [vmem:[#allocation308_spill] sm:$0xff] %v15140_v60  ;;  %v15144_v27 = vpop.f32.mrf.mxu1 }
 0x337   :  { %19381 = vst [vmem:[#allocation309_spill] sm:$0xff] %v15142_v18 }
 0x338   :  { %19382 = vst [vmem:[#allocation310_spill] sm:$0xff] %v15144_v27 }
 0x33c   :  { %v15146_v41 = vpop.f32.mrf.mxu2 }
 0x33d   :  { %19383 = vst [vmem:[#allocation311_spill] sm:$0xff] %v15146_v41  ;;  %v15148_v20 = vpop.f32.mrf.mxu3  ;;  %v15150_v25 = vpop.f32.mrf.mxu0  ;;  %v9891_v41 = vld [vmem:[%s19064_s1 + $0x378] sm:$0xf0] }
 0x33e   :  { %19384 = vst [vmem:[#allocation312_spill] sm:$0xff] %v15148_v20  ;;  %v15152_v28 = vpop.f32.mrf.mxu1 }
 0x33f   :  { %19385 = vst [vmem:[#allocation313_spill] sm:$0xff] %v15150_v25  ;;  %v12872_v25 = vld [vmem:[%s19064_s1 + $0x33c] sm:$0xf] }
 0x340   :  { %19386 = vst [vmem:[#allocation314_spill] sm:$0xff] %v15152_v28  ;;  %10023 = vmatmul.msk.bf16.gmra.mxu0 %vm881_vm0, %v14349_v24  ;;  %10049 = vmatmul.msk.bf16.gmra.mxu1 %vm881_vm0, %v14349_v24  ;;  %v12880_v28 = vld [vmem:[%s19064_s1 + $0x374] sm:$0xf0] }
 0x341   :  { %10075 = vmatmul.msk.bf16.gmra.mxu2 %vm881_vm0, %v14349_v24  ;;  %v9890_v20 = vor.u32 %v12880_v28, %v9889_v19  ;;  %v12879_v28 = vld [vmem:[%s19064_s1 + $0x36c] sm:$0xf0]  ;;  %v12871_v19 = vld [vmem:[%s19064_s1 + $0x334] sm:$0xf] }
 0x342   :  { %10101 = vmatmul.msk.bf16.gmra.mxu3 %vm881_vm0, %v14349_v24  ;;  %v9894_v24 = vor.u32 %v12872_v25, %v9891_v41  ;;  %v9882_v41 = vor.u32 %v12879_v28, %v9881_v23  ;;  %v9883_v25 = vld [vmem:[%s19064_s1 + $0x370] sm:$0xf0] }
 0x343   :  { %2907 = vmatpush.bf16.msrb.mxu2 %v9890_v20  ;;  %v9886_v20 = vor.u32 %v12871_v19, %v9883_v25 }
 0x344   :  { %v15174_v27 = vpop.f32.mrf.mxu2  ;;  %3046 = vmatpush.bf16.msrb.mxu3 %v9894_v24  ;;  %2629 = vmatpush.bf16.msrb.mxu0 %v9882_v41 }
 0x345   :  { %19387 = vst [vmem:[#allocation315_spill] sm:$0xff] %v15174_v27  ;;  %v15176_v18 = vpop.f32.mrf.mxu3  ;;  %v15178_v60 = vpop.f32.mrf.mxu0  ;;  %2768 = vmatpush.bf16.msrb.mxu1 %v9886_v20 }
 0x346   :  { %19388 = vst [vmem:[#allocation316_spill] sm:$0xff] %v15176_v18  ;;  %v15189_v22 = vpop.f32.mrf.mxu1 }
 0x347   :  { %19389 = vst [vmem:[#allocation317_spill] sm:$0xff] %v15178_v60 }
 0x348   :  { %19390 = vst [vmem:[#allocation318_spill] sm:$0xff] %v15189_v22 }
 0x34c   :  { %v15194_v60 = vpop.f32.mrf.mxu2 }
 0x34d   :  { %19391 = vst [vmem:[#allocation319_spill] sm:$0xff] %v15194_v60  ;;  %v15196_v18 = vpop.f32.mrf.mxu3  ;;  %v15198_v27 = vpop.f32.mrf.mxu0 }
 0x34e   :  { %19392 = vst [vmem:[#allocation320_spill] sm:$0xff] %v15196_v18  ;;  %v15200_v26 = vpop.f32.mrf.mxu1 }
 0x34f   :  { %19393 = vst [vmem:[#allocation321_spill] sm:$0xff] %v15198_v27  ;;  %v15258_v27 = vld [vmem:[%s19065_s0 + $0x8] sm:$0xff] }
 0x350   :  { %19394 = vst [vmem:[#allocation322_spill] sm:$0xff] %v15200_v26  ;;  %10024 = vmatmul.msk.bf16.gmra.mxu0 %vm881_vm0, %v14402_v21  ;;  %10050 = vmatmul.msk.bf16.gmra.mxu1 %vm881_vm0, %v14402_v21 }
 0x351   :  { %10076 = vmatmul.msk.bf16.gmra.mxu2 %vm881_vm0, %v14402_v21 }
 0x352   :  { %10102 = vmatmul.msk.bf16.gmra.mxu3 %vm881_vm0, %v14402_v21  ;;  %v15229_v21 = vld [vmem:[%s19065_s0] sm:$0xff] }
 0x354   :  { %v15210_v23 = vpop.f32.mrf.mxu2 }
 0x355   :  { %19395 = vst [vmem:[#allocation323_spill] sm:$0xff] %v15210_v23  ;;  %v15212_v24 = vpop.f32.mrf.mxu3  ;;  %v15214_v28 = vpop.f32.mrf.mxu0 }
 0x356   :  { %19396 = vst [vmem:[#allocation324_spill] sm:$0xff] %v15212_v24  ;;  %v15216_v19 = vpop.f32.mrf.mxu1 }
 0x357   :  { %19397 = vst [vmem:[#allocation325_spill] sm:$0xff] %v15214_v28 }
 0x358   :  { %19398 = vst [vmem:[#allocation326_spill] sm:$0xff] %v15216_v19 }
 0x35c   :  { %v15218_v41 = vpop.f32.mrf.mxu2 }
 0x35d   :  { %19399 = vst [vmem:[#allocation327_spill] sm:$0xff] %v15218_v41  ;;  %v15220_v25 = vpop.f32.mrf.mxu3  ;;  %v15222_v20 = vpop.f32.mrf.mxu0 }
 0x35e   :  { %19400 = vst [vmem:[#allocation328_spill] sm:$0xff] %v15220_v25  ;;  %v15224_v26 = vpop.f32.mrf.mxu1 }
 0x35f   :  { %19401 = vst [vmem:[#allocation329_spill] sm:$0xff] %v15222_v20 }
 0x360   :  { %19402 = vst [vmem:[#allocation330_spill] sm:$0xff] %v15224_v26  ;;  %10103 = vmatmul.msk.bf16.vlgmr.msra.gmra.mxu0 %vm881_vm0, %v15229_v21  ;;  %10129 = vmatmul.msk.bf16.vlgmr.msra.gmra.mxu1 %vm881_vm0, %v15229_v21 }
 0x361   :  { %10155 = vmatmul.msk.bf16.vlgmr.msra.gmra.mxu2 %vm881_vm0, %v15229_v21 }
 0x362   :  { %10181 = vmatmul.msk.bf16.vlgmr.msra.gmra.mxu3 %vm881_vm0, %v15229_v21 }
 0x364   :  { %v15239_v20 = vpop.f32.mrf.mxu2 }
 0x365   :  { %19403 = vst [vmem:[#allocation331_spill] sm:$0xff] %v15239_v20  ;;  %v15241_v26 = vpop.f32.mrf.mxu3  ;;  %v15243_v25 = vpop.f32.mrf.mxu0  ;;  %v9825_v20 = vld [vmem:[%s19064_s1 + $0x2b8] sm:$0xf] }
 0x366   :  { %19404 = vst [vmem:[#allocation332_spill] sm:$0xff] %v15241_v26  ;;  %v15245_v41 = vpop.f32.mrf.mxu1 }
 0x367   :  { %19405 = vst [vmem:[#allocation333_spill] sm:$0xff] %v15243_v25 }
 0x368   :  { %19406 = vst [vmem:[#allocation334_spill] sm:$0xff] %v15245_v41 }
 0x36c   :  { %v15247_v19 = vpop.f32.mrf.mxu2 }
 0x36d   :  { %19407 = vst [vmem:[#allocation335_spill] sm:$0xff] %v15247_v19  ;;  %v15249_v28 = vpop.f32.mrf.mxu3  ;;  %v15251_v24 = vpop.f32.mrf.mxu0 }
 0x36e   :  { %19408 = vst [vmem:[#allocation336_spill] sm:$0xff] %v15249_v28  ;;  %v15253_v23 = vpop.f32.mrf.mxu1 }
 0x36f   :  { %19409 = vst [vmem:[#allocation337_spill] sm:$0xff] %v15251_v24 }
 0x370   :  { %19410 = vst [vmem:[#allocation338_spill] sm:$0xff] %v15253_v23  ;;  %10104 = vmatmul.msk.bf16.gmra.mxu0 %vm881_vm0, %v15258_v27  ;;  %10130 = vmatmul.msk.bf16.gmra.mxu1 %vm881_vm0, %v15258_v27 }
 0x371   :  { %10156 = vmatmul.msk.bf16.gmra.mxu2 %vm881_vm0, %v15258_v27 }
 0x372   :  { %10182 = vmatmul.msk.bf16.gmra.mxu3 %vm881_vm0, %v15258_v27 }
 0x374   :  { %v15268_v24 = vpop.f32.mrf.mxu2 }
 0x375   :  { %19411 = vst [vmem:[#allocation339_spill] sm:$0xff] %v15268_v24  ;;  %v15270_v23 = vpop.f32.mrf.mxu3  ;;  %v15272_v28 = vpop.f32.mrf.mxu0  ;;  %v12864_v24 = vld [vmem:[%s19064_s1 + $0x2f4] sm:$0xf0] }
 0x376   :  { %19412 = vst [vmem:[#allocation340_spill] sm:$0xff] %v15270_v23  ;;  %v15274_v19 = vpop.f32.mrf.mxu1  ;;  %v9826_v23 = vor.u32 %v12864_v24, %v9825_v20  ;;  %v9817_v24 = vld [vmem:[%s19064_s1 + $0x2b0] sm:$0xf]  ;;  %v9819_v20 = vld [vmem:[%s19064_s1 + $0x2f0] sm:$0xf0] }
 0x377   :  { %19413 = vst [vmem:[#allocation341_spill] sm:$0xff] %v15272_v28 }
 0x378   :  { %19414 = vst [vmem:[#allocation342_spill] sm:$0xff] %v15274_v19  ;;  %v12856_v19 = vld [vmem:[%s19064_s1 + $0x2bc] sm:$0xf]  ;;  %2908 = vmatpush.bf16.msrb.mxu2 %v9826_v23  ;;  %v12855_v23 = vld [vmem:[%s19064_s1 + $0x2b4] sm:$0xf] }
 0x379   :  { %v9822_v28 = vor.u32 %v12855_v23, %v9819_v20 }
 0x37b   :  { %2769 = vmatpush.bf16.msrb.mxu1 %v9822_v28 }
 0x37c   :  { %v15276_v41 = vpop.f32.mrf.mxu2 }
 0x37d   :  { %19415 = vst [vmem:[#allocation343_spill] sm:$0xff] %v15276_v41  ;;  %v15278_v25 = vpop.f32.mrf.mxu3  ;;  %v15280_v26 = vpop.f32.mrf.mxu0  ;;  %v15299_v41 = vld [vmem:[%s19065_s0 + $0x10] sm:$0xff] }
 0x37e   :  { %19416 = vst [vmem:[#allocation344_spill] sm:$0xff] %v15278_v25  ;;  %v15288_v18 = vpop.f32.mrf.mxu1  ;;  %v9827_v25 = vld [vmem:[%s19064_s1 + $0x2f8] sm:$0xf0] }
 0x37f   :  { %19417 = vst [vmem:[#allocation345_spill] sm:$0xff] %v15280_v26  ;;  %v9830_v26 = vor.u32 %v12856_v19, %v9827_v25  ;;  %v12863_v19 = vld [vmem:[%s19064_s1 + $0x2ec] sm:$0xf0] }
 0x380   :  { %19418 = vst [vmem:[#allocation346_spill] sm:$0xff] %v15288_v18  ;;  %10105 = vmatmul.msk.bf16.gmra.mxu0 %vm881_vm0, %v15299_v41  ;;  %10131 = vmatmul.msk.bf16.gmra.mxu1 %vm881_vm0, %v15299_v41  ;;  %v9818_v25 = vor.u32 %v12863_v19, %v9817_v24  ;;  %v15340_v19 = vld [vmem:[%s19065_s0 + $0x18] sm:$0xff] }
 0x381   :  { %10157 = vmatmul.msk.bf16.gmra.mxu2 %vm881_vm0, %v15299_v41  ;;  %3047 = vmatpush.bf16.msrb.mxu3 %v9830_v26 }
 0x382   :  { %10183 = vmatmul.msk.bf16.gmra.mxu3 %vm881_vm0, %v15299_v41  ;;  %2630 = vmatpush.bf16.msrb.mxu0 %v9818_v25 }
 0x384   :  { %v15321_v18 = vpop.f32.mrf.mxu2 }
 0x385   :  { %19419 = vst [vmem:[#allocation347_spill] sm:$0xff] %v15321_v18  ;;  %v15323_v60 = vpop.f32.mrf.mxu3  ;;  %v15325_v22 = vpop.f32.mrf.mxu0  ;;  %v9753_v18 = vld [vmem:[%s19064_s1 + $0x230] sm:$0xf] }
 0x386   :  { %19420 = vst [vmem:[#allocation348_spill] sm:$0xff] %v15323_v60  ;;  %v15327_v53 = vpop.f32.mrf.mxu1 }
 0x387   :  { %19421 = vst [vmem:[#allocation349_spill] sm:$0xff] %v15325_v22  ;;  %v15398_v22 = vld [vmem:[%s19065_s0 + $0x28] sm:$0xff] }
 0x388   :  { %19422 = vst [vmem:[#allocation350_spill] sm:$0xff] %v15327_v53  ;;  %v15369_v53 = vld [vmem:[%s19065_s0 + $0x20] sm:$0xff] }
 0x38c   :  { %v15329_v36 = vpop.f32.mrf.mxu2 }
 0x38d   :  { %19423 = vst [vmem:[#allocation351_spill] sm:$0xff] %v15329_v36  ;;  %v15331_v50 = vpop.f32.mrf.mxu3  ;;  %v15333_v26 = vpop.f32.mrf.mxu0 }
 0x38e   :  { %19424 = vst [vmem:[#allocation352_spill] sm:$0xff] %v15331_v50  ;;  %v15335_v24 = vpop.f32.mrf.mxu1 }
 0x38f   :  { %19425 = vst [vmem:[#allocation353_spill] sm:$0xff] %v15333_v26 }
 0x390   :  { %19426 = vst [vmem:[#allocation354_spill] sm:$0xff] %v15335_v24  ;;  %10106 = vmatmul.msk.bf16.gmra.mxu0 %vm881_vm0, %v15340_v19  ;;  %10132 = vmatmul.msk.bf16.gmra.mxu1 %vm881_vm0, %v15340_v19 }
 0x391   :  { %10158 = vmatmul.msk.bf16.gmra.mxu2 %vm881_vm0, %v15340_v19 }
 0x392   :  { %10184 = vmatmul.msk.bf16.gmra.mxu3 %vm881_vm0, %v15340_v19 }
 0x394   :  { %v15350_v28 = vpop.f32.mrf.mxu2 }
 0x395   :  { %19427 = vst [vmem:[#allocation355_spill] sm:$0xff] %v15350_v28  ;;  %v15352_v23 = vpop.f32.mrf.mxu3  ;;  %v15354_v25 = vpop.f32.mrf.mxu0 }
 0x396   :  { %19428 = vst [vmem:[#allocation356_spill] sm:$0xff] %v15352_v23  ;;  %v15356_v20 = vpop.f32.mrf.mxu1 }
 0x397   :  { %19429 = vst [vmem:[#allocation357_spill] sm:$0xff] %v15354_v25 }
 0x398   :  { %19430 = vst [vmem:[#allocation358_spill] sm:$0xff] %v15356_v20 }
 0x39c   :  { %v15358_v24 = vpop.f32.mrf.mxu2 }
 0x39d   :  { %19431 = vst [vmem:[#allocation359_spill] sm:$0xff] %v15358_v24  ;;  %v15360_v26 = vpop.f32.mrf.mxu3  ;;  %v15362_v50 = vpop.f32.mrf.mxu0 }
 0x39e   :  { %19432 = vst [vmem:[#allocation360_spill] sm:$0xff] %v15360_v26  ;;  %v15364_v36 = vpop.f32.mrf.mxu1 }
 0x39f   :  { %19433 = vst [vmem:[#allocation361_spill] sm:$0xff] %v15362_v50 }
 0x3a0   :  { %19434 = vst [vmem:[#allocation362_spill] sm:$0xff] %v15364_v36  ;;  %10107 = vmatmul.msk.bf16.gmra.mxu0 %vm881_vm0, %v15369_v53  ;;  %10133 = vmatmul.msk.bf16.gmra.mxu1 %vm881_vm0, %v15369_v53 }
 0x3a1   :  { %10159 = vmatmul.msk.bf16.gmra.mxu2 %vm881_vm0, %v15369_v53 }
 0x3a2   :  { %10185 = vmatmul.msk.bf16.gmra.mxu3 %vm881_vm0, %v15369_v53 }
 0x3a4   :  { %v15379_v50 = vpop.f32.mrf.mxu2 }
 0x3a5   :  { %19435 = vst [vmem:[#allocation363_spill] sm:$0xff] %v15379_v50  ;;  %v15381_v36 = vpop.f32.mrf.mxu3  ;;  %v15383_v26 = vpop.f32.mrf.mxu0 }
 0x3a6   :  { %19436 = vst [vmem:[#allocation364_spill] sm:$0xff] %v15381_v36  ;;  %v15385_v24 = vpop.f32.mrf.mxu1  ;;  %v12840_v36 = vld [vmem:[%s19064_s1 + $0x23c] sm:$0xf] }
 0x3a7   :  { %19437 = vst [vmem:[#allocation365_spill] sm:$0xff] %v15383_v26  ;;  %v12848_v26 = vld [vmem:[%s19064_s1 + $0x274] sm:$0xf0] }
 0x3a8   :  { %19438 = vst [vmem:[#allocation366_spill] sm:$0xff] %v15385_v24  ;;  %v9761_v24 = vld [vmem:[%s19064_s1 + $0x238] sm:$0xf] }
 0x3a9   :  { %v9762_v50 = vor.u32 %v12848_v26, %v9761_v24  ;;  %v12847_v26 = vld [vmem:[%s19064_s1 + $0x26c] sm:$0xf0] }
 0x3aa   :  { %v9754_v24 = vor.u32 %v12847_v26, %v9753_v18 }
 0x3ab   :  { %2909 = vmatpush.bf16.msrb.mxu2 %v9762_v50 }
 0x3ac   :  { %v15387_v20 = vpop.f32.mrf.mxu2  ;;  %2631 = vmatpush.bf16.msrb.mxu0 %v9754_v24  ;;  %v15480_v24 = vld [vmem:[%s19065_s0 + $0x38] sm:$0xff] }
 0x3ad   :  { %19439 = vst [vmem:[#allocation367_spill] sm:$0xff] %v15387_v20  ;;  %v15389_v25 = vpop.f32.mrf.mxu3  ;;  %v15391_v23 = vpop.f32.mrf.mxu0 }
 0x3ae   :  { %19440 = vst [vmem:[#allocation368_spill] sm:$0xff] %v15389_v25  ;;  %v15393_v28 = vpop.f32.mrf.mxu1 }
 0x3af   :  { %19441 = vst [vmem:[#allocation369_spill] sm:$0xff] %v15391_v23  ;;  %2910 = vmatpush.bf16.msrb.mxu2 %v9698_v44 }
 0x3b0   :  { %19442 = vst [vmem:[#allocation370_spill] sm:$0xff] %v15393_v28  ;;  %10108 = vmatmul.msk.bf16.gmra.mxu0 %vm881_vm0, %v15398_v22  ;;  %10134 = vmatmul.msk.bf16.gmra.mxu1 %vm881_vm0, %v15398_v22 }
 0x3b1   :  { %10160 = vmatmul.msk.bf16.gmra.mxu2 %vm881_vm0, %v15398_v22  ;;  %2632 = vmatpush.bf16.msrb.mxu0 %v9690_v32 }
 0x3b2   :  { %10186 = vmatmul.msk.bf16.gmra.mxu3 %vm881_vm0, %v15398_v22 }
 0x3b4   :  { %v15408_v23 = vpop.f32.mrf.mxu2 }
 0x3b5   :  { %19443 = vst [vmem:[#allocation371_spill] sm:$0xff] %v15408_v23  ;;  %v15410_v28 = vpop.f32.mrf.mxu3  ;;  %v15412_v25 = vpop.f32.mrf.mxu0 }
 0x3b6   :  { %19444 = vst [vmem:[#allocation372_spill] sm:$0xff] %v15410_v28  ;;  %v15414_v20 = vpop.f32.mrf.mxu1  ;;  %v9763_v28 = vld [vmem:[%s19064_s1 + $0x278] sm:$0xf0] }
 0x3b7   :  { %19445 = vst [vmem:[#allocation373_spill] sm:$0xff] %v15412_v25  ;;  %v9766_v25 = vor.u32 %v12840_v36, %v9763_v28  ;;  %v12839_v36 = vld [vmem:[%s19064_s1 + $0x234] sm:$0xf] }
 0x3b8   :  { %19446 = vst [vmem:[#allocation374_spill] sm:$0xff] %v15414_v20  ;;  %v9755_v28 = vld [vmem:[%s19064_s1 + $0x270] sm:$0xf0] }
 0x3b9   :  { %3048 = vmatpush.bf16.msrb.mxu3 %v9766_v25  ;;  %v9758_v25 = vor.u32 %v12839_v36, %v9755_v28 }
 0x3bb   :  { %2770 = vmatpush.bf16.msrb.mxu1 %v9758_v25 }
 0x3bc   :  { %v15428_v20 = vpop.f32.mrf.mxu2 }
 0x3bd   :  { %19447 = vst [vmem:[#allocation375_spill] sm:$0xff] %v15428_v20  ;;  %v15430_v23 = vpop.f32.mrf.mxu3  ;;  %v15432_v60 = vpop.f32.mrf.mxu0  ;;  %3049 = vmatpush.bf16.msrb.mxu3 %v9702_v8 }
 0x3be   :  { %19448 = vst [vmem:[#allocation376_spill] sm:$0xff] %v15430_v23  ;;  %v15443_v50 = vpop.f32.mrf.mxu1 }
 0x3bf   :  { %19449 = vst [vmem:[#allocation377_spill] sm:$0xff] %v15432_v60  ;;  %v15451_v60 = vld [vmem:[%s19065_s0 + $0x30] sm:$0xff]  ;;  %2771 = vmatpush.bf16.msrb.mxu1 %v9694_v42 }
 0x3c0   :  { %19450 = vst [vmem:[#allocation378_spill] sm:$0xff] %v15443_v50  ;;  %10109 = vmatmul.msk.bf16.gmra.mxu0 %vm881_vm0, %v15451_v60  ;;  %10135 = vmatmul.msk.bf16.gmra.mxu1 %vm881_vm0, %v15451_v60 }
 0x3c1   :  { %10161 = vmatmul.msk.bf16.gmra.mxu2 %vm881_vm0, %v15451_v60 }
 0x3c2   :  { %10187 = vmatmul.msk.bf16.gmra.mxu3 %vm881_vm0, %v15451_v60 }
 0x3c4   :  { %v15461_v18 = vpop.f32.mrf.mxu2 }
 0x3c5   :  { %19451 = vst [vmem:[#allocation379_spill] sm:$0xff] %v15461_v18  ;;  %v15463_v26 = vpop.f32.mrf.mxu3  ;;  %v15465_v36 = vpop.f32.mrf.mxu0  ;;  %v15509_v18 = vld [vmem:[%s19065_s0 + $0x40] sm:$0xff] }
 0x3c6   :  { %19452 = vst [vmem:[#allocation380_spill] sm:$0xff] %v15463_v26  ;;  %v15467_v28 = vpop.f32.mrf.mxu1 }
 0x3c7   :  { %19453 = vst [vmem:[#allocation381_spill] sm:$0xff] %v15465_v36 }
 0x3c8   :  { %19454 = vst [vmem:[#allocation382_spill] sm:$0xff] %v15467_v28 }
 0x3cc   :  { %v15469_v50 = vpop.f32.mrf.mxu2 }
 0x3cd   :  { %19455 = vst [vmem:[#allocation383_spill] sm:$0xff] %v15469_v50  ;;  %v15471_v23 = vpop.f32.mrf.mxu3  ;;  %v15473_v20 = vpop.f32.mrf.mxu0 }
 0x3ce   :  { %19456 = vst [vmem:[#allocation384_spill] sm:$0xff] %v15471_v23  ;;  %v15475_v15 = vpop.f32.mrf.mxu1 }
 0x3cf   :  { %19457 = vst [vmem:[#allocation385_spill] sm:$0xff] %v15473_v20 }
 0x3d0   :  { %19458 = vst [vmem:[#allocation386_spill] sm:$0xff] %v15475_v15  ;;  %10110 = vmatmul.msk.bf16.gmra.mxu0 %vm881_vm0, %v15480_v24  ;;  %10136 = vmatmul.msk.bf16.gmra.mxu1 %vm881_vm0, %v15480_v24 }
 0x3d1   :  { %10162 = vmatmul.msk.bf16.gmra.mxu2 %vm881_vm0, %v15480_v24 }
 0x3d2   :  { %10188 = vmatmul.msk.bf16.gmra.mxu3 %vm881_vm0, %v15480_v24 }
 0x3d4   :  { %v15490_v25 = vpop.f32.mrf.mxu2 }
 0x3d5   :  { %19459 = vst [vmem:[#allocation387_spill] sm:$0xff] %v15490_v25  ;;  %v15492_v15 = vpop.f32.mrf.mxu3  ;;  %v15494_v20 = vpop.f32.mrf.mxu0 }
 0x3d6   :  { %19460 = vst [vmem:[#allocation388_spill] sm:$0xff] %v15492_v15  ;;  %v15496_v23 = vpop.f32.mrf.mxu1 }
 0x3d7   :  { %19461 = vst [vmem:[#allocation389_spill] sm:$0xff] %v15494_v20 }
 0x3d8   :  { %19462 = vst [vmem:[#allocation390_spill] sm:$0xff] %v15496_v23 }
 0x3dc   :  { %v15498_v50 = vpop.f32.mrf.mxu2 }
 0x3dd   :  { %19463 = vst [vmem:[#allocation391_spill] sm:$0xff] %v15498_v50  ;;  %v15500_v28 = vpop.f32.mrf.mxu3  ;;  %v15502_v36 = vpop.f32.mrf.mxu0 }
 0x3de   :  { %19464 = vst [vmem:[#allocation392_spill] sm:$0xff] %v15500_v28  ;;  %v15504_v26 = vpop.f32.mrf.mxu1 }
 0x3e0   :  { %10111 = vmatmul.msk.bf16.gmra.mxu0 %vm881_vm0, %v15509_v18  ;;  %10137 = vmatmul.msk.bf16.gmra.mxu1 %vm881_vm0, %v15509_v18 }
 0x3e1   :  { %10163 = vmatmul.msk.bf16.gmra.mxu2 %vm881_vm0, %v15509_v18 }
 0x3e2   :  { %10189 = vmatmul.msk.bf16.gmra.mxu3 %vm881_vm0, %v15509_v18 }
 0x3e4   :  { %v15519_v28 = vpop.f32.mrf.mxu2 }
 0x3e5   :  { %v15521_v50 = vpop.f32.mrf.mxu3  ;;  %v15523_v23 = vpop.f32.mrf.mxu0 }
 0x3e6   :  { %v15525_v20 = vpop.f32.mrf.mxu1 }
 0x3ec   :  { %v15527_v15 = vpop.f32.mrf.mxu2 }
 0x3ed   :  { %v15529_v25 = vpop.f32.mrf.mxu3  ;;  %v15531_v59 = vpop.f32.mrf.mxu0 }
 0x3ee   :  { %v15533_v57 = vpop.f32.mrf.mxu1 }
 0x3f0   :  { %10112 = vmatmul.msk.bf16.gmra.mxu0 %vm881_vm0, %v15538_v45  ;;  %10138 = vmatmul.msk.bf16.gmra.mxu1 %vm881_vm0, %v15538_v45 }
 0x3f1   :  { %10164 = vmatmul.msk.bf16.gmra.mxu2 %vm881_vm0, %v15538_v45 }
 0x3f2   :  { %10190 = vmatmul.msk.bf16.gmra.mxu3 %vm881_vm0, %v15538_v45 }
 0x3f4   :  { %v15548_v37 = vpop.f32.mrf.mxu2 }
 0x3f5   :  { %v15550_v38 = vpop.f32.mrf.mxu3  ;;  %v15552_v16 = vpop.f32.mrf.mxu0 }
 0x3f6   :  { %v15554_v61 = vpop.f32.mrf.mxu1 }
 0x3fc   :  { %v15580_v31 = vpop.f32.mrf.mxu2 }
 0x3fd   :  { %19465 = vst [vmem:[#allocation393_spill] sm:$0xff] %v15580_v31  ;;  %v15582_v35 = vpop.f32.mrf.mxu3  ;;  %v15584_v39 = vpop.f32.mrf.mxu0 }
 0x3fe   :  { %19466 = vst [vmem:[#allocation394_spill] sm:$0xff] %v15582_v35  ;;  %v15586_v29 = vpop.f32.mrf.mxu1 }
 0x3ff   :  { %19467 = vst [vmem:[#allocation395_spill] sm:$0xff] %v15584_v39 }
 0x400   :  { %19468 = vst [vmem:[#allocation396_spill] sm:$0xff] %v15586_v29  ;;  %10113 = vmatmul.msk.bf16.gmra.mxu0 %vm881_vm0, %v15591_v56  ;;  %10139 = vmatmul.msk.bf16.gmra.mxu1 %vm881_vm0, %v15591_v56 }
 0x401   :  { %10165 = vmatmul.msk.bf16.gmra.mxu2 %vm881_vm0, %v15591_v56 }
 0x402   :  { %10191 = vmatmul.msk.bf16.gmra.mxu3 %vm881_vm0, %v15591_v56  ;;  %v13374_v56 = vld [vmem:[%s19065_s0 + $0x58] sm:$0xff] }
 0x404   :  { %v15601_v32 = vpop.f32.mrf.mxu2 }
 0x405   :  { %19470 = vst [vmem:[#allocation398_spill] sm:$0xff] %v15601_v32  ;;  %v15603_v34 = vpop.f32.mrf.mxu3  ;;  %v15605_v42 = vpop.f32.mrf.mxu0 }
 0x406   :  { %19471 = vst [vmem:[#allocation399_spill] sm:$0xff] %v15603_v34  ;;  %v15607_v51 = vpop.f32.mrf.mxu1 }
 0x407   :  { %19472 = vst [vmem:[#allocation400_spill] sm:$0xff] %v15605_v42 }
 0x408   :  { %19473 = vst [vmem:[#allocation401_spill] sm:$0xff] %v15607_v51 }
 0x40c   :  { %v15609_v8 = vpop.f32.mrf.mxu2 }
 0x40d   :  { %19474 = vst [vmem:[#allocation402_spill] sm:$0xff] %v15609_v8  ;;  %v15611_v44 = vpop.f32.mrf.mxu3  ;;  %v15613_v43 = vpop.f32.mrf.mxu0 }
 0x40e   :  { %19475 = vst [vmem:[#allocation403_spill] sm:$0xff] %v15611_v44  ;;  %v15615_v30 = vpop.f32.mrf.mxu1 }
 0x40f   :  { %19476 = vst [vmem:[#allocation404_spill] sm:$0xff] %v15613_v43 }
 0x410   :  { %19477 = vst [vmem:[#allocation405_spill] sm:$0xff] %v15615_v30  ;;  %10114 = vmatmul.msk.bf16.gmra.mxu0 %vm881_vm0, %v13374_v56  ;;  %10140 = vmatmul.msk.bf16.gmra.mxu1 %vm881_vm0, %v13374_v56 }
 0x411   :  { %10166 = vmatmul.msk.bf16.gmra.mxu2 %vm881_vm0, %v13374_v56 }
 0x412   :  { %10192 = vmatmul.msk.bf16.gmra.mxu3 %vm881_vm0, %v13374_v56  ;;  %v13375_v56 = vld [vmem:[%s19065_s0 + $0x60] sm:$0xff] }
 0x414   :  { %v15624_v51 = vpop.f32.mrf.mxu2 }
 0x415   :  { %19478 = vst [vmem:[#allocation406_spill] sm:$0xff] %v15624_v51  ;;  %v15626_v8 = vpop.f32.mrf.mxu3  ;;  %v15628_v44 = vpop.f32.mrf.mxu0 }
 0x416   :  { %19479 = vst [vmem:[#allocation407_spill] sm:$0xff] %v15626_v8  ;;  %v15630_v43 = vpop.f32.mrf.mxu1 }
 0x417   :  { %19480 = vst [vmem:[#allocation408_spill] sm:$0xff] %v15628_v44 }
 0x418   :  { %19481 = vst [vmem:[#allocation409_spill] sm:$0xff] %v15630_v43 }
 0x41c   :  { %v15632_v30 = vpop.f32.mrf.mxu2 }
 0x41d   :  { %19482 = vst [vmem:[#allocation410_spill] sm:$0xff] %v15632_v30  ;;  %v15634_v42 = vpop.f32.mrf.mxu3  ;;  %v15636_v34 = vpop.f32.mrf.mxu0 }
 0x41e   :  { %19483 = vst [vmem:[#allocation411_spill] sm:$0xff] %v15634_v42  ;;  %v15638_v32 = vpop.f32.mrf.mxu1 }
 0x41f   :  { %19484 = vst [vmem:[#allocation412_spill] sm:$0xff] %v15636_v34 }
 0x420   :  { %19485 = vst [vmem:[#allocation413_spill] sm:$0xff] %v15638_v32  ;;  %10115 = vmatmul.msk.bf16.gmra.mxu0 %vm881_vm0, %v13375_v56  ;;  %10141 = vmatmul.msk.bf16.gmra.mxu1 %vm881_vm0, %v13375_v56 }
 0x421   :  { %10167 = vmatmul.msk.bf16.gmra.mxu2 %vm881_vm0, %v13375_v56 }
 0x422   :  { %10193 = vmatmul.msk.bf16.gmra.mxu3 %vm881_vm0, %v13375_v56  ;;  %v9633_v56 = vld [vmem:[%s19064_s1 + $0x138] sm:$0xf] }
 0x424   :  { %v15647_v43 = vpop.f32.mrf.mxu2 }
 0x425   :  { %19486 = vst [vmem:[#allocation414_spill] sm:$0xff] %v15647_v43  ;;  %v15649_v30 = vpop.f32.mrf.mxu3  ;;  %v15651_v42 = vpop.f32.mrf.mxu0 }
 0x426   :  { %19487 = vst [vmem:[#allocation415_spill] sm:$0xff] %v15649_v30  ;;  %v15653_v34 = vpop.f32.mrf.mxu1  ;;  %v12816_v30 = vld [vmem:[%s19064_s1 + $0x174] sm:$0xf0] }
 0x427   :  { %19488 = vst [vmem:[#allocation416_spill] sm:$0xff] %v15651_v42 }
 0x428   :  { %19489 = vst [vmem:[#allocation417_spill] sm:$0xff] %v15653_v34  ;;  %v13376_v34 = vld [vmem:[%s19065_s0 + $0x68] sm:$0xff] }
 0x42c   :  { %v15655_v32 = vpop.f32.mrf.mxu2 }
 0x42d   :  { %19490 = vst [vmem:[#allocation418_spill] sm:$0xff] %v15655_v32  ;;  %v15657_v44 = vpop.f32.mrf.mxu3  ;;  %v15659_v8 = vpop.f32.mrf.mxu0  ;;  %v9634_v32 = vor.u32 %v12816_v30, %v9633_v56  ;;  %v12815_v56 = vld [vmem:[%s19064_s1 + $0x16c] sm:$0xf0] }
 0x42e   :  { %19491 = vst [vmem:[#allocation419_spill] sm:$0xff] %v15657_v44  ;;  %v15661_v51 = vpop.f32.mrf.mxu1  ;;  %v9625_v44 = vld [vmem:[%s19064_s1 + $0x130] sm:$0xf] }
 0x42f   :  { %19492 = vst [vmem:[#allocation420_spill] sm:$0xff] %v15659_v8  ;;  %2911 = vmatpush.bf16.msrb.mxu2 %v9634_v32  ;;  %v9635_v8 = vld [vmem:[%s19064_s1 + $0x178] sm:$0xf0]  ;;  %v12807_v32 = vld [vmem:[%s19064_s1 + $0x134] sm:$0xf]  ;;  %v9626_v43 = vor.u32 %v12815_v56, %v9625_v44 }
 0x430   :  { %19493 = vst [vmem:[#allocation421_spill] sm:$0xff] %v15661_v51  ;;  %10116 = vmatmul.msk.bf16.gmra.mxu0 %vm881_vm0, %v13376_v34  ;;  %10142 = vmatmul.msk.bf16.gmra.mxu1 %vm881_vm0, %v13376_v34  ;;  %v12808_v51 = vld [vmem:[%s19064_s1 + $0x13c] sm:$0xf]  ;;  %v13377_v44 = vld [vmem:[%s19065_s0 + $0x70] sm:$0xff] }
 0x431   :  { %10168 = vmatmul.msk.bf16.gmra.mxu2 %vm881_vm0, %v13376_v34  ;;  %v9638_v30 = vor.u32 %v12808_v51, %v9635_v8  ;;  %2633 = vmatpush.bf16.msrb.mxu0 %v9626_v43 }
 0x432   :  { %10194 = vmatmul.msk.bf16.gmra.mxu3 %vm881_vm0, %v13376_v34  ;;  %v9627_v34 = vld [vmem:[%s19064_s1 + $0x170] sm:$0xf0] }
 0x433   :  { %v9630_v29 = vor.u32 %v12807_v32, %v9627_v34  ;;  %3050 = vmatpush.bf16.msrb.mxu3 %v9638_v30 }
 0x434   :  { %v15694_v42 = vpop.f32.mrf.mxu2 }
 0x435   :  { %v15696_v39 = vpop.f32.mrf.mxu3  ;;  %v15698_v35 = vpop.f32.mrf.mxu0  ;;  %2772 = vmatpush.bf16.msrb.mxu1 %v9630_v29 }
 0x436   :  { %19494 = vst [vmem:[#allocation422_spill] sm:$0xff] %v15698_v35  ;;  %v15700_v51 = vpop.f32.mrf.mxu1 }
 0x437   :  { %19495 = vst [vmem:[#allocation423_spill] sm:$0xff] %v15700_v51 }
 0x43c   :  { %v15702_v8 = vpop.f32.mrf.mxu2 }
 0x43d   :  { %19496 = vst [vmem:[#allocation424_spill] sm:$0xff] %v15702_v8  ;;  %v15704_v31 = vpop.f32.mrf.mxu3  ;;  %v15706_v47 = vpop.f32.mrf.mxu0 }
 0x43e   :  { %19497 = vst [vmem:[#allocation425_spill] sm:$0xff] %v15704_v31  ;;  %v15708_v58 = vpop.f32.mrf.mxu1 }
 0x43f   :  { %19498 = vst [vmem:[#allocation426_spill] sm:$0xff] %v15706_v47 }
 0x440   :  { %19499 = vst [vmem:[#allocation427_spill] sm:$0xff] %v15708_v58  ;;  %10117 = vmatmul.msk.bf16.gmra.mxu0 %vm881_vm0, %v13377_v44  ;;  %10143 = vmatmul.msk.bf16.gmra.mxu1 %vm881_vm0, %v13377_v44 }
 0x441   :  { %10169 = vmatmul.msk.bf16.gmra.mxu2 %vm881_vm0, %v13377_v44 }
 0x442   :  { %10195 = vmatmul.msk.bf16.gmra.mxu3 %vm881_vm0, %v13377_v44  ;;  %v13378_v44 = vld [vmem:[%s19065_s0 + $0x78] sm:$0xff] }
 0x444   :  { %v15717_v29 = vpop.f32.mrf.mxu2 }
 0x445   :  { %19500 = vst [vmem:[#allocation428_spill] sm:$0xff] %v15717_v29  ;;  %v15719_v43 = vpop.f32.mrf.mxu3  ;;  %v15721_v30 = vpop.f32.mrf.mxu0 }
 0x446   :  { %19501 = vst [vmem:[#allocation429_spill] sm:$0xff] %v15719_v43  ;;  %v15723_v56 = vpop.f32.mrf.mxu1 }
 0x447   :  { %19502 = vst [vmem:[#allocation430_spill] sm:$0xff] %v15721_v30 }
 0x448   :  { %19503 = vst [vmem:[#allocation431_spill] sm:$0xff] %v15723_v56 }
 0x44c   :  { %v15725_v32 = vpop.f32.mrf.mxu2 }
 0x44d   :  { %19504 = vst [vmem:[#allocation432_spill] sm:$0xff] %v15725_v32  ;;  %v15727_v34 = vpop.f32.mrf.mxu3  ;;  %v15729_v58 = vpop.f32.mrf.mxu0 }
 0x44e   :  { %19505 = vst [vmem:[#allocation433_spill] sm:$0xff] %v15727_v34  ;;  %v15731_v47 = vpop.f32.mrf.mxu1 }
 0x44f   :  { %19506 = vst [vmem:[#allocation434_spill] sm:$0xff] %v15729_v58 }
 0x450   :  { %19507 = vst [vmem:[#allocation435_spill] sm:$0xff] %v15731_v47  ;;  %10118 = vmatmul.msk.bf16.gmra.mxu0 %vm881_vm0, %v13378_v44  ;;  %10144 = vmatmul.msk.bf16.gmra.mxu1 %vm881_vm0, %v13378_v44 }
 0x451   :  { %10170 = vmatmul.msk.bf16.gmra.mxu2 %vm881_vm0, %v13378_v44 }
 0x452   :  { %10196 = vmatmul.msk.bf16.gmra.mxu3 %vm881_vm0, %v13378_v44  ;;  %v13379_v44 = vld [vmem:[%s19065_s0 + $0x80] sm:$0xff] }
 0x454   :  { %v15740_v56 = vpop.f32.mrf.mxu2 }
 0x455   :  { %19508 = vst [vmem:[#allocation436_spill] sm:$0xff] %v15740_v56  ;;  %v15742_v32 = vpop.f32.mrf.mxu3  ;;  %v15744_v34 = vpop.f32.mrf.mxu0 }
 0x456   :  { %19509 = vst [vmem:[#allocation437_spill] sm:$0xff] %v15742_v32  ;;  %v15746_v58 = vpop.f32.mrf.mxu1 }
 0x457   :  { %19510 = vst [vmem:[#allocation438_spill] sm:$0xff] %v15744_v34  ;;  %v12800_v34 = vld [vmem:[%s19064_s1 + $0xf4] sm:$0xf0] }
 0x458   :  { %19511 = vst [vmem:[#allocation439_spill] sm:$0xff] %v15746_v58 }
 0x45c   :  { %v15748_v47 = vpop.f32.mrf.mxu2 }
 0x45d   :  { %19512 = vst [vmem:[#allocation440_spill] sm:$0xff] %v15748_v47  ;;  %v15750_v30 = vpop.f32.mrf.mxu3  ;;  %v15752_v43 = vpop.f32.mrf.mxu0 }
 0x45e   :  { %19513 = vst [vmem:[#allocation441_spill] sm:$0xff] %v15750_v30  ;;  %v15754_v29 = vpop.f32.mrf.mxu1 }
 0x45f   :  { %19514 = vst [vmem:[#allocation442_spill] sm:$0xff] %v15752_v43 }
 0x460   :  { %19515 = vst [vmem:[#allocation443_spill] sm:$0xff] %v15754_v29  ;;  %10119 = vmatmul.msk.bf16.gmra.mxu0 %vm881_vm0, %v13379_v44  ;;  %10145 = vmatmul.msk.bf16.gmra.mxu1 %vm881_vm0, %v13379_v44  ;;  %v9569_v29 = vld [vmem:[%s19064_s1 + $0xb8] sm:$0xf] }
 0x461   :  { %10171 = vmatmul.msk.bf16.gmra.mxu2 %vm881_vm0, %v13379_v44  ;;  %v9570_v32 = vor.u32 %v12800_v34, %v9569_v29  ;;  %v9561_v29 = vld [vmem:[%s19064_s1 + $0xb0] sm:$0xf]  ;;  %v12791_v34 = vld [vmem:[%s19064_s1 + $0xb4] sm:$0xf] }
 0x462   :  { %10197 = vmatmul.msk.bf16.gmra.mxu3 %vm881_vm0, %v13379_v44 }
 0x463   :  { %2912 = vmatpush.bf16.msrb.mxu2 %v9570_v32  ;;  %v12799_v32 = vld [vmem:[%s19064_s1 + $0xec] sm:$0xf0] }
 0x464   :  { %v15763_v58 = vpop.f32.mrf.mxu2 }
 0x465   :  { %19516 = vst [vmem:[#allocation444_spill] sm:$0xff] %v15763_v58  ;;  %v15765_v47 = vpop.f32.mrf.mxu3  ;;  %v15767_v30 = vpop.f32.mrf.mxu0 }
 0x466   :  { %19517 = vst [vmem:[#allocation445_spill] sm:$0xff] %v15765_v47  ;;  %v15769_v43 = vpop.f32.mrf.mxu1 }
 0x467   :  { %19518 = vst [vmem:[#allocation446_spill] sm:$0xff] %v15767_v30  ;;  %v9571_v30 = vld [vmem:[%s19064_s1 + $0xf8] sm:$0xf0] }
 0x468   :  { %19519 = vst [vmem:[#allocation447_spill] sm:$0xff] %v15769_v43  ;;  %v12792_v43 = vld [vmem:[%s19064_s1 + $0xbc] sm:$0xf] }
 0x469   :  { %v9574_v31 = vor.u32 %v12792_v43, %v9571_v30  ;;  %v9563_v43 = vld [vmem:[%s19064_s1 + $0xf0] sm:$0xf0] }
 0x46a   :  { %v9566_v30 = vor.u32 %v12791_v34, %v9563_v43 }
 0x46b   :  { %3051 = vmatpush.bf16.msrb.mxu3 %v9574_v31  ;;  %v13381_v31 = vld [vmem:[%s19065_s0 + $0x90] sm:$0xff] }
 0x46c   :  { %v15777_v56 = vpop.f32.mrf.mxu2  ;;  %2773 = vmatpush.bf16.msrb.mxu1 %v9566_v30 }
 0x46d   :  { %19520 = vst [vmem:[#allocation448_spill] sm:$0xff] %v15777_v56  ;;  %v15779_v44 = vpop.f32.mrf.mxu3  ;;  %v15781_v58 = vpop.f32.mrf.mxu0 }
 0x46e   :  { %19521 = vst [vmem:[#allocation449_spill] sm:$0xff] %v15779_v44  ;;  %v15783_v47 = vpop.f32.mrf.mxu1 }
 0x46f   :  { %19522 = vst [vmem:[#allocation450_spill] sm:$0xff] %v15781_v58  ;;  %v9562_v58 = vor.u32 %v12799_v32, %v9561_v29 }
 0x470   :  { %19523 = vst [vmem:[#allocation451_spill] sm:$0xff] %v15783_v47  ;;  %v13380_v47 = vld [vmem:[%s19065_s0 + $0x88] sm:$0xff] }
 0x471   :  { %10120 = vmatmul.msk.bf16.gmra.mxu0 %vm881_vm0, %v13380_v47  ;;  %10146 = vmatmul.msk.bf16.gmra.mxu1 %vm881_vm0, %v13380_v47 }
 0x472   :  { %10172 = vmatmul.msk.bf16.gmra.mxu2 %vm881_vm0, %v13380_v47  ;;  %10198 = vmatmul.msk.bf16.gmra.mxu3 %vm881_vm0, %v13380_v47 }
 0x473   :  { %2634 = vmatpush.bf16.msrb.mxu0 %v9562_v58 }
 0x474   :  { %v15810_v44 = vpop.f32.mrf.mxu2 }
 0x475   :  { %19524 = vst [vmem:[#allocation452_spill] sm:$0xff] %v15810_v44  ;;  %v15812_v56 = vpop.f32.mrf.mxu3  ;;  %v15814_v8 = vpop.f32.mrf.mxu0 }
 0x476   :  { %19525 = vst [vmem:[#allocation453_spill] sm:$0xff] %v15812_v56  ;;  %v15816_v29 = vpop.f32.mrf.mxu1 }
 0x477   :  { %19526 = vst [vmem:[#allocation454_spill] sm:$0xff] %v15814_v8 }
 0x478   :  { %19527 = vst [vmem:[#allocation455_spill] sm:$0xff] %v15816_v29  ;;  %v12775_v29 = vld [vmem:[%s19064_s1 + $0x34] sm:$0xf] }
 0x47c   :  { %v15818_v32 = vpop.f32.mrf.mxu2 }
 0x47d   :  { %19528 = vst [vmem:[#allocation456_spill] sm:$0xff] %v15818_v32  ;;  %v15820_v51 = vpop.f32.mrf.mxu3  ;;  %v15822_v35 = vpop.f32.mrf.mxu0 }
 0x47e   :  { %19529 = vst [vmem:[#allocation457_spill] sm:$0xff] %v15820_v51  ;;  %v15824_v34 = vpop.f32.mrf.mxu1 }
 0x47f   :  { %19530 = vst [vmem:[#allocation458_spill] sm:$0xff] %v15822_v35 }
 0x480   :  { %19531 = vst [vmem:[#allocation459_spill] sm:$0xff] %v15824_v34 }
 0x481   :  { %10121 = vmatmul.msk.bf16.gmra.mxu0 %vm881_vm0, %v13381_v31  ;;  %10147 = vmatmul.msk.bf16.gmra.mxu1 %vm881_vm0, %v13381_v31 }
 0x482   :  { %10173 = vmatmul.msk.bf16.gmra.mxu2 %vm881_vm0, %v13381_v31  ;;  %10199 = vmatmul.msk.bf16.gmra.mxu3 %vm881_vm0, %v13381_v31  ;;  %v13382_v31 = vld [vmem:[%s19065_s0 + $0x98] sm:$0xff] }
 0x484   :  { %v15833_v47 = vpop.f32.mrf.mxu2 }
 0x485   :  { %19532 = vst [vmem:[#allocation460_spill] sm:$0xff] %v15833_v47  ;;  %v15835_v58 = vpop.f32.mrf.mxu3  ;;  %v15837_v43 = vpop.f32.mrf.mxu0 }
 0x486   :  { %19533 = vst [vmem:[#allocation461_spill] sm:$0xff] %v15835_v58  ;;  %v15839_v30 = vpop.f32.mrf.mxu1 }
 0x487   :  { %19534 = vst [vmem:[#allocation462_spill] sm:$0xff] %v15837_v43 }
 0x488   :  { %19535 = vst [vmem:[#allocation463_spill] sm:$0xff] %v15839_v30 }
 0x48c   :  { %v15841_v34 = vpop.f32.mrf.mxu2 }
 0x48d   :  { %19536 = vst [vmem:[#allocation464_spill] sm:$0xff] %v15841_v34  ;;  %v15843_v35 = vpop.f32.mrf.mxu3  ;;  %v15845_v51 = vpop.f32.mrf.mxu0 }
 0x48e   :  { %19537 = vst [vmem:[#allocation465_spill] sm:$0xff] %v15843_v35  ;;  %v15847_v32 = vpop.f32.mrf.mxu1 }
 0x48f   :  { %19538 = vst [vmem:[#allocation466_spill] sm:$0xff] %v15845_v51 }
 0x490   :  { %19539 = vst [vmem:[#allocation467_spill] sm:$0xff] %v15847_v32 }
 0x491   :  { %10122 = vmatmul.msk.bf16.gmra.mxu0 %vm881_vm0, %v13382_v31  ;;  %10148 = vmatmul.msk.bf16.gmra.mxu1 %vm881_vm0, %v13382_v31 }
 0x492   :  { %10174 = vmatmul.msk.bf16.gmra.mxu2 %vm881_vm0, %v13382_v31  ;;  %10200 = vmatmul.msk.bf16.gmra.mxu3 %vm881_vm0, %v13382_v31  ;;  %v13383_v31 = vld [vmem:[%s19065_s0 + $0xa0] sm:$0xff] }
 0x494   :  { %v15856_v30 = vpop.f32.mrf.mxu2 }
 0x495   :  { %19540 = vst [vmem:[#allocation468_spill] sm:$0xff] %v15856_v30  ;;  %v15858_v34 = vpop.f32.mrf.mxu3  ;;  %v15860_v35 = vpop.f32.mrf.mxu0 }
 0x496   :  { %19541 = vst [vmem:[#allocation469_spill] sm:$0xff] %v15858_v34  ;;  %v15862_v51 = vpop.f32.mrf.mxu1 }
 0x497   :  { %19542 = vst [vmem:[#allocation470_spill] sm:$0xff] %v15860_v35  ;;  %v12784_v35 = vld [vmem:[%s19064_s1 + $0x74] sm:$0xf0] }
 0x498   :  { %19543 = vst [vmem:[#allocation471_spill] sm:$0xff] %v15862_v51 }
 0x49c   :  { %v15864_v32 = vpop.f32.mrf.mxu2 }
 0x49d   :  { %19544 = vst [vmem:[#allocation472_spill] sm:$0xff] %v15864_v32  ;;  %v15866_v43 = vpop.f32.mrf.mxu3  ;;  %v15868_v58 = vpop.f32.mrf.mxu0 }
 0x49e   :  { %19545 = vst [vmem:[#allocation473_spill] sm:$0xff] %v15866_v43  ;;  %v15870_v47 = vpop.f32.mrf.mxu1 }
 0x49f   :  { %19546 = vst [vmem:[#allocation474_spill] sm:$0xff] %v15868_v58 }
 0x4a0   :  { %19547 = vst [vmem:[#allocation475_spill] sm:$0xff] %v15870_v47  ;;  %v9505_v47 = vld [vmem:[%s19064_s1 + $0x38] sm:$0xf] }
 0x4a1   :  { %10123 = vmatmul.msk.bf16.gmra.mxu0 %vm881_vm0, %v13383_v31  ;;  %10149 = vmatmul.msk.bf16.gmra.mxu1 %vm881_vm0, %v13383_v31  ;;  %v9506_v34 = vor.u32 %v12784_v35, %v9505_v47  ;;  %v9499_v35 = vld [vmem:[%s19064_s1 + $0x70] sm:$0xf0] }
 0x4a2   :  { %10175 = vmatmul.msk.bf16.gmra.mxu2 %vm881_vm0, %v13383_v31  ;;  %10201 = vmatmul.msk.bf16.gmra.mxu3 %vm881_vm0, %v13383_v31  ;;  %v12776_v31 = vld [vmem:[%s19064_s1 + $0x3c] sm:$0xf]  ;;  %v9502_v47 = vor.u32 %v12775_v29, %v9499_v35 }
 0x4a3   :  { %2913 = vmatpush.bf16.msrb.mxu2 %v9506_v34 }
 0x4a4   :  { %v15879_v51 = vpop.f32.mrf.mxu2  ;;  %2774 = vmatpush.bf16.msrb.mxu1 %v9502_v47 }
 0x4a5   :  { %19548 = vst [vmem:[#allocation476_spill] sm:$0xff] %v15879_v51  ;;  %v15881_v32 = vpop.f32.mrf.mxu3  ;;  %v15883_v43 = vpop.f32.mrf.mxu0 }
 0x4a6   :  { %19549 = vst [vmem:[#allocation477_spill] sm:$0xff] %v15881_v32  ;;  %v15885_v58 = vpop.f32.mrf.mxu1  ;;  %v9507_v32 = vld [vmem:[%s19064_s1 + $0x78] sm:$0xf0] }
 0x4a7   :  { %19550 = vst [vmem:[#allocation478_spill] sm:$0xff] %v15883_v43  ;;  %v12783_v43 = vld [vmem:[%s19064_s1 + $0x6c] sm:$0xf0]  ;;  %v9510_v51 = vor.u32 %v12776_v31, %v9507_v32 }
 0x4a8   :  { %19551 = vst [vmem:[#allocation479_spill] sm:$0xff] %v15885_v58  ;;  %v9497_v58 = vld [vmem:[%s19064_s1 + $0x30] sm:$0xf] }
 0x4a9   :  { %v9498_v30 = vor.u32 %v12783_v43, %v9497_v58  ;;  %3052 = vmatpush.bf16.msrb.mxu3 %v9510_v51  ;;  %v13384_v58 = vld [vmem:[%s19065_s0 + $0xa8] sm:$0xff] }
 0x4ab   :  { %2635 = vmatpush.bf16.msrb.mxu0 %v9498_v30 }
 0x4ac   :  { %v15911_v8 = vpop.f32.mrf.mxu2 }
 0x4ad   :  { %v15913_v56 = vpop.f32.mrf.mxu3  ;;  %v15915_v44 = vpop.f32.mrf.mxu0 }
 0x4ae   :  { %v15917_v32 = vpop.f32.mrf.mxu1 }
 0x4b1   :  { %10124 = vmatmul.msk.bf16.gmra.mxu0 %vm881_vm0, %v13384_v58  ;;  %10150 = vmatmul.msk.bf16.gmra.mxu1 %vm881_vm0, %v13384_v58 }
 0x4b2   :  { %10176 = vmatmul.msk.bf16.gmra.mxu2 %vm881_vm0, %v13384_v58  ;;  %10202 = vmatmul.msk.bf16.gmra.mxu3 %vm881_vm0, %v13384_v58  ;;  %v13385_v58 = vld [vmem:[%s19065_s0 + $0xb0] sm:$0xff] }
 0x4b4   :  { %v15926_v51 = vpop.f32.mrf.mxu2 }
 0x4b5   :  { %19552 = vst [vmem:[#allocation480_spill] sm:$0xff] %v15926_v51  ;;  %v15928_v29 = vpop.f32.mrf.mxu3  ;;  %v15930_v34 = vpop.f32.mrf.mxu0 }
 0x4b6   :  { %19553 = vst [vmem:[#allocation481_spill] sm:$0xff] %v15928_v29  ;;  %v15932_v43 = vpop.f32.mrf.mxu1 }
 0x4b7   :  { %19554 = vst [vmem:[#allocation482_spill] sm:$0xff] %v15930_v34 }
 0x4b8   :  { %19555 = vst [vmem:[#allocation483_spill] sm:$0xff] %v15932_v43 }
 0x4bc   :  { %v15934_v30 = vpop.f32.mrf.mxu2 }
 0x4bd   :  { %19556 = vst [vmem:[#allocation484_spill] sm:$0xff] %v15934_v30  ;;  %v15936_v31 = vpop.f32.mrf.mxu3  ;;  %v15938_v35 = vpop.f32.mrf.mxu0 }
 0x4be   :  { %19557 = vst [vmem:[#allocation485_spill] sm:$0xff] %v15936_v31  ;;  %v15940_v47 = vpop.f32.mrf.mxu1 }
 0x4bf   :  { %19558 = vst [vmem:[#allocation486_spill] sm:$0xff] %v15938_v35 }
 0x4c0   :  { %19559 = vst [vmem:[#allocation487_spill] sm:$0xff] %v15940_v47 }
 0x4c1   :  { %10125 = vmatmul.msk.bf16.gmra.mxu0 %vm881_vm0, %v13385_v58  ;;  %10151 = vmatmul.msk.bf16.gmra.mxu1 %vm881_vm0, %v13385_v58 }
 0x4c2   :  { %10177 = vmatmul.msk.bf16.gmra.mxu2 %vm881_vm0, %v13385_v58  ;;  %10203 = vmatmul.msk.bf16.gmra.mxu3 %vm881_vm0, %v13385_v58  ;;  %v13386_v58 = vld [vmem:[%s19065_s0 + $0xb8] sm:$0xff] }
 0x4c4   :  { %v15949_v43 = vpop.f32.mrf.mxu2 }
 0x4c5   :  { %19560 = vst [vmem:[#allocation488_spill] sm:$0xff] %v15949_v43  ;;  %v15951_v30 = vpop.f32.mrf.mxu3  ;;  %v15953_v31 = vpop.f32.mrf.mxu0 }
 0x4c6   :  { %19561 = vst [vmem:[#allocation489_spill] sm:$0xff] %v15951_v30  ;;  %v15955_v35 = vpop.f32.mrf.mxu1 }
 0x4c7   :  { %19562 = vst [vmem:[#allocation490_spill] sm:$0xff] %v15953_v31 }
 0x4c8   :  { %19563 = vst [vmem:[#allocation491_spill] sm:$0xff] %v15955_v35 }
 0x4cc   :  { %v15957_v47 = vpop.f32.mrf.mxu2 }
 0x4cd   :  { %19564 = vst [vmem:[#allocation492_spill] sm:$0xff] %v15957_v47  ;;  %v15959_v34 = vpop.f32.mrf.mxu3  ;;  %v15961_v29 = vpop.f32.mrf.mxu0 }
 0x4ce   :  { %19565 = vst [vmem:[#allocation493_spill] sm:$0xff] %v15959_v34  ;;  %v15963_v51 = vpop.f32.mrf.mxu1 }
 0x4cf   :  { %19566 = vst [vmem:[#allocation494_spill] sm:$0xff] %v15961_v29 }
 0x4d0   :  { %19567 = vst [vmem:[#allocation495_spill] sm:$0xff] %v15963_v51 }
 0x4d1   :  { %10126 = vmatmul.msk.bf16.gmra.mxu0 %vm881_vm0, %v13386_v58  ;;  %10152 = vmatmul.msk.bf16.gmra.mxu1 %vm881_vm0, %v13386_v58 }
 0x4d2   :  { %10178 = vmatmul.msk.bf16.gmra.mxu2 %vm881_vm0, %v13386_v58  ;;  %10204 = vmatmul.msk.bf16.gmra.mxu3 %vm881_vm0, %v13386_v58  ;;  %v13387_v58 = vld [vmem:[%s19065_s0 + $0xc0] sm:$0xff] }
 0x4d4   :  { %v15972_v35 = vpop.f32.mrf.mxu2 }
 0x4d5   :  { %19568 = vst [vmem:[#allocation496_spill] sm:$0xff] %v15972_v35  ;;  %v15974_v47 = vpop.f32.mrf.mxu3  ;;  %v15976_v34 = vpop.f32.mrf.mxu0 }
 0x4d6   :  { %19569 = vst [vmem:[#allocation497_spill] sm:$0xff] %v15974_v47  ;;  %v15978_v29 = vpop.f32.mrf.mxu1  ;;  %v12928_v47 = vld [vmem:[%s19066_s3 + $0x178] sm:$0xff] }
 0x4d7   :  { %19570 = vst [vmem:[#allocation498_spill] sm:$0xff] %v15976_v34  ;;  %4718 = vmatpush.bf16.msra.mxu1 %v12928_v47 }
 0x4d8   :  { %19571 = vst [vmem:[#allocation499_spill] sm:$0xff] %v15978_v29 }
 0x4dc   :  { %v15980_v51 = vpop.f32.mrf.mxu2 }
 0x4dd   :  { %19572 = vst [vmem:[#allocation500_spill] sm:$0xff] %v15980_v51  ;;  %v15982_v31 = vpop.f32.mrf.mxu3  ;;  %v15984_v30 = vpop.f32.mrf.mxu0 }
 0x4de   :  { %19573 = vst [vmem:[#allocation501_spill] sm:$0xff] %v15982_v31  ;;  %v15986_v43 = vpop.f32.mrf.mxu1  ;;  %v12936_v31 = vld [vmem:[%s19066_s3 + $0x1b8] sm:$0xff] }
 0x4df   :  { %19574 = vst [vmem:[#allocation502_spill] sm:$0xff] %v15984_v30  ;;  %4737 = vmatpush.bf16.msra.mxu2 %v12936_v31 }
 0x4e0   :  { %19575 = vst [vmem:[#allocation503_spill] sm:$0xff] %v15986_v43  ;;  %v12944_v43 = vld [vmem:[%s19066_s3 + $0x1f8] sm:$0xff] }
 0x4e1   :  { %10127 = vmatmul.msk.bf16.gmra.mxu0 %vm881_vm0, %v13387_v58  ;;  %10153 = vmatmul.msk.bf16.gmra.mxu1 %vm881_vm0, %v13387_v58 }
 0x4e2   :  { %10179 = vmatmul.msk.bf16.gmra.mxu2 %vm881_vm0, %v13387_v58  ;;  %10205 = vmatmul.msk.bf16.gmra.mxu3 %vm881_vm0, %v13387_v58  ;;  %v12920_v58 = vld [vmem:[%s19066_s3 + $0x138] sm:$0xff] }
 0x4e3   :  { %4756 = vmatpush.bf16.msra.mxu3 %v12944_v43  ;;  %4699 = vmatpush.bf16.msra.mxu0 %v12920_v58 }
 0x4e4   :  { %v16001_v30 = vpop.f32.mrf.mxu2 }
 0x4e5   :  { %19576 = vst [vmem:[#allocation504_spill] sm:$0xff] %v16001_v30  ;;  %v16003_v51 = vpop.f32.mrf.mxu3  ;;  %v16005_v29 = vpop.f32.mrf.mxu0 }
 0x4e6   :  { %19577 = vst [vmem:[#allocation505_spill] sm:$0xff] %v16003_v51  ;;  %v16007_v34 = vpop.f32.mrf.mxu1 }
 0x4e7   :  { %19578 = vst [vmem:[#allocation506_spill] sm:$0xff] %v16005_v29 }
 0x4e8   :  { %19579 = vst [vmem:[#allocation507_spill] sm:$0xff] %v16007_v34  ;;  %v13388_v34 = vld [vmem:[%s19065_s0 + $0xc8] sm:$0xff] }
 0x4ec   :  { %v16015_v35 = vpop.f32.mrf.mxu2 }
 0x4ed   :  { %19580 = vst [vmem:[#allocation508_spill] sm:$0xff] %v16015_v35  ;;  %v16017_v31 = vpop.f32.mrf.mxu3 }
 0x4ee   :  { %19581 = vst [vmem:[#allocation509_spill] sm:$0xff] %v16017_v31  ;;  %v16019_v43 = vpop.f32.mrf.mxu0  ;;  %v16021_v51 = vpop.f32.mrf.mxu1 }
 0x4ef   :  { %19582 = vst [vmem:[#allocation510_spill] sm:$0xff] %v16019_v43 }
 0x4f0   :  { %19583 = vst [vmem:[#allocation511_spill] sm:$0xff] %v16021_v51 }
 0x4f1   :  { %10128 = vmatmul.msk.bf16.gmra.mxu0 %vm881_vm0, %v13388_v34  ;;  %10154 = vmatmul.msk.bf16.gmra.mxu1 %vm881_vm0, %v13388_v34 }
 0x4f2   :  { %10180 = vmatmul.msk.bf16.gmra.mxu2 %vm881_vm0, %v13388_v34  ;;  %10206 = vmatmul.msk.bf16.gmra.mxu3 %vm881_vm0, %v13388_v34 }
 0x4f5   :  { %v16030_v47 = vpop.f32.mrf.mxu2  ;;  %v16032_v58 = vpop.f32.mrf.mxu3 }
 0x4f6   :  { %19584 = vst [vmem:[#allocation512_spill] sm:$0xff] %v16032_v58  ;;  %v16034_v31 = vpop.f32.mrf.mxu0  ;;  %v16036_v43 = vpop.f32.mrf.mxu1 }
 0x4f7   :  { %19585 = vst [vmem:[#allocation513_spill] sm:$0xff] %v16034_v31 }
 0x4f8   :  { %19586 = vst [vmem:[#allocation514_spill] sm:$0xff] %v16036_v43 }
 0x4fd   :  { %v16038_v51 = vpop.f32.mrf.mxu2  ;;  %v16040_v35 = vpop.f32.mrf.mxu3 }
 0x4fe   :  { %19587 = vst [vmem:[#allocation515_spill] sm:$0xff] %v16038_v51  ;;  %v16042_v29 = vpop.f32.mrf.mxu0  ;;  %v16044_v30 = vpop.f32.mrf.mxu1 }
 0x4ff   :  { %19588 = vst [vmem:[#allocation516_spill] sm:$0xff] %v16040_v35 }
 0x500   :  { %19589 = vst [vmem:[#allocation517_spill] sm:$0xff] %v16042_v29 }
 0x501   :  { %19590 = vst [vmem:[#allocation518_spill] sm:$0xff] %v16044_v30  ;;  %10207 = vmatmul.msk.bf16.vlgmr.msrb.gmra.mxu0 %vm881_vm0, %v15229_v21  ;;  %10233 = vmatmul.msk.bf16.vlgmr.msrb.gmra.mxu1 %vm881_vm0, %v15229_v21 }
 0x502   :  { %10259 = vmatmul.msk.bf16.vlgmr.msrb.gmra.mxu2 %vm881_vm0, %v15229_v21  ;;  %10285 = vmatmul.msk.bf16.vlgmr.msrb.gmra.mxu3 %vm881_vm0, %v15229_v21 }
 0x505   :  { %v16054_v34 = vpop.f32.mrf.mxu2  ;;  %v16056_v51 = vpop.f32.mrf.mxu3 }
 0x506   :  { %v16058_v35 = vpop.f32.mrf.mxu0  ;;  %v16060_v29 = vpop.f32.mrf.mxu1 }
 0x507   :  { %19591 = vst [vmem:[#allocation519_spill] sm:$0xff] %v16058_v35 }
 0x508   :  { %19592 = vst [vmem:[#allocation520_spill] sm:$0xff] %v16060_v29  ;;  %v12943_v29 = vld [vmem:[%s19066_s3 + $0x1f0] sm:$0xff] }
 0x509   :  { %4757 = vmatpush.bf16.msra.mxu3 %v12943_v29 }
 0x50d   :  { %v16062_v30 = vpop.f32.mrf.mxu2  ;;  %v16064_v43 = vpop.f32.mrf.mxu3 }
 0x50e   :  { %19593 = vst [vmem:[#allocation521_spill] sm:$0xff] %v16062_v30  ;;  %v16066_v31 = vpop.f32.mrf.mxu0  ;;  %v16068_v58 = vpop.f32.mrf.mxu1 }
 0x50f   :  { %19594 = vst [vmem:[#allocation522_spill] sm:$0xff] %v16064_v43 }
 0x510   :  { %19595 = vst [vmem:[#allocation523_spill] sm:$0xff] %v16066_v31 }
 0x511   :  { %19596 = vst [vmem:[#allocation524_spill] sm:$0xff] %v16068_v58  ;;  %10208 = vmatmul.msk.bf16.gmra.mxu0 %vm881_vm0, %v15258_v27  ;;  %10234 = vmatmul.msk.bf16.gmra.mxu1 %vm881_vm0, %v15258_v27  ;;  %v12935_v58 = vld [vmem:[%s19066_s3 + $0x1b0] sm:$0xff] }
 0x512   :  { %10260 = vmatmul.msk.bf16.gmra.mxu2 %vm881_vm0, %v15258_v27  ;;  %10286 = vmatmul.msk.bf16.gmra.mxu3 %vm881_vm0, %v15258_v27  ;;  %v12919_v27 = vld [vmem:[%s19066_s3 + $0x130] sm:$0xff] }
 0x513   :  { %4738 = vmatpush.bf16.msra.mxu2 %v12935_v58  ;;  %4700 = vmatpush.bf16.msra.mxu0 %v12919_v27 }
 0x515   :  { %v16078_v21 = vpop.f32.mrf.mxu2  ;;  %v16080_v30 = vpop.f32.mrf.mxu3 }
 0x516   :  { %19597 = vst [vmem:[#allocation525_spill] sm:$0xff] %v16078_v21  ;;  %v16082_v43 = vpop.f32.mrf.mxu0  ;;  %v16084_v31 = vpop.f32.mrf.mxu1 }
 0x517   :  { %19598 = vst [vmem:[#allocation526_spill] sm:$0xff] %v16080_v30  ;;  %v12927_v30 = vld [vmem:[%s19066_s3 + $0x170] sm:$0xff] }
 0x518   :  { %19599 = vst [vmem:[#allocation527_spill] sm:$0xff] %v16082_v43  ;;  %4719 = vmatpush.bf16.msra.mxu1 %v12927_v30 }
 0x519   :  { %19600 = vst [vmem:[#allocation528_spill] sm:$0xff] %v16084_v31 }
 0x51d   :  { %v16098_v31 = vpop.f32.mrf.mxu2  ;;  %v16100_v43 = vpop.f32.mrf.mxu3 }
 0x51e   :  { %19601 = vst [vmem:[#allocation529_spill] sm:$0xff] %v16098_v31  ;;  %v16102_v21 = vpop.f32.mrf.mxu0  ;;  %v16104_v35 = vpop.f32.mrf.mxu1 }
 0x51f   :  { %19602 = vst [vmem:[#allocation530_spill] sm:$0xff] %v16100_v43 }
 0x520   :  { %19603 = vst [vmem:[#allocation531_spill] sm:$0xff] %v16102_v21 }
 0x521   :  { %19604 = vst [vmem:[#allocation532_spill] sm:$0xff] %v16104_v35  ;;  %10209 = vmatmul.msk.bf16.gmra.mxu0 %vm881_vm0, %v15299_v41  ;;  %10235 = vmatmul.msk.bf16.gmra.mxu1 %vm881_vm0, %v15299_v41 }
 0x522   :  { %10261 = vmatmul.msk.bf16.gmra.mxu2 %vm881_vm0, %v15299_v41  ;;  %10287 = vmatmul.msk.bf16.gmra.mxu3 %vm881_vm0, %v15299_v41 }
 0x525   :  { %v16114_v29 = vpop.f32.mrf.mxu2  ;;  %v16116_v30 = vpop.f32.mrf.mxu3 }
 0x526   :  { %19605 = vst [vmem:[#allocation533_spill] sm:$0xff] %v16116_v30  ;;  %v16118_v58 = vpop.f32.mrf.mxu0  ;;  %v16120_v27 = vpop.f32.mrf.mxu1 }
 0x527   :  { %19606 = vst [vmem:[#allocation534_spill] sm:$0xff] %v16118_v58 }
 0x528   :  { %19607 = vst [vmem:[#allocation535_spill] sm:$0xff] %v16120_v27 }
 0x52d   :  { %v16122_v35 = vpop.f32.mrf.mxu2  ;;  %v16124_v21 = vpop.f32.mrf.mxu3 }
 0x52e   :  { %19608 = vst [vmem:[#allocation536_spill] sm:$0xff] %v16122_v35  ;;  %v16126_v43 = vpop.f32.mrf.mxu0  ;;  %v16128_v31 = vpop.f32.mrf.mxu1 }
 0x52f   :  { %19609 = vst [vmem:[#allocation537_spill] sm:$0xff] %v16124_v21 }
 0x530   :  { %19610 = vst [vmem:[#allocation538_spill] sm:$0xff] %v16126_v43 }
 0x531   :  { %19611 = vst [vmem:[#allocation539_spill] sm:$0xff] %v16128_v31  ;;  %10210 = vmatmul.msk.bf16.gmra.mxu0 %vm881_vm0, %v15340_v19  ;;  %10236 = vmatmul.msk.bf16.gmra.mxu1 %vm881_vm0, %v15340_v19 }
 0x532   :  { %10262 = vmatmul.msk.bf16.gmra.mxu2 %vm881_vm0, %v15340_v19  ;;  %10288 = vmatmul.msk.bf16.gmra.mxu3 %vm881_vm0, %v15340_v19 }
 0x535   :  { %v16138_v41 = vpop.f32.mrf.mxu2  ;;  %v16140_v35 = vpop.f32.mrf.mxu3 }
 0x536   :  { %19612 = vst [vmem:[#allocation540_spill] sm:$0xff] %v16140_v35  ;;  %v16142_v21 = vpop.f32.mrf.mxu0  ;;  %v16144_v43 = vpop.f32.mrf.mxu1 }
 0x537   :  { %19613 = vst [vmem:[#allocation541_spill] sm:$0xff] %v16142_v21 }
 0x538   :  { %19614 = vst [vmem:[#allocation542_spill] sm:$0xff] %v16144_v43  ;;  %v12942_v43 = vld [vmem:[%s19066_s3 + $0x1e8] sm:$0xff] }
 0x539   :  { %4758 = vmatpush.bf16.msra.mxu3 %v12942_v43 }
 0x53d   :  { %v16146_v31 = vpop.f32.mrf.mxu2  ;;  %v16148_v27 = vpop.f32.mrf.mxu3 }
 0x53e   :  { %19615 = vst [vmem:[#allocation543_spill] sm:$0xff] %v16146_v31  ;;  %v16150_v58 = vpop.f32.mrf.mxu0  ;;  %v16152_v30 = vpop.f32.mrf.mxu1 }
 0x53f   :  { %19616 = vst [vmem:[#allocation544_spill] sm:$0xff] %v16148_v27 }
 0x540   :  { %19617 = vst [vmem:[#allocation545_spill] sm:$0xff] %v16150_v58 }
 0x541   :  { %19618 = vst [vmem:[#allocation546_spill] sm:$0xff] %v16152_v30  ;;  %10211 = vmatmul.msk.bf16.gmra.mxu0 %vm881_vm0, %v15369_v53  ;;  %10237 = vmatmul.msk.bf16.gmra.mxu1 %vm881_vm0, %v15369_v53  ;;  %v12934_v30 = vld [vmem:[%s19066_s3 + $0x1a8] sm:$0xff] }
 0x542   :  { %10263 = vmatmul.msk.bf16.gmra.mxu2 %vm881_vm0, %v15369_v53  ;;  %10289 = vmatmul.msk.bf16.gmra.mxu3 %vm881_vm0, %v15369_v53 }
 0x543   :  { %4739 = vmatpush.bf16.msra.mxu2 %v12934_v30 }
 0x545   :  { %v16162_v19 = vpop.f32.mrf.mxu2  ;;  %v16164_v31 = vpop.f32.mrf.mxu3 }
 0x546   :  { %19619 = vst [vmem:[#allocation547_spill] sm:$0xff] %v16162_v19  ;;  %v16166_v27 = vpop.f32.mrf.mxu0  ;;  %v16168_v58 = vpop.f32.mrf.mxu1 }
 0x547   :  { %19620 = vst [vmem:[#allocation548_spill] sm:$0xff] %v16164_v31 }
 0x548   :  { %19621 = vst [vmem:[#allocation549_spill] sm:$0xff] %v16166_v27  ;;  %v12926_v27 = vld [vmem:[%s19066_s3 + $0x168] sm:$0xff] }
 0x549   :  { %19622 = vst [vmem:[#allocation550_spill] sm:$0xff] %v16168_v58  ;;  %v12918_v58 = vld [vmem:[%s19066_s3 + $0x128] sm:$0xff]  ;;  %4720 = vmatpush.bf16.msra.mxu1 %v12926_v27 }
 0x54a   :  { %4701 = vmatpush.bf16.msra.mxu0 %v12918_v58 }
 0x54d   :  { %v16176_v21 = vpop.f32.mrf.mxu2  ;;  %v16178_v53 = vpop.f32.mrf.mxu3 }
 0x54e   :  { %19623 = vst [vmem:[#allocation551_spill] sm:$0xff] %v16176_v21  ;;  %v16180_v19 = vpop.f32.mrf.mxu0  ;;  %v16182_v31 = vpop.f32.mrf.mxu1 }
 0x54f   :  { %19624 = vst [vmem:[#allocation552_spill] sm:$0xff] %v16178_v53 }
 0x550   :  { %19625 = vst [vmem:[#allocation553_spill] sm:$0xff] %v16180_v19 }
 0x551   :  { %19626 = vst [vmem:[#allocation554_spill] sm:$0xff] %v16182_v31  ;;  %10212 = vmatmul.msk.bf16.gmra.mxu0 %vm881_vm0, %v15398_v22  ;;  %10238 = vmatmul.msk.bf16.gmra.mxu1 %vm881_vm0, %v15398_v22 }
 0x552   :  { %10264 = vmatmul.msk.bf16.gmra.mxu2 %vm881_vm0, %v15398_v22  ;;  %10290 = vmatmul.msk.bf16.gmra.mxu3 %vm881_vm0, %v15398_v22 }
 0x555   :  { %v16198_v43 = vpop.f32.mrf.mxu2  ;;  %v16200_v30 = vpop.f32.mrf.mxu3 }
 0x556   :  { %19627 = vst [vmem:[#allocation555_spill] sm:$0xff] %v16198_v43  ;;  %v16202_v31 = vpop.f32.mrf.mxu0  ;;  %v16204_v19 = vpop.f32.mrf.mxu1 }
 0x557   :  { %19628 = vst [vmem:[#allocation556_spill] sm:$0xff] %v16200_v30 }
 0x558   :  { %19629 = vst [vmem:[#allocation557_spill] sm:$0xff] %v16202_v31 }
 0x559   :  { %19630 = vst [vmem:[#allocation558_spill] sm:$0xff] %v16204_v19 }
 0x55d   :  { %v16206_v53 = vpop.f32.mrf.mxu2  ;;  %v16208_v27 = vpop.f32.mrf.mxu3 }
 0x55e   :  { %19631 = vst [vmem:[#allocation559_spill] sm:$0xff] %v16206_v53  ;;  %v16210_v21 = vpop.f32.mrf.mxu0  ;;  %v16212_v35 = vpop.f32.mrf.mxu1 }
 0x55f   :  { %19632 = vst [vmem:[#allocation560_spill] sm:$0xff] %v16208_v27 }
 0x560   :  { %19633 = vst [vmem:[#allocation561_spill] sm:$0xff] %v16210_v21 }
 0x561   :  { %19634 = vst [vmem:[#allocation562_spill] sm:$0xff] %v16212_v35  ;;  %10213 = vmatmul.msk.bf16.gmra.mxu0 %vm881_vm0, %v15451_v60  ;;  %10239 = vmatmul.msk.bf16.gmra.mxu1 %vm881_vm0, %v15451_v60 }
 0x562   :  { %10265 = vmatmul.msk.bf16.gmra.mxu2 %vm881_vm0, %v15451_v60  ;;  %10291 = vmatmul.msk.bf16.gmra.mxu3 %vm881_vm0, %v15451_v60 }
 0x565   :  { %v16222_v22 = vpop.f32.mrf.mxu2  ;;  %v16224_v58 = vpop.f32.mrf.mxu3 }
 0x566   :  { %19635 = vst [vmem:[#allocation563_spill] sm:$0xff] %v16222_v22  ;;  %v16226_v27 = vpop.f32.mrf.mxu0  ;;  %v16228_v21 = vpop.f32.mrf.mxu1 }
 0x567   :  { %19636 = vst [vmem:[#allocation564_spill] sm:$0xff] %v16224_v58 }
 0x568   :  { %19637 = vst [vmem:[#allocation565_spill] sm:$0xff] %v16226_v27 }
 0x569   :  { %19638 = vst [vmem:[#allocation566_spill] sm:$0xff] %v16228_v21 }
 0x56d   :  { %v16230_v35 = vpop.f32.mrf.mxu2  ;;  %v16232_v53 = vpop.f32.mrf.mxu3 }
 0x56e   :  { %19639 = vst [vmem:[#allocation567_spill] sm:$0xff] %v16230_v35  ;;  %v16234_v19 = vpop.f32.mrf.mxu0  ;;  %v16236_v31 = vpop.f32.mrf.mxu1 }
 0x56f   :  { %19640 = vst [vmem:[#allocation568_spill] sm:$0xff] %v16232_v53 }
 0x570   :  { %19641 = vst [vmem:[#allocation569_spill] sm:$0xff] %v16234_v19 }
 0x571   :  { %19642 = vst [vmem:[#allocation570_spill] sm:$0xff] %v16236_v31  ;;  %10214 = vmatmul.msk.bf16.gmra.mxu0 %vm881_vm0, %v15480_v24  ;;  %10240 = vmatmul.msk.bf16.gmra.mxu1 %vm881_vm0, %v15480_v24  ;;  %v3808_v31 = vld [vmem:[%s19067_s2] sm:$0xf] }
 0x572   :  { %10266 = vmatmul.msk.bf16.gmra.mxu2 %vm881_vm0, %v15480_v24  ;;  %10292 = vmatmul.msk.bf16.gmra.mxu3 %vm881_vm0, %v15480_v24  ;;  %v3184_v24 = vmax.f32 %v13793_v1, %v15502_v36  ;;  %v16264_v22 = vperm.slane %v3808_v31, 0  ;;  %v16269_v30 = vperm.slane %v3808_v31, 1  ;;  %v12933_v36 = vld [vmem:[%s19066_s3 + $0x1a0] sm:$0xff] }
 0x573   :  { %4740 = vmatpush.bf16.msra.mxu2 %v12933_v36 }
 0x575   :  { %v16246_v60 = vpop.f32.mrf.mxu2  ;;  %v16248_v35 = vpop.f32.mrf.mxu3 }
 0x576   :  { %19643 = vst [vmem:[#allocation571_spill] sm:$0xff] %v16246_v60  ;;  %v16250_v53 = vpop.f32.mrf.mxu0  ;;  %v16252_v19 = vpop.f32.mrf.mxu1 }
 0x577   :  { %19644 = vst [vmem:[#allocation572_spill] sm:$0xff] %v16248_v35 }
 0x578   :  { %19645 = vst [vmem:[#allocation573_spill] sm:$0xff] %v16250_v53 }
 0x579   :  { %19646 = vst [vmem:[#allocation574_spill] sm:$0xff] %v16252_v19  ;;  %v3185_v19 = vmax.f32 %v13795_v2, %v15504_v26 }
 0x57d   :  { %v16257_v21 = vpop.f32.mrf.mxu2  ;;  %v16259_v27 = vpop.f32.mrf.mxu3 }
 0x57e   :  { %19647 = vst [vmem:[#allocation575_spill] sm:$0xff] %v16257_v21  ;;  %v2637_v58 = vpop.f32.mrf.mxu0  ;;  %v2776_v35 = vpop.f32.mrf.mxu1 }
 0x57f   :  { %19648 = vst [vmem:[#allocation576_spill] sm:$0xff] %v16259_v27  ;;  %v3188_v60 = vmax.f32 %v14670_v33, %v2637_v58  ;;  %v3189_v53 = vmax.f32 %v14672_v52, %v2776_v35  ;;  %v3186_v52 = vmax.f32 %v13805_v3, %v15519_v28  ;;  %v3187_v35 = vmax.f32 %v13807_v4, %v15521_v50 }
 0x580   :  { %v16294_v28 = vperm.slane %v3808_v31, 3  ;;  %v3193_v4 = vmax.f32 %v13811_v6, %v15525_v20  ;;  %v12925_v6 = vld [vmem:[%s19066_s3 + $0x160] sm:$0xff] }
 0x581   :  { %v3600_v43 = vmax.f32 %v3184_v24, %v3188_v60  ;;  %10215 = vmatmul.msk.bf16.gmra.mxu0 %vm881_vm0, %v15509_v18  ;;  %v3601_v27 = vmax.f32 %v3185_v19, %v3189_v53  ;;  %10241 = vmatmul.msk.bf16.gmra.mxu1 %vm881_vm0, %v15509_v18 }
 0x582   :  { %10267 = vmatmul.msk.bf16.gmra.mxu2 %vm881_vm0, %v15509_v18  ;;  %10293 = vmatmul.msk.bf16.gmra.mxu3 %vm881_vm0, %v15509_v18 }
 0x583   :  { %v3818_v1 = vadd.f32 %v16264_v22, %v3600_v43  ;;  %v3819_v2 = vadd.f32 %v16269_v30, %v3601_v27  ;;  %v16289_v43 = vperm.slane %v3808_v31, 2  ;;  %v3192_v27 = vmax.f32 %v13809_v5, %v15523_v23  ;;  %4721 = vmatpush.bf16.msra.mxu1 %v12925_v6 }
 0x585   :  { %v4026_v33 = vmax.f32 %v3818_v1, 0.0  ;;  %v2915_v26 = vpop.f32.mrf.mxu2  ;;  %v4027_v19 = vmax.f32 %v3819_v2, 0.0  ;;  %v3054_v18 = vpop.f32.mrf.mxu3 }
 0x586   :  { %v3190_v53 = vmax.f32 %v14682_v63, %v2915_v26  ;;  %v2639_v58 = vpop.f32.mrf.mxu0  ;;  %v3191_v3 = vmax.f32 %v14684_v54, %v3054_v18  ;;  %v2778_v24 = vpop.f32.mrf.mxu1  ;;  %v12941_v54 = vld [vmem:[%s19066_s3 + $0x1e0] sm:$0xff] }
 0x587   :  { %v3196_v60 = vmax.f32 %v14686_v40, %v2639_v58  ;;  %v4234_v50 = vpack.c.bf16 %v4027_v19, %v4026_v33  ;;  %v3197_v1 = vmax.f32 %v14688_v48, %v2778_v24  ;;  %v12917_v40 = vld [vmem:[%s19066_s3 + $0x120] sm:$0xff]  ;;  %4759 = vmatpush.bf16.msra.mxu3 %v12941_v54  ;;  %v3195_v19 = vmax.f32 %v13820_v9, %v15529_v25 }
 0x588   :  { %v3602_v63 = vmax.f32 %v3186_v52, %v3190_v53  ;;  %v3603_v2 = vmax.f32 %v3187_v35, %v3191_v3  ;;  %4702 = vmatpush.bf16.msra.mxu0 %v12917_v40  ;;  %v3194_v35 = vmax.f32 %v13813_v7, %v15527_v15  ;;  %v3201_v7 = vmax.f32 %v13824_v11, %v15533_v57 }
 0x589   :  { %v3604_v26 = vmax.f32 %v3192_v27, %v3196_v60  ;;  %v3605_v5 = vmax.f32 %v3193_v4, %v3197_v1  ;;  %v4783_v25 = vunpack.c.l.b16 %v4234_v50  ;;  %v3202_v54 = vmax.f32 %v13834_v12, %v15548_v37  ;;  %v19649_v12 = vld [vmem:[#allocation196_spill] sm:$0xff] }
 0x58a   :  { %v3820_v21 = vadd.f32 %v16289_v43, %v3602_v63  ;;  %v3821_v23 = vadd.f32 %v16294_v28, %v3603_v2  ;;  %v3203_v40 = vmax.f32 %v13836_v13, %v15550_v38 }
 0x58b   :  { %v3822_v48 = vadd.f32 %v16264_v22, %v3604_v26  ;;  %v3823_v31 = vadd.f32 %v16269_v30, %v3605_v5 }
 0x58c   :  { %v4028_v20 = vmax.f32 %v3820_v21, 0.0  ;;  %v4029_v52 = vmax.f32 %v3821_v23, 0.0  ;;  %v3200_v21 = vmax.f32 %v13822_v10, %v15531_v59 }
 0x58d   :  { %v4030_v33 = vmax.f32 %v3822_v48, 0.0  ;;  %v2917_v36 = vpop.f32.mrf.mxu2  ;;  %v4031_v53 = vmax.f32 %v3823_v31, 0.0  ;;  %v3056_v58 = vpop.f32.mrf.mxu3 }
 0x58e   :  { %v3198_v18 = vmax.f32 %v14690_v49, %v2917_v36  ;;  %v2642_v27 = vpop.f32.mrf.mxu0  ;;  %v4235_v3 = vpack.c.bf16 %v4029_v52, %v4028_v20  ;;  %v3199_v60 = vmax.f32 %v14692_v46, %v3056_v58  ;;  %v2781_v4 = vpop.f32.mrf.mxu1  ;;  %v4784_v49 = vunpack.c.h.b16 %v4234_v50 }
 0x58f   :  { %v3204_v24 = vmax.f32 %v14694_v62, %v2642_v27  ;;  %v4236_v15 = vpack.c.bf16 %v4031_v53, %v4030_v33  ;;  %v3205_v9 = vmax.f32 %v14696_v55, %v2781_v4  ;;  %v3208_v20 = vmax.f32 %v13838_v14, %v15552_v16  ;;  %v19650_v53 = vld [vmem:[#allocation197_spill] sm:$0xff] }
 0x590   :  { %v3606_v63 = vmax.f32 %v3194_v35, %v3198_v18  ;;  %v3607_v1 = vmax.f32 %v3195_v19, %v3199_v60  ;;  %v4785_v35 = vunpack.c.l.b16 %v4235_v3  ;;  %v4786_v18 = vunpack.c.h.b16 %v4235_v3 }
 0x591   :  { %v3608_v2 = vmax.f32 %v3200_v21, %v3204_v24  ;;  %10216 = vmatmul.msk.bf16.gmra.mxu0 %vm881_vm0, %v15538_v45  ;;  %v4787_v10 = vunpack.c.l.b16 %v4236_v15  ;;  %v4788_v59 = vunpack.c.h.b16 %v4236_v15  ;;  %v3609_v62 = vmax.f32 %v3201_v7, %v3205_v9  ;;  %10242 = vmatmul.msk.bf16.gmra.mxu1 %vm881_vm0, %v15538_v45  ;;  %v19651_v21 = vld [vmem:[#allocation198_spill] sm:$0xff] }
 0x592   :  { %v3824_v46 = vadd.f32 %v16289_v43, %v3606_v63  ;;  %10268 = vmatmul.msk.bf16.gmra.mxu2 %vm881_vm0, %v15538_v45  ;;  %v3825_v11 = vadd.f32 %v16294_v28, %v3607_v1  ;;  %10294 = vmatmul.msk.bf16.gmra.mxu3 %vm881_vm0, %v15538_v45  ;;  %v3209_v45 = vmax.f32 %v13846_v17, %v15554_v61 }
 0x593   :  { %v3826_v55 = vadd.f32 %v16264_v22, %v3608_v2  ;;  %v3827_v50 = vadd.f32 %v16269_v30, %v3609_v62  ;;  %v16337_v26 = vpack.c.b16 %v4787_v10, %v4783_v25  ;;  %v16339_v5 = vpack.c.b16 %v4788_v59, %v4784_v49  ;;  %v19652_v2 = vld [vmem:[#allocation393_spill] sm:$0xff]  ;;  %v19653_v10 = vld [vmem:[#allocation2_spill] sm:$0xff]  ;;  %v19655_v62 = vld [vmem:[#allocation3_spill] sm:$0xff] }
 0x594   :  { %v4032_v57 = vmax.f32 %v3824_v46, 0.0  ;;  %v4033_v6 = vmax.f32 %v3825_v11, 0.0  ;;  %v3210_v59 = vmax.f32 %v19653_v10, %v19652_v2  ;;  %v19654_v46 = vld [vmem:[#allocation394_spill] sm:$0xff]  ;;  %v19667_v2 = vld [vmem:[#allocation399_spill] sm:$0xff] }
 0x595   :  { %v4034_v23 = vmax.f32 %v3826_v55, 0.0  ;;  %v2920_v48 = vpop.f32.mrf.mxu2  ;;  %v4035_v31 = vmax.f32 %v3827_v50, 0.0  ;;  %v3059_v33 = vpop.f32.mrf.mxu3  ;;  %v3211_v11 = vmax.f32 %v19655_v62, %v19654_v46  ;;  %v19668_v10 = vld [vmem:[#allocation7_spill] sm:$0xff] }
 0x596   :  { %v3206_v52 = vmax.f32 %v14706_v0, %v2920_v48  ;;  %v2644_v36 = vpop.f32.mrf.mxu0  ;;  %v4237_v19 = vpack.c.bf16 %v4033_v6, %v4032_v57  ;;  %v3207_v37 = vmax.f32 %v19649_v12, %v3059_v33  ;;  %v2783_v38 = vpop.f32.mrf.mxu1  ;;  %v19656_v57 = vld [vmem:[#allocation199_spill] sm:$0xff] }
 0x597   :  { %v3212_v13 = vmax.f32 %v19650_v53, %v2644_v36  ;;  %v4238_v58 = vpack.c.bf16 %v4035_v31, %v4034_v23  ;;  %v3213_v14 = vmax.f32 %v19651_v21, %v2783_v38  ;;  %v19657_v6 = vld [vmem:[#allocation395_spill] sm:$0xff]  ;;  %v19658_v23 = vld [vmem:[#allocation4_spill] sm:$0xff]  ;;  %v19663_v53 = vld [vmem:[#allocation202_spill] sm:$0xff] }
 0x598   :  { %v3610_v27 = vmax.f32 %v3202_v54, %v3206_v52  ;;  %v4789_v16 = vunpack.c.l.b16 %v4237_v19  ;;  %v4790_v60 = vunpack.c.h.b16 %v4237_v19  ;;  %v3611_v17 = vmax.f32 %v3203_v40, %v3207_v37  ;;  %v19660_v52 = vld [vmem:[#allocation201_spill] sm:$0xff] }
 0x599   :  { %v3612_v61 = vmax.f32 %v3208_v20, %v3212_v13  ;;  %v3613_v24 = vmax.f32 %v3209_v45, %v3213_v14  ;;  %v3216_v48 = vmax.f32 %v19658_v23, %v19657_v6  ;;  %v19659_v45 = vld [vmem:[#allocation200_spill] sm:$0xff]  ;;  %v19662_v19 = vld [vmem:[#allocation5_spill] sm:$0xff]  ;;  %v4791_v14 = vunpack.c.l.b16 %v4238_v58 }
 0x59a   :  { %v3828_v0 = vadd.f32 %v16289_v43, %v3610_v27  ;;  %v3829_v4 = vadd.f32 %v16294_v28, %v3611_v17  ;;  %v16356_v15 = vpack.c.b16 %v4789_v16, %v4785_v35  ;;  %v16358_v63 = vpack.c.b16 %v4790_v60, %v4786_v18  ;;  %v19661_v35 = vld [vmem:[#allocation396_spill] sm:$0xff]  ;;  %v19664_v21 = vld [vmem:[#allocation397_spill] sm:$0xff] }
 0x59b   :  { %v3830_v7 = vadd.f32 %v16264_v22, %v3612_v61  ;;  %v3831_v9 = vadd.f32 %v16269_v30, %v3613_v24  ;;  %v3217_v12 = vmax.f32 %v19662_v19, %v19661_v35  ;;  %v4792_v16 = vunpack.c.h.b16 %v4238_v58  ;;  %v19675_v35 = vld [vmem:[#allocation205_spill] sm:$0xff] }
 0x59c   :  { %v4036_v3 = vmax.f32 %v3828_v0, 0.0  ;;  %v4037_v25 = vmax.f32 %v3829_v4, 0.0 }
 0x59d   :  { %v4038_v49 = vmax.f32 %v3830_v7, 0.0  ;;  %v2922_v1 = vpop.f32.mrf.mxu2  ;;  %v4039_v55 = vmax.f32 %v3831_v9, 0.0  ;;  %v3061_v54 = vpop.f32.mrf.mxu3 }
 0x59e   :  { %v3214_v50 = vmax.f32 %v19656_v57, %v2922_v1  ;;  %v2647_v40 = vpop.f32.mrf.mxu0  ;;  %v4239_v20 = vpack.c.bf16 %v4037_v25, %v4036_v3  ;;  %v3215_v31 = vmax.f32 %v19659_v45, %v3061_v54  ;;  %v2786_v36 = vpop.f32.mrf.mxu1  ;;  %v19665_v25 = vld [vmem:[#allocation398_spill] sm:$0xff]  ;;  %v19670_v57 = vld [vmem:[#allocation8_spill] sm:$0xff]  ;;  %v19671_v54 = vld [vmem:[#allocation401_spill] sm:$0xff] }
 0x59f   :  { %v3220_v33 = vmax.f32 %v19660_v52, %v2647_v40  ;;  %v3221_v13 = vmax.f32 %v19663_v53, %v2786_v36  ;;  %v4240_v38 = vpack.c.bf16 %v4039_v55, %v4038_v49  ;;  %v19666_v49 = vld [vmem:[#allocation6_spill] sm:$0xff]  ;;  %v19669_v55 = vld [vmem:[#allocation400_spill] sm:$0xff]  ;;  %v19672_v40 = vld [vmem:[#allocation9_spill] sm:$0xff] }
 0x5a0   :  { %v3614_v37 = vmax.f32 %v3210_v59, %v3214_v50  ;;  %v3615_v18 = vmax.f32 %v3211_v11, %v3215_v31  ;;  %v3218_v1 = vmax.f32 %v19666_v49, %v19665_v25  ;;  %v3219_v59 = vmax.f32 %v19668_v10, %v19667_v2  ;;  %v19677_v10 = vld [vmem:[#allocation402_spill] sm:$0xff] }
 0x5a1   :  { %v3616_v27 = vmax.f32 %v3216_v48, %v3220_v33  ;;  %10217 = vmatmul.msk.bf16.gmra.mxu0 %vm881_vm0, %v19664_v21  ;;  %v3617_v17 = vmax.f32 %v3217_v12, %v3221_v13  ;;  %10243 = vmatmul.msk.bf16.gmra.mxu1 %vm881_vm0, %v19664_v21  ;;  %v4795_v61 = vunpack.c.l.b16 %v4240_v38  ;;  %v4796_v0 = vunpack.c.h.b16 %v4240_v38  ;;  %v19673_v48 = vld [vmem:[#allocation203_spill] sm:$0xff]  ;;  %v19674_v33 = vld [vmem:[#allocation204_spill] sm:$0xff] }
 0x5a2   :  { %v3832_v60 = vadd.f32 %v16289_v43, %v3614_v37  ;;  %10269 = vmatmul.msk.bf16.gmra.mxu2 %vm881_vm0, %v19664_v21  ;;  %v3833_v24 = vadd.f32 %v16294_v28, %v3615_v18  ;;  %10295 = vmatmul.msk.bf16.gmra.mxu3 %vm881_vm0, %v19664_v21  ;;  %v3224_v50 = vmax.f32 %v19670_v57, %v19669_v55  ;;  %v4793_v53 = vunpack.c.l.b16 %v4239_v20  ;;  %v19676_v18 = vld [vmem:[#allocation206_spill] sm:$0xff] }
 0x5a3   :  { %v3834_v4 = vadd.f32 %v16264_v22, %v3616_v27  ;;  %v3835_v58 = vadd.f32 %v16269_v30, %v3617_v17  ;;  %v16385_v3 = vpack.c.b16 %v4795_v61, %v4791_v14  ;;  %v16387_v9 = vpack.c.b16 %v4796_v0, %v4792_v16 }
 0x5a4   :  { %v4040_v7 = vmax.f32 %v3832_v60, 0.0  ;;  %v4041_v46 = vmax.f32 %v3833_v24, 0.0  ;;  %v3225_v6 = vmax.f32 %v19672_v40, %v19671_v54  ;;  %v4794_v21 = vunpack.c.h.b16 %v4239_v20 }
 0x5a5   :  { %v4042_v62 = vmax.f32 %v3834_v4, 0.0  ;;  %v2925_v11 = vpop.f32.mrf.mxu2  ;;  %v4043_v23 = vmax.f32 %v3835_v58, 0.0  ;;  %v3064_v31 = vpop.f32.mrf.mxu3 }
 0x5a6   :  { %v3222_v45 = vmax.f32 %v19673_v48, %v2925_v11  ;;  %v2649_v52 = vpop.f32.mrf.mxu0  ;;  %v3223_v36 = vmax.f32 %v19674_v33, %v3064_v31  ;;  %v2788_v12 = vpop.f32.mrf.mxu1  ;;  %v4241_v37 = vpack.c.bf16 %v4041_v46, %v4040_v7  ;;  %v19680_v11 = vld [vmem:[#allocation11_spill] sm:$0xff]  ;;  %v19683_v48 = vld [vmem:[#allocation12_spill] sm:$0xff] }
 0x5a7   :  { %v3228_v19 = vmax.f32 %v19675_v35, %v2649_v52  ;;  %v4242_v13 = vpack.c.bf16 %v4043_v23, %v4042_v62  ;;  %v3229_v27 = vmax.f32 %v19676_v18, %v2788_v12  ;;  %v19679_v62 = vld [vmem:[#allocation403_spill] sm:$0xff]  ;;  %v19682_v23 = vld [vmem:[#allocation404_spill] sm:$0xff]  ;;  %v19686_v12 = vld [vmem:[#allocation405_spill] sm:$0xff] }
 0x5a8   :  { %v3618_v38 = vmax.f32 %v3218_v1, %v3222_v45  ;;  %v3619_v14 = vmax.f32 %v3219_v59, %v3223_v36  ;;  %v4797_v60 = vunpack.c.l.b16 %v4241_v37  ;;  %v4798_v17 = vunpack.c.h.b16 %v4241_v37  ;;  %v19678_v59 = vld [vmem:[#allocation10_spill] sm:$0xff]  ;;  %v19684_v52 = vld [vmem:[#allocation208_spill] sm:$0xff]  ;;  %v19685_v36 = vld [vmem:[#allocation209_spill] sm:$0xff] }
 0x5a9   :  { %v3620_v16 = vmax.f32 %v3224_v50, %v3228_v19  ;;  %v3621_v0 = vmax.f32 %v3225_v6, %v3229_v27  ;;  %v3226_v46 = vmax.f32 %v19678_v59, %v19677_v10  ;;  %v3227_v55 = vmax.f32 %v19680_v11, %v19679_v62  ;;  %v19681_v50 = vld [vmem:[#allocation207_spill] sm:$0xff]  ;;  %v19687_v37 = vld [vmem:[#allocation13_spill] sm:$0xff]  ;;  %v19688_v27 = vld [vmem:[#allocation210_spill] sm:$0xff] }
 0x5aa   :  { %v3836_v61 = vadd.f32 %v16289_v43, %v3618_v38  ;;  %v3837_v24 = vadd.f32 %v16294_v28, %v3619_v14  ;;  %v16404_v58 = vpack.c.b16 %v4797_v60, %v4793_v53  ;;  %v16406_v7 = vpack.c.b16 %v4798_v17, %v4794_v21  ;;  %v19689_v59 = vld [vmem:[#allocation406_spill] sm:$0xff] }
 0x5ab   :  { %v3838_v4 = vadd.f32 %v16264_v22, %v3620_v16  ;;  %v3839_v49 = vadd.f32 %v16269_v30, %v3621_v0  ;;  %v3232_v45 = vmax.f32 %v19683_v48, %v19682_v23  ;;  %v3233_v53 = vmax.f32 %v19687_v37, %v19686_v12  ;;  %v19694_v23 = vld [vmem:[#allocation16_spill] sm:$0xff]  ;;  %v19697_v12 = vld [vmem:[#allocation17_spill] sm:$0xff] }
 0x5ac   :  { %v4044_v25 = vmax.f32 %v3836_v61, 0.0  ;;  %v4045_v1 = vmax.f32 %v3837_v24, 0.0  ;;  %v4475_v14 = vunpack.c.l.b16 %v4242_v13  ;;  %v4476_v16 = vunpack.c.h.b16 %v4242_v13  ;;  %v13389_v61 = vld [vmem:[%s19065_s0 + $0x58] sm:$0xff] }
 0x5ad   :  { %v4046_v20 = vmax.f32 %v3838_v4, 0.0  ;;  %v2927_v2 = vpop.f32.mrf.mxu2  ;;  %v4047_v57 = vmax.f32 %v3839_v49, 0.0  ;;  %v3066_v40 = vpop.f32.mrf.mxu3 }
 0x5ae   :  { %v3230_v54 = vmax.f32 %v19681_v50, %v2927_v2  ;;  %v2652_v6 = vpop.f32.mrf.mxu0  ;;  %v16416_v31 = vpack.c.bf16 %v4045_v1, %v4044_v25  ;;  %v3231_v33 = vmax.f32 %v19684_v52, %v3066_v40  ;;  %v2791_v19 = vpop.f32.mrf.mxu1  ;;  %v19691_v50 = vld [vmem:[#allocation407_spill] sm:$0xff] }
 0x5af   :  { %v3236_v35 = vmax.f32 %v19685_v36, %v2652_v6  ;;  %v4244_v38 = vpack.c.bf16 %v4047_v57, %v4046_v20  ;;  %v3237_v21 = vmax.f32 %v19688_v27, %v2791_v19  ;;  %v19693_v6 = vld [vmem:[#allocation408_spill] sm:$0xff]  ;;  %v19695_v52 = vld [vmem:[#allocation211_spill] sm:$0xff]  ;;  %v19696_v19 = vld [vmem:[#allocation409_spill] sm:$0xff] }
 0x5b0   :  { %v3622_v18 = vmax.f32 %v3226_v46, %v3230_v54  ;;  %v3623_v60 = vmax.f32 %v3227_v55, %v3231_v33  ;;  %v19690_v46 = vld [vmem:[#allocation14_spill] sm:$0xff]  ;;  %v19692_v54 = vld [vmem:[#allocation15_spill] sm:$0xff]  ;;  %v3240_v48 = vmax.f32 %v19694_v23, %v19693_v6  ;;  %v3241_v37 = vmax.f32 %v19697_v12, %v19696_v19  ;;  %v19699_v27 = vld [vmem:[#allocation213_spill] sm:$0xff] }
 0x5b1   :  { %v3624_v17 = vmax.f32 %v3232_v45, %v3236_v35  ;;  %10218 = vmatmul.msk.bf16.gmra.mxu0 %vm881_vm0, %v13389_v61  ;;  %v4479_v0 = vunpack.c.l.b16 %v4244_v38  ;;  %v4480_v24 = vunpack.c.h.b16 %v4244_v38  ;;  %v3625_v25 = vmax.f32 %v3233_v53, %v3237_v21  ;;  %10244 = vmatmul.msk.bf16.gmra.mxu1 %vm881_vm0, %v13389_v61  ;;  %v19698_v38 = vld [vmem:[#allocation212_spill] sm:$0xff]  ;;  %v19705_v19 = vld [vmem:[#allocation215_spill] sm:$0xff] }
 0x5b2   :  { %v3840_v4 = vadd.f32 %v16289_v43, %v3622_v18  ;;  %10270 = vmatmul.msk.bf16.gmra.mxu2 %vm881_vm0, %v13389_v61  ;;  %v3841_v49 = vadd.f32 %v16294_v28, %v3623_v60  ;;  %10296 = vmatmul.msk.bf16.gmra.mxu3 %vm881_vm0, %v13389_v61  ;;  %v3234_v62 = vmax.f32 %v19690_v46, %v19689_v59  ;;  %v19700_v61 = vld [vmem:[#allocation214_spill] sm:$0xff] }
 0x5b3   :  { %v3842_v13 = vadd.f32 %v16264_v22, %v3624_v17  ;;  %v3843_v20 = vadd.f32 %v16269_v30, %v3625_v25  ;;  %v16434_v2 = vpack.c.b16 %v4479_v0, %v4475_v14  ;;  %v16436_v10 = vpack.c.b16 %v4480_v24, %v4476_v16 }
 0x5b4   :  { %v4048_v1 = vmax.f32 %v3840_v4, 0.0  ;;  %v4049_v11 = vmax.f32 %v3841_v49, 0.0  ;;  %v3235_v40 = vmax.f32 %v19692_v54, %v19691_v50  ;;  %v4477_v16 = vunpack.c.l.b16 %v16416_v31 }
 0x5b5   :  { %v4050_v55 = vmax.f32 %v3842_v13, 0.0  ;;  %v2930_v57 = vpop.f32.mrf.mxu2  ;;  %v4051_v45 = vmax.f32 %v3843_v20, 0.0  ;;  %v3069_v36 = vpop.f32.mrf.mxu3  ;;  %v12932_v13 = vld [vmem:[%s19066_s3 + $0x198] sm:$0xff]  ;;  %v4478_v20 = vunpack.c.h.b16 %v16416_v31  ;;  %v19701_v31 = vld [vmem:[#allocation410_spill] sm:$0xff] }
 0x5b6   :  { %v3238_v33 = vmax.f32 %v19695_v52, %v2930_v57  ;;  %v2654_v35 = vpop.f32.mrf.mxu0  ;;  %v4245_v53 = vpack.c.bf16 %v4049_v11, %v4048_v1  ;;  %v3239_v18 = vmax.f32 %v19698_v38, %v3069_v36  ;;  %v2793_v14 = vpop.f32.mrf.mxu1  ;;  %v12940_v1 = vld [vmem:[%s19066_s3 + $0x1d8] sm:$0xff]  ;;  %4741 = vmatpush.bf16.msra.mxu2 %v12932_v13  ;;  %v19703_v52 = vld [vmem:[#allocation411_spill] sm:$0xff]  ;;  %v19706_v38 = vld [vmem:[#allocation412_spill] sm:$0xff] }
 0x5b7   :  { %v3244_v21 = vmax.f32 %v19699_v27, %v2654_v35  ;;  %v4246_v60 = vpack.c.bf16 %v4051_v45, %v4050_v55  ;;  %v3245_v0 = vmax.f32 %v19700_v61, %v2793_v14  ;;  %4760 = vmatpush.bf16.msra.mxu3 %v12940_v1  ;;  %v19708_v14 = vld [vmem:[#allocation216_spill] sm:$0xff] }
 0x5b8   :  { %v3626_v17 = vmax.f32 %v3234_v62, %v3238_v33  ;;  %v4481_v24 = vunpack.c.l.b16 %v4245_v53  ;;  %v4482_v4 = vunpack.c.h.b16 %v4245_v53  ;;  %v3627_v25 = vmax.f32 %v3235_v40, %v3239_v18  ;;  %v19704_v33 = vld [vmem:[#allocation19_spill] sm:$0xff]  ;;  %v19707_v18 = vld [vmem:[#allocation20_spill] sm:$0xff] }
 0x5b9   :  { %v3628_v49 = vmax.f32 %v3240_v48, %v3244_v21  ;;  %v3629_v46 = vmax.f32 %v3241_v37, %v3245_v0  ;;  %v19702_v48 = vld [vmem:[#allocation18_spill] sm:$0xff]  ;;  %v3243_v36 = vmax.f32 %v19704_v33, %v19703_v52  ;;  %v3248_v27 = vmax.f32 %v19707_v18, %v19706_v38  ;;  %v19716_v38 = vld [vmem:[#allocation23_spill] sm:$0xff] }
 0x5ba   :  { %v3844_v59 = vadd.f32 %v16289_v43, %v3626_v17  ;;  %v3845_v62 = vadd.f32 %v16294_v28, %v3627_v25  ;;  %v16461_v55 = vpack.c.b16 %v4481_v24, %v4477_v16  ;;  %v16464_v54 = vpack.c.b16 %v4482_v4, %v4478_v20  ;;  %v19709_v17 = vld [vmem:[#allocation217_spill] sm:$0xff]  ;;  %v19712_v20 = vld [vmem:[#allocation218_spill] sm:$0xff] }
 0x5bb   :  { %v3846_v11 = vadd.f32 %v16264_v22, %v3628_v49  ;;  %v3847_v50 = vadd.f32 %v16269_v30, %v3629_v46  ;;  %v3242_v45 = vmax.f32 %v19702_v48, %v19701_v31  ;;  %v12916_v24 = vld [vmem:[%s19066_s3 + $0x118] sm:$0xff] }
 0x5bc   :  { %v4052_v57 = vmax.f32 %v3844_v59, 0.0  ;;  %v4053_v40 = vmax.f32 %v3845_v62, 0.0  ;;  %v12924_v4 = vld [vmem:[%s19066_s3 + $0x158] sm:$0xff]  ;;  %4703 = vmatpush.bf16.msra.mxu0 %v12916_v24 }
 0x5bd   :  { %v4054_v6 = vmax.f32 %v3846_v11, 0.0  ;;  %v2932_v23 = vpop.f32.mrf.mxu2  ;;  %v4055_v35 = vmax.f32 %v3847_v50, 0.0  ;;  %v3071_v37 = vpop.f32.mrf.mxu3  ;;  %v19710_v25 = vld [vmem:[#allocation413_spill] sm:$0xff]  ;;  %4722 = vmatpush.bf16.msra.mxu1 %v12924_v4  ;;  %v4483_v50 = vunpack.c.l.b16 %v4246_v60 }
 0x5be   :  { %v3246_v12 = vmax.f32 %v19705_v19, %v2932_v23  ;;  %v2657_v53 = vpop.f32.mrf.mxu0  ;;  %v4247_v21 = vpack.c.bf16 %v4053_v40, %v4052_v57  ;;  %v3247_v16 = vmax.f32 %v19708_v14, %v3071_v37  ;;  %v2796_v0 = vpop.f32.mrf.mxu1  ;;  %v19711_v49 = vld [vmem:[#allocation21_spill] sm:$0xff]  ;;  %v13390_v57 = vld [vmem:[%s19065_s0 + $0x60] sm:$0xff]  ;;  %v4484_v40 = vunpack.c.h.b16 %v4246_v60 }
 0x5bf   :  { %v3252_v61 = vmax.f32 %v19709_v17, %v2657_v53  ;;  %v3249_v13 = vmax.f32 %v19711_v49, %v19710_v25  ;;  %v3253_v59 = vmax.f32 %v19712_v20, %v2796_v0  ;;  %v4248_v46 = vpack.c.bf16 %v4055_v35, %v4054_v6  ;;  %v19713_v19 = vld [vmem:[#allocation414_spill] sm:$0xff]  ;;  %v19715_v53 = vld [vmem:[#allocation415_spill] sm:$0xff]  ;;  %v19717_v17 = vld [vmem:[#allocation416_spill] sm:$0xff] }
 0x5c0   :  { %v3630_v1 = vmax.f32 %v3242_v45, %v3246_v12  ;;  %v3631_v62 = vmax.f32 %v3243_v36, %v3247_v16  ;;  %v19714_v12 = vld [vmem:[#allocation22_spill] sm:$0xff]  ;;  %v3251_v18 = vmax.f32 %v19716_v38, %v19715_v53  ;;  %v19719_v24 = vld [vmem:[#allocation417_spill] sm:$0xff] }
 0x5c1   :  { %v3632_v11 = vmax.f32 %v3248_v27, %v3252_v61  ;;  %10219 = vmatmul.msk.bf16.gmra.mxu0 %vm881_vm0, %v13390_v57  ;;  %v3633_v31 = vmax.f32 %v3249_v13, %v3253_v59  ;;  %10245 = vmatmul.msk.bf16.gmra.mxu1 %vm881_vm0, %v13390_v57  ;;  %v4487_v48 = vunpack.c.l.b16 %v4248_v46  ;;  %v4488_v6 = vunpack.c.h.b16 %v4248_v46  ;;  %v19718_v61 = vld [vmem:[#allocation24_spill] sm:$0xff]  ;;  %v19720_v4 = vld [vmem:[#allocation25_spill] sm:$0xff]  ;;  %v19721_v13 = vld [vmem:[#allocation219_spill] sm:$0xff] }
 0x5c2   :  { %v3848_v23 = vadd.f32 %v16289_v43, %v3630_v1  ;;  %10271 = vmatmul.msk.bf16.gmra.mxu2 %vm881_vm0, %v13390_v57  ;;  %v3849_v45 = vadd.f32 %v16294_v28, %v3631_v62  ;;  %10297 = vmatmul.msk.bf16.gmra.mxu3 %vm881_vm0, %v13390_v57  ;;  %v3250_v37 = vmax.f32 %v19714_v12, %v19713_v19  ;;  %v19722_v46 = vld [vmem:[#allocation220_spill] sm:$0xff] }
 0x5c3   :  { %v3850_v52 = vadd.f32 %v16264_v22, %v3632_v11  ;;  %v3851_v36 = vadd.f32 %v16269_v30, %v3633_v31  ;;  %v16495_v60 = vpack.c.b16 %v4487_v48, %v4483_v50  ;;  %v16497_v35 = vpack.c.b16 %v4488_v6, %v4484_v40  ;;  %v19723_v11 = vld [vmem:[#allocation221_spill] sm:$0xff]  ;;  %v19724_v6 = vld [vmem:[#allocation222_spill] sm:$0xff] }
 0x5c4   :  { %v4056_v33 = vmax.f32 %v3848_v23, 0.0  ;;  %v4057_v27 = vmax.f32 %v3849_v45, 0.0  ;;  %v3256_v0 = vmax.f32 %v19718_v61, %v19717_v17  ;;  %v3257_v25 = vmax.f32 %v19720_v4, %v19719_v24  ;;  %v19726_v4 = vld [vmem:[#allocation26_spill] sm:$0xff] }
 0x5c5   :  { %v4058_v14 = vmax.f32 %v3850_v52, 0.0  ;;  %v2935_v16 = vpop.f32.mrf.mxu2  ;;  %v4059_v49 = vmax.f32 %v3851_v36, 0.0  ;;  %v3074_v20 = vpop.f32.mrf.mxu3  ;;  %v4485_v23 = vunpack.c.l.b16 %v4247_v21  ;;  %v4486_v52 = vunpack.c.h.b16 %v4247_v21 }
 0x5c6   :  { %v3254_v1 = vmax.f32 %v19721_v13, %v2935_v16  ;;  %v2659_v59 = vpop.f32.mrf.mxu0  ;;  %v3255_v62 = vmax.f32 %v19722_v46, %v3074_v20  ;;  %v2798_v50 = vpop.f32.mrf.mxu1  ;;  %v4249_v40 = vpack.c.bf16 %v4057_v27, %v4056_v33  ;;  %v19727_v13 = vld [vmem:[#allocation419_spill] sm:$0xff] }
 0x5c7   :  { %v3260_v57 = vmax.f32 %v19723_v11, %v2659_v59  ;;  %v4250_v31 = vpack.c.bf16 %v4059_v49, %v4058_v14  ;;  %v3261_v45 = vmax.f32 %v19724_v6, %v2798_v50  ;;  %v19729_v59 = vld [vmem:[#allocation223_spill] sm:$0xff]  ;;  %v19731_v50 = vld [vmem:[#allocation28_spill] sm:$0xff] }
 0x5c8   :  { %v3634_v48 = vmax.f32 %v3250_v37, %v3254_v1  ;;  %v3635_v19 = vmax.f32 %v3251_v18, %v3255_v62  ;;  %v4489_v53 = vunpack.c.l.b16 %v4249_v40  ;;  %v4490_v36 = vunpack.c.h.b16 %v4249_v40  ;;  %v19728_v1 = vld [vmem:[#allocation27_spill] sm:$0xff] }
 0x5c9   :  { %v3636_v12 = vmax.f32 %v3256_v0, %v3260_v57  ;;  %v3637_v16 = vmax.f32 %v3257_v25, %v3261_v45  ;;  %v19725_v0 = vld [vmem:[#allocation418_spill] sm:$0xff]  ;;  %v3259_v25 = vmax.f32 %v19728_v1, %v19727_v13  ;;  %v19730_v57 = vld [vmem:[#allocation420_spill] sm:$0xff]  ;;  %v19733_v45 = vld [vmem:[#allocation225_spill] sm:$0xff] }
 0x5ca   :  { %v3852_v38 = vadd.f32 %v16289_v43, %v3634_v48  ;;  %v3853_v17 = vadd.f32 %v16294_v28, %v3635_v19  ;;  %v16514_v24 = vpack.c.b16 %v4489_v53, %v4485_v23  ;;  %v16516_v33 = vpack.c.b16 %v4490_v36, %v4486_v52  ;;  %v19732_v48 = vld [vmem:[#allocation224_spill] sm:$0xff]  ;;  %v19735_v53 = vld [vmem:[#allocation29_spill] sm:$0xff] }
 0x5cb   :  { %v3854_v61 = vadd.f32 %v16264_v22, %v3636_v12  ;;  %v3855_v37 = vadd.f32 %v16269_v30, %v3637_v16  ;;  %v3258_v49 = vmax.f32 %v19726_v4, %v19725_v0  ;;  %v3264_v40 = vmax.f32 %v19731_v50, %v19730_v57  ;;  %v19734_v12 = vld [vmem:[#allocation421_spill] sm:$0xff]  ;;  %v19738_v57 = vld [vmem:[#allocation31_spill] sm:$0xff] }
 0x5cc   :  { %v4060_v27 = vmax.f32 %v3852_v38, 0.0  ;;  %v4061_v14 = vmax.f32 %v3853_v17, 0.0  ;;  %v3265_v36 = vmax.f32 %v19735_v53, %v19734_v12  ;;  %v19736_v17 = vld [vmem:[#allocation226_spill] sm:$0xff]  ;;  %v3267_v50 = vmax.f32 %v19738_v57, %v15696_v39  ;;  %v19741_v12 = vld [vmem:[#allocation423_spill] sm:$0xff]  ;;  %v19742_v53 = vld [vmem:[#allocation33_spill] sm:$0xff] }
 0x5cd   :  { %v4062_v21 = vmax.f32 %v3854_v61, 0.0  ;;  %v2937_v18 = vpop.f32.mrf.mxu2  ;;  %v4063_v20 = vmax.f32 %v3855_v37, 0.0  ;;  %v3076_v62 = vpop.f32.mrf.mxu3  ;;  %v5156_v37 = vunpack.c.l.b16 %v4250_v31 }
 0x5ce   :  { %v3262_v46 = vmax.f32 %v19729_v59, %v2937_v18  ;;  %v2662_v11 = vpop.f32.mrf.mxu0  ;;  %v4251_v23 = vpack.c.bf16 %v4061_v14, %v4060_v27  ;;  %v3263_v6 = vmax.f32 %v19732_v48, %v3076_v62  ;;  %v2801_v19 = vpop.f32.mrf.mxu1  ;;  %v5157_v18 = vunpack.c.h.b16 %v4250_v31  ;;  %v13391_v27 = vld [vmem:[%s19065_s0 + $0x68] sm:$0xff]  ;;  %v19737_v62 = vld [vmem:[#allocation30_spill] sm:$0xff] }
 0x5cf   :  { %v3268_v52 = vmax.f32 %v19733_v45, %v2662_v11  ;;  %v4252_v38 = vpack.c.bf16 %v4063_v20, %v4062_v21  ;;  %v3269_v61 = vmax.f32 %v19736_v17, %v2801_v19  ;;  %v3266_v11 = vmax.f32 %v19737_v62, %v15694_v42  ;;  %v19739_v45 = vld [vmem:[#allocation422_spill] sm:$0xff]  ;;  %v19744_v42 = vld [vmem:[#allocation228_spill] sm:$0xff] }
 0x5d0   :  { %v3638_v16 = vmax.f32 %v3258_v49, %v3262_v46  ;;  %v3639_v0 = vmax.f32 %v3259_v25, %v3263_v6 }
 0x5d1   :  { %v3640_v4 = vmax.f32 %v3264_v40, %v3268_v52  ;;  %10220 = vmatmul.msk.bf16.gmra.mxu0 %vm881_vm0, %v13391_v27  ;;  %v5160_v14 = vunpack.c.l.b16 %v4252_v38  ;;  %v5161_v13 = vunpack.c.h.b16 %v4252_v38  ;;  %v3641_v59 = vmax.f32 %v3265_v36, %v3269_v61  ;;  %10246 = vmatmul.msk.bf16.gmra.mxu1 %vm881_vm0, %v13391_v27  ;;  %v19740_v52 = vld [vmem:[#allocation32_spill] sm:$0xff] }
 0x5d2   :  { %v3856_v1 = vadd.f32 %v16289_v43, %v3638_v16  ;;  %10272 = vmatmul.msk.bf16.gmra.mxu2 %vm881_vm0, %v13391_v27  ;;  %v3857_v21 = vadd.f32 %v16294_v28, %v3639_v0  ;;  %10298 = vmatmul.msk.bf16.gmra.mxu3 %vm881_vm0, %v13391_v27  ;;  %v3272_v19 = vmax.f32 %v19740_v52, %v19739_v45  ;;  %v19743_v16 = vld [vmem:[#allocation227_spill] sm:$0xff]  ;;  %v19745_v27 = vld [vmem:[#allocation229_spill] sm:$0xff] }
 0x5d3   :  { %v3858_v31 = vadd.f32 %v16264_v22, %v3640_v4  ;;  %v3859_v25 = vadd.f32 %v16269_v30, %v3641_v59  ;;  %v16542_v20 = vpack.c.b16 %v5160_v14, %v5156_v37  ;;  %v16544_v46 = vpack.c.b16 %v5161_v13, %v5157_v18 }
 0x5d4   :  { %v4064_v49 = vmax.f32 %v3856_v1, 0.0  ;;  %v4065_v40 = vmax.f32 %v3857_v21, 0.0  ;;  %v3273_v36 = vmax.f32 %v19742_v53, %v19741_v12  ;;  %v5158_v18 = vunpack.c.l.b16 %v4251_v23  ;;  %v19746_v21 = vld [vmem:[#allocation230_spill] sm:$0xff] }
 0x5d5   :  { %v4066_v48 = vmax.f32 %v3858_v31, 0.0  ;;  %v2940_v6 = vpop.f32.mrf.mxu2  ;;  %v4067_v38 = vmax.f32 %v3859_v25, 0.0  ;;  %v3079_v61 = vpop.f32.mrf.mxu3  ;;  %v5159_v13 = vunpack.c.h.b16 %v4251_v23 }
 0x5d6   :  { %v3270_v17 = vmax.f32 %v19743_v16, %v2940_v6  ;;  %v2664_v37 = vpop.f32.mrf.mxu0  ;;  %v4253_v0 = vpack.c.bf16 %v4065_v40, %v4064_v49  ;;  %v3271_v4 = vmax.f32 %v19744_v42, %v3079_v61  ;;  %v2803_v14 = vpop.f32.mrf.mxu1  ;;  %v19749_v61 = vld [vmem:[#allocation425_spill] sm:$0xff]  ;;  %v19751_v42 = vld [vmem:[#allocation231_spill] sm:$0xff] }
 0x5d7   :  { %v3276_v39 = vmax.f32 %v19745_v27, %v2664_v37  ;;  %v4254_v1 = vpack.c.bf16 %v4067_v38, %v4066_v48  ;;  %v3277_v31 = vmax.f32 %v19746_v21, %v2803_v14  ;;  %v19750_v37 = vld [vmem:[#allocation35_spill] sm:$0xff]  ;;  %v19753_v14 = vld [vmem:[#allocation36_spill] sm:$0xff] }
 0x5d8   :  { %v3642_v59 = vmax.f32 %v3266_v11, %v3270_v17  ;;  %v5162_v62 = vunpack.c.l.b16 %v4253_v0  ;;  %v5163_v57 = vunpack.c.h.b16 %v4253_v0  ;;  %v3643_v45 = vmax.f32 %v3267_v50, %v3271_v4  ;;  %v19747_v17 = vld [vmem:[#allocation424_spill] sm:$0xff]  ;;  %v19748_v50 = vld [vmem:[#allocation34_spill] sm:$0xff] }
 0x5d9   :  { %v3644_v25 = vmax.f32 %v3272_v19, %v3276_v39  ;;  %v3645_v52 = vmax.f32 %v3273_v36, %v3277_v31  ;;  %v3274_v19 = vmax.f32 %v19748_v50, %v19747_v17  ;;  %v3275_v36 = vmax.f32 %v19750_v37, %v19749_v61  ;;  %v19752_v39 = vld [vmem:[#allocation426_spill] sm:$0xff]  ;;  %v19754_v21 = vld [vmem:[#allocation232_spill] sm:$0xff] }
 0x5da   :  { %v3860_v6 = vadd.f32 %v16289_v43, %v3642_v59  ;;  %v3861_v12 = vadd.f32 %v16294_v28, %v3643_v45  ;;  %v16561_v40 = vpack.c.b16 %v5162_v62, %v5158_v18  ;;  %v16563_v53 = vpack.c.b16 %v5163_v57, %v5159_v13  ;;  %v19755_v62 = vld [vmem:[#allocation233_spill] sm:$0xff]  ;;  %v13392_v61 = vld [vmem:[%s19065_s0 + $0x70] sm:$0xff] }
 0x5db   :  { %v3862_v49 = vadd.f32 %v16264_v22, %v3644_v25  ;;  %v3863_v11 = vadd.f32 %v16269_v30, %v3645_v52  ;;  %v3280_v13 = vmax.f32 %v19753_v14, %v19752_v39  ;;  %v19756_v25 = vld [vmem:[#allocation427_spill] sm:$0xff]  ;;  %v19761_v39 = vld [vmem:[#allocation428_spill] sm:$0xff]  ;;  %v19762_v14 = vld [vmem:[#allocation38_spill] sm:$0xff] }
 0x5dc   :  { %v4068_v23 = vmax.f32 %v3860_v6, 0.0  ;;  %v4069_v48 = vmax.f32 %v3861_v12, 0.0  ;;  %v19757_v6 = vld [vmem:[#allocation37_spill] sm:$0xff] }
 0x5dd   :  { %v4070_v38 = vmax.f32 %v3862_v49, 0.0  ;;  %v2942_v16 = vpop.f32.mrf.mxu2  ;;  %v4071_v0 = vmax.f32 %v3863_v11, 0.0  ;;  %v3081_v27 = vpop.f32.mrf.mxu3  ;;  %v3281_v52 = vmax.f32 %v19757_v6, %v19756_v25  ;;  %v19758_v49 = vld [vmem:[#allocation234_spill] sm:$0xff] }
 0x5de   :  { %v3278_v4 = vmax.f32 %v19751_v42, %v2942_v16  ;;  %v2667_v18 = vpop.f32.mrf.mxu0  ;;  %v4255_v59 = vpack.c.bf16 %v4069_v48, %v4068_v23  ;;  %v3279_v31 = vmax.f32 %v19754_v21, %v3081_v27  ;;  %v2806_v45 = vpop.f32.mrf.mxu1  ;;  %v5164_v23 = vunpack.c.l.b16 %v4254_v1  ;;  %v19763_v21 = vld [vmem:[#allocation429_spill] sm:$0xff]  ;;  %v19765_v6 = vld [vmem:[#allocation430_spill] sm:$0xff] }
 0x5df   :  { %v3284_v57 = vmax.f32 %v19755_v62, %v2667_v18  ;;  %v3285_v17 = vmax.f32 %v19758_v49, %v2806_v45  ;;  %v4256_v11 = vpack.c.bf16 %v4071_v0, %v4070_v38  ;;  %v5165_v48 = vunpack.c.h.b16 %v4254_v1  ;;  %v19767_v49 = vld [vmem:[#allocation431_spill] sm:$0xff] }
 0x5e0   :  { %v3646_v12 = vmax.f32 %v3274_v19, %v3278_v4  ;;  %v3647_v50 = vmax.f32 %v3275_v36, %v3279_v31  ;;  %v19764_v31 = vld [vmem:[#allocation39_spill] sm:$0xff] }
 0x5e1   :  { %v3648_v16 = vmax.f32 %v3280_v13, %v3284_v57  ;;  %10221 = vmatmul.msk.bf16.gmra.mxu0 %vm881_vm0, %v13392_v61  ;;  %v3649_v42 = vmax.f32 %v3281_v52, %v3285_v17  ;;  %10247 = vmatmul.msk.bf16.gmra.mxu1 %vm881_vm0, %v13392_v61  ;;  %v5168_v19 = vunpack.c.l.b16 %v4256_v11  ;;  %v5169_v4 = vunpack.c.h.b16 %v4256_v11  ;;  %v19766_v52 = vld [vmem:[#allocation40_spill] sm:$0xff]  ;;  %v19768_v17 = vld [vmem:[#allocation41_spill] sm:$0xff] }
 0x5e2   :  { %v3864_v37 = vadd.f32 %v16289_v43, %v3646_v12  ;;  %10273 = vmatmul.msk.bf16.gmra.mxu2 %vm881_vm0, %v13392_v61  ;;  %v3865_v38 = vadd.f32 %v16294_v28, %v3647_v50  ;;  %10299 = vmatmul.msk.bf16.gmra.mxu3 %vm881_vm0, %v13392_v61  ;;  %v3282_v13 = vmax.f32 %v19762_v14, %v19761_v39 }
 0x5e3   :  { %v3866_v36 = vadd.f32 %v16264_v22, %v3648_v16  ;;  %v3867_v27 = vadd.f32 %v16269_v30, %v3649_v42  ;;  %v16589_v18 = vpack.c.b16 %v5168_v19, %v5164_v23  ;;  %v16591_v1 = vpack.c.b16 %v5169_v4, %v5165_v48  ;;  %v19769_v16 = vld [vmem:[#allocation235_spill] sm:$0xff]  ;;  %v19771_v19 = vld [vmem:[#allocation237_spill] sm:$0xff] }
 0x5e4   :  { %v4072_v0 = vmax.f32 %v3864_v37, 0.0  ;;  %v3283_v62 = vmax.f32 %v19764_v31, %v19763_v21  ;;  %v4073_v57 = vmax.f32 %v3865_v38, 0.0  ;;  %v3288_v12 = vmax.f32 %v19766_v52, %v19765_v6  ;;  %v19770_v37 = vld [vmem:[#allocation236_spill] sm:$0xff]  ;;  %v19772_v31 = vld [vmem:[#allocation238_spill] sm:$0xff] }
 0x5e5   :  { %19759 = vst [vmem:[#allocation196_spill] sm:$0xff] %v16589_v18  ;;  %v4074_v45 = vmax.f32 %v3866_v36, 0.0  ;;  %v2945_v25 = vpop.f32.mrf.mxu2  ;;  %v3289_v11 = vmax.f32 %v19768_v17, %v19767_v49  ;;  %v4075_v50 = vmax.f32 %v3867_v27, 0.0  ;;  %v3084_v23 = vpop.f32.mrf.mxu3  ;;  %v5166_v38 = vunpack.c.l.b16 %v4255_v59 }
 0x5e6   :  { %19760 = vst [vmem:[#allocation197_spill] sm:$0xff] %v16591_v1  ;;  %v3286_v61 = vmax.f32 %v19769_v16, %v2945_v25  ;;  %v2669_v48 = vpop.f32.mrf.mxu0  ;;  %v3287_v42 = vmax.f32 %v19770_v37, %v3084_v23  ;;  %v2808_v39 = vpop.f32.mrf.mxu1  ;;  %v4257_v14 = vpack.c.bf16 %v4073_v57, %v4072_v0  ;;  %v5167_v6 = vunpack.c.h.b16 %v4255_v59  ;;  %v19777_v37 = vld [vmem:[#allocation433_spill] sm:$0xff] }
 0x5e7   :  { %v3292_v4 = vmax.f32 %v19771_v19, %v2669_v48  ;;  %v4258_v36 = vpack.c.bf16 %v4075_v50, %v4074_v45  ;;  %v3293_v1 = vmax.f32 %v19772_v31, %v2808_v39  ;;  %v19776_v50 = vld [vmem:[#allocation42_spill] sm:$0xff]  ;;  %v19779_v19 = vld [vmem:[#allocation239_spill] sm:$0xff] }
 0x5e8   :  { %v3650_v21 = vmax.f32 %v3282_v13, %v3286_v61  ;;  %v3651_v52 = vmax.f32 %v3283_v62, %v3287_v42  ;;  %v5170_v49 = vunpack.c.l.b16 %v4257_v14  ;;  %v5171_v27 = vunpack.c.h.b16 %v4257_v14  ;;  %v19778_v42 = vld [vmem:[#allocation43_spill] sm:$0xff]  ;;  %v19780_v14 = vld [vmem:[#allocation434_spill] sm:$0xff] }
 0x5e9   :  { %v3652_v18 = vmax.f32 %v3288_v12, %v3292_v4  ;;  %v3653_v17 = vmax.f32 %v3289_v11, %v3293_v1  ;;  %v19775_v12 = vld [vmem:[#allocation432_spill] sm:$0xff]  ;;  %v3291_v1 = vmax.f32 %v19778_v42, %v19777_v37  ;;  %v5534_v42 = vunpack.c.h.b16 %v4258_v36 }
 0x5ea   :  { %v3868_v25 = vadd.f32 %v16289_v43, %v3650_v21  ;;  %v3869_v16 = vadd.f32 %v16294_v28, %v3651_v52  ;;  %v16608_v48 = vpack.c.b16 %v5170_v49, %v5166_v38  ;;  %v16610_v0 = vpack.c.b16 %v5171_v27, %v5167_v6  ;;  %v19781_v38 = vld [vmem:[#allocation44_spill] sm:$0xff]  ;;  %v19783_v49 = vld [vmem:[#allocation241_spill] sm:$0xff] }
 0x5eb   :  { %v3870_v23 = vadd.f32 %v16264_v22, %v3652_v18  ;;  %v3871_v13 = vadd.f32 %v16269_v30, %v3653_v17  ;;  %v3290_v61 = vmax.f32 %v19776_v50, %v19775_v12  ;;  %v3296_v21 = vmax.f32 %v19781_v38, %v19780_v14  ;;  %v19782_v6 = vld [vmem:[#allocation240_spill] sm:$0xff]  ;;  %v19784_v17 = vld [vmem:[#allocation435_spill] sm:$0xff] }
 0x5ec   :  { %19773 = vst [vmem:[#allocation198_spill] sm:$0xff] %v16608_v48  ;;  %v4076_v57 = vmax.f32 %v3868_v25, 0.0  ;;  %v4077_v45 = vmax.f32 %v3869_v16, 0.0  ;;  %v19785_v16 = vld [vmem:[#allocation45_spill] sm:$0xff] }
 0x5ed   :  { %19774 = vst [vmem:[#allocation393_spill] sm:$0xff] %v16610_v0  ;;  %v4078_v59 = vmax.f32 %v3870_v23, 0.0  ;;  %v2947_v62 = vpop.f32.mrf.mxu2  ;;  %v4079_v11 = vmax.f32 %v3871_v13, 0.0  ;;  %v3086_v18 = vpop.f32.mrf.mxu3  ;;  %v3297_v23 = vmax.f32 %v19785_v16, %v19784_v17  ;;  %v19786_v13 = vld [vmem:[#allocation242_spill] sm:$0xff]  ;;  %v19791_v17 = vld [vmem:[#allocation437_spill] sm:$0xff]  ;;  %v19792_v16 = vld [vmem:[#allocation47_spill] sm:$0xff] }
 0x5ee   :  { %v3294_v4 = vmax.f32 %v19779_v19, %v2947_v62  ;;  %v2672_v39 = vpop.f32.mrf.mxu0  ;;  %v16620_v31 = vpack.c.bf16 %v4077_v45, %v4076_v57  ;;  %v3295_v52 = vmax.f32 %v19782_v6, %v3086_v18  ;;  %v2811_v25 = vpop.f32.mrf.mxu1  ;;  %v5533_v62 = vunpack.c.l.b16 %v4258_v36  ;;  %v13393_v57 = vld [vmem:[%s19065_s0 + $0x78] sm:$0xff]  ;;  %v12931_v45 = vld [vmem:[%s19066_s3 + $0x190] sm:$0xff] }
 0x5ef   :  { %v3300_v27 = vmax.f32 %v19783_v49, %v2672_v39  ;;  %v4260_v12 = vpack.c.bf16 %v4079_v11, %v4078_v59  ;;  %v3301_v37 = vmax.f32 %v19786_v13, %v2811_v25  ;;  %v12939_v36 = vld [vmem:[%s19066_s3 + $0x1d0] sm:$0xff]  ;;  %4742 = vmatpush.bf16.msra.mxu2 %v12931_v45  ;;  %v19793_v13 = vld [vmem:[#allocation438_spill] sm:$0xff]  ;;  %v19796_v45 = vld [vmem:[#allocation49_spill] sm:$0xff] }
 0x5f0   :  { %v3654_v50 = vmax.f32 %v3290_v61, %v3294_v4  ;;  %v3655_v19 = vmax.f32 %v3291_v1, %v3295_v52  ;;  %v12915_v1 = vld [vmem:[%s19066_s3 + $0x110] sm:$0xff]  ;;  %4761 = vmatpush.bf16.msra.mxu3 %v12939_v36  ;;  %v5535_v36 = vunpack.c.l.b16 %v16620_v31 }
 0x5f1   :  { %v3656_v0 = vmax.f32 %v3296_v21, %v3300_v27  ;;  %10222 = vmatmul.msk.bf16.gmra.mxu0 %vm881_vm0, %v13393_v57  ;;  %v5537_v18 = vunpack.c.l.b16 %v4260_v12  ;;  %v5538_v39 = vunpack.c.h.b16 %v4260_v12  ;;  %v3657_v61 = vmax.f32 %v3297_v23, %v3301_v37  ;;  %10248 = vmatmul.msk.bf16.gmra.mxu1 %vm881_vm0, %v13393_v57  ;;  %v12923_v11 = vld [vmem:[%s19066_s3 + $0x150] sm:$0xff]  ;;  %v19790_v27 = vld [vmem:[#allocation46_spill] sm:$0xff] }
 0x5f2   :  { %v3872_v59 = vadd.f32 %v16289_v43, %v3654_v50  ;;  %10274 = vmatmul.msk.bf16.gmra.mxu2 %vm881_vm0, %v13393_v57  ;;  %v3873_v4 = vadd.f32 %v16294_v28, %v3655_v19  ;;  %10300 = vmatmul.msk.bf16.gmra.mxu3 %vm881_vm0, %v13393_v57  ;;  %v19789_v49 = vld [vmem:[#allocation436_spill] sm:$0xff]  ;;  %v3299_v23 = vmax.f32 %v19792_v16, %v19791_v17  ;;  %v19795_v57 = vld [vmem:[#allocation439_spill] sm:$0xff] }
 0x5f3   :  { %v3874_v14 = vadd.f32 %v16264_v22, %v3656_v0  ;;  %v3875_v21 = vadd.f32 %v16269_v30, %v3657_v61  ;;  %4704 = vmatpush.bf16.msra.mxu0 %v12915_v1  ;;  %v16650_v6 = vpack.c.b16 %v5537_v18, %v5533_v62  ;;  %v16652_v52 = vpack.c.b16 %v5538_v39, %v5534_v42  ;;  %v19794_v37 = vld [vmem:[#allocation48_spill] sm:$0xff]  ;;  %v19797_v18 = vld [vmem:[#allocation243_spill] sm:$0xff] }
 0x5f4   :  { %v4080_v38 = vmax.f32 %v3872_v59, 0.0  ;;  %v3298_v25 = vmax.f32 %v19790_v27, %v19789_v49  ;;  %v4081_v12 = vmax.f32 %v3873_v4, 0.0  ;;  %4723 = vmatpush.bf16.msra.mxu1 %v12923_v11  ;;  %v3304_v19 = vmax.f32 %v19794_v37, %v19793_v13  ;;  %v19798_v49 = vld [vmem:[#allocation244_spill] sm:$0xff]  ;;  %v19799_v4 = vld [vmem:[#allocation245_spill] sm:$0xff]  ;;  %v19800_v37 = vld [vmem:[#allocation246_spill] sm:$0xff] }
 0x5f5   :  { %19787 = vst [vmem:[#allocation2_spill] sm:$0xff] %v16650_v6  ;;  %v4082_v0 = vmax.f32 %v3874_v14, 0.0  ;;  %v2950_v50 = vpop.f32.mrf.mxu2  ;;  %v3305_v59 = vmax.f32 %v19796_v45, %v19795_v57  ;;  %v4083_v62 = vmax.f32 %v3875_v21, 0.0  ;;  %v3089_v39 = vpop.f32.mrf.mxu3  ;;  %v5536_v11 = vunpack.c.h.b16 %v16620_v31 }
 0x5f6   :  { %19788 = vst [vmem:[#allocation394_spill] sm:$0xff] %v16652_v52  ;;  %v3302_v42 = vmax.f32 %v19797_v18, %v2950_v50  ;;  %v2674_v61 = vpop.f32.mrf.mxu0  ;;  %v4261_v1 = vpack.c.bf16 %v4081_v12, %v4080_v38  ;;  %v3303_v27 = vmax.f32 %v19798_v49, %v3089_v39  ;;  %v2813_v17 = vpop.f32.mrf.mxu1  ;;  %v19805_v49 = vld [vmem:[#allocation441_spill] sm:$0xff] }
 0x5f7   :  { %v3308_v14 = vmax.f32 %v19799_v4, %v2674_v61  ;;  %v4262_v16 = vpack.c.bf16 %v4083_v62, %v4082_v0  ;;  %v3309_v52 = vmax.f32 %v19800_v37, %v2813_v17  ;;  %v19807_v4 = vld [vmem:[#allocation247_spill] sm:$0xff] }
 0x5f8   :  { %v3658_v13 = vmax.f32 %v3298_v25, %v3302_v42  ;;  %v5539_v57 = vunpack.c.l.b16 %v4261_v1  ;;  %v5540_v21 = vunpack.c.h.b16 %v4261_v1  ;;  %v3659_v45 = vmax.f32 %v3299_v23, %v3303_v27  ;;  %v19803_v1 = vld [vmem:[#allocation440_spill] sm:$0xff]  ;;  %v19804_v23 = vld [vmem:[#allocation50_spill] sm:$0xff]  ;;  %v19806_v27 = vld [vmem:[#allocation51_spill] sm:$0xff] }
 0x5f9   :  { %v3660_v50 = vmax.f32 %v3304_v19, %v3308_v14  ;;  %v3661_v6 = vmax.f32 %v3305_v59, %v3309_v52  ;;  %v3306_v19 = vmax.f32 %v19804_v23, %v19803_v1  ;;  %v3307_v52 = vmax.f32 %v19806_v27, %v19805_v49 }
 0x5fa   :  { %v3876_v18 = vadd.f32 %v16289_v43, %v3658_v13  ;;  %v3877_v38 = vadd.f32 %v16294_v28, %v3659_v45  ;;  %v16671_v39 = vpack.c.b16 %v5539_v57, %v5535_v36  ;;  %v16673_v61 = vpack.c.b16 %v5540_v21, %v5536_v11  ;;  %v19808_v13 = vld [vmem:[#allocation442_spill] sm:$0xff]  ;;  %v19809_v11 = vld [vmem:[#allocation52_spill] sm:$0xff]  ;;  %v19811_v45 = vld [vmem:[#allocation249_spill] sm:$0xff] }
 0x5fb   :  { %v3878_v12 = vadd.f32 %v16264_v22, %v3660_v50  ;;  %v3879_v25 = vadd.f32 %v16269_v30, %v3661_v6  ;;  %v3312_v37 = vmax.f32 %v19809_v11, %v19808_v13  ;;  %v19810_v21 = vld [vmem:[#allocation248_spill] sm:$0xff] }
 0x5fc   :  { %19801 = vst [vmem:[#allocation3_spill] sm:$0xff] %v16671_v39  ;;  %v4084_v31 = vmax.f32 %v3876_v18, 0.0  ;;  %v4085_v0 = vmax.f32 %v3877_v38, 0.0  ;;  %v19812_v38 = vld [vmem:[#allocation443_spill] sm:$0xff]  ;;  %v19817_v11 = vld [vmem:[#allocation444_spill] sm:$0xff] }
 0x5fd   :  { %19802 = vst [vmem:[#allocation199_spill] sm:$0xff] %v16673_v61  ;;  %v4086_v62 = vmax.f32 %v3878_v12, 0.0  ;;  %v2952_v42 = vpop.f32.mrf.mxu2  ;;  %v4087_v59 = vmax.f32 %v3879_v25, 0.0  ;;  %v3091_v17 = vpop.f32.mrf.mxu3  ;;  %v19813_v12 = vld [vmem:[#allocation53_spill] sm:$0xff]  ;;  %v19814_v61 = vld [vmem:[#allocation250_spill] sm:$0xff] }
 0x5fe   :  { %v3310_v14 = vmax.f32 %v19807_v4, %v2952_v42  ;;  %v2677_v36 = vpop.f32.mrf.mxu0  ;;  %v4263_v57 = vpack.c.bf16 %v4085_v0, %v4084_v31  ;;  %v3311_v6 = vmax.f32 %v19810_v21, %v3091_v17  ;;  %v2816_v18 = vpop.f32.mrf.mxu1  ;;  %v3313_v1 = vmax.f32 %v19813_v12, %v19812_v38  ;;  %v13394_v4 = vld [vmem:[%s19065_s0 + $0x80] sm:$0xff] }
 0x5ff   :  { %v3316_v50 = vmax.f32 %v19811_v45, %v2677_v36  ;;  %v3317_v49 = vmax.f32 %v19814_v61, %v2816_v18  ;;  %v4264_v25 = vpack.c.bf16 %v4087_v59, %v4086_v62  ;;  %v5541_v31 = vunpack.c.l.b16 %v4262_v16  ;;  %v19820_v45 = vld [vmem:[#allocation55_spill] sm:$0xff] }
 0x600   :  { %v3662_v23 = vmax.f32 %v3306_v19, %v3310_v14  ;;  %v3663_v27 = vmax.f32 %v3307_v52, %v3311_v6  ;;  %v5542_v0 = vunpack.c.h.b16 %v4262_v16  ;;  %v19819_v6 = vld [vmem:[#allocation445_spill] sm:$0xff] }
 0x601   :  { %v3664_v42 = vmax.f32 %v3312_v37, %v3316_v50  ;;  %10223 = vmatmul.msk.bf16.gmra.mxu0 %vm881_vm0, %v13394_v4  ;;  %v3665_v36 = vmax.f32 %v3313_v1, %v3317_v49  ;;  %10249 = vmatmul.msk.bf16.gmra.mxu1 %vm881_vm0, %v13394_v4  ;;  %v5545_v19 = vunpack.c.l.b16 %v4264_v25  ;;  %v5546_v61 = vunpack.c.h.b16 %v4264_v25  ;;  %v19818_v37 = vld [vmem:[#allocation54_spill] sm:$0xff]  ;;  %v19823_v25 = vld [vmem:[#allocation447_spill] sm:$0xff] }
 0x602   :  { %v3880_v17 = vadd.f32 %v16289_v43, %v3662_v23  ;;  %10275 = vmatmul.msk.bf16.gmra.mxu2 %vm881_vm0, %v13394_v4  ;;  %v3881_v62 = vadd.f32 %v16294_v28, %v3663_v27  ;;  %10301 = vmatmul.msk.bf16.gmra.mxu3 %vm881_vm0, %v13394_v4  ;;  %v3314_v21 = vmax.f32 %v19818_v37, %v19817_v11  ;;  %v19821_v1 = vld [vmem:[#allocation446_spill] sm:$0xff]  ;;  %v19822_v23 = vld [vmem:[#allocation56_spill] sm:$0xff]  ;;  %v19824_v27 = vld [vmem:[#allocation57_spill] sm:$0xff] }
 0x603   :  { %v3882_v52 = vadd.f32 %v16264_v22, %v3664_v42  ;;  %v3883_v14 = vadd.f32 %v16269_v30, %v3665_v36  ;;  %v16699_v13 = vpack.c.b16 %v5545_v19, %v5541_v31  ;;  %v16701_v16 = vpack.c.b16 %v5546_v61, %v5542_v0  ;;  %v19825_v31 = vld [vmem:[#allocation251_spill] sm:$0xff]  ;;  %v19826_v19 = vld [vmem:[#allocation252_spill] sm:$0xff]  ;;  %v19827_v11 = vld [vmem:[#allocation253_spill] sm:$0xff] }
 0x604   :  { %v4088_v59 = vmax.f32 %v3880_v17, 0.0  ;;  %v3315_v50 = vmax.f32 %v19820_v45, %v19819_v6  ;;  %v4089_v18 = vmax.f32 %v3881_v62, 0.0  ;;  %v3320_v49 = vmax.f32 %v19822_v23, %v19821_v1 }
 0x605   :  { %19815 = vst [vmem:[#allocation395_spill] sm:$0xff] %v16699_v13  ;;  %v4090_v38 = vmax.f32 %v3882_v52, 0.0  ;;  %v2955_v12 = vpop.f32.mrf.mxu2  ;;  %v3321_v42 = vmax.f32 %v19824_v27, %v19823_v25  ;;  %v4091_v4 = vmax.f32 %v3883_v14, 0.0  ;;  %v3094_v0 = vpop.f32.mrf.mxu3  ;;  %v5543_v62 = vunpack.c.l.b16 %v4263_v57  ;;  %v19828_v13 = vld [vmem:[#allocation254_spill] sm:$0xff] }
 0x606   :  { %19816 = vst [vmem:[#allocation4_spill] sm:$0xff] %v16701_v16  ;;  %v3318_v17 = vmax.f32 %v19825_v31, %v2955_v12  ;;  %v2679_v36 = vpop.f32.mrf.mxu0  ;;  %v3319_v61 = vmax.f32 %v19826_v19, %v3094_v0  ;;  %v2818_v16 = vpop.f32.mrf.mxu1  ;;  %v4265_v6 = vpack.c.bf16 %v4089_v18, %v4088_v59  ;;  %v5544_v1 = vunpack.c.h.b16 %v4263_v57  ;;  %v19835_v19 = vld [vmem:[#allocation255_spill] sm:$0xff] }
 0x607   :  { %v3324_v37 = vmax.f32 %v19827_v11, %v2679_v36  ;;  %v4266_v52 = vpack.c.bf16 %v4091_v4, %v4090_v38  ;;  %v3325_v39 = vmax.f32 %v19828_v13, %v2818_v16  ;;  %v19832_v38 = vld [vmem:[#allocation58_spill] sm:$0xff]  ;;  %v19833_v4 = vld [vmem:[#allocation449_spill] sm:$0xff] }
 0x608   :  { %v3666_v45 = vmax.f32 %v3314_v21, %v3318_v17  ;;  %v3667_v23 = vmax.f32 %v3315_v50, %v3319_v61  ;;  %v5547_v25 = vunpack.c.l.b16 %v4265_v6  ;;  %v5548_v14 = vunpack.c.h.b16 %v4265_v6  ;;  %v19831_v50 = vld [vmem:[#allocation448_spill] sm:$0xff]  ;;  %v19834_v17 = vld [vmem:[#allocation59_spill] sm:$0xff] }
 0x609   :  { %v3668_v48 = vmax.f32 %v3320_v49, %v3324_v37  ;;  %v3669_v27 = vmax.f32 %v3321_v42, %v3325_v39  ;;  %v3322_v49 = vmax.f32 %v19832_v38, %v19831_v50  ;;  %v3323_v39 = vmax.f32 %v19834_v17, %v19833_v4  ;;  %v19836_v37 = vld [vmem:[#allocation450_spill] sm:$0xff]  ;;  %v19837_v6 = vld [vmem:[#allocation60_spill] sm:$0xff] }
 0x60a   :  { %v3884_v12 = vadd.f32 %v16289_v43, %v3666_v45  ;;  %v3885_v31 = vadd.f32 %v16294_v28, %v3667_v23  ;;  %v16718_v36 = vpack.c.b16 %v5547_v25, %v5543_v62  ;;  %v16720_v59 = vpack.c.b16 %v5548_v14, %v5544_v1  ;;  %v19838_v1 = vld [vmem:[#allocation256_spill] sm:$0xff]  ;;  %v19839_v25 = vld [vmem:[#allocation257_spill] sm:$0xff]  ;;  %v19842_v4 = vld [vmem:[#allocation258_spill] sm:$0xff] }
 0x60b   :  { %v3886_v0 = vadd.f32 %v16264_v22, %v3668_v48  ;;  %v3887_v21 = vadd.f32 %v16269_v30, %v3669_v27  ;;  %v3328_v62 = vmax.f32 %v19837_v6, %v19836_v37  ;;  %v19840_v27 = vld [vmem:[#allocation451_spill] sm:$0xff]  ;;  %v5910_v17 = vunpack.c.l.b16 %v4266_v52  ;;  %v19845_v6 = vld [vmem:[#allocation452_spill] sm:$0xff] }
 0x60c   :  { %19829 = vst [vmem:[#allocation200_spill] sm:$0xff] %v16718_v36  ;;  %v4092_v18 = vmax.f32 %v3884_v12, 0.0  ;;  %v4093_v13 = vmax.f32 %v3885_v31, 0.0  ;;  %v19841_v31 = vld [vmem:[#allocation61_spill] sm:$0xff] }
 0x60d   :  { %19830 = vst [vmem:[#allocation201_spill] sm:$0xff] %v16720_v59  ;;  %v4094_v57 = vmax.f32 %v3886_v0, 0.0  ;;  %v2957_v16 = vpop.f32.mrf.mxu2  ;;  %v4095_v42 = vmax.f32 %v3887_v21, 0.0  ;;  %v3096_v48 = vpop.f32.mrf.mxu3  ;;  %v3329_v0 = vmax.f32 %v19841_v31, %v19840_v27 }
 0x60e   :  { %v3326_v61 = vmax.f32 %v19835_v19, %v2957_v16  ;;  %v2682_v11 = vpop.f32.mrf.mxu0  ;;  %v4267_v45 = vpack.c.bf16 %v4093_v13, %v4092_v18  ;;  %v3327_v23 = vmax.f32 %v19838_v1, %v3096_v48  ;;  %v2821_v12 = vpop.f32.mrf.mxu1  ;;  %v5911_v16 = vunpack.c.h.b16 %v4266_v52  ;;  %v13395_v18 = vld [vmem:[%s19065_s0 + $0x88] sm:$0xff] }
 0x60f   :  { %v3332_v14 = vmax.f32 %v19839_v25, %v2682_v11  ;;  %v4268_v50 = vpack.c.bf16 %v4095_v42, %v4094_v57  ;;  %v3333_v21 = vmax.f32 %v19842_v4, %v2821_v12  ;;  %v19848_v25 = vld [vmem:[#allocation63_spill] sm:$0xff]  ;;  %v19852_v4 = vld [vmem:[#allocation65_spill] sm:$0xff] }
 0x610   :  { %v3670_v38 = vmax.f32 %v3322_v49, %v3326_v61  ;;  %v3671_v19 = vmax.f32 %v3323_v39, %v3327_v23  ;;  %v19847_v23 = vld [vmem:[#allocation453_spill] sm:$0xff] }
 0x611   :  { %v3672_v59 = vmax.f32 %v3328_v62, %v3332_v14  ;;  %10224 = vmatmul.msk.bf16.gmra.mxu0 %vm881_vm0, %v13395_v18  ;;  %v5914_v13 = vunpack.c.l.b16 %v4268_v50  ;;  %v5915_v48 = vunpack.c.h.b16 %v4268_v50  ;;  %v3673_v37 = vmax.f32 %v3329_v0, %v3333_v21  ;;  %10250 = vmatmul.msk.bf16.gmra.mxu1 %vm881_vm0, %v13395_v18  ;;  %v19846_v62 = vld [vmem:[#allocation62_spill] sm:$0xff] }
 0x612   :  { %v3888_v11 = vadd.f32 %v16289_v43, %v3670_v38  ;;  %10276 = vmatmul.msk.bf16.gmra.mxu2 %vm881_vm0, %v13395_v18  ;;  %v3889_v57 = vadd.f32 %v16294_v28, %v3671_v19  ;;  %10302 = vmatmul.msk.bf16.gmra.mxu3 %vm881_vm0, %v13395_v18  ;;  %v3330_v1 = vmax.f32 %v19846_v62, %v19845_v6  ;;  %v19849_v0 = vld [vmem:[#allocation454_spill] sm:$0xff]  ;;  %v19851_v38 = vld [vmem:[#allocation455_spill] sm:$0xff]  ;;  %v19855_v62 = vld [vmem:[#allocation261_spill] sm:$0xff] }
 0x613   :  { %v3890_v52 = vadd.f32 %v16264_v22, %v3672_v59  ;;  %v3891_v39 = vadd.f32 %v16269_v30, %v3673_v37  ;;  %v16746_v42 = vpack.c.b16 %v5914_v13, %v5910_v17  ;;  %v16748_v61 = vpack.c.b16 %v5915_v48, %v5911_v16  ;;  %v19850_v59 = vld [vmem:[#allocation64_spill] sm:$0xff]  ;;  %v19853_v17 = vld [vmem:[#allocation259_spill] sm:$0xff] }
 0x614   :  { %v4096_v49 = vmax.f32 %v3888_v11, 0.0  ;;  %v3331_v14 = vmax.f32 %v19848_v25, %v19847_v23  ;;  %v4097_v12 = vmax.f32 %v3889_v57, 0.0  ;;  %v3336_v50 = vmax.f32 %v19850_v59, %v19849_v0  ;;  %v19854_v37 = vld [vmem:[#allocation260_spill] sm:$0xff] }
 0x615   :  { %19843 = vst [vmem:[#allocation396_spill] sm:$0xff] %v16746_v42  ;;  %v4098_v27 = vmax.f32 %v3890_v52, 0.0  ;;  %v2960_v31 = vpop.f32.mrf.mxu2  ;;  %v3337_v21 = vmax.f32 %v19852_v4, %v19851_v38  ;;  %v4099_v19 = vmax.f32 %v3891_v39, 0.0  ;;  %v3099_v16 = vpop.f32.mrf.mxu3  ;;  %v5912_v48 = vunpack.c.l.b16 %v4267_v45  ;;  %v19856_v42 = vld [vmem:[#allocation262_spill] sm:$0xff] }
 0x616   :  { %19844 = vst [vmem:[#allocation5_spill] sm:$0xff] %v16748_v61  ;;  %v3334_v18 = vmax.f32 %v19853_v17, %v2960_v31  ;;  %v2684_v13 = vpop.f32.mrf.mxu0  ;;  %v4269_v11 = vpack.c.bf16 %v4097_v12, %v4096_v49  ;;  %v3335_v6 = vmax.f32 %v19854_v37, %v3099_v16  ;;  %v2823_v57 = vpop.f32.mrf.mxu1  ;;  %v5913_v52 = vunpack.c.h.b16 %v4267_v45  ;;  %v19863_v37 = vld [vmem:[#allocation263_spill] sm:$0xff] }
 0x617   :  { %v3340_v23 = vmax.f32 %v19855_v62, %v2684_v13  ;;  %v4270_v25 = vpack.c.bf16 %v4099_v19, %v4098_v27  ;;  %v3341_v0 = vmax.f32 %v19856_v42, %v2823_v57  ;;  %v19861_v13 = vld [vmem:[#allocation457_spill] sm:$0xff] }
 0x618   :  { %v3674_v61 = vmax.f32 %v3330_v1, %v3334_v18  ;;  %v5916_v59 = vunpack.c.l.b16 %v4269_v11  ;;  %v5917_v36 = vunpack.c.h.b16 %v4269_v11  ;;  %v3675_v38 = vmax.f32 %v3331_v14, %v3335_v6  ;;  %v19859_v18 = vld [vmem:[#allocation456_spill] sm:$0xff]  ;;  %v19860_v14 = vld [vmem:[#allocation66_spill] sm:$0xff] }
 0x619   :  { %v3676_v39 = vmax.f32 %v3336_v50, %v3340_v23  ;;  %v3677_v4 = vmax.f32 %v3337_v21, %v3341_v0  ;;  %v3338_v50 = vmax.f32 %v19860_v14, %v19859_v18  ;;  %v19864_v23 = vld [vmem:[#allocation458_spill] sm:$0xff]  ;;  %v19866_v0 = vld [vmem:[#allocation264_spill] sm:$0xff] }
 0x61a   :  { %v3892_v31 = vadd.f32 %v16289_v43, %v3674_v61  ;;  %v3893_v17 = vadd.f32 %v16294_v28, %v3675_v38  ;;  %v16765_v12 = vpack.c.b16 %v5916_v59, %v5912_v48  ;;  %v16767_v16 = vpack.c.b16 %v5917_v36, %v5913_v52  ;;  %v19862_v61 = vld [vmem:[#allocation67_spill] sm:$0xff]  ;;  %v19865_v36 = vld [vmem:[#allocation68_spill] sm:$0xff]  ;;  %v19867_v38 = vld [vmem:[#allocation265_spill] sm:$0xff] }
 0x61b   :  { %v3894_v49 = vadd.f32 %v16264_v22, %v3676_v39  ;;  %v3895_v1 = vadd.f32 %v16269_v30, %v3677_v4  ;;  %v3339_v21 = vmax.f32 %v19862_v61, %v19861_v13  ;;  %v3344_v57 = vmax.f32 %v19865_v36, %v19864_v23  ;;  %v12930_v4 = vld [vmem:[%s19066_s3 + $0x188] sm:$0xff]  ;;  %v19870_v18 = vld [vmem:[#allocation266_spill] sm:$0xff] }
 0x61c   :  { %19857 = vst [vmem:[#allocation202_spill] sm:$0xff] %v16765_v12  ;;  %v4100_v45 = vmax.f32 %v3892_v31, 0.0  ;;  %v4101_v27 = vmax.f32 %v3893_v17, 0.0  ;;  %v19868_v17 = vld [vmem:[#allocation459_spill] sm:$0xff]  ;;  %4743 = vmatpush.bf16.msra.mxu2 %v12930_v4 }
 0x61d   :  { %19858 = vst [vmem:[#allocation397_spill] sm:$0xff] %v16767_v16  ;;  %v4102_v42 = vmax.f32 %v3894_v49, 0.0  ;;  %v2962_v19 = vpop.f32.mrf.mxu2  ;;  %v4103_v11 = vmax.f32 %v3895_v1, 0.0  ;;  %v3101_v62 = vpop.f32.mrf.mxu3  ;;  %v19869_v49 = vld [vmem:[#allocation69_spill] sm:$0xff]  ;;  %v19876_v4 = vld [vmem:[#allocation71_spill] sm:$0xff] }
 0x61e   :  { %v3342_v6 = vmax.f32 %v19863_v37, %v2962_v19  ;;  %v2687_v48 = vpop.f32.mrf.mxu0  ;;  %v16777_v52 = vpack.c.bf16 %v4101_v27, %v4100_v45  ;;  %v3343_v59 = vmax.f32 %v19866_v0, %v3101_v62  ;;  %v2826_v31 = vpop.f32.mrf.mxu1  ;;  %v3345_v1 = vmax.f32 %v19869_v49, %v19868_v17  ;;  %v12938_v45 = vld [vmem:[%s19066_s3 + $0x1c8] sm:$0xff]  ;;  %v13396_v37 = vld [vmem:[%s19065_s0 + $0x90] sm:$0xff] }
 0x61f   :  { %v3348_v39 = vmax.f32 %v19867_v38, %v2687_v48  ;;  %v3349_v14 = vmax.f32 %v19870_v18, %v2826_v31  ;;  %v4272_v27 = vpack.c.bf16 %v4103_v11, %v4102_v42  ;;  %v5918_v62 = vunpack.c.l.b16 %v4270_v25  ;;  %4762 = vmatpush.bf16.msra.mxu3 %v12938_v45  ;;  %v19874_v38 = vld [vmem:[#allocation70_spill] sm:$0xff]  ;;  %v19875_v31 = vld [vmem:[#allocation461_spill] sm:$0xff]  ;;  %v12914_v18 = vld [vmem:[%s19066_s3 + $0x108] sm:$0xff] }
 0x620   :  { %v3678_v19 = vmax.f32 %v3338_v50, %v3342_v6  ;;  %v3679_v13 = vmax.f32 %v3339_v21, %v3343_v59  ;;  %v5919_v48 = vunpack.c.h.b16 %v4270_v25  ;;  %v19873_v59 = vld [vmem:[#allocation460_spill] sm:$0xff]  ;;  %v3347_v17 = vmax.f32 %v19876_v4, %v19875_v31  ;;  %v19877_v45 = vld [vmem:[#allocation462_spill] sm:$0xff]  ;;  %4705 = vmatpush.bf16.msra.mxu0 %v12914_v18 }
 0x621   :  { %v3680_v61 = vmax.f32 %v3344_v57, %v3348_v39  ;;  %10225 = vmatmul.msk.bf16.gmra.mxu0 %vm881_vm0, %v13396_v37  ;;  %v3681_v6 = vmax.f32 %v3345_v1, %v3349_v14  ;;  %10251 = vmatmul.msk.bf16.gmra.mxu1 %vm881_vm0, %v13396_v37  ;;  %v5922_v23 = vunpack.c.l.b16 %v4272_v27  ;;  %v5923_v42 = vunpack.c.h.b16 %v4272_v27  ;;  %v12922_v14 = vld [vmem:[%s19066_s3 + $0x148] sm:$0xff]  ;;  %v19878_v27 = vld [vmem:[#allocation72_spill] sm:$0xff] }
 0x622   :  { %v3896_v50 = vadd.f32 %v16289_v43, %v3678_v19  ;;  %10277 = vmatmul.msk.bf16.gmra.mxu2 %vm881_vm0, %v13396_v37  ;;  %v3897_v21 = vadd.f32 %v16294_v28, %v3679_v13  ;;  %10303 = vmatmul.msk.bf16.gmra.mxu3 %vm881_vm0, %v13396_v37  ;;  %v3346_v39 = vmax.f32 %v19874_v38, %v19873_v59  ;;  %v19880_v37 = vld [vmem:[#allocation73_spill] sm:$0xff] }
 0x623   :  { %v3898_v11 = vadd.f32 %v16264_v22, %v3680_v61  ;;  %v3899_v57 = vadd.f32 %v16269_v30, %v3681_v6  ;;  %v16801_v25 = vpack.c.b16 %v5922_v23, %v5918_v62  ;;  %v16803_v0 = vpack.c.b16 %v5923_v42, %v5919_v48  ;;  %v19879_v61 = vld [vmem:[#allocation463_spill] sm:$0xff]  ;;  %v19883_v59 = vld [vmem:[#allocation269_spill] sm:$0xff]  ;;  %4724 = vmatpush.bf16.msra.mxu1 %v12922_v14 }
 0x624   :  { %v4104_v36 = vmax.f32 %v3896_v50, 0.0  ;;  %v4105_v49 = vmax.f32 %v3897_v21, 0.0  ;;  %v3352_v13 = vmax.f32 %v19878_v27, %v19877_v45  ;;  %v3353_v62 = vmax.f32 %v19880_v37, %v19879_v61  ;;  %v19881_v50 = vld [vmem:[#allocation267_spill] sm:$0xff]  ;;  %v19882_v21 = vld [vmem:[#allocation268_spill] sm:$0xff]  ;;  %v19884_v27 = vld [vmem:[#allocation270_spill] sm:$0xff] }
 0x625   :  { %19871 = vst [vmem:[#allocation398_spill] sm:$0xff] %v16801_v25  ;;  %v4106_v1 = vmax.f32 %v3898_v11, 0.0  ;;  %v2965_v19 = vpop.f32.mrf.mxu2  ;;  %v4107_v48 = vmax.f32 %v3899_v57, 0.0  ;;  %v3104_v23 = vpop.f32.mrf.mxu3  ;;  %v5921_v57 = vunpack.c.h.b16 %v16777_v52 }
 0x626   :  { %19872 = vst [vmem:[#allocation6_spill] sm:$0xff] %v16803_v0  ;;  %v3350_v6 = vmax.f32 %v19881_v50, %v2965_v19  ;;  %v2689_v42 = vpop.f32.mrf.mxu0  ;;  %v3351_v11 = vmax.f32 %v19882_v21, %v3104_v23  ;;  %v2828_v31 = vpop.f32.mrf.mxu1  ;;  %v4273_v4 = vpack.c.bf16 %v4105_v49, %v4104_v36  ;;  %v5920_v0 = vunpack.c.l.b16 %v16777_v52 }
 0x627   :  { %v3356_v38 = vmax.f32 %v19883_v59, %v2689_v42  ;;  %v4274_v25 = vpack.c.bf16 %v4107_v48, %v4106_v1  ;;  %v3357_v16 = vmax.f32 %v19884_v27, %v2828_v31  ;;  %v19888_v48 = vld [vmem:[#allocation74_spill] sm:$0xff]  ;;  %v19890_v59 = vld [vmem:[#allocation75_spill] sm:$0xff]  ;;  %v19893_v27 = vld [vmem:[#allocation76_spill] sm:$0xff] }
 0x628   :  { %v3682_v45 = vmax.f32 %v3346_v39, %v3350_v6  ;;  %v3683_v61 = vmax.f32 %v3347_v17, %v3351_v11  ;;  %v5924_v37 = vunpack.c.l.b16 %v4273_v4  ;;  %v5925_v50 = vunpack.c.h.b16 %v4273_v4  ;;  %v19889_v11 = vld [vmem:[#allocation465_spill] sm:$0xff] }
 0x629   :  { %v3684_v19 = vmax.f32 %v3352_v13, %v3356_v38  ;;  %v3685_v21 = vmax.f32 %v3353_v62, %v3357_v16  ;;  %v19887_v13 = vld [vmem:[#allocation464_spill] sm:$0xff]  ;;  %v3355_v16 = vmax.f32 %v19890_v59, %v19889_v11  ;;  %v19891_v38 = vld [vmem:[#allocation271_spill] sm:$0xff]  ;;  %v19898_v11 = vld [vmem:[#allocation274_spill] sm:$0xff]  ;;  %v6287_v59 = vunpack.c.l.b16 %v4274_v25 }
 0x62a   :  { %v3900_v23 = vadd.f32 %v16289_v43, %v3682_v45  ;;  %v3901_v42 = vadd.f32 %v16294_v28, %v3683_v61  ;;  %v16828_v36 = vpack.c.b16 %v5924_v37, %v5920_v0  ;;  %v16830_v49 = vpack.c.b16 %v5925_v50, %v5921_v57  ;;  %v19892_v45 = vld [vmem:[#allocation466_spill] sm:$0xff]  ;;  %v19895_v50 = vld [vmem:[#allocation273_spill] sm:$0xff] }
 0x62b   :  { %v3902_v18 = vadd.f32 %v16264_v22, %v3684_v19  ;;  %v3903_v1 = vadd.f32 %v16269_v30, %v3685_v21  ;;  %v3354_v6 = vmax.f32 %v19888_v48, %v19887_v13  ;;  %v3360_v57 = vmax.f32 %v19893_v27, %v19892_v45  ;;  %v19894_v19 = vld [vmem:[#allocation272_spill] sm:$0xff] }
 0x62c   :  { %19885 = vst [vmem:[#allocation399_spill] sm:$0xff] %v16828_v36  ;;  %v4108_v39 = vmax.f32 %v3900_v23, 0.0  ;;  %v4109_v14 = vmax.f32 %v3901_v42, 0.0  ;;  %v19896_v42 = vld [vmem:[#allocation467_spill] sm:$0xff]  ;;  %v19901_v27 = vld [vmem:[#allocation468_spill] sm:$0xff] }
 0x62d   :  { %19886 = vst [vmem:[#allocation7_spill] sm:$0xff] %v16830_v49  ;;  %v4110_v52 = vmax.f32 %v3902_v18, 0.0  ;;  %v2967_v17 = vpop.f32.mrf.mxu2  ;;  %v4111_v62 = vmax.f32 %v3903_v1, 0.0  ;;  %v3106_v4 = vpop.f32.mrf.mxu3  ;;  %v19897_v18 = vld [vmem:[#allocation77_spill] sm:$0xff] }
 0x62e   :  { %v3358_v31 = vmax.f32 %v19891_v38, %v2967_v17  ;;  %v2692_v0 = vpop.f32.mrf.mxu0  ;;  %v4275_v61 = vpack.c.bf16 %v4109_v14, %v4108_v39  ;;  %v3359_v37 = vmax.f32 %v19894_v19, %v3106_v4  ;;  %v2831_v21 = vpop.f32.mrf.mxu1  ;;  %v3361_v13 = vmax.f32 %v19897_v18, %v19896_v42  ;;  %v13397_v39 = vld [vmem:[%s19065_s0 + $0x98] sm:$0xff]  ;;  %v19905_v18 = vld [vmem:[#allocation470_spill] sm:$0xff] }
 0x62f   :  { %v3364_v23 = vmax.f32 %v19895_v50, %v2692_v0  ;;  %v4276_v48 = vpack.c.bf16 %v4111_v62, %v4110_v52  ;;  %v3365_v1 = vmax.f32 %v19898_v11, %v2831_v21  ;;  %v6288_v17 = vunpack.c.h.b16 %v4274_v25  ;;  %v19903_v19 = vld [vmem:[#allocation469_spill] sm:$0xff] }
 0x630   :  { %v3686_v49 = vmax.f32 %v3354_v6, %v3358_v31  ;;  %v3687_v38 = vmax.f32 %v3355_v16, %v3359_v37  ;;  %v19904_v37 = vld [vmem:[#allocation79_spill] sm:$0xff]  ;;  %v19908_v11 = vld [vmem:[#allocation81_spill] sm:$0xff] }
 0x631   :  { %v3688_v36 = vmax.f32 %v3360_v57, %v3364_v23  ;;  %10226 = vmatmul.msk.bf16.gmra.mxu0 %vm881_vm0, %v13397_v39  ;;  %v6291_v14 = vunpack.c.l.b16 %v4276_v48  ;;  %v6292_v4 = vunpack.c.h.b16 %v4276_v48  ;;  %v3689_v45 = vmax.f32 %v3361_v13, %v3365_v1  ;;  %10252 = vmatmul.msk.bf16.gmra.mxu1 %vm881_vm0, %v13397_v39  ;;  %v19907_v48 = vld [vmem:[#allocation471_spill] sm:$0xff] }
 0x632   :  { %v3904_v0 = vadd.f32 %v16289_v43, %v3686_v49  ;;  %10278 = vmatmul.msk.bf16.gmra.mxu2 %vm881_vm0, %v13397_v39  ;;  %v3905_v52 = vadd.f32 %v16294_v28, %v3687_v38  ;;  %10304 = vmatmul.msk.bf16.gmra.mxu3 %vm881_vm0, %v13397_v39  ;;  %v19902_v49 = vld [vmem:[#allocation78_spill] sm:$0xff]  ;;  %v3363_v50 = vmax.f32 %v19904_v37, %v19903_v19 }
 0x633   :  { %v3906_v25 = vadd.f32 %v16264_v22, %v3688_v36  ;;  %v3907_v16 = vadd.f32 %v16269_v30, %v3689_v45  ;;  %v16856_v62 = vpack.c.b16 %v6291_v14, %v6287_v59  ;;  %v16858_v31 = vpack.c.b16 %v6292_v4, %v6288_v17  ;;  %v19906_v36 = vld [vmem:[#allocation80_spill] sm:$0xff]  ;;  %v19909_v59 = vld [vmem:[#allocation275_spill] sm:$0xff] }
 0x634   :  { %v4112_v6 = vmax.f32 %v3904_v0, 0.0  ;;  %v3362_v57 = vmax.f32 %v19902_v49, %v19901_v27  ;;  %v4113_v23 = vmax.f32 %v3905_v52, 0.0  ;;  %v3368_v13 = vmax.f32 %v19906_v36, %v19905_v18  ;;  %v19910_v45 = vld [vmem:[#allocation276_spill] sm:$0xff]  ;;  %v19911_v49 = vld [vmem:[#allocation277_spill] sm:$0xff] }
 0x635   :  { %19899 = vst [vmem:[#allocation400_spill] sm:$0xff] %v16856_v62  ;;  %v4114_v21 = vmax.f32 %v3906_v25, 0.0  ;;  %v2970_v42 = vpop.f32.mrf.mxu2  ;;  %v3369_v1 = vmax.f32 %v19908_v11, %v19907_v48  ;;  %v4115_v38 = vmax.f32 %v3907_v16, 0.0  ;;  %v3109_v17 = vpop.f32.mrf.mxu3  ;;  %v6289_v4 = vunpack.c.l.b16 %v4275_v61  ;;  %v19912_v62 = vld [vmem:[#allocation278_spill] sm:$0xff] }
 0x636   :  { %19900 = vst [vmem:[#allocation8_spill] sm:$0xff] %v16858_v31  ;;  %v3366_v39 = vmax.f32 %v19909_v59, %v2970_v42  ;;  %v2694_v14 = vpop.f32.mrf.mxu0  ;;  %v4277_v0 = vpack.c.bf16 %v4113_v23, %v4112_v6  ;;  %v3367_v27 = vmax.f32 %v19910_v45, %v3109_v17  ;;  %v2833_v52 = vpop.f32.mrf.mxu1  ;;  %v6290_v25 = vunpack.c.h.b16 %v4275_v61  ;;  %v19919_v45 = vld [vmem:[#allocation279_spill] sm:$0xff] }
 0x637   :  { %v3372_v19 = vmax.f32 %v19911_v49, %v2694_v14  ;;  %v4278_v37 = vpack.c.bf16 %v4115_v38, %v4114_v21  ;;  %v3373_v18 = vmax.f32 %v19912_v62, %v2833_v52  ;;  %v19917_v14 = vld [vmem:[#allocation473_spill] sm:$0xff] }
 0x638   :  { %v3690_v31 = vmax.f32 %v3362_v57, %v3366_v39  ;;  %v6293_v36 = vunpack.c.l.b16 %v4277_v0  ;;  %v6294_v12 = vunpack.c.h.b16 %v4277_v0  ;;  %v3691_v48 = vmax.f32 %v3363_v50, %v3367_v27  ;;  %v19915_v39 = vld [vmem:[#allocation472_spill] sm:$0xff]  ;;  %v19916_v50 = vld [vmem:[#allocation82_spill] sm:$0xff] }
 0x639   :  { %v3692_v16 = vmax.f32 %v3368_v13, %v3372_v19  ;;  %v3693_v11 = vmax.f32 %v3369_v1, %v3373_v18  ;;  %v3370_v13 = vmax.f32 %v19916_v50, %v19915_v39  ;;  %v19920_v19 = vld [vmem:[#allocation474_spill] sm:$0xff]  ;;  %v19922_v18 = vld [vmem:[#allocation280_spill] sm:$0xff] }
 0x63a   :  { %v3908_v42 = vadd.f32 %v16289_v43, %v3690_v31  ;;  %v3909_v59 = vadd.f32 %v16294_v28, %v3691_v48  ;;  %v16875_v23 = vpack.c.b16 %v6293_v36, %v6289_v4  ;;  %v16877_v17 = vpack.c.b16 %v6294_v12, %v6290_v25  ;;  %v19918_v31 = vld [vmem:[#allocation83_spill] sm:$0xff]  ;;  %v19921_v12 = vld [vmem:[#allocation84_spill] sm:$0xff]  ;;  %v19923_v48 = vld [vmem:[#allocation281_spill] sm:$0xff] }
 0x63b   :  { %v3910_v6 = vadd.f32 %v16264_v22, %v3692_v16  ;;  %v3911_v57 = vadd.f32 %v16269_v30, %v3693_v11  ;;  %v3371_v1 = vmax.f32 %v19918_v31, %v19917_v14  ;;  %v3376_v52 = vmax.f32 %v19921_v12, %v19920_v19  ;;  %v19924_v11 = vld [vmem:[#allocation475_spill] sm:$0xff]  ;;  %v19926_v50 = vld [vmem:[#allocation282_spill] sm:$0xff] }
 0x63c   :  { %19913 = vst [vmem:[#allocation401_spill] sm:$0xff] %v16875_v23  ;;  %v4116_v61 = vmax.f32 %v3908_v42, 0.0  ;;  %v4117_v21 = vmax.f32 %v3909_v59, 0.0  ;;  %v19925_v59 = vld [vmem:[#allocation85_spill] sm:$0xff] }
 0x63d   :  { %19914 = vst [vmem:[#allocation9_spill] sm:$0xff] %v16877_v17  ;;  %v4118_v62 = vmax.f32 %v3910_v6, 0.0  ;;  %v2972_v38 = vpop.f32.mrf.mxu2  ;;  %v4119_v0 = vmax.f32 %v3911_v57, 0.0  ;;  %v3111_v49 = vpop.f32.mrf.mxu3  ;;  %v3377_v6 = vmax.f32 %v19925_v59, %v19924_v11 }
 0x63e   :  { %v3374_v27 = vmax.f32 %v19919_v45, %v2972_v38  ;;  %v2697_v4 = vpop.f32.mrf.mxu0  ;;  %v4279_v25 = vpack.c.bf16 %v4117_v21, %v4116_v61  ;;  %v3375_v36 = vmax.f32 %v19922_v18, %v3111_v49  ;;  %v2836_v42 = vpop.f32.mrf.mxu1  ;;  %v13398_v45 = vld [vmem:[%s19065_s0 + $0xa0] sm:$0xff]  ;;  %v6295_v61 = vunpack.c.l.b16 %v4278_v37 }
 0x63f   :  { %v3380_v16 = vmax.f32 %v19923_v48, %v2697_v4  ;;  %v3381_v14 = vmax.f32 %v19926_v50, %v2836_v42  ;;  %v4280_v57 = vpack.c.bf16 %v4119_v0, %v4118_v62  ;;  %v6296_v21 = vunpack.c.h.b16 %v4278_v37  ;;  %v19930_v18 = vld [vmem:[#allocation86_spill] sm:$0xff]  ;;  %v19931_v48 = vld [vmem:[#allocation477_spill] sm:$0xff]  ;;  %v19934_v50 = vld [vmem:[#allocation88_spill] sm:$0xff] }
 0x640   :  { %v3694_v39 = vmax.f32 %v3370_v13, %v3374_v27  ;;  %v3695_v31 = vmax.f32 %v3371_v1, %v3375_v36 }
 0x641   :  { %v3696_v38 = vmax.f32 %v3376_v52, %v3380_v16  ;;  %10227 = vmatmul.msk.bf16.gmra.mxu0 %vm881_vm0, %v13398_v45  ;;  %v3697_v4 = vmax.f32 %v3377_v6, %v3381_v14  ;;  %10253 = vmatmul.msk.bf16.gmra.mxu1 %vm881_vm0, %v13398_v45  ;;  %v6299_v13 = vunpack.c.l.b16 %v4280_v57  ;;  %v6300_v27 = vunpack.c.h.b16 %v4280_v57  ;;  %v19929_v52 = vld [vmem:[#allocation476_spill] sm:$0xff]  ;;  %v19932_v16 = vld [vmem:[#allocation87_spill] sm:$0xff] }
 0x642   :  { %v3912_v49 = vadd.f32 %v16289_v43, %v3694_v39  ;;  %10279 = vmatmul.msk.bf16.gmra.mxu2 %vm881_vm0, %v13398_v45  ;;  %v3913_v62 = vadd.f32 %v16294_v28, %v3695_v31  ;;  %10305 = vmatmul.msk.bf16.gmra.mxu3 %vm881_vm0, %v13398_v45  ;;  %v3378_v36 = vmax.f32 %v19930_v18, %v19929_v52  ;;  %v19933_v39 = vld [vmem:[#allocation478_spill] sm:$0xff]  ;;  %v19935_v57 = vld [vmem:[#allocation479_spill] sm:$0xff]  ;;  %v19936_v31 = vld [vmem:[#allocation89_spill] sm:$0xff] }
 0x643   :  { %v3914_v1 = vadd.f32 %v16264_v22, %v3696_v38  ;;  %v3915_v19 = vadd.f32 %v16269_v30, %v3697_v4  ;;  %v16903_v12 = vpack.c.b16 %v6299_v13, %v6295_v61  ;;  %v16905_v37 = vpack.c.b16 %v6300_v27, %v6296_v21  ;;  %v19937_v61 = vld [vmem:[#allocation283_spill] sm:$0xff]  ;;  %v19938_v13 = vld [vmem:[#allocation284_spill] sm:$0xff]  ;;  %v19939_v52 = vld [vmem:[#allocation285_spill] sm:$0xff] }
 0x644   :  { %v4120_v0 = vmax.f32 %v3912_v49, 0.0  ;;  %v3379_v42 = vmax.f32 %v19932_v16, %v19931_v48  ;;  %v4121_v11 = vmax.f32 %v3913_v62, 0.0  ;;  %v3384_v14 = vmax.f32 %v19934_v50, %v19933_v39 }
 0x645   :  { %19927 = vst [vmem:[#allocation203_spill] sm:$0xff] %v16903_v12  ;;  %v4122_v59 = vmax.f32 %v3914_v1, 0.0  ;;  %v2975_v6 = vpop.f32.mrf.mxu2  ;;  %v3385_v38 = vmax.f32 %v19936_v31, %v19935_v57  ;;  %v4123_v45 = vmax.f32 %v3915_v19, 0.0  ;;  %v3114_v21 = vpop.f32.mrf.mxu3  ;;  %v6297_v62 = vunpack.c.l.b16 %v4279_v25  ;;  %v19940_v12 = vld [vmem:[#allocation286_spill] sm:$0xff] }
 0x646   :  { %19928 = vst [vmem:[#allocation204_spill] sm:$0xff] %v16905_v37  ;;  %v3382_v49 = vmax.f32 %v19937_v61, %v2975_v6  ;;  %v2699_v4 = vpop.f32.mrf.mxu0  ;;  %v3383_v27 = vmax.f32 %v19938_v13, %v3114_v21  ;;  %v2838_v37 = vpop.f32.mrf.mxu1  ;;  %v4281_v48 = vpack.c.bf16 %v4121_v11, %v4120_v0  ;;  %v6298_v39 = vunpack.c.h.b16 %v4279_v25 }
 0x647   :  { %v3388_v18 = vmax.f32 %v19939_v52, %v2699_v4  ;;  %v4282_v1 = vpack.c.bf16 %v4123_v45, %v4122_v59  ;;  %v3389_v17 = vmax.f32 %v19940_v12, %v2838_v37  ;;  %v19943_v45 = vld [vmem:[#allocation287_spill] sm:$0xff] }
 0x648   :  { %v3698_v16 = vmax.f32 %v3378_v36, %v3382_v49  ;;  %v3699_v50 = vmax.f32 %v3379_v42, %v3383_v27  ;;  %v6301_v57 = vunpack.c.l.b16 %v4281_v48  ;;  %v6302_v19 = vunpack.c.h.b16 %v4281_v48  ;;  %v19941_v42 = vld [vmem:[#allocation90_spill] sm:$0xff]  ;;  %v19944_v27 = vld [vmem:[#allocation92_spill] sm:$0xff] }
 0x649   :  { %v3700_v23 = vmax.f32 %v3384_v14, %v3388_v18  ;;  %v3701_v31 = vmax.f32 %v3385_v38, %v3389_v17  ;;  %v3386_v59 = vmax.f32 %v19941_v42, %v15911_v8  ;;  %v19942_v14 = vld [vmem:[#allocation91_spill] sm:$0xff]  ;;  %v3392_v52 = vmax.f32 %v19944_v27, %v15915_v44  ;;  %v19945_v48 = vld [vmem:[#allocation288_spill] sm:$0xff]  ;;  %v19947_v8 = vld [vmem:[#allocation93_spill] sm:$0xff] }
 0x64a   :  { %v3916_v6 = vadd.f32 %v16289_v43, %v3698_v16  ;;  %v3917_v61 = vadd.f32 %v16294_v28, %v3699_v50  ;;  %v16922_v4 = vpack.c.b16 %v6301_v57, %v6297_v62  ;;  %v16924_v0 = vpack.c.b16 %v6302_v19, %v6298_v39  ;;  %v19946_v16 = vld [vmem:[#allocation289_spill] sm:$0xff]  ;;  %v13399_v44 = vld [vmem:[%s19065_s0 + $0xa8] sm:$0xff] }
 0x64b   :  { %v3918_v21 = vadd.f32 %v16264_v22, %v3700_v23  ;;  %v3919_v36 = vadd.f32 %v16269_v30, %v3701_v31  ;;  %v3387_v17 = vmax.f32 %v19942_v14, %v15913_v56  ;;  %v3393_v57 = vmax.f32 %v19947_v8, %v15917_v32 }
 0x64c   :  { %v4124_v11 = vmax.f32 %v3916_v6, 0.0  ;;  %v4125_v12 = vmax.f32 %v3917_v61, 0.0  ;;  %v19948_v6 = vld [vmem:[#allocation290_spill] sm:$0xff]  ;;  %v6664_v61 = vunpack.c.l.b16 %v4282_v1 }
 0x64d   :  { %v4126_v25 = vmax.f32 %v3918_v21, 0.0  ;;  %v2977_v37 = vpop.f32.mrf.mxu2  ;;  %v4127_v38 = vmax.f32 %v3919_v36, 0.0  ;;  %v3116_v23 = vpop.f32.mrf.mxu3  ;;  %v6665_v21 = vunpack.c.h.b16 %v4282_v1 }
 0x64e   :  { %v3390_v49 = vmax.f32 %v19943_v45, %v2977_v37  ;;  %v2702_v13 = vpop.f32.mrf.mxu0  ;;  %v16934_v18 = vpack.c.bf16 %v4125_v12, %v4124_v11  ;;  %v3391_v62 = vmax.f32 %v19945_v48, %v3116_v23  ;;  %v2841_v50 = vpop.f32.mrf.mxu1  ;;  %v19949_v45 = vld [vmem:[#allocation480_spill] sm:$0xff]  ;;  %v19951_v48 = vld [vmem:[#allocation481_spill] sm:$0xff] }
 0x64f   :  { %v3396_v39 = vmax.f32 %v19946_v16, %v2702_v13  ;;  %v4284_v19 = vpack.c.bf16 %v4127_v38, %v4126_v25  ;;  %v3397_v31 = vmax.f32 %v19948_v6, %v2841_v50  ;;  %v19954_v50 = vld [vmem:[#allocation96_spill] sm:$0xff] }
 0x650   :  { %v3702_v56 = vmax.f32 %v3386_v59, %v3390_v49  ;;  %v3703_v36 = vmax.f32 %v3387_v17, %v3391_v62  ;;  %v19950_v49 = vld [vmem:[#allocation94_spill] sm:$0xff]  ;;  %v19952_v62 = vld [vmem:[#allocation95_spill] sm:$0xff] }
 0x651   :  { %v3704_v37 = vmax.f32 %v3392_v52, %v3396_v39  ;;  %10228 = vmatmul.msk.bf16.gmra.mxu0 %vm881_vm0, %v13399_v44  ;;  %v6668_v11 = vunpack.c.l.b16 %v4284_v19  ;;  %v6669_v12 = vunpack.c.h.b16 %v4284_v19  ;;  %v3705_v14 = vmax.f32 %v3393_v57, %v3397_v31  ;;  %10254 = vmatmul.msk.bf16.gmra.mxu1 %vm881_vm0, %v13399_v44  ;;  %v19953_v39 = vld [vmem:[#allocation482_spill] sm:$0xff]  ;;  %v19955_v19 = vld [vmem:[#allocation291_spill] sm:$0xff] }
 0x652   :  { %v3920_v42 = vadd.f32 %v16289_v43, %v3702_v56  ;;  %10280 = vmatmul.msk.bf16.gmra.mxu2 %vm881_vm0, %v13399_v44  ;;  %v3921_v32 = vadd.f32 %v16294_v28, %v3703_v36  ;;  %10306 = vmatmul.msk.bf16.gmra.mxu3 %vm881_vm0, %v13399_v44  ;;  %v3394_v23 = vmax.f32 %v19950_v49, %v19949_v45  ;;  %v19958_v44 = vld [vmem:[#allocation292_spill] sm:$0xff]  ;;  %v19960_v49 = vld [vmem:[#allocation294_spill] sm:$0xff] }
 0x653   :  { %v3922_v1 = vadd.f32 %v16264_v22, %v3704_v37  ;;  %v3923_v59 = vadd.f32 %v16269_v30, %v3705_v14  ;;  %v16952_v17 = vpack.c.b16 %v6668_v11, %v6664_v61  ;;  %v16954_v38 = vpack.c.b16 %v6669_v12, %v6665_v21  ;;  %v19956_v61 = vld [vmem:[#allocation483_spill] sm:$0xff]  ;;  %v19957_v21 = vld [vmem:[#allocation97_spill] sm:$0xff] }
 0x654   :  { %v4128_v25 = vmax.f32 %v3920_v42, 0.0  ;;  %v4129_v13 = vmax.f32 %v3921_v32, 0.0  ;;  %v3395_v16 = vmax.f32 %v19952_v62, %v19951_v48  ;;  %v3400_v8 = vmax.f32 %v19954_v50, %v19953_v39  ;;  %v19959_v12 = vld [vmem:[#allocation293_spill] sm:$0xff]  ;;  %v12929_v50 = vld [vmem:[%s19066_s3 + $0x180] sm:$0xff] }
 0x655   :  { %v4130_v27 = vmax.f32 %v3922_v1, 0.0  ;;  %v2980_v52 = vpop.f32.mrf.mxu2  ;;  %v4131_v57 = vmax.f32 %v3923_v59, 0.0  ;;  %v3119_v6 = vpop.f32.mrf.mxu3  ;;  %v3401_v36 = vmax.f32 %v19957_v21, %v19956_v61  ;;  %v6666_v32 = vunpack.c.l.b16 %v16934_v18  ;;  %4744 = vmatpush.bf16.msra.mxu2 %v12929_v50 }
 0x656   :  { %v3398_v56 = vmax.f32 %v19955_v19, %v2980_v52  ;;  %v2704_v31 = vpop.f32.mrf.mxu0  ;;  %v4285_v37 = vpack.c.bf16 %v4129_v13, %v4128_v25  ;;  %v3399_v11 = vmax.f32 %v19958_v44, %v3119_v6  ;;  %v2843_v14 = vpop.f32.mrf.mxu1  ;;  %v12937_v25 = vld [vmem:[%s19066_s3 + $0x1c0] sm:$0xff] }
 0x657   :  { %v3404_v42 = vmax.f32 %v19959_v12, %v2704_v31  ;;  %v4286_v1 = vpack.c.bf16 %v4131_v57, %v4130_v27  ;;  %v3405_v48 = vmax.f32 %v19960_v49, %v2843_v14  ;;  %v12913_v13 = vld [vmem:[%s19066_s3 + $0x100] sm:$0xff]  ;;  %4763 = vmatpush.bf16.msra.mxu3 %v12937_v25  ;;  %v19965_v12 = vld [vmem:[#allocation485_spill] sm:$0xff]  ;;  %v19967_v49 = vld [vmem:[#allocation295_spill] sm:$0xff] }
 0x658   :  { %v3706_v45 = vmax.f32 %v3394_v23, %v3398_v56  ;;  %v6670_v59 = vunpack.c.l.b16 %v4285_v37  ;;  %v6671_v62 = vunpack.c.h.b16 %v4285_v37  ;;  %v3707_v52 = vmax.f32 %v3395_v16, %v3399_v11  ;;  %v12921_v16 = vld [vmem:[%s19066_s3 + $0x140] sm:$0xff]  ;;  %4706 = vmatpush.bf16.msra.mxu0 %v12913_v13  ;;  %v19963_v37 = vld [vmem:[#allocation484_spill] sm:$0xff] }
 0x659   :  { %v3708_v39 = vmax.f32 %v3400_v8, %v3404_v42  ;;  %v6667_v23 = vunpack.c.h.b16 %v16934_v18  ;;  %v3709_v57 = vmax.f32 %v3401_v36, %v3405_v48  ;;  %4725 = vmatpush.bf16.msra.mxu1 %v12921_v16  ;;  %v19964_v44 = vld [vmem:[#allocation98_spill] sm:$0xff]  ;;  %v19966_v42 = vld [vmem:[#allocation99_spill] sm:$0xff] }
 0x65a   :  { %v3924_v27 = vadd.f32 %v16289_v43, %v3706_v45  ;;  %v3925_v8 = vadd.f32 %v16294_v28, %v3707_v52  ;;  %v16985_v56 = vpack.c.b16 %v6670_v59, %v6666_v32  ;;  %v3402_v11 = vmax.f32 %v19964_v44, %v19963_v37  ;;  %v19968_v52 = vld [vmem:[#allocation486_spill] sm:$0xff]  ;;  %v19972_v16 = vld [vmem:[#allocation487_spill] sm:$0xff] }
 0x65b   :  { %v3926_v19 = vadd.f32 %v16264_v22, %v3708_v39  ;;  %v3927_v31 = vadd.f32 %v16269_v30, %v3709_v57  ;;  %v16988_v18 = vpack.c.b16 %v6671_v62, %v6667_v23  ;;  %v3403_v14 = vmax.f32 %v19966_v42, %v19965_v12  ;;  %v19969_v39 = vld [vmem:[#allocation100_spill] sm:$0xff]  ;;  %v19971_v23 = vld [vmem:[#allocation297_spill] sm:$0xff]  ;;  %v19974_v44 = vld [vmem:[#allocation298_spill] sm:$0xff] }
 0x65c   :  { %19961 = vst [vmem:[#allocation205_spill] sm:$0xff] %v16985_v56  ;;  %v4132_v6 = vmax.f32 %v3924_v27, 0.0  ;;  %v4133_v61 = vmax.f32 %v3925_v8, 0.0  ;;  %v3408_v50 = vmax.f32 %v19969_v39, %v19968_v52  ;;  %v19970_v62 = vld [vmem:[#allocation296_spill] sm:$0xff]  ;;  %v19973_v8 = vld [vmem:[#allocation101_spill] sm:$0xff] }
 0x65d   :  { %19962 = vst [vmem:[#allocation206_spill] sm:$0xff] %v16988_v18  ;;  %v4134_v21 = vmax.f32 %v3926_v19, 0.0  ;;  %v2982_v36 = vpop.f32.mrf.mxu2  ;;  %v4135_v45 = vmax.f32 %v3927_v31, 0.0  ;;  %v3121_v48 = vpop.f32.mrf.mxu3  ;;  %v3409_v19 = vmax.f32 %v19973_v8, %v19972_v16 }
 0x65e   :  { %v3406_v32 = vmax.f32 %v19967_v49, %v2982_v36  ;;  %v2707_v59 = vpop.f32.mrf.mxu0  ;;  %v4287_v25 = vpack.c.bf16 %v4133_v61, %v4132_v6  ;;  %v3407_v13 = vmax.f32 %v19970_v62, %v3121_v48  ;;  %v2846_v57 = vpop.f32.mrf.mxu1  ;;  %v13400_v49 = vld [vmem:[%s19065_s0 + $0xb0] sm:$0xff]  ;;  %v6672_v6 = vunpack.c.l.b16 %v4286_v1  ;;  %v19978_v62 = vld [vmem:[#allocation102_spill] sm:$0xff] }
 0x65f   :  { %v3412_v27 = vmax.f32 %v19971_v23, %v2707_v59  ;;  %v3413_v12 = vmax.f32 %v19974_v44, %v2846_v57  ;;  %v4288_v31 = vpack.c.bf16 %v4135_v45, %v4134_v21  ;;  %v6673_v61 = vunpack.c.h.b16 %v4286_v1  ;;  %v19979_v23 = vld [vmem:[#allocation489_spill] sm:$0xff]  ;;  %v19982_v44 = vld [vmem:[#allocation104_spill] sm:$0xff] }
 0x660   :  { %v3710_v37 = vmax.f32 %v3402_v11, %v3406_v32  ;;  %v3711_v42 = vmax.f32 %v3403_v14, %v3407_v13 }
 0x661   :  { %v3712_v36 = vmax.f32 %v3408_v50, %v3412_v27  ;;  %10229 = vmatmul.msk.bf16.gmra.mxu0 %vm881_vm0, %v13400_v49  ;;  %v3713_v59 = vmax.f32 %v3409_v19, %v3413_v12  ;;  %10255 = vmatmul.msk.bf16.gmra.mxu1 %vm881_vm0, %v13400_v49  ;;  %v6676_v11 = vunpack.c.l.b16 %v4288_v31  ;;  %v6677_v32 = vunpack.c.h.b16 %v4288_v31  ;;  %v19977_v50 = vld [vmem:[#allocation488_spill] sm:$0xff]  ;;  %v19980_v27 = vld [vmem:[#allocation103_spill] sm:$0xff] }
 0x662   :  { %v3928_v48 = vadd.f32 %v16289_v43, %v3710_v37  ;;  %10281 = vmatmul.msk.bf16.gmra.mxu2 %vm881_vm0, %v13400_v49  ;;  %v3929_v21 = vadd.f32 %v16294_v28, %v3711_v42  ;;  %10307 = vmatmul.msk.bf16.gmra.mxu3 %vm881_vm0, %v13400_v49  ;;  %v3410_v13 = vmax.f32 %v19978_v62, %v19977_v50  ;;  %v19981_v37 = vld [vmem:[#allocation490_spill] sm:$0xff]  ;;  %v19983_v31 = vld [vmem:[#allocation491_spill] sm:$0xff]  ;;  %v19984_v42 = vld [vmem:[#allocation105_spill] sm:$0xff] }
 0x663   :  { %v3930_v14 = vadd.f32 %v16264_v22, %v3712_v36  ;;  %v3931_v52 = vadd.f32 %v16269_v30, %v3713_v59  ;;  %v17013_v39 = vpack.c.b16 %v6676_v11, %v6672_v6  ;;  %v17015_v1 = vpack.c.b16 %v6677_v32, %v6673_v61  ;;  %v19985_v6 = vld [vmem:[#allocation299_spill] sm:$0xff]  ;;  %v19986_v11 = vld [vmem:[#allocation300_spill] sm:$0xff]  ;;  %v19987_v50 = vld [vmem:[#allocation301_spill] sm:$0xff] }
 0x664   :  { %v4136_v45 = vmax.f32 %v3928_v48, 0.0  ;;  %v3411_v57 = vmax.f32 %v19980_v27, %v19979_v23  ;;  %v4137_v16 = vmax.f32 %v3929_v21, 0.0  ;;  %v3416_v12 = vmax.f32 %v19982_v44, %v19981_v37 }
 0x665   :  { %19975 = vst [vmem:[#allocation402_spill] sm:$0xff] %v17013_v39  ;;  %v4138_v8 = vmax.f32 %v3930_v14, 0.0  ;;  %v2985_v19 = vpop.f32.mrf.mxu2  ;;  %v3417_v36 = vmax.f32 %v19984_v42, %v19983_v31  ;;  %v4139_v49 = vmax.f32 %v3931_v52, 0.0  ;;  %v3124_v61 = vpop.f32.mrf.mxu3  ;;  %v6674_v21 = vunpack.c.l.b16 %v4287_v25  ;;  %v19988_v39 = vld [vmem:[#allocation302_spill] sm:$0xff] }
 0x666   :  { %19976 = vst [vmem:[#allocation10_spill] sm:$0xff] %v17015_v1  ;;  %v3414_v48 = vmax.f32 %v19985_v6, %v2985_v19  ;;  %v2709_v59 = vpop.f32.mrf.mxu0  ;;  %v3415_v32 = vmax.f32 %v19986_v11, %v3124_v61  ;;  %v2848_v1 = vpop.f32.mrf.mxu1  ;;  %v4289_v23 = vpack.c.bf16 %v4137_v16, %v4136_v45  ;;  %v6675_v37 = vunpack.c.h.b16 %v4287_v25  ;;  %v19995_v11 = vld [vmem:[#allocation303_spill] sm:$0xff] }
 0x667   :  { %v3420_v62 = vmax.f32 %v19987_v50, %v2709_v59  ;;  %v4290_v14 = vpack.c.bf16 %v4139_v49, %v4138_v8  ;;  %v3421_v18 = vmax.f32 %v19988_v39, %v2848_v1  ;;  %v19992_v8 = vld [vmem:[#allocation106_spill] sm:$0xff]  ;;  %v19993_v49 = vld [vmem:[#allocation493_spill] sm:$0xff] }
 0x668   :  { %v3714_v27 = vmax.f32 %v3410_v13, %v3414_v48  ;;  %v3715_v44 = vmax.f32 %v3411_v57, %v3415_v32  ;;  %v6678_v31 = vunpack.c.l.b16 %v4289_v23  ;;  %v6679_v52 = vunpack.c.h.b16 %v4289_v23  ;;  %v19991_v57 = vld [vmem:[#allocation492_spill] sm:$0xff]  ;;  %v19994_v48 = vld [vmem:[#allocation107_spill] sm:$0xff] }
 0x669   :  { %v3716_v56 = vmax.f32 %v3416_v12, %v3420_v62  ;;  %v3717_v42 = vmax.f32 %v3417_v36, %v3421_v18  ;;  %v3418_v12 = vmax.f32 %v19992_v8, %v19991_v57  ;;  %v3419_v18 = vmax.f32 %v19994_v48, %v19993_v49  ;;  %v19996_v62 = vld [vmem:[#allocation494_spill] sm:$0xff]  ;;  %v19997_v23 = vld [vmem:[#allocation108_spill] sm:$0xff] }
 0x66a   :  { %v3932_v19 = vadd.f32 %v16289_v43, %v3714_v27  ;;  %v3933_v6 = vadd.f32 %v16294_v28, %v3715_v44  ;;  %v17032_v59 = vpack.c.b16 %v6678_v31, %v6674_v21  ;;  %v17034_v45 = vpack.c.b16 %v6679_v52, %v6675_v37  ;;  %v19998_v37 = vld [vmem:[#allocation304_spill] sm:$0xff]  ;;  %v19999_v31 = vld [vmem:[#allocation305_spill] sm:$0xff]  ;;  %v20002_v49 = vld [vmem:[#allocation306_spill] sm:$0xff] }
 0x66b   :  { %v3934_v61 = vadd.f32 %v16264_v22, %v3716_v56  ;;  %v3935_v13 = vadd.f32 %v16269_v30, %v3717_v42  ;;  %v3424_v21 = vmax.f32 %v19997_v23, %v19996_v62  ;;  %v20000_v42 = vld [vmem:[#allocation495_spill] sm:$0xff]  ;;  %v7041_v48 = vunpack.c.l.b16 %v4290_v14  ;;  %v20005_v23 = vld [vmem:[#allocation496_spill] sm:$0xff] }
 0x66c   :  { %19989 = vst [vmem:[#allocation403_spill] sm:$0xff] %v17032_v59  ;;  %v4140_v16 = vmax.f32 %v3932_v19, 0.0  ;;  %v4141_v39 = vmax.f32 %v3933_v6, 0.0  ;;  %v20001_v6 = vld [vmem:[#allocation109_spill] sm:$0xff] }
 0x66d   :  { %19990 = vst [vmem:[#allocation11_spill] sm:$0xff] %v17034_v45  ;;  %v4142_v25 = vmax.f32 %v3934_v61, 0.0  ;;  %v2987_v1 = vpop.f32.mrf.mxu2  ;;  %v4143_v36 = vmax.f32 %v3935_v13, 0.0  ;;  %v3126_v56 = vpop.f32.mrf.mxu3  ;;  %v3425_v61 = vmax.f32 %v20001_v6, %v20000_v42 }
 0x66e   :  { %v3422_v32 = vmax.f32 %v19995_v11, %v2987_v1  ;;  %v2712_v50 = vpop.f32.mrf.mxu0  ;;  %v4291_v27 = vpack.c.bf16 %v4141_v39, %v4140_v16  ;;  %v3423_v44 = vmax.f32 %v19998_v37, %v3126_v56  ;;  %v2851_v19 = vpop.f32.mrf.mxu1  ;;  %v7042_v1 = vunpack.c.h.b16 %v4290_v14  ;;  %v13401_v16 = vld [vmem:[%s19065_s0 + $0xb8] sm:$0xff] }
 0x66f   :  { %v3428_v52 = vmax.f32 %v19999_v31, %v2712_v50  ;;  %v4292_v57 = vpack.c.bf16 %v4143_v36, %v4142_v25  ;;  %v3429_v13 = vmax.f32 %v20002_v49, %v2851_v19  ;;  %v20008_v31 = vld [vmem:[#allocation111_spill] sm:$0xff]  ;;  %v20012_v49 = vld [vmem:[#allocation113_spill] sm:$0xff] }
 0x670   :  { %v3718_v8 = vmax.f32 %v3418_v12, %v3422_v32  ;;  %v3719_v11 = vmax.f32 %v3419_v18, %v3423_v44  ;;  %v20007_v44 = vld [vmem:[#allocation497_spill] sm:$0xff] }
 0x671   :  { %v3720_v45 = vmax.f32 %v3424_v21, %v3428_v52  ;;  %10230 = vmatmul.msk.bf16.gmra.mxu0 %vm881_vm0, %v13401_v16  ;;  %v7045_v39 = vunpack.c.l.b16 %v4292_v57  ;;  %v7046_v56 = vunpack.c.h.b16 %v4292_v57  ;;  %v3721_v62 = vmax.f32 %v3425_v61, %v3429_v13  ;;  %10256 = vmatmul.msk.bf16.gmra.mxu1 %vm881_vm0, %v13401_v16  ;;  %v20006_v21 = vld [vmem:[#allocation110_spill] sm:$0xff] }
 0x672   :  { %v3936_v50 = vadd.f32 %v16289_v43, %v3718_v8  ;;  %10282 = vmatmul.msk.bf16.gmra.mxu2 %vm881_vm0, %v13401_v16  ;;  %v3937_v25 = vadd.f32 %v16294_v28, %v3719_v11  ;;  %10308 = vmatmul.msk.bf16.gmra.mxu3 %vm881_vm0, %v13401_v16  ;;  %v3426_v37 = vmax.f32 %v20006_v21, %v20005_v23  ;;  %v20009_v61 = vld [vmem:[#allocation498_spill] sm:$0xff]  ;;  %v20011_v8 = vld [vmem:[#allocation499_spill] sm:$0xff]  ;;  %v20015_v21 = vld [vmem:[#allocation309_spill] sm:$0xff] }
 0x673   :  { %v3938_v14 = vadd.f32 %v16264_v22, %v3720_v45  ;;  %v3939_v18 = vadd.f32 %v16269_v30, %v3721_v62  ;;  %v17060_v36 = vpack.c.b16 %v7045_v39, %v7041_v48  ;;  %v17062_v32 = vpack.c.b16 %v7046_v56, %v7042_v1  ;;  %v20010_v45 = vld [vmem:[#allocation112_spill] sm:$0xff]  ;;  %v20013_v48 = vld [vmem:[#allocation307_spill] sm:$0xff] }
 0x674   :  { %v4144_v12 = vmax.f32 %v3936_v50, 0.0  ;;  %v3427_v52 = vmax.f32 %v20008_v31, %v20007_v44  ;;  %v4145_v19 = vmax.f32 %v3937_v25, 0.0  ;;  %v3432_v57 = vmax.f32 %v20010_v45, %v20009_v61  ;;  %v20014_v62 = vld [vmem:[#allocation308_spill] sm:$0xff] }
 0x675   :  { %20003 = vst [vmem:[#allocation207_spill] sm:$0xff] %v17060_v36  ;;  %v4146_v42 = vmax.f32 %v3938_v14, 0.0  ;;  %v2990_v6 = vpop.f32.mrf.mxu2  ;;  %v3433_v13 = vmax.f32 %v20012_v49, %v20011_v8  ;;  %v4147_v11 = vmax.f32 %v3939_v18, 0.0  ;;  %v3129_v1 = vpop.f32.mrf.mxu3  ;;  %v7043_v56 = vunpack.c.l.b16 %v4291_v27  ;;  %v20016_v36 = vld [vmem:[#allocation310_spill] sm:$0xff] }
 0x676   :  { %20004 = vst [vmem:[#allocation404_spill] sm:$0xff] %v17062_v32  ;;  %v3430_v16 = vmax.f32 %v20013_v48, %v2990_v6  ;;  %v2714_v39 = vpop.f32.mrf.mxu0  ;;  %v4293_v50 = vpack.c.bf16 %v4145_v19, %v4144_v12  ;;  %v3431_v23 = vmax.f32 %v20014_v62, %v3129_v1  ;;  %v2853_v25 = vpop.f32.mrf.mxu1  ;;  %v7044_v14 = vunpack.c.h.b16 %v4291_v27  ;;  %v20021_v62 = vld [vmem:[#allocation311_spill] sm:$0xff] }
 0x677   :  { %v3436_v44 = vmax.f32 %v20015_v21, %v2714_v39  ;;  %v4294_v31 = vpack.c.bf16 %v4147_v11, %v4146_v42  ;;  %v3437_v61 = vmax.f32 %v20016_v36, %v2853_v25  ;;  %v20019_v39 = vld [vmem:[#allocation501_spill] sm:$0xff] }
 0x678   :  { %v3722_v32 = vmax.f32 %v3426_v37, %v3430_v16  ;;  %v7047_v45 = vunpack.c.l.b16 %v4293_v50  ;;  %v7048_v59 = vunpack.c.h.b16 %v4293_v50  ;;  %v3723_v8 = vmax.f32 %v3427_v52, %v3431_v23  ;;  %v20017_v16 = vld [vmem:[#allocation500_spill] sm:$0xff]  ;;  %v20018_v52 = vld [vmem:[#allocation114_spill] sm:$0xff] }
 0x679   :  { %v3724_v18 = vmax.f32 %v3432_v57, %v3436_v44  ;;  %v3725_v49 = vmax.f32 %v3433_v13, %v3437_v61  ;;  %v3434_v57 = vmax.f32 %v20018_v52, %v20017_v16  ;;  %v20022_v44 = vld [vmem:[#allocation502_spill] sm:$0xff]  ;;  %v20024_v61 = vld [vmem:[#allocation312_spill] sm:$0xff] }
 0x67a   :  { %v3940_v6 = vadd.f32 %v16289_v43, %v3722_v32  ;;  %v3941_v48 = vadd.f32 %v16294_v28, %v3723_v8  ;;  %v17079_v19 = vpack.c.b16 %v7047_v45, %v7043_v56  ;;  %v17081_v1 = vpack.c.b16 %v7048_v59, %v7044_v14  ;;  %v20020_v32 = vld [vmem:[#allocation115_spill] sm:$0xff]  ;;  %v20023_v59 = vld [vmem:[#allocation116_spill] sm:$0xff]  ;;  %v20025_v8 = vld [vmem:[#allocation313_spill] sm:$0xff] }
 0x67b   :  { %v3942_v12 = vadd.f32 %v16264_v22, %v3724_v18  ;;  %v3943_v37 = vadd.f32 %v16269_v30, %v3725_v49  ;;  %v3435_v13 = vmax.f32 %v20020_v32, %v20019_v39  ;;  %v3440_v25 = vmax.f32 %v20023_v59, %v20022_v44  ;;  %v20026_v49 = vld [vmem:[#allocation503_spill] sm:$0xff]  ;;  %v20028_v52 = vld [vmem:[#allocation314_spill] sm:$0xff]  ;;  %v12896_v44 = vld [vmem:[%s19066_s3 + $0x78] sm:$0xff] }
 0x67c   :  { %v4148_v27 = vmax.f32 %v3940_v6, 0.0  ;;  %v4149_v42 = vmax.f32 %v3941_v48, 0.0  ;;  %v20027_v48 = vld [vmem:[#allocation117_spill] sm:$0xff]  ;;  %5026 = vmatpush.bf16.msrb.mxu1 %v12896_v44 }
 0x67d   :  { %v4150_v36 = vmax.f32 %v3942_v12, 0.0  ;;  %v2992_v11 = vpop.f32.mrf.mxu2  ;;  %v4151_v50 = vmax.f32 %v3943_v37, 0.0  ;;  %v3131_v21 = vpop.f32.mrf.mxu3  ;;  %v3441_v12 = vmax.f32 %v20027_v48, %v20026_v49  ;;  %v20033_v48 = vld [vmem:[#allocation505_spill] sm:$0xff] }
 0x67e   :  { %v3438_v23 = vmax.f32 %v20021_v62, %v2992_v11  ;;  %v2717_v56 = vpop.f32.mrf.mxu0  ;;  %v17091_v14 = vpack.c.bf16 %v4149_v42, %v4148_v27  ;;  %v3439_v45 = vmax.f32 %v20024_v61, %v3131_v21  ;;  %v2856_v6 = vpop.f32.mrf.mxu1  ;;  %v13402_v62 = vld [vmem:[%s19065_s0 + $0xc0] sm:$0xff]  ;;  %v7049_v27 = vunpack.c.l.b16 %v4294_v31  ;;  %v12912_v61 = vld [vmem:[%s19066_s3 + $0xf8] sm:$0xff] }
 0x67f   :  { %v3444_v18 = vmax.f32 %v20025_v8, %v2717_v56  ;;  %v3445_v37 = vmax.f32 %v20028_v52, %v2856_v6  ;;  %v4296_v39 = vpack.c.bf16 %v4151_v50, %v4150_v36  ;;  %v7050_v42 = vunpack.c.h.b16 %v4294_v31  ;;  %v12904_v50 = vld [vmem:[%s19066_s3 + $0xb8] sm:$0xff]  ;;  %v20032_v6 = vld [vmem:[#allocation118_spill] sm:$0xff]  ;;  %5064 = vmatpush.bf16.msrb.mxu3 %v12912_v61 }
 0x680   :  { %v3726_v16 = vmax.f32 %v3434_v57, %v3438_v23  ;;  %v3727_v11 = vmax.f32 %v3435_v13, %v3439_v45  ;;  %v12888_v31 = vld [vmem:[%s19066_s3 + $0x38] sm:$0xff]  ;;  %5045 = vmatpush.bf16.msrb.mxu2 %v12904_v50  ;;  %v12903_v50 = vld [vmem:[%s19066_s3 + $0xb0] sm:$0xff]  ;;  %v7051_v44 = vunpack.c.l.b16 %v17091_v14 }
 0x681   :  { %v3728_v32 = vmax.f32 %v3440_v25, %v3444_v18  ;;  %10231 = vmatmul.msk.bf16.gmra.mxu0 %vm881_vm0, %v13402_v62  ;;  %v3729_v56 = vmax.f32 %v3441_v12, %v3445_v37  ;;  %10257 = vmatmul.msk.bf16.gmra.mxu1 %vm881_vm0, %v13402_v62  ;;  %v7053_v57 = vunpack.c.l.b16 %v4296_v39  ;;  %v7054_v23 = vunpack.c.h.b16 %v4296_v39  ;;  %v20031_v18 = vld [vmem:[#allocation504_spill] sm:$0xff]  ;;  %v20034_v12 = vld [vmem:[#allocation119_spill] sm:$0xff] }
 0x682   :  { %v3944_v21 = vadd.f32 %v16289_v43, %v3726_v16  ;;  %10283 = vmatmul.msk.bf16.gmra.mxu2 %vm881_vm0, %v13402_v62  ;;  %v3945_v36 = vadd.f32 %v16294_v28, %v3727_v11  ;;  %10309 = vmatmul.msk.bf16.gmra.mxu3 %vm881_vm0, %v13402_v62  ;;  %v3442_v49 = vmax.f32 %v20032_v6, %v20031_v18  ;;  %v20035_v11 = vld [vmem:[#allocation506_spill] sm:$0xff]  ;;  %v20040_v18 = vld [vmem:[#allocation316_spill] sm:$0xff] }
 0x683   :  { %v3946_v13 = vadd.f32 %v16264_v22, %v3728_v32  ;;  %v3947_v25 = vadd.f32 %v16269_v30, %v3729_v56  ;;  %v17121_v45 = vpack.c.b16 %v7053_v57, %v7049_v27  ;;  %v17123_v8 = vpack.c.b16 %v7054_v23, %v7050_v42  ;;  %5007 = vmatpush.bf16.msrb.mxu0 %v12888_v31  ;;  %v20036_v32 = vld [vmem:[#allocation120_spill] sm:$0xff]  ;;  %v20038_v56 = vld [vmem:[#allocation121_spill] sm:$0xff]  ;;  %v20039_v42 = vld [vmem:[#allocation315_spill] sm:$0xff] }
 0x684   :  { %v4152_v59 = vmax.f32 %v3944_v21, 0.0  ;;  %v3443_v16 = vmax.f32 %v20034_v12, %v20033_v48  ;;  %v4153_v52 = vmax.f32 %v3945_v36, 0.0  ;;  %v3448_v62 = vmax.f32 %v20036_v32, %v20035_v11  ;;  %v20037_v21 = vld [vmem:[#allocation507_spill] sm:$0xff]  ;;  %v20041_v36 = vld [vmem:[#allocation317_spill] sm:$0xff]  ;;  %v12887_v31 = vld [vmem:[%s19066_s3 + $0x30] sm:$0xff]  ;;  %5046 = vmatpush.bf16.msrb.mxu2 %v12903_v50 }
 0x685   :  { %20029 = vst [vmem:[#allocation12_spill] sm:$0xff] %v17121_v45  ;;  %v4154_v37 = vmax.f32 %v3946_v13, 0.0  ;;  %v2995_v39 = vpop.f32.mrf.mxu2  ;;  %v3449_v27 = vmax.f32 %v20038_v56, %v20037_v21  ;;  %v4155_v57 = vmax.f32 %v3947_v25, 0.0  ;;  %v12895_v25 = vld [vmem:[%s19066_s3 + $0x70] sm:$0xff]  ;;  %v7052_v32 = vunpack.c.h.b16 %v17091_v14  ;;  %v12886_v14 = vld [vmem:[%s19066_s3 + $0x28] sm:$0xff] }
 0x686   :  { %20030 = vst [vmem:[#allocation208_spill] sm:$0xff] %v17123_v8  ;;  %v3446_v23 = vmax.f32 %v20039_v42, %v2995_v39  ;;  %v3134_v8 = vpop.f32.mrf.mxu3  ;;  %v2719_v45 = vpop.f32.mrf.mxu0  ;;  %v4297_v12 = vpack.c.bf16 %v4153_v52, %v4152_v59  ;;  %v12911_v11 = vld [vmem:[%s19066_s3 + $0xf0] sm:$0xff]  ;;  %5027 = vmatpush.bf16.msrb.mxu1 %v12895_v25  ;;  %v20046_v25 = vld [vmem:[#allocation122_spill] sm:$0xff] }
 0x687   :  { %v3447_v6 = vmax.f32 %v20040_v18, %v3134_v8  ;;  %v3452_v13 = vmax.f32 %v20041_v36, %v2719_v45  ;;  %v2858_v48 = vpop.f32.mrf.mxu1  ;;  %v17146_v61 = vpack.c.bf16 %v4155_v57, %v4154_v37  ;;  %v20042_v45 = vld [vmem:[#allocation318_spill] sm:$0xff]  ;;  %5008 = vmatpush.bf16.msrb.mxu0 %v12887_v31  ;;  %5065 = vmatpush.bf16.msrb.mxu3 %v12911_v11  ;;  %v12902_v57 = vld [vmem:[%s19066_s3 + $0xa8] sm:$0xff]  ;;  %v20045_v31 = vld [vmem:[#allocation508_spill] sm:$0xff] }
 0x688   :  { %v3730_v8 = vmax.f32 %v3442_v49, %v3446_v23  ;;  %v3453_v39 = vmax.f32 %v20042_v45, %v2858_v48  ;;  %v7055_v42 = vunpack.c.l.b16 %v4297_v12  ;;  %v7056_v18 = vunpack.c.h.b16 %v4297_v12  ;;  %v12910_v36 = vld [vmem:[%s19066_s3 + $0xe8] sm:$0xff]  ;;  %5047 = vmatpush.bf16.msrb.mxu2 %v12902_v57  ;;  %v20053_v57 = vld [vmem:[#allocation321_spill] sm:$0xff] }
 0x689   :  { %v3731_v21 = vmax.f32 %v3443_v16, %v3447_v6  ;;  %v3732_v56 = vmax.f32 %v3448_v62, %v3452_v13  ;;  %v12894_v16 = vld [vmem:[%s19066_s3 + $0x68] sm:$0xff]  ;;  %v3450_v12 = vmax.f32 %v20046_v25, %v20045_v31 }
 0x68a   :  { %v3948_v59 = vadd.f32 %v16289_v43, %v3730_v8  ;;  %v3733_v52 = vmax.f32 %v3449_v27, %v3453_v39  ;;  %v17165_v62 = vpack.c.b16 %v7055_v42, %v7051_v44  ;;  %v17167_v27 = vpack.c.b16 %v7056_v18, %v7052_v32  ;;  %v20047_v8 = vld [vmem:[#allocation509_spill] sm:$0xff]  ;;  %v20048_v44 = vld [vmem:[#allocation123_spill] sm:$0xff]  ;;  %5028 = vmatpush.bf16.msrb.mxu1 %v12894_v16  ;;  %v20050_v42 = vld [vmem:[#allocation510_spill] sm:$0xff] }
 0x68b   :  { %v3949_v49 = vadd.f32 %v16294_v28, %v3731_v21  ;;  %v3950_v37 = vadd.f32 %v16264_v22, %v3732_v56  ;;  %5009 = vmatpush.bf16.msrb.mxu0 %v12886_v14  ;;  %v3451_v45 = vmax.f32 %v20048_v44, %v20047_v8  ;;  %v20049_v11 = vld [vmem:[#allocation319_spill] sm:$0xff]  ;;  %5066 = vmatpush.bf16.msrb.mxu3 %v12910_v36  ;;  %v20051_v18 = vld [vmem:[#allocation124_spill] sm:$0xff]  ;;  %v20055_v36 = vld [vmem:[#allocation125_spill] sm:$0xff] }
 0x68c   :  { %20043 = vst [vmem:[#allocation209_spill] sm:$0xff] %v17165_v62  ;;  %v4156_v23 = vmax.f32 %v3948_v59, 0.0  ;;  %v3951_v6 = vadd.f32 %v16269_v30, %v3733_v52  ;;  %v3456_v59 = vmax.f32 %v20051_v18, %v20050_v42  ;;  %v20054_v16 = vld [vmem:[#allocation511_spill] sm:$0xff]  ;;  %v7419_v42 = vunpack.c.h.b16 %v17146_v61 }
 0x68d   :  { %20044 = vst [vmem:[#allocation405_spill] sm:$0xff] %v17167_v27  ;;  %v4157_v13 = vmax.f32 %v3949_v49, 0.0  ;;  %v4158_v48 = vmax.f32 %v3950_v37, 0.0  ;;  %v2997_v50 = vpop.f32.mrf.mxu2  ;;  %v20052_v49 = vld [vmem:[#allocation320_spill] sm:$0xff]  ;;  %v3457_v25 = vmax.f32 %v20055_v36, %v20054_v16  ;;  %v20065_v27 = vld [vmem:[#allocation129_spill] sm:$0xff] }
 0x68e   :  { %v4159_v39 = vmax.f32 %v3951_v6, 0.0  ;;  %v3454_v32 = vmax.f32 %v20049_v11, %v2997_v50  ;;  %v3136_v21 = vpop.f32.mrf.mxu3  ;;  %v2722_v56 = vpop.f32.mrf.mxu0  ;;  %v12901_v6 = vld [vmem:[%s19066_s3 + $0xa0] sm:$0xff] }
 0x68f   :  { %v17180_v52 = vpack.c.bf16 %v4157_v13, %v4156_v23  ;;  %v3455_v37 = vmax.f32 %v20052_v49, %v3136_v21  ;;  %v3460_v14 = vmax.f32 %v20053_v57, %v2722_v56  ;;  %v2861_v31 = vpop.f32.mrf.mxu1  ;;  %v12885_v50 = vld [vmem:[%s19066_s3 + $0x20] sm:$0xff]  ;;  %v7418_v56 = vunpack.c.l.b16 %v17146_v61  ;;  %5048 = vmatpush.bf16.msrb.mxu2 %v12901_v6  ;;  %v12892_v6 = vld [vmem:[%s19066_s3 + $0x58] sm:$0xff] }
 0x690   :  { %v4300_v8 = vpack.c.bf16 %v4159_v39, %v4158_v48  ;;  %v3734_v44 = vmax.f32 %v3450_v12, %v3454_v32  ;;  %v20056_v23 = vld [vmem:[#allocation322_spill] sm:$0xff]  ;;  %v13403_v48 = vld [vmem:[%s19065_s0 + $0xc8] sm:$0xff]  ;;  %5010 = vmatpush.bf16.msrb.mxu0 %v12885_v50  ;;  %v12908_v50 = vld [vmem:[%s19066_s3 + $0xd8] sm:$0xff] }
 0x691   :  { %v3461_v13 = vmax.f32 %v20056_v23, %v2861_v31  ;;  %v12893_v11 = vld [vmem:[%s19066_s3 + $0x60] sm:$0xff]  ;;  %v3735_v18 = vmax.f32 %v3451_v45, %v3455_v37  ;;  %v3736_v49 = vmax.f32 %v3456_v59, %v3460_v14  ;;  %10232 = vmatmul.msk.bf16.gmra.mxu0 %vm881_vm0, %v13403_v48  ;;  %10258 = vmatmul.msk.bf16.gmra.mxu1 %vm881_vm0, %v13403_v48  ;;  %v12900_v59 = vld [vmem:[%s19066_s3 + $0x98] sm:$0xff]  ;;  %v20061_v23 = vld [vmem:[#allocation127_spill] sm:$0xff] }
 0x692   :  { %v12909_v21 = vld [vmem:[%s19066_s3 + $0xe0] sm:$0xff]  ;;  %v7422_v12 = vunpack.c.l.b16 %v4300_v8  ;;  %v7423_v39 = vunpack.c.h.b16 %v4300_v8  ;;  %v3952_v32 = vadd.f32 %v16289_v43, %v3734_v44  ;;  %10284 = vmatmul.msk.bf16.gmra.mxu2 %vm881_vm0, %v13403_v48  ;;  %10310 = vmatmul.msk.bf16.gmra.mxu3 %vm881_vm0, %v13403_v48  ;;  %v12884_v37 = vld [vmem:[%s19066_s3 + $0x18] sm:$0xff]  ;;  %v20060_v44 = vld [vmem:[#allocation512_spill] sm:$0xff] }
 0x693   :  { %v3737_v57 = vmax.f32 %v3457_v25, %v3461_v13  ;;  %v3953_v61 = vadd.f32 %v16294_v28, %v3735_v18  ;;  %v3954_v45 = vadd.f32 %v16264_v22, %v3736_v49  ;;  %5029 = vmatpush.bf16.msrb.mxu1 %v12893_v11  ;;  %5067 = vmatpush.bf16.msrb.mxu3 %v12909_v21  ;;  %v20059_v25 = vld [vmem:[#allocation126_spill] sm:$0xff]  ;;  %v20062_v49 = vld [vmem:[#allocation513_spill] sm:$0xff]  ;;  %v20063_v48 = vld [vmem:[#allocation128_spill] sm:$0xff] }
 0x694   :  { %v4160_v14 = vmax.f32 %v3952_v32, 0.0  ;;  %v17224_v16 = vpack.c.b16 %v7422_v12, %v7418_v56  ;;  %v17226_v36 = vpack.c.b16 %v7423_v39, %v7419_v42  ;;  %v3458_v8 = vmax.f32 %v20059_v25, %v16030_v47  ;;  %5049 = vmatpush.bf16.msrb.mxu2 %v12900_v59  ;;  %v20066_v12 = vld [vmem:[#allocation323_spill] sm:$0xff]  ;;  %5011 = vmatpush.bf16.msrb.mxu0 %v12884_v37  ;;  %v12899_v59 = vld [vmem:[%s19066_s3 + $0x90] sm:$0xff] }
 0x695   :  { %v3955_v31 = vadd.f32 %v16269_v30, %v3737_v57  ;;  %v3459_v13 = vmax.f32 %v20061_v23, %v20060_v44  ;;  %v4161_v11 = vmax.f32 %v3953_v61, 0.0  ;;  %v4162_v21 = vmax.f32 %v3954_v45, 0.0  ;;  %v3000_v18 = vpop.f32.mrf.mxu2  ;;  %v20064_v57 = vld [vmem:[#allocation514_spill] sm:$0xff]  ;;  %v20068_v61 = vld [vmem:[#allocation325_spill] sm:$0xff]  ;;  %v12891_v37 = vld [vmem:[%s19066_s3 + $0x50] sm:$0xff] }
 0x696   :  { %20057 = vst [vmem:[#allocation13_spill] sm:$0xff] %v17224_v16  ;;  %v3464_v32 = vmax.f32 %v20063_v48, %v20062_v49  ;;  %v3465_v62 = vmax.f32 %v20065_v27, %v20064_v57  ;;  %v3462_v42 = vmax.f32 %v20066_v12, %v3000_v18  ;;  %v3139_v39 = vpop.f32.mrf.mxu3  ;;  %v7420_v47 = vunpack.c.l.b16 %v17180_v52  ;;  %v20067_v16 = vld [vmem:[#allocation324_spill] sm:$0xff] }
 0x697   :  { %20058 = vst [vmem:[#allocation210_spill] sm:$0xff] %v17226_v36  ;;  %v4163_v56 = vmax.f32 %v3955_v31, 0.0  ;;  %v2724_v36 = vpop.f32.mrf.mxu0  ;;  %v4301_v25 = vpack.c.bf16 %v4161_v11, %v4160_v14  ;;  %v3463_v44 = vmax.f32 %v20067_v16, %v3139_v39  ;;  %v2863_v23 = vpop.f32.mrf.mxu1  ;;  %v12883_v27 = vld [vmem:[%s19066_s3 + $0x10] sm:$0xff]  ;;  %v7421_v31 = vunpack.c.h.b16 %v17180_v52  ;;  %v20069_v14 = vld [vmem:[#allocation326_spill] sm:$0xff]  ;;  %5030 = vmatpush.bf16.msrb.mxu1 %v12892_v6  ;;  %5068 = vmatpush.bf16.msrb.mxu3 %v12908_v50  ;;  %v12898_v50 = vld [vmem:[%s19066_s3 + $0x88] sm:$0xff] }
 0x698   :  { %v3468_v45 = vmax.f32 %v20068_v61, %v2724_v36  ;;  %v3738_v49 = vmax.f32 %v3458_v8, %v3462_v42  ;;  %v3469_v11 = vmax.f32 %v20069_v14, %v2863_v23  ;;  %v12907_v16 = vld [vmem:[%s19066_s3 + $0xd0] sm:$0xff]  ;;  %5050 = vmatpush.bf16.msrb.mxu2 %v12899_v59  ;;  %5012 = vmatpush.bf16.msrb.mxu0 %v12883_v27  ;;  %v12890_v39 = vld [vmem:[%s19066_s3 + $0x48] sm:$0xff]  ;;  %v20073_v61 = vld [vmem:[#allocation130_spill] sm:$0xff] }
 0x699   :  { %v17247_v18 = vpack.c.bf16 %v4163_v56, %v4162_v21  ;;  %v7424_v36 = vunpack.c.l.b16 %v4301_v25  ;;  %v7425_v48 = vunpack.c.h.b16 %v4301_v25  ;;  %v3739_v57 = vmax.f32 %v3459_v13, %v3463_v44  ;;  %v12882_v56 = vld [vmem:[%s19066_s3 + $0x8] sm:$0xff]  ;;  %v20074_v27 = vld [vmem:[#allocation516_spill] sm:$0xff]  ;;  %v20076_v14 = vld [vmem:[#allocation517_spill] sm:$0xff] }
 0x69a   :  { %v3740_v12 = vmax.f32 %v3464_v32, %v3468_v45  ;;  %v3956_v52 = vadd.f32 %v16289_v43, %v3738_v49  ;;  %v3741_v8 = vmax.f32 %v3465_v62, %v3469_v11  ;;  %v12906_v25 = vld [vmem:[%s19066_s3 + $0xc8] sm:$0xff]  ;;  %v20077_v11 = vld [vmem:[#allocation132_spill] sm:$0xff] }
 0x69b   :  { %v3957_v21 = vadd.f32 %v16294_v28, %v3739_v57  ;;  %v17265_v42 = vpack.c.b16 %v7424_v36, %v7420_v47  ;;  %v17267_v13 = vpack.c.b16 %v7425_v48, %v7421_v31  ;;  %5031 = vmatpush.bf16.msrb.mxu1 %v12891_v37  ;;  %5069 = vmatpush.bf16.msrb.mxu3 %v12907_v16  ;;  %v20072_v44 = vld [vmem:[#allocation515_spill] sm:$0xff] }
 0x69c   :  { %v3958_v6 = vadd.f32 %v16264_v22, %v3740_v12  ;;  %v4164_v32 = vmax.f32 %v3956_v52, 0.0  ;;  %v3959_v62 = vadd.f32 %v16269_v30, %v3741_v8  ;;  %v3466_v45 = vmax.f32 %v20073_v61, %v20072_v44  ;;  %5051 = vmatpush.bf16.msrb.mxu2 %v12898_v50  ;;  %v20075_v31 = vld [vmem:[#allocation131_spill] sm:$0xff]  ;;  %v20079_v52 = vld [vmem:[#allocation518_spill] sm:$0xff]  ;;  %v20080_v8 = vld [vmem:[#allocation133_spill] sm:$0xff]  ;;  %5013 = vmatpush.bf16.msrb.mxu0 %v12882_v56 }
 0x69d   :  { %20070 = vst [vmem:[#allocation406_spill] sm:$0xff] %v17265_v42  ;;  %v4165_v47 = vmax.f32 %v3957_v21, 0.0  ;;  %v3002_v59 = vpop.f32.mrf.mxu2  ;;  %v3467_v49 = vmax.f32 %v20075_v31, %v20074_v27  ;;  %v3472_v37 = vmax.f32 %v20077_v11, %v20076_v14  ;;  %v20078_v36 = vld [vmem:[#allocation327_spill] sm:$0xff]  ;;  %v20081_v21 = vld [vmem:[#allocation328_spill] sm:$0xff]  ;;  %v20082_v44 = vld [vmem:[#allocation329_spill] sm:$0xff] }
 0x69e   :  { %20071 = vst [vmem:[#allocation14_spill] sm:$0xff] %v17267_v13  ;;  %v4166_v23 = vmax.f32 %v3958_v6, 0.0  ;;  %v4167_v16 = vmax.f32 %v3959_v62, 0.0  ;;  %v3470_v48 = vmax.f32 %v20078_v36, %v3002_v59  ;;  %v3141_v57 = vpop.f32.mrf.mxu3  ;;  %v3473_v13 = vmax.f32 %v20080_v8, %v20079_v52  ;;  %v12897_v27 = vld [vmem:[%s19066_s3 + $0x80] sm:$0xff] }
 0x69f   :  { %v2727_v12 = vpop.f32.mrf.mxu0  ;;  %v17285_v42 = vpack.c.bf16 %v4165_v47, %v4164_v32  ;;  %v3471_v6 = vmax.f32 %v20081_v21, %v3141_v57  ;;  %v2866_v61 = vpop.f32.mrf.mxu1  ;;  %v12881_v62 = vld [vmem:[%s19066_s3] sm:$0xff]  ;;  %5032 = vmatpush.bf16.msrb.mxu1 %v12890_v39  ;;  %5070 = vmatpush.bf16.msrb.mxu3 %v12906_v25  ;;  %v20085_v21 = vld [vmem:[#allocation135_spill] sm:$0xff] }
 0x6a0   :  { %v3476_v50 = vmax.f32 %v20082_v44, %v2727_v12  ;;  %v3742_v59 = vmax.f32 %v3466_v45, %v3470_v48  ;;  %v20083_v31 = vld [vmem:[#allocation330_spill] sm:$0xff]  ;;  %v4304_v47 = vpack.c.bf16 %v4167_v16, %v4166_v23  ;;  %5052 = vmatpush.bf16.msrb.mxu2 %v12897_v27  ;;  %v7426_v45 = vunpack.c.l.b16 %v17247_v18  ;;  %5014 = vmatpush.bf16.msrb.mxu0 %v12881_v62  ;;  %v20086_v27 = vld [vmem:[#allocation519_spill] sm:$0xff]  ;;  %v20087_v62 = vld [vmem:[#allocation136_spill] sm:$0xff] }
 0x6a1   :  { %v3477_v14 = vmax.f32 %v20083_v31, %v2866_v61  ;;  %v12889_v32 = vld [vmem:[%s19066_s3 + $0x40] sm:$0xff]  ;;  %v3743_v11 = vmax.f32 %v3467_v49, %v3471_v6  ;;  %4707 = vmatmul.bf16.vlgmr.msra.gmra.mxu0 %v16434_v2  ;;  %v7427_v48 = vunpack.c.h.b16 %v17247_v18  ;;  %4726 = vmatmul.bf16.vlgmr.msra.gmra.mxu1 %v16436_v10  ;;  %v12968_v2 = vld [vmem:[%s19066_s3 + $0x2b8] sm:$0xff]  ;;  %v3475_v6 = vmax.f32 %v20085_v21, %v16056_v51  ;;  %v20088_v31 = vld [vmem:[#allocation520_spill] sm:$0xff] }
 0x6a2   :  { %v12905_v56 = vld [vmem:[%s19066_s3 + $0xc0] sm:$0xff]  ;;  %v3744_v36 = vmax.f32 %v3472_v37, %v3476_v50  ;;  %v3960_v39 = vadd.f32 %v16289_v43, %v3742_v59  ;;  %4745 = vmatmul.bf16.vlgmr.msra.gmra.mxu2 %v16461_v55  ;;  %v7430_v57 = vunpack.c.l.b16 %v4304_v47  ;;  %v7431_v12 = vunpack.c.h.b16 %v4304_v47  ;;  %4764 = vmatmul.bf16.vlgmr.msra.gmra.mxu3 %v16464_v54  ;;  %v12952_v18 = vld [vmem:[%s19066_s3 + $0x238] sm:$0xff]  ;;  %v20090_v47 = vld [vmem:[#allocation331_spill] sm:$0xff] }
 0x6a3   :  { %v3745_v25 = vmax.f32 %v3473_v13, %v3477_v14  ;;  %v3961_v23 = vadd.f32 %v16294_v28, %v3743_v11  ;;  %v12960_v10 = vld [vmem:[%s19066_s3 + $0x278] sm:$0xff]  ;;  %5033 = vmatpush.bf16.msrb.mxu1 %v12889_v32  ;;  %5071 = vmatpush.bf16.msrb.mxu3 %v12905_v56  ;;  %v20084_v52 = vld [vmem:[#allocation134_spill] sm:$0xff]  ;;  %v3480_v59 = vmax.f32 %v20087_v62, %v20086_v27  ;;  %v7429_v21 = vunpack.c.h.b16 %v17285_v42 }
 0x6a4   :  { %v3962_v49 = vadd.f32 %v16264_v22, %v3744_v36  ;;  %v4168_v55 = vmax.f32 %v3960_v39, 0.0  ;;  %v12976_v54 = vld [vmem:[%s19066_s3 + $0x2f8] sm:$0xff]  ;;  %v17324_v37 = vpack.c.b16 %v7430_v57, %v7426_v45  ;;  %v17326_v16 = vpack.c.b16 %v7431_v12, %v7427_v48  ;;  %5418 = vmatpush.bf16.msra.mxu2 %v12968_v2  ;;  %5380 = vmatpush.bf16.msra.mxu0 %v12952_v18  ;;  %v12967_v57 = vld [vmem:[%s19066_s3 + $0x2b0] sm:$0xff] }
 0x6a5   :  { %v3963_v13 = vadd.f32 %v16269_v30, %v3745_v25  ;;  %v3474_v8 = vmax.f32 %v20084_v52, %v16054_v34  ;;  %v4169_v44 = vmax.f32 %v3961_v23, 0.0  ;;  %v3005_v61 = vpop.f32.mrf.mxu2  ;;  %v20089_v14 = vld [vmem:[#allocation137_spill] sm:$0xff]  ;;  %v20091_v34 = vld [vmem:[#allocation332_spill] sm:$0xff]  ;;  %v7428_v2 = vunpack.c.l.b16 %v17285_v42  ;;  %v12950_v42 = vld [vmem:[%s19066_s3 + $0x228] sm:$0xff] }
 0x6a6   :  { %v4170_v50 = vmax.f32 %v3962_v49, 0.0  ;;  %v3481_v32 = vmax.f32 %v20089_v14, %v20088_v31  ;;  %v3478_v11 = vmax.f32 %v20090_v47, %v3005_v61  ;;  %v3144_v36 = vpop.f32.mrf.mxu3  ;;  %v20092_v48 = vld [vmem:[#allocation333_spill] sm:$0xff]  ;;  %v12951_v12 = vld [vmem:[%s19066_s3 + $0x230] sm:$0xff]  ;;  %v12966_v14 = vld [vmem:[%s19066_s3 + $0x2a8] sm:$0xff] }
 0x6a7   :  { %v4171_v56 = vmax.f32 %v3963_v13, 0.0  ;;  %v2729_v45 = vpop.f32.mrf.mxu0  ;;  %5399 = vmatpush.bf16.msra.mxu1 %v12960_v10  ;;  %5437 = vmatpush.bf16.msra.mxu3 %v12976_v54  ;;  %v3479_v51 = vmax.f32 %v20091_v34, %v3144_v36  ;;  %v2868_v25 = vpop.f32.mrf.mxu1  ;;  %v12959_v23 = vld [vmem:[%s19066_s3 + $0x270] sm:$0xff]  ;;  %v4305_v49 = vpack.c.bf16 %v4169_v44, %v4168_v55  ;;  %v20093_v13 = vld [vmem:[#allocation334_spill] sm:$0xff] }
 0x6a8   :  { %v3484_v39 = vmax.f32 %v20092_v48, %v2729_v45  ;;  %v3746_v10 = vmax.f32 %v3474_v8, %v3478_v11  ;;  %v3485_v54 = vmax.f32 %v20093_v13, %v2868_v25  ;;  %v12975_v52 = vld [vmem:[%s19066_s3 + $0x2f0] sm:$0xff]  ;;  %5419 = vmatpush.bf16.msra.mxu2 %v12967_v57  ;;  %5381 = vmatpush.bf16.msra.mxu0 %v12951_v12  ;;  %v12974_v11 = vld [vmem:[%s19066_s3 + $0x2e8] sm:$0xff]  ;;  %v20095_v48 = vld [vmem:[#allocation138_spill] sm:$0xff] }
 0x6a9   :  { %v17349_v18 = vpack.c.bf16 %v4171_v56, %v4170_v50  ;;  %v3747_v61 = vmax.f32 %v3475_v6, %v3479_v51  ;;  %v7432_v62 = vunpack.c.l.b16 %v4305_v49  ;;  %v7433_v31 = vunpack.c.h.b16 %v4305_v49  ;;  %v12958_v6 = vld [vmem:[%s19066_s3 + $0x268] sm:$0xff]  ;;  %v20094_v51 = vld [vmem:[#allocation521_spill] sm:$0xff]  ;;  %v20096_v25 = vld [vmem:[#allocation522_spill] sm:$0xff] }
 0x6aa   :  { %v3748_v27 = vmax.f32 %v3480_v59, %v3484_v39  ;;  %v3964_v55 = vadd.f32 %v16289_v43, %v3746_v10  ;;  %v3749_v44 = vmax.f32 %v3481_v32, %v3485_v54  ;;  %v3482_v39 = vmax.f32 %v20095_v48, %v20094_v51  ;;  %v20097_v57 = vld [vmem:[#allocation139_spill] sm:$0xff]  ;;  %v12973_v51 = vld [vmem:[%s19066_s3 + $0x2e0] sm:$0xff] }
 0x6ab   :  { %5400 = vmatpush.bf16.msra.mxu1 %v12959_v23  ;;  %5438 = vmatpush.bf16.msra.mxu3 %v12975_v52  ;;  %v3965_v8 = vadd.f32 %v16294_v28, %v3747_v61  ;;  %v17368_v59 = vpack.c.b16 %v7432_v62, %v7428_v2  ;;  %v17370_v32 = vpack.c.b16 %v7433_v31, %v7429_v21  ;;  %v20098_v49 = vld [vmem:[#allocation335_spill] sm:$0xff]  ;;  %v20100_v52 = vld [vmem:[#allocation140_spill] sm:$0xff]  ;;  %v20102_v31 = vld [vmem:[#allocation337_spill] sm:$0xff]  ;;  %v7795_v48 = vunpack.c.l.b16 %v17349_v18 }
 0x6ac   :  { %v3966_v50 = vadd.f32 %v16264_v22, %v3748_v27  ;;  %v4172_v56 = vmax.f32 %v3964_v55, 0.0  ;;  %v3967_v47 = vadd.f32 %v16269_v30, %v3749_v44  ;;  %5420 = vmatpush.bf16.msra.mxu2 %v12966_v14  ;;  %5382 = vmatpush.bf16.msra.mxu0 %v12950_v42  ;;  %v3483_v12 = vmax.f32 %v20097_v57, %v20096_v25  ;;  %v20099_v54 = vld [vmem:[#allocation523_spill] sm:$0xff]  ;;  %v20101_v27 = vld [vmem:[#allocation336_spill] sm:$0xff]  ;;  %v20104_v42 = vld [vmem:[#allocation141_spill] sm:$0xff] }
 0x6ad   :  { %v4173_v36 = vmax.f32 %v3965_v8, 0.0  ;;  %v3007_v34 = vpop.f32.mrf.mxu2  ;;  %v3488_v21 = vmax.f32 %v20100_v52, %v20099_v54  ;;  %v12965_v8 = vld [vmem:[%s19066_s3 + $0x2a0] sm:$0xff]  ;;  %v20103_v14 = vld [vmem:[#allocation524_spill] sm:$0xff]  ;;  %v7796_v25 = vunpack.c.h.b16 %v17349_v18  ;;  %v12948_v18 = vld [vmem:[%s19066_s3 + $0x218] sm:$0xff] }
 0x6ae   :  { %v4174_v45 = vmax.f32 %v3966_v50, 0.0  ;;  %v4175_v23 = vmax.f32 %v3967_v47, 0.0  ;;  %v3486_v2 = vmax.f32 %v20098_v49, %v3007_v34  ;;  %v3146_v10 = vpop.f32.mrf.mxu3  ;;  %v12949_v50 = vld [vmem:[%s19066_s3 + $0x220] sm:$0xff] }
 0x6af   :  { %v2732_v13 = vpop.f32.mrf.mxu0  ;;  %5401 = vmatpush.bf16.msra.mxu1 %v12958_v6  ;;  %5439 = vmatpush.bf16.msra.mxu3 %v12974_v11  ;;  %v17383_v61 = vpack.c.bf16 %v4173_v36, %v4172_v56  ;;  %v3487_v62 = vmax.f32 %v20101_v27, %v3146_v10  ;;  %v2871_v44 = vpop.f32.mrf.mxu1  ;;  %v3489_v6 = vmax.f32 %v20104_v42, %v20103_v14  ;;  %v20105_v56 = vld [vmem:[#allocation338_spill] sm:$0xff]  ;;  %v20110_v42 = vld [vmem:[#allocation527_spill] sm:$0xff] }
 0x6b0   :  { %v3492_v55 = vmax.f32 %v20102_v31, %v2732_v13  ;;  %v4308_v47 = vpack.c.bf16 %v4175_v23, %v4174_v45  ;;  %v3750_v11 = vmax.f32 %v3482_v39, %v3486_v2  ;;  %v3493_v36 = vmax.f32 %v20105_v56, %v2871_v44  ;;  %v12957_v34 = vld [vmem:[%s19066_s3 + $0x260] sm:$0xff]  ;;  %5421 = vmatpush.bf16.msra.mxu2 %v12965_v8  ;;  %v20113_v56 = vld [vmem:[#allocation145_spill] sm:$0xff] }
 0x6b1   :  { %v3751_v57 = vmax.f32 %v3483_v12, %v3487_v62  ;;  %4712 = vmatmul.bf16.gmra.mxu0 %v16495_v60  ;;  %4731 = vmatmul.bf16.gmra.mxu1 %v16497_v35  ;;  %v12964_v60 = vld [vmem:[%s19066_s3 + $0x298] sm:$0xff]  ;;  %v20107_v27 = vld [vmem:[#allocation142_spill] sm:$0xff] }
 0x6b2   :  { %v3752_v49 = vmax.f32 %v3488_v21, %v3492_v55  ;;  %v7799_v45 = vunpack.c.l.b16 %v4308_v47  ;;  %v7800_v39 = vunpack.c.h.b16 %v4308_v47  ;;  %v3968_v23 = vadd.f32 %v16289_v43, %v3750_v11  ;;  %4750 = vmatmul.bf16.gmra.mxu2 %v16514_v24  ;;  %4769 = vmatmul.bf16.gmra.mxu3 %v16516_v33  ;;  %v12956_v24 = vld [vmem:[%s19066_s3 + $0x258] sm:$0xff]  ;;  %v20108_v31 = vld [vmem:[#allocation526_spill] sm:$0xff]  ;;  %v20109_v55 = vld [vmem:[#allocation143_spill] sm:$0xff] }
 0x6b3   :  { %v3753_v2 = vmax.f32 %v3489_v6, %v3493_v36  ;;  %v3969_v10 = vadd.f32 %v16294_v28, %v3751_v57  ;;  %5383 = vmatpush.bf16.msra.mxu0 %v12949_v50  ;;  %5402 = vmatpush.bf16.msra.mxu1 %v12957_v34  ;;  %v12972_v33 = vld [vmem:[%s19066_s3 + $0x2d8] sm:$0xff]  ;;  %v3491_v44 = vmax.f32 %v20109_v55, %v20108_v31  ;;  %v20111_v6 = vld [vmem:[#allocation144_spill] sm:$0xff] }
 0x6b4   :  { %v3970_v13 = vadd.f32 %v16264_v22, %v3752_v49  ;;  %v4176_v12 = vmax.f32 %v3968_v23, 0.0  ;;  %5440 = vmatpush.bf16.msra.mxu3 %v12973_v51  ;;  %v17424_v54 = vpack.c.b16 %v7799_v45, %v7795_v48  ;;  %v17426_v52 = vpack.c.b16 %v7800_v39, %v7796_v25  ;;  %v20106_v21 = vld [vmem:[#allocation525_spill] sm:$0xff]  ;;  %5422 = vmatpush.bf16.msra.mxu2 %v12964_v60  ;;  %v20112_v11 = vld [vmem:[#allocation528_spill] sm:$0xff]  ;;  %v20114_v51 = vld [vmem:[#allocation339_spill] sm:$0xff] }
 0x6b5   :  { %v3971_v35 = vadd.f32 %v16269_v30, %v3753_v2  ;;  %v3490_v62 = vmax.f32 %v20107_v27, %v20106_v21  ;;  %v4177_v8 = vmax.f32 %v3969_v10, 0.0  ;;  %v3010_v14 = vpop.f32.mrf.mxu2  ;;  %v3496_v47 = vmax.f32 %v20111_v6, %v20110_v42  ;;  %v20115_v39 = vld [vmem:[#allocation340_spill] sm:$0xff]  ;;  %v20116_v2 = vld [vmem:[#allocation341_spill] sm:$0xff] }
 0x6b6   :  { %v4178_v50 = vmax.f32 %v3970_v13, 0.0  ;;  %v3497_v36 = vmax.f32 %v20113_v56, %v20112_v11  ;;  %v3494_v48 = vmax.f32 %v20114_v51, %v3010_v14  ;;  %v3149_v25 = vpop.f32.mrf.mxu3  ;;  %v7797_v49 = vunpack.c.l.b16 %v17383_v61  ;;  %v12963_v60 = vld [vmem:[%s19066_s3 + $0x290] sm:$0xff]  ;;  %v12946_v56 = vld [vmem:[%s19066_s3 + $0x208] sm:$0xff] }
 0x6b7   :  { %v4179_v34 = vmax.f32 %v3971_v35, 0.0  ;;  %v2734_v57 = vpop.f32.mrf.mxu0  ;;  %v4309_v45 = vpack.c.bf16 %v4177_v8, %v4176_v12  ;;  %v3495_v23 = vmax.f32 %v20115_v39, %v3149_v25  ;;  %v2873_v13 = vpop.f32.mrf.mxu1  ;;  %5384 = vmatpush.bf16.msra.mxu0 %v12948_v18  ;;  %v12947_v35 = vld [vmem:[%s19066_s3 + $0x210] sm:$0xff]  ;;  %v7798_v21 = vunpack.c.h.b16 %v17383_v61  ;;  %v20117_v12 = vld [vmem:[#allocation342_spill] sm:$0xff]  ;;  %5403 = vmatpush.bf16.msra.mxu1 %v12956_v24  ;;  %v12954_v51 = vld [vmem:[%s19066_s3 + $0x248] sm:$0xff] }
 0x6b8   :  { %v3500_v10 = vmax.f32 %v20116_v2, %v2734_v57  ;;  %v3754_v31 = vmax.f32 %v3490_v62, %v3494_v48  ;;  %v3501_v55 = vmax.f32 %v20117_v12, %v2873_v13  ;;  %5441 = vmatpush.bf16.msra.mxu3 %v12972_v33  ;;  %v12955_v18 = vld [vmem:[%s19066_s3 + $0x250] sm:$0xff]  ;;  %5423 = vmatpush.bf16.msra.mxu2 %v12963_v60  ;;  %v12962_v33 = vld [vmem:[%s19066_s3 + $0x288] sm:$0xff]  ;;  %v20118_v25 = vld [vmem:[#allocation529_spill] sm:$0xff] }
 0x6b9   :  { %v17447_v27 = vpack.c.bf16 %v4179_v34, %v4178_v50  ;;  %v12971_v8 = vld [vmem:[%s19066_s3 + $0x2d0] sm:$0xff]  ;;  %v7801_v14 = vunpack.c.l.b16 %v4309_v45  ;;  %v7802_v42 = vunpack.c.h.b16 %v4309_v45  ;;  %v3755_v6 = vmax.f32 %v3491_v44, %v3495_v23  ;;  %v12970_v48 = vld [vmem:[%s19066_s3 + $0x2c8] sm:$0xff]  ;;  %v20119_v57 = vld [vmem:[#allocation146_spill] sm:$0xff] }
 0x6ba   :  { %v3756_v11 = vmax.f32 %v3496_v47, %v3500_v10  ;;  %v3972_v61 = vadd.f32 %v16289_v43, %v3754_v31  ;;  %v3757_v62 = vmax.f32 %v3497_v36, %v3501_v55  ;;  %v3498_v45 = vmax.f32 %v20119_v57, %v20118_v25  ;;  %v20120_v2 = vld [vmem:[#allocation530_spill] sm:$0xff]  ;;  %v20121_v10 = vld [vmem:[#allocation147_spill] sm:$0xff] }
 0x6bb   :  { %v3973_v50 = vadd.f32 %v16294_v28, %v3755_v6  ;;  %5385 = vmatpush.bf16.msra.mxu0 %v12947_v35  ;;  %v17465_v34 = vpack.c.b16 %v7801_v14, %v7797_v49  ;;  %v17467_v44 = vpack.c.b16 %v7802_v42, %v7798_v21  ;;  %5404 = vmatpush.bf16.msra.mxu1 %v12955_v18  ;;  %v20122_v60 = vld [vmem:[#allocation531_spill] sm:$0xff]  ;;  %v20123_v35 = vld [vmem:[#allocation148_spill] sm:$0xff]  ;;  %v20126_v42 = vld [vmem:[#allocation149_spill] sm:$0xff] }
 0x6bc   :  { %v3974_v24 = vadd.f32 %v16264_v22, %v3756_v11  ;;  %v4180_v47 = vmax.f32 %v3972_v61, 0.0  ;;  %v3975_v36 = vadd.f32 %v16269_v30, %v3757_v62  ;;  %5442 = vmatpush.bf16.msra.mxu3 %v12971_v8  ;;  %5424 = vmatpush.bf16.msra.mxu2 %v12962_v33  ;;  %v3499_v13 = vmax.f32 %v20121_v10, %v20120_v2  ;;  %v20124_v12 = vld [vmem:[#allocation343_spill] sm:$0xff]  ;;  %v20125_v14 = vld [vmem:[#allocation532_spill] sm:$0xff]  ;;  %v12961_v25 = vld [vmem:[%s19066_s3 + $0x280] sm:$0xff] }
 0x6bd   :  { %v4181_v49 = vmax.f32 %v3973_v50, 0.0  ;;  %v3012_v23 = vpop.f32.mrf.mxu2  ;;  %v3504_v21 = vmax.f32 %v20123_v35, %v20122_v60  ;;  %v3505_v6 = vmax.f32 %v20126_v42, %v20125_v14  ;;  %v20127_v61 = vld [vmem:[#allocation344_spill] sm:$0xff]  ;;  %v20128_v50 = vld [vmem:[#allocation345_spill] sm:$0xff]  ;;  %v7804_v35 = vunpack.c.h.b16 %v17447_v27 }
 0x6be   :  { %v4182_v39 = vmax.f32 %v3974_v24, 0.0  ;;  %v4183_v31 = vmax.f32 %v3975_v36, 0.0  ;;  %v3502_v55 = vmax.f32 %v20124_v12, %v3012_v23  ;;  %v3151_v18 = vpop.f32.mrf.mxu3  ;;  %v12945_v36 = vld [vmem:[%s19066_s3 + $0x200] sm:$0xff]  ;;  %v20131_v42 = vld [vmem:[#allocation533_spill] sm:$0xff] }
 0x6bf   :  { %v2737_v8 = vpop.f32.mrf.mxu0  ;;  %v17485_v11 = vpack.c.bf16 %v4181_v49, %v4180_v47  ;;  %v3503_v62 = vmax.f32 %v20127_v61, %v3151_v18  ;;  %v2876_v33 = vpop.f32.mrf.mxu1  ;;  %5386 = vmatpush.bf16.msra.mxu0 %v12946_v56  ;;  %v20129_v23 = vld [vmem:[#allocation346_spill] sm:$0xff]  ;;  %5405 = vmatpush.bf16.msra.mxu1 %v12954_v51 }
 0x6c0   :  { %v3508_v24 = vmax.f32 %v20128_v50, %v2737_v8  ;;  %v3758_v57 = vmax.f32 %v3498_v45, %v3502_v55  ;;  %v3509_v2 = vmax.f32 %v20129_v23, %v2876_v33  ;;  %5443 = vmatpush.bf16.msra.mxu3 %v12970_v48  ;;  %v12953_v47 = vld [vmem:[%s19066_s3 + $0x240] sm:$0xff]  ;;  %v4312_v49 = vpack.c.bf16 %v4183_v31, %v4182_v39  ;;  %v20136_v23 = vld [vmem:[#allocation153_spill] sm:$0xff] }
 0x6c1   :  { %v12969_v56 = vld [vmem:[%s19066_s3 + $0x2c0] sm:$0xff]  ;;  %v3759_v10 = vmax.f32 %v3499_v13, %v3503_v62  ;;  %5015 = vmatmul.bf16.vlgmr.msrb.gmra.mxu0 %v16337_v26  ;;  %5425 = vmatpush.bf16.msra.mxu2 %v12961_v25  ;;  %v7803_v45 = vunpack.c.l.b16 %v17447_v27  ;;  %v13000_v26 = vld [vmem:[%s19066_s3 + $0x3b8] sm:$0xff]  ;;  %v20134_v25 = vld [vmem:[#allocation152_spill] sm:$0xff] }
 0x6c2   :  { %v3760_v60 = vmax.f32 %v3504_v21, %v3508_v24  ;;  %v3976_v51 = vadd.f32 %v16289_v43, %v3758_v57  ;;  %v3761_v48 = vmax.f32 %v3505_v6, %v3509_v2  ;;  %5034 = vmatmul.bf16.vlgmr.msrb.gmra.mxu1 %v16339_v5  ;;  %5053 = vmatmul.bf16.vlgmr.msrb.gmra.mxu2 %v16356_v15  ;;  %v7807_v12 = vunpack.c.l.b16 %v4312_v49  ;;  %v12984_v27 = vld [vmem:[%s19066_s3 + $0x338] sm:$0xff]  ;;  %v20130_v8 = vld [vmem:[#allocation150_spill] sm:$0xff]  ;;  %v20132_v6 = vld [vmem:[#allocation151_spill] sm:$0xff] }
 0x6c3   :  { %v7808_v55 = vunpack.c.h.b16 %v4312_v49  ;;  %v3977_v39 = vadd.f32 %v16294_v28, %v3759_v10  ;;  %5072 = vmatmul.bf16.vlgmr.msrb.gmra.mxu3 %v16358_v63  ;;  %5387 = vmatpush.bf16.msra.mxu0 %v12945_v36  ;;  %v12992_v5 = vld [vmem:[%s19066_s3 + $0x378] sm:$0xff]  ;;  %v3506_v14 = vmax.f32 %v20130_v8, %v16114_v29  ;;  %v3507_v61 = vmax.f32 %v20132_v6, %v20131_v42  ;;  %v20133_v33 = vld [vmem:[#allocation534_spill] sm:$0xff]  ;;  %v20135_v57 = vld [vmem:[#allocation535_spill] sm:$0xff] }
 0x6c4   :  { %v3978_v13 = vadd.f32 %v16264_v22, %v3760_v60  ;;  %v4184_v15 = vmax.f32 %v3976_v51, 0.0  ;;  %v3979_v21 = vadd.f32 %v16269_v30, %v3761_v48  ;;  %5406 = vmatpush.bf16.msra.mxu1 %v12953_v47  ;;  %5444 = vmatpush.bf16.msra.mxu3 %v12969_v56  ;;  %v13008_v63 = vld [vmem:[%s19066_s3 + $0x3f8] sm:$0xff]  ;;  %v17524_v31 = vpack.c.b16 %v7807_v12, %v7803_v45  ;;  %v20137_v56 = vld [vmem:[#allocation347_spill] sm:$0xff]  ;;  %v20138_v29 = vld [vmem:[#allocation348_spill] sm:$0xff] }
 0x6c5   :  { %v17526_v18 = vpack.c.b16 %v7808_v55, %v7804_v35  ;;  %v4185_v62 = vmax.f32 %v3977_v39, 0.0  ;;  %v3015_v24 = vpop.f32.mrf.mxu2  ;;  %5795 = vmatpush.bf16.msrb.mxu2 %v13000_v26  ;;  %v3512_v36 = vmax.f32 %v20134_v25, %v20133_v33  ;;  %v3513_v2 = vmax.f32 %v20136_v23, %v20135_v57  ;;  %v20139_v35 = vld [vmem:[#allocation349_spill] sm:$0xff]  ;;  %v12999_v12 = vld [vmem:[%s19066_s3 + $0x3b0] sm:$0xff]  ;;  %v12998_v57 = vld [vmem:[%s19066_s3 + $0x3a8] sm:$0xff] }
 0x6c6   :  { %v4186_v50 = vmax.f32 %v3978_v13, 0.0  ;;  %v4187_v47 = vmax.f32 %v3979_v21, 0.0  ;;  %v3510_v49 = vmax.f32 %v20137_v56, %v3015_v24  ;;  %v3154_v10 = vpop.f32.mrf.mxu3  ;;  %v12983_v55 = vld [vmem:[%s19066_s3 + $0x330] sm:$0xff]  ;;  %v7805_v26 = vunpack.c.l.b16 %v17485_v11  ;;  %v20140_v21 = vld [vmem:[#allocation350_spill] sm:$0xff]  ;;  %v13006_v56 = vld [vmem:[%s19066_s3 + $0x3e8] sm:$0xff] }
 0x6c7   :  { %5757 = vmatpush.bf16.msrb.mxu0 %v12984_v27  ;;  %v2739_v60 = vpop.f32.mrf.mxu0  ;;  %v3511_v45 = vmax.f32 %v20138_v29, %v3154_v10  ;;  %v2878_v48 = vpop.f32.mrf.mxu1  ;;  %v12991_v39 = vld [vmem:[%s19066_s3 + $0x370] sm:$0xff]  ;;  %v4313_v13 = vpack.c.bf16 %v4185_v62, %v4184_v15  ;;  %v7806_v42 = vunpack.c.h.b16 %v17485_v11  ;;  %v12982_v11 = vld [vmem:[%s19066_s3 + $0x328] sm:$0xff] }
 0x6c8   :  { %5776 = vmatpush.bf16.msrb.mxu1 %v12992_v5  ;;  %5814 = vmatpush.bf16.msrb.mxu3 %v13008_v63  ;;  %v3516_v51 = vmax.f32 %v20139_v35, %v2739_v60  ;;  %v17549_v27 = vpack.c.bf16 %v4187_v47, %v4186_v50  ;;  %v3762_v5 = vmax.f32 %v3506_v14, %v3510_v49  ;;  %v13007_v8 = vld [vmem:[%s19066_s3 + $0x3f0] sm:$0xff] }
 0x6c9   :  { %v3517_v63 = vmax.f32 %v20140_v21, %v2878_v48  ;;  %v3763_v6 = vmax.f32 %v3507_v61, %v3511_v45  ;;  %5796 = vmatpush.bf16.msrb.mxu2 %v12999_v12  ;;  %v7809_v33 = vunpack.c.l.b16 %v4313_v13  ;;  %v7810_v25 = vunpack.c.h.b16 %v4313_v13  ;;  %v12990_v61 = vld [vmem:[%s19066_s3 + $0x368] sm:$0xff]  ;;  %v20141_v29 = vld [vmem:[#allocation536_spill] sm:$0xff]  ;;  %v20142_v45 = vld [vmem:[#allocation154_spill] sm:$0xff] }
 0x6ca   :  { %v3764_v24 = vmax.f32 %v3512_v36, %v3516_v51  ;;  %v3980_v15 = vadd.f32 %v16289_v43, %v3762_v5  ;;  %v3514_v35 = vmax.f32 %v20142_v45, %v20141_v29  ;;  %v20143_v51 = vld [vmem:[#allocation537_spill] sm:$0xff]  ;;  %v20144_v48 = vld [vmem:[#allocation155_spill] sm:$0xff]  ;;  %v20146_v21 = vld [vmem:[#allocation538_spill] sm:$0xff]  ;;  %v8172_v29 = vunpack.c.l.b16 %v17549_v27 }
 0x6cb   :  { %5758 = vmatpush.bf16.msrb.mxu0 %v12983_v55  ;;  %v3765_v62 = vmax.f32 %v3513_v2, %v3517_v63  ;;  %v3981_v14 = vadd.f32 %v16294_v28, %v3763_v6  ;;  %v17568_v36 = vpack.c.b16 %v7809_v33, %v7805_v26  ;;  %v17570_v23 = vpack.c.b16 %v7810_v25, %v7806_v42  ;;  %v20147_v63 = vld [vmem:[#allocation156_spill] sm:$0xff]  ;;  %v20149_v33 = vld [vmem:[#allocation353_spill] sm:$0xff] }
 0x6cc   :  { %5777 = vmatpush.bf16.msrb.mxu1 %v12991_v39  ;;  %5815 = vmatpush.bf16.msrb.mxu3 %v13007_v8  ;;  %v3982_v50 = vadd.f32 %v16264_v22, %v3764_v24  ;;  %v4188_v2 = vmax.f32 %v3980_v15, 0.0  ;;  %v3515_v12 = vmax.f32 %v20144_v48, %v20143_v51  ;;  %v20145_v39 = vld [vmem:[#allocation351_spill] sm:$0xff]  ;;  %v3520_v8 = vmax.f32 %v20147_v63, %v20146_v21  ;;  %v20148_v6 = vld [vmem:[#allocation352_spill] sm:$0xff]  ;;  %v20153_v63 = vld [vmem:[#allocation158_spill] sm:$0xff] }
 0x6cd   :  { %v3983_v47 = vadd.f32 %v16269_v30, %v3765_v62  ;;  %v4189_v49 = vmax.f32 %v3981_v14, 0.0  ;;  %v3017_v60 = vpop.f32.mrf.mxu2  ;;  %5797 = vmatpush.bf16.msrb.mxu2 %v12998_v57  ;;  %v12997_v62 = vld [vmem:[%s19066_s3 + $0x3a0] sm:$0xff]  ;;  %v20151_v57 = vld [vmem:[#allocation157_spill] sm:$0xff]  ;;  %v8173_v45 = vunpack.c.h.b16 %v17549_v27 }
 0x6ce   :  { %v4190_v10 = vmax.f32 %v3982_v50, 0.0  ;;  %v3518_v13 = vmax.f32 %v20145_v39, %v3017_v60  ;;  %v3156_v26 = vpop.f32.mrf.mxu3  ;;  %v12981_v14 = vld [vmem:[%s19066_s3 + $0x320] sm:$0xff]  ;;  %v20150_v50 = vld [vmem:[#allocation539_spill] sm:$0xff]  ;;  %v12980_v27 = vld [vmem:[%s19066_s3 + $0x318] sm:$0xff] }
 0x6cf   :  { %5759 = vmatpush.bf16.msrb.mxu0 %v12982_v11  ;;  %v4191_v55 = vmax.f32 %v3983_v47, 0.0  ;;  %v2742_v5 = vpop.f32.mrf.mxu0  ;;  %v17583_v42 = vpack.c.bf16 %v4189_v49, %v4188_v2  ;;  %v3519_v24 = vmax.f32 %v20148_v6, %v3156_v26  ;;  %v2881_v15 = vpop.f32.mrf.mxu1  ;;  %v3521_v11 = vmax.f32 %v20151_v57, %v20150_v50  ;;  %v20152_v2 = vld [vmem:[#allocation354_spill] sm:$0xff]  ;;  %v20154_v6 = vld [vmem:[#allocation540_spill] sm:$0xff] }
 0x6d0   :  { %5778 = vmatpush.bf16.msrb.mxu1 %v12990_v61  ;;  %5816 = vmatpush.bf16.msrb.mxu3 %v13006_v56  ;;  %v3524_v25 = vmax.f32 %v20149_v33, %v2742_v5  ;;  %v3766_v47 = vmax.f32 %v3514_v35, %v3518_v13  ;;  %v3525_v56 = vmax.f32 %v20152_v2, %v2881_v15  ;;  %v12989_v49 = vld [vmem:[%s19066_s3 + $0x360] sm:$0xff]  ;;  %v20157_v50 = vld [vmem:[#allocation160_spill] sm:$0xff] }
 0x6d1   :  { %v4316_v61 = vpack.c.bf16 %v4191_v55, %v4190_v10  ;;  %v13005_v60 = vld [vmem:[%s19066_s3 + $0x3e0] sm:$0xff]  ;;  %v3767_v51 = vmax.f32 %v3515_v12, %v3519_v24  ;;  %5020 = vmatmul.bf16.gmra.mxu0 %v16385_v3  ;;  %5798 = vmatpush.bf16.msrb.mxu2 %v12997_v62  ;;  %v12996_v3 = vld [vmem:[%s19066_s3 + $0x398] sm:$0xff]  ;;  %v20155_v24 = vld [vmem:[#allocation159_spill] sm:$0xff] }
 0x6d2   :  { %v3768_v48 = vmax.f32 %v3520_v8, %v3524_v25  ;;  %v3984_v55 = vadd.f32 %v16289_v43, %v3766_v47  ;;  %v3769_v39 = vmax.f32 %v3521_v11, %v3525_v56  ;;  %5039 = vmatmul.bf16.gmra.mxu1 %v16387_v9  ;;  %5058 = vmatmul.bf16.gmra.mxu2 %v16404_v58  ;;  %v12988_v58 = vld [vmem:[%s19066_s3 + $0x358] sm:$0xff]  ;;  %v20158_v11 = vld [vmem:[#allocation542_spill] sm:$0xff]  ;;  %v20160_v56 = vld [vmem:[#allocation355_spill] sm:$0xff] }
 0x6d3   :  { %v8176_v10 = vunpack.c.l.b16 %v4316_v61  ;;  %v8177_v35 = vunpack.c.h.b16 %v4316_v61  ;;  %v3985_v13 = vadd.f32 %v16294_v28, %v3767_v51  ;;  %5077 = vmatmul.bf16.gmra.mxu3 %v16406_v7  ;;  %5760 = vmatpush.bf16.msrb.mxu0 %v12981_v14  ;;  %v13004_v7 = vld [vmem:[%s19066_s3 + $0x3d8] sm:$0xff]  ;;  %v3522_v8 = vmax.f32 %v20153_v63, %v16138_v41  ;;  %v20161_v51 = vld [vmem:[#allocation356_spill] sm:$0xff] }
 0x6d4   :  { %v3986_v26 = vadd.f32 %v16264_v22, %v3768_v48  ;;  %v4192_v12 = vmax.f32 %v3984_v55, 0.0  ;;  %v3987_v9 = vadd.f32 %v16269_v30, %v3769_v39  ;;  %5779 = vmatpush.bf16.msrb.mxu1 %v12989_v49  ;;  %5817 = vmatpush.bf16.msrb.mxu3 %v13005_v60  ;;  %v3523_v33 = vmax.f32 %v20155_v24, %v20154_v6  ;;  %v20156_v14 = vld [vmem:[#allocation541_spill] sm:$0xff]  ;;  %v12995_v39 = vld [vmem:[%s19066_s3 + $0x390] sm:$0xff] }
 0x6d5   :  { %v17624_v5 = vpack.c.b16 %v8176_v10, %v8172_v29  ;;  %v17626_v21 = vpack.c.b16 %v8177_v35, %v8173_v45  ;;  %v4193_v25 = vmax.f32 %v3985_v13, 0.0  ;;  %v3020_v62 = vpop.f32.mrf.mxu2  ;;  %5799 = vmatpush.bf16.msrb.mxu2 %v12996_v3  ;;  %v3528_v57 = vmax.f32 %v20157_v50, %v20156_v14  ;;  %v20159_v61 = vld [vmem:[#allocation161_spill] sm:$0xff]  ;;  %v12979_v13 = vld [vmem:[%s19066_s3 + $0x310] sm:$0xff]  ;;  %v12978_v50 = vld [vmem:[%s19066_s3 + $0x308] sm:$0xff] }
 0x6d6   :  { %v4194_v15 = vmax.f32 %v3986_v26, 0.0  ;;  %v3529_v47 = vmax.f32 %v20159_v61, %v20158_v11  ;;  %v4195_v2 = vmax.f32 %v3987_v9, 0.0  ;;  %v3526_v49 = vmax.f32 %v20160_v56, %v3020_v62  ;;  %v3159_v60 = vpop.f32.mrf.mxu3  ;;  %v20162_v10 = vld [vmem:[#allocation357_spill] sm:$0xff]  ;;  %v13003_v6 = vld [vmem:[%s19066_s3 + $0x3d0] sm:$0xff]  ;;  %v20164_v56 = vld [vmem:[#allocation543_spill] sm:$0xff] }
 0x6d7   :  { %v2744_v29 = vpop.f32.mrf.mxu0  ;;  %v8174_v41 = vunpack.c.l.b16 %v17583_v42  ;;  %v4317_v45 = vpack.c.bf16 %v4193_v25, %v4192_v12  ;;  %v3527_v48 = vmax.f32 %v20161_v51, %v3159_v60  ;;  %v2883_v55 = vpop.f32.mrf.mxu1  ;;  %5761 = vmatpush.bf16.msrb.mxu0 %v12980_v27  ;;  %v8175_v26 = vunpack.c.h.b16 %v17583_v42  ;;  %v20163_v12 = vld [vmem:[#allocation358_spill] sm:$0xff]  ;;  %v12987_v27 = vld [vmem:[%s19066_s3 + $0x350] sm:$0xff] }
 0x6d8   :  { %v3532_v35 = vmax.f32 %v20162_v10, %v2744_v29  ;;  %v17647_v3 = vpack.c.bf16 %v4195_v2, %v4194_v15  ;;  %v3770_v9 = vmax.f32 %v3522_v8, %v3526_v49  ;;  %v3533_v63 = vmax.f32 %v20163_v12, %v2883_v55  ;;  %5780 = vmatpush.bf16.msrb.mxu1 %v12988_v58  ;;  %v13002_v2 = vld [vmem:[%s19066_s3 + $0x3c8] sm:$0xff]  ;;  %v20165_v49 = vld [vmem:[#allocation162_spill] sm:$0xff]  ;;  %v20166_v51 = vld [vmem:[#allocation544_spill] sm:$0xff] }
 0x6d9   :  { %5818 = vmatpush.bf16.msrb.mxu3 %v13004_v7  ;;  %v8178_v24 = vunpack.c.l.b16 %v4317_v45  ;;  %v8179_v25 = vunpack.c.h.b16 %v4317_v45  ;;  %v3771_v62 = vmax.f32 %v3523_v33, %v3527_v48  ;;  %5800 = vmatpush.bf16.msrb.mxu2 %v12995_v39  ;;  %v12994_v7 = vld [vmem:[%s19066_s3 + $0x388] sm:$0xff]  ;;  %v3530_v60 = vmax.f32 %v20165_v49, %v20164_v56  ;;  %v20169_v55 = vld [vmem:[#allocation164_spill] sm:$0xff]  ;;  %v20175_v56 = vld [vmem:[#allocation362_spill] sm:$0xff] }
 0x6da   :  { %v3772_v14 = vmax.f32 %v3528_v57, %v3532_v35  ;;  %v3988_v42 = vadd.f32 %v16289_v43, %v3770_v9  ;;  %v3773_v8 = vmax.f32 %v3529_v47, %v3533_v63  ;;  %v12986_v47 = vld [vmem:[%s19066_s3 + $0x348] sm:$0xff]  ;;  %v20168_v35 = vld [vmem:[#allocation545_spill] sm:$0xff] }
 0x6db   :  { %v3989_v15 = vadd.f32 %v16294_v28, %v3771_v62  ;;  %5762 = vmatpush.bf16.msrb.mxu0 %v12979_v13  ;;  %v17665_v11 = vpack.c.b16 %v8178_v24, %v8174_v41  ;;  %v17667_v33 = vpack.c.b16 %v8179_v25, %v8175_v26  ;;  %v20167_v48 = vld [vmem:[#allocation163_spill] sm:$0xff]  ;;  %v3536_v39 = vmax.f32 %v20169_v55, %v20168_v35  ;;  %v20173_v62 = vld [vmem:[#allocation360_spill] sm:$0xff] }
 0x6dc   :  { %v3990_v58 = vadd.f32 %v16264_v22, %v3772_v14  ;;  %v4196_v57 = vmax.f32 %v3988_v42, 0.0  ;;  %v3991_v61 = vadd.f32 %v16269_v30, %v3773_v8  ;;  %5781 = vmatpush.bf16.msrb.mxu1 %v12987_v27  ;;  %v3531_v10 = vmax.f32 %v20167_v48, %v20166_v51  ;;  %v20170_v26 = vld [vmem:[#allocation359_spill] sm:$0xff]  ;;  %v20171_v27 = vld [vmem:[#allocation546_spill] sm:$0xff]  ;;  %v20174_v42 = vld [vmem:[#allocation361_spill] sm:$0xff] }
 0x6dd   :  { %5819 = vmatpush.bf16.msrb.mxu3 %v13003_v6  ;;  %v4197_v29 = vmax.f32 %v3989_v15, 0.0  ;;  %v3022_v45 = vpop.f32.mrf.mxu2  ;;  %5801 = vmatpush.bf16.msrb.mxu2 %v12994_v7  ;;  %v20172_v6 = vld [vmem:[#allocation165_spill] sm:$0xff]  ;;  %v12977_v7 = vld [vmem:[%s19066_s3 + $0x300] sm:$0xff]  ;;  %v8181_v48 = vunpack.c.h.b16 %v17647_v3 }
 0x6de   :  { %v4198_v41 = vmax.f32 %v3990_v58, 0.0  ;;  %v4199_v13 = vmax.f32 %v3991_v61, 0.0  ;;  %v3534_v9 = vmax.f32 %v20170_v26, %v3022_v45  ;;  %v3161_v12 = vpop.f32.mrf.mxu3  ;;  %v3537_v24 = vmax.f32 %v20172_v6, %v20171_v27  ;;  %v12993_v58 = vld [vmem:[%s19066_s3 + $0x380] sm:$0xff]  ;;  %v20178_v27 = vld [vmem:[#allocation548_spill] sm:$0xff]  ;;  %v20179_v6 = vld [vmem:[#allocation167_spill] sm:$0xff] }
 0x6df   :  { %v2747_v63 = vpop.f32.mrf.mxu0  ;;  %v17685_v25 = vpack.c.bf16 %v4197_v29, %v4196_v57  ;;  %v3535_v14 = vmax.f32 %v20173_v62, %v3161_v12  ;;  %v2886_v15 = vpop.f32.mrf.mxu1  ;;  %5763 = vmatpush.bf16.msrb.mxu0 %v12978_v50  ;;  %v12985_v57 = vld [vmem:[%s19066_s3 + $0x340] sm:$0xff] }
 0x6e0   :  { %v3540_v8 = vmax.f32 %v20174_v42, %v2747_v63  ;;  %v3774_v61 = vmax.f32 %v3530_v60, %v3534_v9  ;;  %v3541_v49 = vmax.f32 %v20175_v56, %v2886_v15  ;;  %5782 = vmatpush.bf16.msrb.mxu1 %v12986_v47  ;;  %v13001_v50 = vld [vmem:[%s19066_s3 + $0x3c0] sm:$0xff]  ;;  %v4320_v29 = vpack.c.bf16 %v4199_v13, %v4198_v41  ;;  %v20176_v9 = vld [vmem:[#allocation547_spill] sm:$0xff]  ;;  %v20181_v15 = vld [vmem:[#allocation168_spill] sm:$0xff] }
 0x6e1   :  { %5820 = vmatpush.bf16.msrb.mxu3 %v13002_v2  ;;  %v3775_v45 = vmax.f32 %v3531_v10, %v3535_v14  ;;  %5388 = vmatmul.bf16.vlgmr.msra.gmra.mxu0 %v16542_v20  ;;  %v8180_v60 = vunpack.c.l.b16 %v17647_v3  ;;  %v13032_v20 = vld [vmem:[%s19066_s3 + $0x4b8] sm:$0xff]  ;;  %v20177_v12 = vld [vmem:[#allocation166_spill] sm:$0xff] }
 0x6e2   :  { %v3776_v51 = vmax.f32 %v3536_v39, %v3540_v8  ;;  %5802 = vmatpush.bf16.msrb.mxu2 %v12993_v58  ;;  %v3992_v47 = vadd.f32 %v16289_v43, %v3774_v61  ;;  %v3777_v2 = vmax.f32 %v3537_v24, %v3541_v49  ;;  %5407 = vmatmul.bf16.vlgmr.msra.gmra.mxu1 %v16544_v46  ;;  %v8184_v35 = vunpack.c.l.b16 %v4320_v29  ;;  %v13016_v3 = vld [vmem:[%s19066_s3 + $0x438] sm:$0xff] }
 0x6e3   :  { %5426 = vmatmul.bf16.vlgmr.msra.gmra.mxu2 %v16561_v40  ;;  %v8185_v55 = vunpack.c.h.b16 %v4320_v29  ;;  %v3993_v41 = vadd.f32 %v16294_v28, %v3775_v45  ;;  %5445 = vmatmul.bf16.vlgmr.msra.gmra.mxu3 %v16563_v53  ;;  %v13024_v46 = vld [vmem:[%s19066_s3 + $0x478] sm:$0xff]  ;;  %v3538_v63 = vmax.f32 %v20177_v12, %v20176_v9  ;;  %v3539_v24 = vmax.f32 %v20179_v6, %v20178_v27  ;;  %v13039_v9 = vld [vmem:[%s19066_s3 + $0x4f0] sm:$0xff] }
 0x6e4   :  { %v3994_v10 = vadd.f32 %v16264_v22, %v3776_v51  ;;  %5764 = vmatpush.bf16.msrb.mxu0 %v12977_v7  ;;  %v4200_v40 = vmax.f32 %v3992_v47, 0.0  ;;  %v3995_v39 = vadd.f32 %v16269_v30, %v3777_v2  ;;  %5783 = vmatpush.bf16.msrb.mxu1 %v12985_v57  ;;  %v13040_v53 = vld [vmem:[%s19066_s3 + $0x4f8] sm:$0xff]  ;;  %v17724_v13 = vpack.c.b16 %v8184_v35, %v8180_v60  ;;  %v20182_v7 = vld [vmem:[#allocation550_spill] sm:$0xff]  ;;  %v20184_v57 = vld [vmem:[#allocation363_spill] sm:$0xff] }
 0x6e5   :  { %5821 = vmatpush.bf16.msrb.mxu3 %v13001_v50  ;;  %v17726_v26 = vpack.c.b16 %v8185_v55, %v8181_v48  ;;  %v4201_v62 = vmax.f32 %v3993_v41, 0.0  ;;  %v3025_v42 = vpop.f32.mrf.mxu2  ;;  %v20180_v8 = vld [vmem:[#allocation549_spill] sm:$0xff]  ;;  %v20185_v51 = vld [vmem:[#allocation364_spill] sm:$0xff]  ;;  %v8183_v12 = vunpack.c.h.b16 %v17685_v25 }
 0x6e6   :  { %v4202_v14 = vmax.f32 %v3994_v10, 0.0  ;;  %6172 = vmatpush.bf16.msra.mxu2 %v13032_v20  ;;  %v3544_v58 = vmax.f32 %v20181_v15, %v20180_v8  ;;  %v20183_v61 = vld [vmem:[#allocation169_spill] sm:$0xff]  ;;  %v4203_v49 = vmax.f32 %v3995_v39, 0.0  ;;  %v3542_v50 = vmax.f32 %v20184_v57, %v3025_v42  ;;  %v3164_v29 = vpop.f32.mrf.mxu3  ;;  %v13031_v35 = vld [vmem:[%s19066_s3 + $0x4b0] sm:$0xff]  ;;  %v20187_v39 = vld [vmem:[#allocation366_spill] sm:$0xff] }
 0x6e7   :  { %v3545_v56 = vmax.f32 %v20183_v61, %v20182_v7  ;;  %v2749_v45 = vpop.f32.mrf.mxu0  ;;  %v3543_v60 = vmax.f32 %v20185_v51, %v3164_v29  ;;  %v20186_v48 = vld [vmem:[#allocation365_spill] sm:$0xff]  ;;  %v2888_v2 = vpop.f32.mrf.mxu1  ;;  %v13015_v55 = vld [vmem:[%s19066_s3 + $0x430] sm:$0xff]  ;;  %v4321_v10 = vpack.c.bf16 %v4201_v62, %v4200_v40  ;;  %v8182_v20 = vunpack.c.l.b16 %v17685_v25  ;;  %v13030_v15 = vld [vmem:[%s19066_s3 + $0x4a8] sm:$0xff] }
 0x6e8   :  { %6134 = vmatpush.bf16.msra.mxu0 %v13016_v3  ;;  %6153 = vmatpush.bf16.msra.mxu1 %v13024_v46  ;;  %v3548_v47 = vmax.f32 %v20186_v48, %v2749_v45  ;;  %v13023_v41 = vld [vmem:[%s19066_s3 + $0x470] sm:$0xff]  ;;  %v17749_v3 = vpack.c.bf16 %v4203_v49, %v4202_v14  ;;  %v3778_v46 = vmax.f32 %v3538_v63, %v3542_v50  ;;  %v13014_v25 = vld [vmem:[%s19066_s3 + $0x428] sm:$0xff]  ;;  %v20189_v51 = vld [vmem:[#allocation170_spill] sm:$0xff] }
 0x6e9   :  { %6191 = vmatpush.bf16.msra.mxu3 %v13040_v53  ;;  %v3549_v53 = vmax.f32 %v20187_v39, %v2888_v2  ;;  %v3779_v27 = vmax.f32 %v3539_v24, %v3543_v60  ;;  %v8186_v42 = vunpack.c.l.b16 %v4321_v10  ;;  %v8187_v8 = vunpack.c.h.b16 %v4321_v10  ;;  %v13022_v24 = vld [vmem:[%s19066_s3 + $0x468] sm:$0xff]  ;;  %v20190_v48 = vld [vmem:[#allocation552_spill] sm:$0xff] }
 0x6ea   :  { %v3780_v6 = vmax.f32 %v3544_v58, %v3548_v47  ;;  %6173 = vmatpush.bf16.msra.mxu2 %v13031_v35  ;;  %v3996_v40 = vadd.f32 %v16289_v43, %v3778_v46  ;;  %v13038_v49 = vld [vmem:[%s19066_s3 + $0x4e8] sm:$0xff]  ;;  %v20193_v46 = vld [vmem:[#allocation553_spill] sm:$0xff]  ;;  %v20194_v39 = vld [vmem:[#allocation172_spill] sm:$0xff] }
 0x6eb   :  { %v3781_v62 = vmax.f32 %v3545_v56, %v3549_v53  ;;  %v3997_v63 = vadd.f32 %v16294_v28, %v3779_v27  ;;  %v17768_v58 = vpack.c.b16 %v8186_v42, %v8182_v20  ;;  %v17770_v7 = vpack.c.b16 %v8187_v8, %v8183_v12  ;;  %v20188_v45 = vld [vmem:[#allocation551_spill] sm:$0xff]  ;;  %v20195_v12 = vld [vmem:[#allocation368_spill] sm:$0xff] }
 0x6ec   :  { %6135 = vmatpush.bf16.msra.mxu0 %v13015_v55  ;;  %6154 = vmatpush.bf16.msra.mxu1 %v13023_v41  ;;  %v3998_v14 = vadd.f32 %v16264_v22, %v3780_v6  ;;  %v4204_v61 = vmax.f32 %v3996_v40, 0.0  ;;  %v3546_v60 = vmax.f32 %v20189_v51, %v20188_v45  ;;  %v20191_v47 = vld [vmem:[#allocation171_spill] sm:$0xff]  ;;  %v3552_v53 = vmax.f32 %v20194_v39, %v20193_v46  ;;  %v20196_v6 = vld [vmem:[#allocation369_spill] sm:$0xff]  ;;  %v13029_v40 = vld [vmem:[%s19066_s3 + $0x4a0] sm:$0xff] }
 0x6ed   :  { %6192 = vmatpush.bf16.msra.mxu3 %v13039_v9  ;;  %v3999_v56 = vadd.f32 %v16269_v30, %v3781_v62  ;;  %v4205_v57 = vmax.f32 %v3997_v63, 0.0  ;;  %v3027_v29 = vpop.f32.mrf.mxu2  ;;  %v3547_v2 = vmax.f32 %v20191_v47, %v20190_v48  ;;  %v20192_v55 = vld [vmem:[#allocation367_spill] sm:$0xff]  ;;  %v13013_v62 = vld [vmem:[%s19066_s3 + $0x420] sm:$0xff]  ;;  %v8550_v45 = vunpack.c.h.b16 %v17749_v3  ;;  %v20200_v47 = vld [vmem:[#allocation196_spill] sm:$0xff] }
 0x6ee   :  { %v4206_v50 = vmax.f32 %v3998_v14, 0.0  ;;  %6174 = vmatpush.bf16.msra.mxu2 %v13030_v15  ;;  %v3550_v41 = vmax.f32 %v20192_v55, %v3027_v29  ;;  %v3166_v10 = vpop.f32.mrf.mxu3  ;;  %v20197_v63 = vld [vmem:[#allocation554_spill] sm:$0xff]  ;;  %v20198_v14 = vld [vmem:[#allocation173_spill] sm:$0xff]  ;;  %v8549_v29 = vunpack.c.l.b16 %v17749_v3 }
 0x6ef   :  { %v4207_v35 = vmax.f32 %v3999_v56, 0.0  ;;  %v2752_v20 = vpop.f32.mrf.mxu0  ;;  %v17783_v9 = vpack.c.bf16 %v4205_v57, %v4204_v61  ;;  %v3551_v27 = vmax.f32 %v20195_v12, %v3166_v10  ;;  %v2891_v8 = vpop.f32.mrf.mxu1  ;;  %v3553_v15 = vmax.f32 %v20198_v14, %v20197_v63  ;;  %v20199_v61 = vld [vmem:[#allocation370_spill] sm:$0xff]  ;;  %v20203_v39 = vld [vmem:[#allocation393_spill] sm:$0xff]  ;;  %v20206_v14 = vld [vmem:[#allocation556_spill] sm:$0xff] }
 0x6f0   :  { %6136 = vmatpush.bf16.msra.mxu0 %v13014_v25  ;;  %6155 = vmatpush.bf16.msra.mxu1 %v13022_v24  ;;  %v3556_v42 = vmax.f32 %v20196_v6, %v2752_v20  ;;  %v3782_v24 = vmax.f32 %v3546_v60, %v3550_v41  ;;  %v3557_v56 = vmax.f32 %v20199_v61, %v2891_v8  ;;  %v13037_v57 = vld [vmem:[%s19066_s3 + $0x4e0] sm:$0xff]  ;;  %v20201_v41 = vld [vmem:[#allocation197_spill] sm:$0xff] }
 0x6f1   :  { %6193 = vmatpush.bf16.msra.mxu3 %v13038_v49  ;;  %v4324_v25 = vpack.c.bf16 %v4207_v35, %v4206_v50  ;;  %v13021_v49 = vld [vmem:[%s19066_s3 + $0x460] sm:$0xff]  ;;  %v3783_v51 = vmax.f32 %v3547_v2, %v3551_v27  ;;  %5393 = vmatmul.bf16.gmra.mxu0 %v20200_v47  ;;  %v13028_v3 = vld [vmem:[%s19066_s3 + $0x498] sm:$0xff] }
 0x6f2   :  { %v3784_v48 = vmax.f32 %v3552_v53, %v3556_v42  ;;  %6175 = vmatpush.bf16.msra.mxu2 %v13029_v40  ;;  %v4000_v35 = vadd.f32 %v16289_v43, %v3782_v24  ;;  %v3785_v55 = vmax.f32 %v3553_v15, %v3557_v56  ;;  %5412 = vmatmul.bf16.gmra.mxu1 %v20201_v41  ;;  %v20202_v10 = vld [vmem:[#allocation198_spill] sm:$0xff]  ;;  %v13012_v2 = vld [vmem:[%s19066_s3 + $0x418] sm:$0xff]  ;;  %v20204_v40 = vld [vmem:[#allocation555_spill] sm:$0xff]  ;;  %v8551_v41 = vunpack.c.l.b16 %v17783_v9 }
 0x6f3   :  { %v8553_v50 = vunpack.c.l.b16 %v4324_v25  ;;  %v8554_v60 = vunpack.c.h.b16 %v4324_v25  ;;  %5431 = vmatmul.bf16.gmra.mxu2 %v20202_v10  ;;  %v4001_v20 = vadd.f32 %v16294_v28, %v3783_v51  ;;  %5450 = vmatmul.bf16.gmra.mxu3 %v20203_v39  ;;  %v13020_v27 = vld [vmem:[%s19066_s3 + $0x458] sm:$0xff]  ;;  %v20207_v15 = vld [vmem:[#allocation175_spill] sm:$0xff]  ;;  %v20213_v39 = vld [vmem:[#allocation372_spill] sm:$0xff] }
 0x6f4   :  { %v4002_v46 = vadd.f32 %v16264_v22, %v3784_v48  ;;  %6137 = vmatpush.bf16.msra.mxu0 %v13013_v62  ;;  %v4208_v53 = vmax.f32 %v4000_v35, 0.0  ;;  %v4003_v12 = vadd.f32 %v16269_v30, %v3785_v55  ;;  %6156 = vmatpush.bf16.msra.mxu1 %v13021_v49  ;;  %v13036_v6 = vld [vmem:[%s19066_s3 + $0x4d8] sm:$0xff]  ;;  %v20205_v62 = vld [vmem:[#allocation174_spill] sm:$0xff]  ;;  %v3555_v25 = vmax.f32 %v20207_v15, %v20206_v14 }
 0x6f5   :  { %6194 = vmatpush.bf16.msra.mxu3 %v13037_v57  ;;  %v17824_v42 = vpack.c.b16 %v8553_v50, %v8549_v29  ;;  %v17826_v8 = vpack.c.b16 %v8554_v60, %v8550_v45  ;;  %v3554_v63 = vmax.f32 %v20205_v62, %v20204_v40  ;;  %v4209_v24 = vmax.f32 %v4001_v20, 0.0  ;;  %v3030_v56 = vpop.f32.mrf.mxu2  ;;  %v20208_v49 = vld [vmem:[#allocation557_spill] sm:$0xff]  ;;  %v20209_v57 = vld [vmem:[#allocation176_spill] sm:$0xff]  ;;  %v20210_v48 = vld [vmem:[#allocation558_spill] sm:$0xff] }
 0x6f6   :  { %v4210_v61 = vmax.f32 %v4002_v46, 0.0  ;;  %6176 = vmatpush.bf16.msra.mxu2 %v13028_v3  ;;  %v3560_v51 = vmax.f32 %v20209_v57, %v20208_v49  ;;  %v20211_v47 = vld [vmem:[#allocation177_spill] sm:$0xff]  ;;  %v4211_v29 = vmax.f32 %v4003_v12, 0.0  ;;  %v20212_v50 = vld [vmem:[#allocation371_spill] sm:$0xff]  ;;  %v3169_v60 = vpop.f32.mrf.mxu3  ;;  %v13027_v3 = vld [vmem:[%s19066_s3 + $0x490] sm:$0xff]  ;;  %v8552_v14 = vunpack.c.h.b16 %v17783_v9 }
 0x6f7   :  { %v3561_v35 = vmax.f32 %v20211_v47, %v20210_v48  ;;  %v3558_v45 = vmax.f32 %v20212_v50, %v3030_v56  ;;  %v2754_v55 = vpop.f32.mrf.mxu0  ;;  %v4325_v10 = vpack.c.bf16 %v4209_v24, %v4208_v53  ;;  %v3559_v40 = vmax.f32 %v20213_v39, %v3169_v60  ;;  %v20214_v20 = vld [vmem:[#allocation373_spill] sm:$0xff]  ;;  %v2893_v62 = vpop.f32.mrf.mxu1  ;;  %v13011_v12 = vld [vmem:[%s19066_s3 + $0x410] sm:$0xff]  ;;  %v20215_v53 = vld [vmem:[#allocation374_spill] sm:$0xff] }
 0x6f8   :  { %v3564_v46 = vmax.f32 %v20214_v20, %v2754_v55  ;;  %6138 = vmatpush.bf16.msra.mxu0 %v13012_v2  ;;  %v17847_v15 = vpack.c.bf16 %v4211_v29, %v4210_v61  ;;  %v3565_v24 = vmax.f32 %v20215_v53, %v2893_v62  ;;  %6157 = vmatpush.bf16.msra.mxu1 %v13020_v27  ;;  %v13019_v2 = vld [vmem:[%s19066_s3 + $0x450] sm:$0xff]  ;;  %v13010_v29 = vld [vmem:[%s19066_s3 + $0x408] sm:$0xff]  ;;  %v20217_v39 = vld [vmem:[#allocation178_spill] sm:$0xff] }
 0x6f9   :  { %v3786_v56 = vmax.f32 %v3554_v63, %v3558_v45  ;;  %6195 = vmatpush.bf16.msra.mxu3 %v13036_v6  ;;  %v13035_v49 = vld [vmem:[%s19066_s3 + $0x4d0] sm:$0xff]  ;;  %v8555_v57 = vunpack.c.l.b16 %v4325_v10  ;;  %v8556_v48 = vunpack.c.h.b16 %v4325_v10  ;;  %v3787_v47 = vmax.f32 %v3555_v25, %v3559_v40  ;;  %v13026_v6 = vld [vmem:[%s19066_s3 + $0x488] sm:$0xff] }
 0x6fa   :  { %v3788_v50 = vmax.f32 %v3560_v51, %v3564_v46  ;;  %6177 = vmatpush.bf16.msra.mxu2 %v13027_v3  ;;  %v3789_v63 = vmax.f32 %v3561_v35, %v3565_v24  ;;  %v13018_v60 = vld [vmem:[%s19066_s3 + $0x448] sm:$0xff]  ;;  %v20218_v62 = vld [vmem:[#allocation560_spill] sm:$0xff] }
 0x6fb   :  { %v4004_v9 = vadd.f32 %v16289_v43, %v3786_v56  ;;  %v4005_v61 = vadd.f32 %v16294_v28, %v3787_v47  ;;  %v17865_v45 = vpack.c.b16 %v8555_v57, %v8551_v41  ;;  %v17867_v25 = vpack.c.b16 %v8556_v48, %v8552_v14  ;;  %v13034_v55 = vld [vmem:[%s19066_s3 + $0x4c8] sm:$0xff]  ;;  %v20220_v14 = vld [vmem:[#allocation561_spill] sm:$0xff]  ;;  %v20221_v56 = vld [vmem:[#allocation180_spill] sm:$0xff] }
 0x6fc   :  { %v4006_v27 = vadd.f32 %v16264_v22, %v3788_v50  ;;  %6139 = vmatpush.bf16.msra.mxu0 %v13011_v12  ;;  %v4007_v35 = vadd.f32 %v16269_v30, %v3789_v63  ;;  %6158 = vmatpush.bf16.msra.mxu1 %v13019_v2  ;;  %v20216_v10 = vld [vmem:[#allocation559_spill] sm:$0xff]  ;;  %v3568_v53 = vmax.f32 %v20221_v56, %v20220_v14  ;;  %v20223_v47 = vld [vmem:[#allocation562_spill] sm:$0xff]  ;;  %v20224_v50 = vld [vmem:[#allocation181_spill] sm:$0xff] }
 0x6fd   :  { %v4212_v51 = vmax.f32 %v4004_v9, 0.0  ;;  %6196 = vmatpush.bf16.msra.mxu3 %v13035_v49  ;;  %v3562_v40 = vmax.f32 %v20217_v39, %v20216_v10  ;;  %v4213_v41 = vmax.f32 %v4005_v61, 0.0  ;;  %v3032_v46 = vpop.f32.mrf.mxu2  ;;  %v20219_v3 = vld [vmem:[#allocation179_spill] sm:$0xff]  ;;  %v3569_v9 = vmax.f32 %v20224_v50, %v20223_v47  ;;  %v20225_v61 = vld [vmem:[#allocation376_spill] sm:$0xff]  ;;  %v20226_v10 = vld [vmem:[#allocation377_spill] sm:$0xff] }
 0x6fe   :  { %v4214_v20 = vmax.f32 %v4006_v27, 0.0  ;;  %6178 = vmatpush.bf16.msra.mxu2 %v13026_v6  ;;  %v3563_v12 = vmax.f32 %v20219_v3, %v20218_v62  ;;  %v4215_v24 = vmax.f32 %v4007_v35, 0.0  ;;  %v20222_v2 = vld [vmem:[#allocation375_spill] sm:$0xff]  ;;  %v3171_v57 = vpop.f32.mrf.mxu3  ;;  %v13025_v62 = vld [vmem:[%s19066_s3 + $0x480] sm:$0xff] }
 0x6ff   :  { %v3566_v49 = vmax.f32 %v20222_v2, %v3032_v46  ;;  %v2757_v48 = vpop.f32.mrf.mxu0  ;;  %v17885_v63 = vpack.c.bf16 %v4213_v41, %v4212_v51  ;;  %v3567_v27 = vmax.f32 %v20225_v61, %v3171_v57  ;;  %v2896_v39 = vpop.f32.mrf.mxu1  ;;  %v13009_v35 = vld [vmem:[%s19066_s3 + $0x400] sm:$0xff]  ;;  %v20230_v47 = vld [vmem:[#allocation3_spill] sm:$0xff] }
 0x700   :  { %v3572_v6 = vmax.f32 %v20226_v10, %v2757_v48  ;;  %6140 = vmatpush.bf16.msra.mxu0 %v13010_v29  ;;  %v20227_v3 = vld [vmem:[#allocation378_spill] sm:$0xff]  ;;  %6159 = vmatpush.bf16.msra.mxu1 %v13018_v60  ;;  %v4328_v41 = vpack.c.bf16 %v4215_v24, %v4214_v20  ;;  %v13048_v24 = vld [vmem:[%s19066_s3 + $0x538] sm:$0xff] }
 0x701   :  { %v3790_v46 = vmax.f32 %v3562_v40, %v3566_v49  ;;  %v3573_v14 = vmax.f32 %v20227_v3, %v2896_v39  ;;  %6197 = vmatpush.bf16.msra.mxu3 %v13034_v55  ;;  %v13017_v51 = vld [vmem:[%s19066_s3 + $0x440] sm:$0xff]  ;;  %v3791_v56 = vmax.f32 %v3563_v12, %v3567_v27  ;;  %v8557_v40 = vunpack.c.l.b16 %v17847_v15 }
 0x702   :  { %v13033_v29 = vld [vmem:[%s19066_s3 + $0x4c0] sm:$0xff]  ;;  %v3792_v2 = vmax.f32 %v3568_v53, %v3572_v6  ;;  %6179 = vmatpush.bf16.msra.mxu2 %v13025_v62  ;;  %v8558_v49 = vunpack.c.h.b16 %v17847_v15  ;;  %v8561_v50 = vunpack.c.l.b16 %v4328_v41  ;;  %v8562_v61 = vunpack.c.h.b16 %v4328_v41  ;;  %v20231_v53 = vld [vmem:[#allocation199_spill] sm:$0xff]  ;;  %v13064_v15 = vld [vmem:[%s19066_s3 + $0x5b8] sm:$0xff] }
 0x703   :  { %v20228_v57 = vld [vmem:[#allocation2_spill] sm:$0xff]  ;;  %v4008_v60 = vadd.f32 %v16289_v43, %v3790_v46  ;;  %v3793_v55 = vmax.f32 %v3569_v9, %v3573_v14  ;;  %5803 = vmatmul.bf16.vlgmr.msrb.gmra.mxu2 %v20230_v47  ;;  %v4009_v20 = vadd.f32 %v16294_v28, %v3791_v56  ;;  %5822 = vmatmul.bf16.vlgmr.msrb.gmra.mxu3 %v20231_v53  ;;  %v13056_v9 = vld [vmem:[%s19066_s3 + $0x578] sm:$0xff]  ;;  %v20236_v14 = vld [vmem:[#allocation564_spill] sm:$0xff] }
 0x704   :  { %5765 = vmatmul.bf16.vlgmr.msrb.gmra.mxu0 %v20228_v57  ;;  %v20229_v48 = vld [vmem:[#allocation394_spill] sm:$0xff]  ;;  %v4010_v12 = vadd.f32 %v16264_v22, %v3792_v2  ;;  %6160 = vmatpush.bf16.msra.mxu1 %v13017_v51  ;;  %v13072_v6 = vld [vmem:[%s19066_s3 + $0x5f8] sm:$0xff]  ;;  %v17924_v39 = vpack.c.b16 %v8561_v50, %v8557_v40  ;;  %v17926_v62 = vpack.c.b16 %v8562_v61, %v8558_v49  ;;  %v20237_v41 = vld [vmem:[#allocation183_spill] sm:$0xff] }
 0x705   :  { %5784 = vmatmul.bf16.vlgmr.msrb.gmra.mxu1 %v20229_v48  ;;  %6141 = vmatpush.bf16.msra.mxu0 %v13009_v35  ;;  %v4216_v27 = vmax.f32 %v4008_v60, 0.0  ;;  %v4011_v10 = vadd.f32 %v16269_v30, %v3793_v55  ;;  %v20234_v35 = vld [vmem:[#allocation563_spill] sm:$0xff]  ;;  %v20235_v46 = vld [vmem:[#allocation182_spill] sm:$0xff]  ;;  %v3571_v56 = vmax.f32 %v20237_v41, %v20236_v14  ;;  %v4217_v2 = vmax.f32 %v4009_v20, 0.0  ;;  %v3035_v60 = vpop.f32.mrf.mxu2  ;;  %v20238_v51 = vld [vmem:[#allocation565_spill] sm:$0xff] }
 0x706   :  { %6198 = vmatpush.bf16.msra.mxu3 %v13033_v29  ;;  %20232 = vst [vmem:[#allocation407_spill] sm:$0xff] %v17924_v39  ;;  %v3570_v3 = vmax.f32 %v20235_v46, %v20234_v35  ;;  %v4218_v57 = vmax.f32 %v4010_v12, 0.0  ;;  %6549 = vmatpush.bf16.msrb.mxu2 %v13064_v15  ;;  %v20239_v29 = vld [vmem:[#allocation184_spill] sm:$0xff]  ;;  %v20240_v48 = vld [vmem:[#allocation566_spill] sm:$0xff]  ;;  %v20241_v47 = vld [vmem:[#allocation185_spill] sm:$0xff]  ;;  %v3174_v53 = vpop.f32.mrf.mxu3 }
 0x707   :  { %20233 = vst [vmem:[#allocation15_spill] sm:$0xff] %v17926_v62  ;;  %v3576_v55 = vmax.f32 %v20239_v29, %v20238_v51  ;;  %v3577_v40 = vmax.f32 %v20241_v47, %v20240_v48  ;;  %v4219_v50 = vmax.f32 %v4011_v10, 0.0  ;;  %v20242_v49 = vld [vmem:[#allocation379_spill] sm:$0xff]  ;;  %v2759_v62 = vpop.f32.mrf.mxu0  ;;  %v20243_v35 = vld [vmem:[#allocation380_spill] sm:$0xff]  ;;  %v20244_v20 = vld [vmem:[#allocation381_spill] sm:$0xff]  ;;  %v2898_v14 = vpop.f32.mrf.mxu1  ;;  %v4329_v41 = vpack.c.bf16 %v4217_v2, %v4216_v27 }
 0x708   :  { %v3574_v61 = vmax.f32 %v20242_v49, %v3035_v60  ;;  %6530 = vmatpush.bf16.msrb.mxu1 %v13056_v9  ;;  %v3575_v46 = vmax.f32 %v20243_v35, %v3174_v53  ;;  %v3580_v12 = vmax.f32 %v20244_v20, %v2759_v62  ;;  %v13063_v15 = vld [vmem:[%s19066_s3 + $0x5b0] sm:$0xff]  ;;  %v8559_v9 = vunpack.c.l.b16 %v17885_v63  ;;  %v20245_v62 = vld [vmem:[#allocation382_spill] sm:$0xff]  ;;  %v13062_v27 = vld [vmem:[%s19066_s3 + $0x5a8] sm:$0xff] }
 0x709   :  { %6511 = vmatpush.bf16.msrb.mxu0 %v13048_v24  ;;  %v13047_v24 = vld [vmem:[%s19066_s3 + $0x530] sm:$0xff]  ;;  %v3581_v51 = vmax.f32 %v20245_v62, %v2898_v14  ;;  %v8560_v48 = vunpack.c.h.b16 %v17885_v63  ;;  %v8563_v2 = vunpack.c.l.b16 %v4329_v41  ;;  %v13054_v63 = vld [vmem:[%s19066_s3 + $0x568] sm:$0xff] }
 0x70a   :  { %6568 = vmatpush.bf16.msrb.mxu3 %v13072_v6  ;;  %v13055_v10 = vld [vmem:[%s19066_s3 + $0x570] sm:$0xff]  ;;  %v17949_v6 = vpack.c.bf16 %v4219_v50, %v4218_v57  ;;  %v3794_v60 = vmax.f32 %v3570_v3, %v3574_v61  ;;  %v3795_v47 = vmax.f32 %v3571_v56, %v3575_v46  ;;  %v3796_v49 = vmax.f32 %v3576_v55, %v3580_v12  ;;  %v13046_v3 = vld [vmem:[%s19066_s3 + $0x528] sm:$0xff] }
 0x70b   :  { %v13071_v29 = vld [vmem:[%s19066_s3 + $0x5f0] sm:$0xff]  ;;  %6550 = vmatpush.bf16.msrb.mxu2 %v13063_v15  ;;  %v8564_v57 = vunpack.c.h.b16 %v4329_v41  ;;  %v3797_v61 = vmax.f32 %v3577_v40, %v3581_v51  ;;  %v13070_v56 = vld [vmem:[%s19066_s3 + $0x5e8] sm:$0xff]  ;;  %v17971_v35 = vpack.c.b16 %v8563_v2, %v8559_v9  ;;  %v20253_v2 = vld [vmem:[#allocation569_spill] sm:$0xff] }
 0x70c   :  { %v4012_v50 = vadd.f32 %v16289_v43, %v3794_v60  ;;  %6531 = vmatpush.bf16.msrb.mxu1 %v13055_v10  ;;  %v4013_v55 = vadd.f32 %v16294_v28, %v3795_v47  ;;  %v4014_v53 = vadd.f32 %v16264_v22, %v3796_v49  ;;  %v20249_v10 = vld [vmem:[#allocation186_spill] sm:$0xff]  ;;  %v20250_v60 = vld [vmem:[#allocation568_spill] sm:$0xff]  ;;  %v20251_v62 = vld [vmem:[#allocation187_spill] sm:$0xff] }
 0x70d   :  { %6512 = vmatpush.bf16.msrb.mxu0 %v13047_v24  ;;  %20246 = vst [vmem:[#allocation408_spill] sm:$0xff] %v17971_v35  ;;  %v17973_v46 = vpack.c.b16 %v8564_v57, %v8560_v48  ;;  %v4015_v40 = vadd.f32 %v16269_v30, %v3797_v61  ;;  %v3037_v15 = vpop.f32.mrf.mxu2  ;;  %v20248_v24 = vld [vmem:[#allocation567_spill] sm:$0xff]  ;;  %v3579_v51 = vmax.f32 %v20251_v62, %v20250_v60  ;;  %v20254_v57 = vld [vmem:[#allocation188_spill] sm:$0xff]  ;;  %v20273_v35 = vld [vmem:[#allocation193_spill] sm:$0xff] }
 0x70e   :  { %6569 = vmatpush.bf16.msrb.mxu3 %v13071_v29  ;;  %v4220_v20 = vmax.f32 %v4012_v50, 0.0  ;;  %v4221_v12 = vmax.f32 %v4013_v55, 0.0  ;;  %v4222_v14 = vmax.f32 %v4014_v53, 0.0  ;;  %v3578_v41 = vmax.f32 %v20249_v10, %v20248_v24  ;;  %v20252_v47 = vld [vmem:[#allocation383_spill] sm:$0xff]  ;;  %v3176_v49 = vpop.f32.mrf.mxu3  ;;  %v20256_v55 = vld [vmem:[#allocation385_spill] sm:$0xff] }
 0x70f   :  { %20247 = vst [vmem:[#allocation16_spill] sm:$0xff] %v17973_v46  ;;  %6551 = vmatpush.bf16.msrb.mxu2 %v13062_v27  ;;  %v4223_v29 = vmax.f32 %v4015_v40, 0.0  ;;  %v3582_v9 = vmax.f32 %v20252_v47, %v3037_v15  ;;  %v2762_v48 = vpop.f32.mrf.mxu0  ;;  %v3584_v50 = vmax.f32 %v20254_v57, %v20253_v2  ;;  %v20255_v27 = vld [vmem:[#allocation384_spill] sm:$0xff]  ;;  %v2901_v24 = vpop.f32.mrf.mxu1  ;;  %v13061_v40 = vld [vmem:[%s19066_s3 + $0x5a0] sm:$0xff]  ;;  %v8927_v2 = vunpack.c.h.b16 %v17949_v6  ;;  %v20263_v46 = vld [vmem:[#allocation201_spill] sm:$0xff] }
 0x710   :  { %6532 = vmatpush.bf16.msrb.mxu1 %v13054_v63  ;;  %v17983_v61 = vpack.c.bf16 %v4221_v12, %v4220_v20  ;;  %v3588_v53 = vmax.f32 %v20256_v55, %v2762_v48  ;;  %v13045_v15 = vld [vmem:[%s19066_s3 + $0x520] sm:$0xff]  ;;  %v8926_v48 = vunpack.c.l.b16 %v17949_v6  ;;  %v20260_v55 = vld [vmem:[#allocation395_spill] sm:$0xff]  ;;  %v13060_v6 = vld [vmem:[%s19066_s3 + $0x598] sm:$0xff] }
 0x711   :  { %6513 = vmatpush.bf16.msrb.mxu0 %v13046_v3  ;;  %v3583_v3 = vmax.f32 %v20255_v27, %v3176_v49  ;;  %v20257_v63 = vld [vmem:[#allocation570_spill] sm:$0xff]  ;;  %v4332_v60 = vpack.c.bf16 %v4223_v29, %v4222_v14  ;;  %v3798_v62 = vmax.f32 %v3578_v41, %v3582_v9 }
 0x712   :  { %6570 = vmatpush.bf16.msrb.mxu3 %v13070_v56  ;;  %v20258_v56 = vld [vmem:[#allocation189_spill] sm:$0xff]  ;;  %v20259_v20 = vld [vmem:[#allocation386_spill] sm:$0xff]  ;;  %v3800_v27 = vmax.f32 %v3584_v50, %v3588_v53 }
 0x713   :  { %v3585_v10 = vmax.f32 %v20258_v56, %v20257_v63  ;;  %v3589_v12 = vmax.f32 %v20259_v20, %v2901_v24  ;;  %v13053_v47 = vld [vmem:[%s19066_s3 + $0x560] sm:$0xff]  ;;  %v3799_v57 = vmax.f32 %v3579_v51, %v3583_v3  ;;  %6552 = vmatpush.bf16.msrb.mxu2 %v13061_v40  ;;  %v8930_v14 = vunpack.c.l.b16 %v4332_v60  ;;  %v20261_v24 = vld [vmem:[#allocation4_spill] sm:$0xff]  ;;  %5827 = vmatmul.bf16.gmra.mxu3 %v20263_v46  ;;  %v13044_v51 = vld [vmem:[%s19066_s3 + $0x518] sm:$0xff] }
 0x714   :  { %v13069_v49 = vld [vmem:[%s19066_s3 + $0x5e0] sm:$0xff]  ;;  %5770 = vmatmul.bf16.gmra.mxu0 %v20260_v55  ;;  %v8931_v41 = vunpack.c.h.b16 %v4332_v60  ;;  %v4016_v29 = vadd.f32 %v16289_v43, %v3798_v62  ;;  %v20262_v63 = vld [vmem:[#allocation200_spill] sm:$0xff]  ;;  %v4018_v20 = vadd.f32 %v16264_v22, %v3800_v27  ;;  %6533 = vmatpush.bf16.msrb.mxu1 %v13053_v47  ;;  %v13052_v53 = vld [vmem:[%s19066_s3 + $0x558] sm:$0xff] }
 0x715   :  { %v3801_v9 = vmax.f32 %v3585_v10, %v3589_v12  ;;  %5789 = vmatmul.bf16.gmra.mxu1 %v20261_v24  ;;  %5808 = vmatmul.bf16.gmra.mxu2 %v20262_v63  ;;  %v4017_v56 = vadd.f32 %v16294_v28, %v3799_v57  ;;  %v13068_v46 = vld [vmem:[%s19066_s3 + $0x5d8] sm:$0xff]  ;;  %v18024_v40 = vpack.c.b16 %v8930_v14, %v8926_v48  ;;  %v20266_v10 = vld [vmem:[#allocation571_spill] sm:$0xff]  ;;  %v20267_v60 = vld [vmem:[#allocation190_spill] sm:$0xff]  ;;  %v3040_v55 = vpop.f32.mrf.mxu2 }
 0x716   :  { %6514 = vmatpush.bf16.msrb.mxu0 %v13045_v15  ;;  %v4224_v50 = vmax.f32 %v4016_v29, 0.0  ;;  %6571 = vmatpush.bf16.msrb.mxu3 %v13069_v49  ;;  %v18026_v15 = vpack.c.b16 %v8931_v41, %v8927_v2  ;;  %v3586_v62 = vmax.f32 %v20267_v60, %v20266_v10  ;;  %v20268_v12 = vld [vmem:[#allocation572_spill] sm:$0xff]  ;;  %v20269_v57 = vld [vmem:[#allocation191_spill] sm:$0xff]  ;;  %v4226_v49 = vmax.f32 %v4018_v20, 0.0  ;;  %v20270_v29 = vld [vmem:[#allocation573_spill] sm:$0xff]  ;;  %v3179_v41 = vpop.f32.mrf.mxu3 }
 0x717   :  { %v4019_v3 = vadd.f32 %v16269_v30, %v3801_v9  ;;  %20264 = vst [vmem:[#allocation211_spill] sm:$0xff] %v18024_v40  ;;  %v3587_v27 = vmax.f32 %v20269_v57, %v20268_v12  ;;  %v4225_v47 = vmax.f32 %v4017_v56, 0.0  ;;  %6553 = vmatpush.bf16.msrb.mxu2 %v13060_v6  ;;  %v20271_v9 = vld [vmem:[#allocation192_spill] sm:$0xff]  ;;  %v20272_v63 = vld [vmem:[#allocation574_spill] sm:$0xff]  ;;  %v20274_v14 = vld [vmem:[#allocation387_spill] sm:$0xff]  ;;  %v8928_v10 = vunpack.c.l.b16 %v17983_v61  ;;  %v2903_v57 = vpop.f32.mrf.mxu1 }
 0x718   :  { %20265 = vst [vmem:[#allocation409_spill] sm:$0xff] %v18026_v15  ;;  %v3592_v24 = vmax.f32 %v20271_v9, %v20270_v29  ;;  %v3593_v39 = vmax.f32 %v20273_v35, %v20272_v63  ;;  %v3590_v2 = vmax.f32 %v20274_v14, %v3040_v55  ;;  %v2764_v15 = vpop.f32.mrf.mxu0  ;;  %v20275_v40 = vld [vmem:[#allocation388_spill] sm:$0xff]  ;;  %v20276_v56 = vld [vmem:[#allocation389_spill] sm:$0xff]  ;;  %6534 = vmatpush.bf16.msrb.mxu1 %v13052_v53 }
 0x719   :  { %v4227_v48 = vmax.f32 %v4019_v3, 0.0  ;;  %v4333_v60 = vpack.c.bf16 %v4225_v47, %v4224_v50  ;;  %v3591_v12 = vmax.f32 %v20275_v40, %v3179_v41  ;;  %v3596_v20 = vmax.f32 %v20276_v56, %v2764_v15  ;;  %v13059_v6 = vld [vmem:[%s19066_s3 + $0x590] sm:$0xff]  ;;  %v20277_v50 = vld [vmem:[#allocation390_spill] sm:$0xff] }
 0x71a   :  { %6515 = vmatpush.bf16.msrb.mxu0 %v13044_v51  ;;  %v13043_v35 = vld [vmem:[%s19066_s3 + $0x510] sm:$0xff]  ;;  %v8929_v3 = vunpack.c.h.b16 %v17983_v61  ;;  %v3802_v29 = vmax.f32 %v3586_v62, %v3590_v2  ;;  %v3597_v47 = vmax.f32 %v20277_v50, %v2903_v57  ;;  %6572 = vmatpush.bf16.msrb.mxu3 %v13068_v46  ;;  %v13058_v61 = vld [vmem:[%s19066_s3 + $0x588] sm:$0xff] }
 0x71b   :  { %v18047_v55 = vpack.c.bf16 %v4227_v48, %v4226_v49  ;;  %v13051_v51 = vld [vmem:[%s19066_s3 + $0x550] sm:$0xff]  ;;  %v8932_v15 = vunpack.c.l.b16 %v4333_v60  ;;  %v8933_v9 = vunpack.c.h.b16 %v4333_v60  ;;  %v3803_v63 = vmax.f32 %v3587_v27, %v3591_v12  ;;  %6554 = vmatpush.bf16.msrb.mxu2 %v13059_v6  ;;  %v13042_v48 = vld [vmem:[%s19066_s3 + $0x508] sm:$0xff] }
 0x71c   :  { %v13067_v40 = vld [vmem:[%s19066_s3 + $0x5d0] sm:$0xff]  ;;  %v3804_v14 = vmax.f32 %v3592_v24, %v3596_v20  ;;  %v4020_v53 = vadd.f32 %v16289_v43, %v3802_v29  ;;  %v3805_v46 = vmax.f32 %v3593_v39, %v3597_v47  ;;  %6535 = vmatpush.bf16.msrb.mxu1 %v13051_v51  ;;  %v13050_v39 = vld [vmem:[%s19066_s3 + $0x548] sm:$0xff]  ;;  %v20279_v20 = vld [vmem:[#allocation194_spill] sm:$0xff] }
 0x71d   :  { %v4021_v62 = vadd.f32 %v16294_v28, %v3803_v63  ;;  %v18065_v2 = vpack.c.b16 %v8932_v15, %v8928_v10  ;;  %v18067_v27 = vpack.c.b16 %v8933_v9, %v8929_v3  ;;  %v3042_v56 = vpop.f32.mrf.mxu2  ;;  %v20278_v10 = vld [vmem:[#allocation575_spill] sm:$0xff]  ;;  %v20281_v50 = vld [vmem:[#allocation576_spill] sm:$0xff] }
 0x71e   :  { %v4022_v49 = vadd.f32 %v16264_v22, %v3804_v14  ;;  %6516 = vmatpush.bf16.msrb.mxu0 %v13043_v35  ;;  %v4228_v24 = vmax.f32 %v4020_v53, 0.0  ;;  %v4023_v41 = vadd.f32 %v16269_v30, %v3805_v46  ;;  %6573 = vmatpush.bf16.msrb.mxu3 %v13067_v40  ;;  %v13066_v22 = vld [vmem:[%s19066_s3 + $0x5c8] sm:$0xff]  ;;  %v3594_v57 = vmax.f32 %v20279_v20, %v20278_v10  ;;  %v3181_v3 = vpop.f32.mrf.mxu3  ;;  %v20283_v15 = vld [vmem:[#allocation392_spill] sm:$0xff]  ;;  %v13057_v14 = vld [vmem:[%s19066_s3 + $0x580] sm:$0xff] }
 0x71f   :  { %v4229_v60 = vmax.f32 %v4021_v62, 0.0  ;;  %6555 = vmatpush.bf16.msrb.mxu2 %v13058_v61  ;;  %v20280_v35 = vld [vmem:[#allocation391_spill] sm:$0xff]  ;;  %v3599_v9 = vmax.f32 %v20283_v15, %v3181_v3  ;;  %v4727_v63 = vpop.f32.mrf.mxu1  ;;  %v13041_v61 = vld [vmem:[%s19066_s3 + $0x500] sm:$0xff]  ;;  %v20285_v10 = vld [vmem:[#allocation5_spill] sm:$0xff]  ;;  %v8935_v20 = vunpack.c.h.b16 %v18047_v55 }
 0x720   :  { %v4230_v12 = vmax.f32 %v4022_v49, 0.0  ;;  %v4231_v6 = vmax.f32 %v4023_v41, 0.0  ;;  %v3598_v30 = vmax.f32 %v20280_v35, %v3042_v56  ;;  %v4708_v29 = vpop.f32.mrf.mxu0  ;;  %v20282_v47 = vld [vmem:[#allocation195_spill] sm:$0xff]  ;;  %6536 = vmatpush.bf16.msrb.mxu1 %v13050_v39  ;;  %v13049_v62 = vld [vmem:[%s19066_s3 + $0x540] sm:$0xff]  ;;  %v20284_v41 = vld [vmem:[#allocation396_spill] sm:$0xff] }
 0x721   :  { %v3595_v51 = vmax.f32 %v20282_v47, %v20281_v50  ;;  %v18081_v40 = vpack.c.bf16 %v4229_v60, %v4228_v24  ;;  %v4728_v46 = vadd.f32 %v4727_v63, %v4708_v29  ;;  %v13065_v49 = vld [vmem:[%s19066_s3 + $0x5c0] sm:$0xff]  ;;  %v8934_v60 = vunpack.c.l.b16 %v18047_v55 }
 0x722   :  { %6517 = vmatpush.bf16.msrb.mxu0 %v13042_v48  ;;  %v3806_v53 = vmax.f32 %v3594_v57, %v3598_v30  ;;  %6574 = vmatpush.bf16.msrb.mxu3 %v13066_v22  ;;  %v4336_v48 = vpack.c.bf16 %v4231_v6, %v4230_v12  ;;  %v20286_v39 = vld [vmem:[#allocation202_spill] sm:$0xff]  ;;  %v20287_v30 = vld [vmem:[#allocation397_spill] sm:$0xff] }
 0x723   :  { %v3807_v24 = vmax.f32 %v3595_v51, %v3599_v9  ;;  %6556 = vmatpush.bf16.msrb.mxu2 %v13057_v14  ;;  %6199 = vmatmul.bf16.vlgmr.msra.gmra.mxu3 %v20287_v30  ;;  %v13096_v12 = vld [vmem:[%s19066_s3 + $0x6b8] sm:$0xff]  ;;  %v13095_v14 = vld [vmem:[%s19066_s3 + $0x6b0] sm:$0xff] }
 0x724   :  { %6142 = vmatmul.bf16.vlgmr.msra.gmra.mxu0 %v20284_v41  ;;  %v4024_v56 = vadd.f32 %v16289_v43, %v3806_v53  ;;  %v8938_v22 = vunpack.c.l.b16 %v4336_v48  ;;  %v8939_v57 = vunpack.c.h.b16 %v4336_v48  ;;  %v13080_v43 = vld [vmem:[%s19066_s3 + $0x638] sm:$0xff]  ;;  %6537 = vmatpush.bf16.msrb.mxu1 %v13049_v62  ;;  %v13087_v53 = vld [vmem:[%s19066_s3 + $0x670] sm:$0xff]  ;;  %v13078_v41 = vld [vmem:[%s19066_s3 + $0x628] sm:$0xff] }
 0x725   :  { %6161 = vmatmul.bf16.vlgmr.msra.gmra.mxu1 %v20285_v10  ;;  %6180 = vmatmul.bf16.vlgmr.msra.gmra.mxu2 %v20286_v39  ;;  %v4025_v35 = vadd.f32 %v16294_v28, %v3807_v24  ;;  %v13088_v6 = vld [vmem:[%s19066_s3 + $0x678] sm:$0xff]  ;;  %v4746_v47 = vpop.f32.mrf.mxu2  ;;  %v13103_v48 = vld [vmem:[%s19066_s3 + $0x6f0] sm:$0xff]  ;;  %v13094_v24 = vld [vmem:[%s19066_s3 + $0x6a8] sm:$0xff]  ;;  %v8937_v10 = vunpack.c.h.b16 %v18081_v40 }
 0x726   :  { %6518 = vmatpush.bf16.msrb.mxu0 %v13041_v61  ;;  %v4232_v3 = vmax.f32 %v4024_v56, 0.0  ;;  %6575 = vmatpush.bf16.msrb.mxu3 %v13065_v49  ;;  %v13104_v28 = vld [vmem:[%s19066_s3 + $0x6f8] sm:$0xff]  ;;  %v18116_v55 = vpack.c.b16 %v8938_v22, %v8934_v60  ;;  %v18118_v29 = vpack.c.b16 %v8939_v57, %v8935_v20  ;;  %v4747_v51 = vadd.f32 %v4746_v47, %v4728_v46  ;;  %v4765_v15 = vpop.f32.mrf.mxu3  ;;  %v13079_v61 = vld [vmem:[%s19066_s3 + $0x630] sm:$0xff]  ;;  %v13086_v22 = vld [vmem:[%s19066_s3 + $0x668] sm:$0xff] }
 0x727   :  { %v4233_v50 = vmax.f32 %v4025_v35, 0.0  ;;  %6926 = vmatpush.bf16.msra.mxu2 %v13096_v12  ;;  %v4729_v63 = vpop.f32.mrf.mxu1  ;;  %v8936_v60 = vunpack.c.l.b16 %v18081_v40  ;;  %v13102_v20 = vld [vmem:[%s19066_s3 + $0x6e8] sm:$0xff] }
 0x728   :  { %v4710_v9 = vpop.f32.mrf.mxu0  ;;  %6907 = vmatpush.bf16.msra.mxu1 %v13088_v6  ;;  %v18129_v49 = vadd.f32 %v4765_v15, %v4747_v51  ;;  %v13085_v51 = vld [vmem:[%s19066_s3 + $0x660] sm:$0xff] }
 0x729   :  { %v4337_v62 = vpack.c.bf16 %v4233_v50, %v4232_v3  ;;  %v4730_v46 = vadd.f32 %v4729_v63, %v4710_v9  ;;  %v13093_v3 = vld [vmem:[%s19066_s3 + $0x6a0] sm:$0xff] }
 0x72a   :  { %6888 = vmatpush.bf16.msra.mxu0 %v13080_v43  ;;  %6945 = vmatpush.bf16.msra.mxu3 %v13104_v28  ;;  %v13077_v28 = vld [vmem:[%s19066_s3 + $0x620] sm:$0xff] }
 0x72b   :  { %6927 = vmatpush.bf16.msra.mxu2 %v13095_v14  ;;  %v8940_v56 = vunpack.c.l.b16 %v4337_v62  ;;  %v8941_v39 = vunpack.c.h.b16 %v4337_v62  ;;  %v13101_v15 = vld [vmem:[%s19066_s3 + $0x6e0] sm:$0xff]  ;;  %v20290_v14 = vld [vmem:[#allocation399_spill] sm:$0xff]  ;;  %v13076_v62 = vld [vmem:[%s19066_s3 + $0x618] sm:$0xff] }
 0x72c   :  { %6908 = vmatpush.bf16.msra.mxu1 %v13087_v53  ;;  %v20288_v9 = vld [vmem:[#allocation398_spill] sm:$0xff]  ;;  %v13092_v53 = vld [vmem:[%s19066_s3 + $0x698] sm:$0xff] }
 0x72d   :  { %v18148_v57 = vpack.c.b16 %v8940_v56, %v8936_v60  ;;  %v18150_v35 = vpack.c.b16 %v8941_v39, %v8937_v10  ;;  %v4748_v30 = vpop.f32.mrf.mxu2  ;;  %v20289_v63 = vld [vmem:[#allocation6_spill] sm:$0xff]  ;;  %v13091_v39 = vld [vmem:[%s19066_s3 + $0x690] sm:$0xff] }
 0x72e   :  { %6889 = vmatpush.bf16.msra.mxu0 %v13079_v61  ;;  %6946 = vmatpush.bf16.msra.mxu3 %v13103_v48  ;;  %v4749_v12 = vadd.f32 %v4748_v30, %v4730_v46  ;;  %v4767_v40 = vpop.f32.mrf.mxu3  ;;  %v20291_v61 = vld [vmem:[#allocation7_spill] sm:$0xff]  ;;  %v13084_v46 = vld [vmem:[%s19066_s3 + $0x658] sm:$0xff] }
 0x72f   :  { %6928 = vmatpush.bf16.msra.mxu2 %v13094_v24  ;;  %v4732_v6 = vpop.f32.mrf.mxu1  ;;  %v13100_v48 = vld [vmem:[%s19066_s3 + $0x6d8] sm:$0xff] }
 0x730   :  { %v4713_v43 = vpop.f32.mrf.mxu0  ;;  %6909 = vmatpush.bf16.msra.mxu1 %v13086_v22  ;;  %v18158_v50 = vadd.f32 %v4767_v40, %v4749_v12  ;;  %v13075_v22 = vld [vmem:[%s19066_s3 + $0x610] sm:$0xff] }
 0x731   :  { %v4733_v47 = vadd.f32 %v4732_v6, %v4713_v43  ;;  %v13083_v12 = vld [vmem:[%s19066_s3 + $0x650] sm:$0xff]  ;;  %v13090_v43 = vld [vmem:[%s19066_s3 + $0x688] sm:$0xff] }
 0x732   :  { %6890 = vmatpush.bf16.msra.mxu0 %v13078_v41  ;;  %6947 = vmatpush.bf16.msra.mxu3 %v13102_v20  ;;  %v13099_v40 = vld [vmem:[%s19066_s3 + $0x6d0] sm:$0xff]  ;;  %v13074_v6 = vld [vmem:[%s19066_s3 + $0x608] sm:$0xff] }
 0x733   :  { %6929 = vmatpush.bf16.msra.mxu2 %v13093_v3  ;;  %6204 = vmatmul.bf16.gmra.mxu3 %v20291_v61  ;;  %v13082_v3 = vld [vmem:[%s19066_s3 + $0x648] sm:$0xff]  ;;  %v13089_v61 = vld [vmem:[%s19066_s3 + $0x680] sm:$0xff] }
 0x734   :  { %6147 = vmatmul.bf16.gmra.mxu0 %v20288_v9  ;;  %6910 = vmatpush.bf16.msra.mxu1 %v13085_v51 }
 0x735   :  { %6166 = vmatmul.bf16.gmra.mxu1 %v20289_v63  ;;  %6185 = vmatmul.bf16.gmra.mxu2 %v20290_v14  ;;  %v4751_v24 = vpop.f32.mrf.mxu2 }
 0x736   :  { %6891 = vmatpush.bf16.msra.mxu0 %v13077_v28  ;;  %6948 = vmatpush.bf16.msra.mxu3 %v13101_v15  ;;  %v4752_v41 = vadd.f32 %v4751_v24, %v4733_v47  ;;  %v4770_v60 = vpop.f32.mrf.mxu3  ;;  %v13098_v28 = vld [vmem:[%s19066_s3 + $0x6c8] sm:$0xff]  ;;  %v20292_v24 = vld [vmem:[#allocation400_spill] sm:$0xff] }
 0x737   :  { %6930 = vmatpush.bf16.msra.mxu2 %v13092_v53  ;;  %v4734_v10 = vpop.f32.mrf.mxu1  ;;  %v13073_v53 = vld [vmem:[%s19066_s3 + $0x600] sm:$0xff] }
 0x738   :  { %v4715_v56 = vpop.f32.mrf.mxu0  ;;  %v18188_v20 = vadd.f32 %v4770_v60, %v4752_v41  ;;  %6911 = vmatpush.bf16.msra.mxu1 %v13084_v46  ;;  %v13081_v46 = vld [vmem:[%s19066_s3 + $0x640] sm:$0xff]  ;;  %v20293_v41 = vld [vmem:[#allocation8_spill] sm:$0xff]  ;;  %v20294_v60 = vld [vmem:[#allocation401_spill] sm:$0xff] }
 0x739   :  { %v4735_v30 = vadd.f32 %v4734_v10, %v4715_v56  ;;  %v20295_v56 = vld [vmem:[#allocation9_spill] sm:$0xff] }
 0x73a   :  { %6892 = vmatpush.bf16.msra.mxu0 %v13076_v62  ;;  %6949 = vmatpush.bf16.msra.mxu3 %v13100_v48  ;;  %v13128_v10 = vld [vmem:[%s19066_s3 + $0x7b8] sm:$0xff] }
 0x73b   :  { %6931 = vmatpush.bf16.msra.mxu2 %v13091_v39  ;;  %v13112_v39 = vld [vmem:[%s19066_s3 + $0x738] sm:$0xff] }
 0x73c   :  { %6912 = vmatpush.bf16.msra.mxu1 %v13083_v12 }
 0x73d   :  { %v4753_v47 = vpop.f32.mrf.mxu2 }
 0x73e   :  { %6893 = vmatpush.bf16.msra.mxu0 %v13075_v22  ;;  %6950 = vmatpush.bf16.msra.mxu3 %v13099_v40  ;;  %v4754_v51 = vadd.f32 %v4753_v47, %v4735_v30  ;;  %v4772_v15 = vpop.f32.mrf.mxu3  ;;  %v13120_v22 = vld [vmem:[%s19066_s3 + $0x778] sm:$0xff]  ;;  %v13127_v47 = vld [vmem:[%s19066_s3 + $0x7b0] sm:$0xff] }
 0x73f   :  { %6932 = vmatpush.bf16.msra.mxu2 %v13090_v43  ;;  %v5035_v14 = vpop.f32.mrf.mxu1  ;;  %v13136_v30 = vld [vmem:[%s19066_s3 + $0x7f8] sm:$0xff] }
 0x740   :  { %v5016_v9 = vpop.f32.mrf.mxu0  ;;  %v18215_v62 = vadd.f32 %v4772_v15, %v4754_v51  ;;  %6913 = vmatpush.bf16.msra.mxu1 %v13082_v3  ;;  %v13111_v51 = vld [vmem:[%s19066_s3 + $0x730] sm:$0xff] }
 0x741   :  { %v5017_v63 = vadd.f32 %v5016_v9, %v18129_v49  ;;  %v13097_v49 = vld [vmem:[%s19066_s3 + $0x6c0] sm:$0xff]  ;;  %v13119_v15 = vld [vmem:[%s19066_s3 + $0x770] sm:$0xff] }
 0x742   :  { %6894 = vmatpush.bf16.msra.mxu0 %v13074_v6  ;;  %6951 = vmatpush.bf16.msra.mxu3 %v13098_v28 }
 0x743   :  { %v5036_v48 = vadd.f32 %v5035_v14, %v5017_v63  ;;  %6933 = vmatpush.bf16.msra.mxu2 %v13089_v61  ;;  %6576 = vmatmul.bf16.vlgmr.msrb.gmra.mxu3 %v20295_v56  ;;  %v13135_v63 = vld [vmem:[%s19066_s3 + $0x7f0] sm:$0xff]  ;;  %v13126_v14 = vld [vmem:[%s19066_s3 + $0x7a8] sm:$0xff] }
 0x744   :  { %6519 = vmatmul.bf16.vlgmr.msrb.gmra.mxu0 %v20292_v24  ;;  %6914 = vmatpush.bf16.msra.mxu1 %v13081_v46  ;;  %v13110_v61 = vld [vmem:[%s19066_s3 + $0x728] sm:$0xff] }
 0x745   :  { %6538 = vmatmul.bf16.vlgmr.msrb.gmra.mxu1 %v20293_v41  ;;  %6557 = vmatmul.bf16.vlgmr.msrb.gmra.mxu2 %v20294_v60  ;;  %v5054_v12 = vpop.f32.mrf.mxu2  ;;  %v13134_v46 = vld [vmem:[%s19066_s3 + $0x7e8] sm:$0xff] }
 0x746   :  { %6895 = vmatpush.bf16.msra.mxu0 %v13073_v53  ;;  %6952 = vmatpush.bf16.msra.mxu3 %v13097_v49  ;;  %v5055_v40 = vadd.f32 %v5054_v12, %v5036_v48  ;;  %v5073_v43 = vpop.f32.mrf.mxu3  ;;  %v13118_v53 = vld [vmem:[%s19066_s3 + $0x768] sm:$0xff]  ;;  %v13133_v12 = vld [vmem:[%s19066_s3 + $0x7e0] sm:$0xff] }
 0x747   :  { %7303 = vmatpush.bf16.msrb.mxu2 %v13128_v10  ;;  %v5037_v28 = vpop.f32.mrf.mxu1  ;;  %v13125_v10 = vld [vmem:[%s19066_s3 + $0x7a0] sm:$0xff] }
 0x748   :  { %v5018_v6 = vpop.f32.mrf.mxu0  ;;  %7284 = vmatpush.bf16.msrb.mxu1 %v13120_v22  ;;  %v18249_v9 = vadd.f32 %v5073_v43, %v5055_v40  ;;  %v20296_v40 = vld [vmem:[#allocation203_spill] sm:$0xff]  ;;  %v20297_v43 = vld [vmem:[#allocation204_spill] sm:$0xff] }
 0x749   :  { %v5019_v3 = vadd.f32 %v5018_v6, %v18158_v50  ;;  %v13124_v6 = vld [vmem:[%s19066_s3 + $0x798] sm:$0xff] }
 0x74a   :  { %7265 = vmatpush.bf16.msrb.mxu0 %v13112_v39  ;;  %7322 = vmatpush.bf16.msrb.mxu3 %v13136_v30  ;;  %v13109_v39 = vld [vmem:[%s19066_s3 + $0x720] sm:$0xff] }
 0x74b   :  { %v5038_v50 = vadd.f32 %v5037_v28, %v5019_v3  ;;  %7304 = vmatpush.bf16.msrb.mxu2 %v13127_v47  ;;  %v13117_v30 = vld [vmem:[%s19066_s3 + $0x760] sm:$0xff]  ;;  %v13108_v3 = vld [vmem:[%s19066_s3 + $0x718] sm:$0xff] }
 0x74c   :  { %7285 = vmatpush.bf16.msrb.mxu1 %v13119_v15  ;;  %v13116_v28 = vld [vmem:[%s19066_s3 + $0x758] sm:$0xff] }
 0x74d   :  { %v5056_v49 = vpop.f32.mrf.mxu2 }
 0x74e   :  { %7266 = vmatpush.bf16.msrb.mxu0 %v13111_v51  ;;  %7323 = vmatpush.bf16.msrb.mxu3 %v13135_v63  ;;  %v5057_v48 = vadd.f32 %v5056_v49, %v5038_v50  ;;  %v5075_v24 = vpop.f32.mrf.mxu3 }
 0x74f   :  { %7305 = vmatpush.bf16.msrb.mxu2 %v13126_v14  ;;  %v5040_v56 = vpop.f32.mrf.mxu1  ;;  %v13123_v14 = vld [vmem:[%s19066_s3 + $0x790] sm:$0xff] }
 0x750   :  { %v5021_v41 = vpop.f32.mrf.mxu0  ;;  %7286 = vmatpush.bf16.msrb.mxu1 %v13118_v53  ;;  %v18273_v22 = vadd.f32 %v5075_v24, %v5057_v48  ;;  %v13122_v48 = vld [vmem:[%s19066_s3 + $0x788] sm:$0xff] }
 0x751   :  { %v5022_v60 = vadd.f32 %v5021_v41, %v18188_v20  ;;  %v13106_v24 = vld [vmem:[%s19066_s3 + $0x708] sm:$0xff] }
 0x752   :  { %7267 = vmatpush.bf16.msrb.mxu0 %v13110_v61  ;;  %7324 = vmatpush.bf16.msrb.mxu3 %v13134_v46  ;;  %v13107_v61 = vld [vmem:[%s19066_s3 + $0x710] sm:$0xff]  ;;  %v13114_v41 = vld [vmem:[%s19066_s3 + $0x748] sm:$0xff] }
 0x753   :  { %v5041_v20 = vadd.f32 %v5040_v56, %v5022_v60  ;;  %7306 = vmatpush.bf16.msrb.mxu2 %v13125_v10  ;;  %6581 = vmatmul.bf16.gmra.mxu3 %v16924_v0  ;;  %v13115_v46 = vld [vmem:[%s19066_s3 + $0x750] sm:$0xff]  ;;  %v13130_v60 = vld [vmem:[%s19066_s3 + $0x7c8] sm:$0xff] }
 0x754   :  { %6524 = vmatmul.bf16.gmra.mxu0 %v20296_v40  ;;  %7287 = vmatpush.bf16.msrb.mxu1 %v13117_v30  ;;  %v13105_v40 = vld [vmem:[%s19066_s3 + $0x700] sm:$0xff] }
 0x755   :  { %6543 = vmatmul.bf16.gmra.mxu1 %v20297_v43  ;;  %6562 = vmatmul.bf16.gmra.mxu2 %v16922_v4  ;;  %v13132_v4 = vld [vmem:[%s19066_s3 + $0x7d8] sm:$0xff]  ;;  %v5059_v0 = vpop.f32.mrf.mxu2 }
 0x756   :  { %7268 = vmatpush.bf16.msrb.mxu0 %v13109_v39  ;;  %7325 = vmatpush.bf16.msrb.mxu3 %v13133_v12  ;;  %v5060_v47 = vadd.f32 %v5059_v0, %v5041_v20  ;;  %v5078_v51 = vpop.f32.mrf.mxu3  ;;  %v13121_v20 = vld [vmem:[%s19066_s3 + $0x780] sm:$0xff] }
 0x757   :  { %7307 = vmatpush.bf16.msrb.mxu2 %v13124_v6  ;;  %v5042_v50 = vpop.f32.mrf.mxu1  ;;  %v20299_v0 = vld [vmem:[#allocation206_spill] sm:$0xff] }
 0x758   :  { %v5023_v15 = vpop.f32.mrf.mxu0  ;;  %v18304_v53 = vadd.f32 %v5078_v51, %v5060_v47  ;;  %7288 = vmatpush.bf16.msrb.mxu1 %v13116_v28  ;;  %v13129_v28 = vld [vmem:[%s19066_s3 + $0x7c0] sm:$0xff]  ;;  %v13160_v47 = vld [vmem:[%s19066_s3 + $0x8b8] sm:$0xff] }
 0x759   :  { %v5024_v63 = vadd.f32 %v5023_v15, %v18215_v62  ;;  %v13131_v62 = vld [vmem:[%s19066_s3 + $0x7d0] sm:$0xff]  ;;  %v13144_v51 = vld [vmem:[%s19066_s3 + $0x838] sm:$0xff] }
 0x75a   :  { %7269 = vmatpush.bf16.msrb.mxu0 %v13108_v3  ;;  %7326 = vmatpush.bf16.msrb.mxu3 %v13132_v4  ;;  %v13113_v3 = vld [vmem:[%s19066_s3 + $0x740] sm:$0xff]  ;;  %v20298_v4 = vld [vmem:[#allocation205_spill] sm:$0xff] }
 0x75b   :  { %v5043_v49 = vadd.f32 %v5042_v50, %v5024_v63  ;;  %7308 = vmatpush.bf16.msrb.mxu2 %v13123_v14 }
 0x75c   :  { %7289 = vmatpush.bf16.msrb.mxu1 %v13115_v46  ;;  %v13159_v46 = vld [vmem:[%s19066_s3 + $0x8b0] sm:$0xff] }
 0x75d   :  { %v5061_v56 = vpop.f32.mrf.mxu2 }
 0x75e   :  { %7270 = vmatpush.bf16.msrb.mxu0 %v13107_v61  ;;  %7327 = vmatpush.bf16.msrb.mxu3 %v13131_v62  ;;  %v5062_v10 = vadd.f32 %v5061_v56, %v5043_v49  ;;  %v5080_v39 = vpop.f32.mrf.mxu3  ;;  %v13143_v62 = vld [vmem:[%s19066_s3 + $0x830] sm:$0xff]  ;;  %v13158_v56 = vld [vmem:[%s19066_s3 + $0x8a8] sm:$0xff] }
 0x75f   :  { %7309 = vmatpush.bf16.msrb.mxu2 %v13122_v48  ;;  %v5408_v12 = vpop.f32.mrf.mxu1  ;;  %v13151_v49 = vld [vmem:[%s19066_s3 + $0x870] sm:$0xff] }
 0x760   :  { %v5389_v30 = vpop.f32.mrf.mxu0  ;;  %v18330_v43 = vadd.f32 %v5080_v39, %v5062_v10  ;;  %7290 = vmatpush.bf16.msrb.mxu1 %v13114_v41  ;;  %v13167_v41 = vld [vmem:[%s19066_s3 + $0x8f0] sm:$0xff]  ;;  %v13142_v10 = vld [vmem:[%s19066_s3 + $0x828] sm:$0xff] }
 0x761   :  { %v5409_v6 = vadd.f32 %v5408_v12, %v5389_v30  ;;  %v13150_v39 = vld [vmem:[%s19066_s3 + $0x868] sm:$0xff] }
 0x762   :  { %7271 = vmatpush.bf16.msrb.mxu0 %v13106_v24  ;;  %7328 = vmatpush.bf16.msrb.mxu3 %v13130_v60  ;;  %v13166_v30 = vld [vmem:[%s19066_s3 + $0x8e8] sm:$0xff] }
 0x763   :  { %7310 = vmatpush.bf16.msrb.mxu2 %v13121_v20  ;;  %6953 = vmatmul.bf16.vlgmr.msra.gmra.mxu3 %v20299_v0 }
 0x764   :  { %6896 = vmatmul.bf16.vlgmr.msra.gmra.mxu0 %v16952_v17  ;;  %v13152_v17 = vld [vmem:[%s19066_s3 + $0x878] sm:$0xff]  ;;  %7291 = vmatpush.bf16.msrb.mxu1 %v13113_v3  ;;  %v13157_v3 = vld [vmem:[%s19066_s3 + $0x8a0] sm:$0xff] }
 0x765   :  { %6915 = vmatmul.bf16.vlgmr.msra.gmra.mxu1 %v16954_v38  ;;  %6934 = vmatmul.bf16.vlgmr.msra.gmra.mxu2 %v20298_v4  ;;  %v13168_v38 = vld [vmem:[%s19066_s3 + $0x8f8] sm:$0xff] }
 0x766   :  { %7272 = vmatpush.bf16.msrb.mxu0 %v13105_v40  ;;  %7329 = vmatpush.bf16.msrb.mxu3 %v13129_v28  ;;  %v5427_v15 = vpop.f32.mrf.mxu2  ;;  %v5446_v50 = vpop.f32.mrf.mxu3  ;;  %v13141_v28 = vld [vmem:[%s19066_s3 + $0x820] sm:$0xff] }
 0x767   :  { %7680 = vmatpush.bf16.msra.mxu2 %v13160_v47  ;;  %v5428_v63 = vadd.f32 %v5427_v15, %v5409_v6  ;;  %v5410_v61 = vpop.f32.mrf.mxu1  ;;  %v13149_v47 = vld [vmem:[%s19066_s3 + $0x860] sm:$0xff] }
 0x768   :  { %v5391_v14 = vpop.f32.mrf.mxu0  ;;  %7661 = vmatpush.bf16.msra.mxu1 %v13152_v17  ;;  %v20300_v17 = vld [vmem:[#allocation402_spill] sm:$0xff] }
 0x769   :  { %v5447_v48 = vadd.f32 %v5446_v50, %v5428_v63  ;;  %v5411_v24 = vadd.f32 %v5410_v61, %v5391_v14  ;;  %v20301_v15 = vld [vmem:[#allocation10_spill] sm:$0xff]  ;;  %v20302_v63 = vld [vmem:[#allocation403_spill] sm:$0xff]  ;;  %v13156_v14 = vld [vmem:[%s19066_s3 + $0x898] sm:$0xff] }
 0x76a   :  { %7642 = vmatpush.bf16.msra.mxu0 %v13144_v51  ;;  %7699 = vmatpush.bf16.msra.mxu3 %v13168_v38  ;;  %v13165_v51 = vld [vmem:[%s19066_s3 + $0x8e0] sm:$0xff]  ;;  %v20303_v50 = vld [vmem:[#allocation11_spill] sm:$0xff]  ;;  %v13140_v61 = vld [vmem:[%s19066_s3 + $0x818] sm:$0xff] }
 0x76b   :  { %7681 = vmatpush.bf16.msra.mxu2 %v13159_v46  ;;  %v18367_v60 = vadd.f32 %v5447_v48, %v18249_v9  ;;  %v13164_v46 = vld [vmem:[%s19066_s3 + $0x8d8] sm:$0xff] }
 0x76c   :  { %7662 = vmatpush.bf16.msra.mxu1 %v13151_v49 }
 0x76e   :  { %7643 = vmatpush.bf16.msra.mxu0 %v13143_v62  ;;  %7700 = vmatpush.bf16.msra.mxu3 %v13167_v41  ;;  %v5429_v9 = vpop.f32.mrf.mxu2  ;;  %v5448_v20 = vpop.f32.mrf.mxu3 }
 0x76f   :  { %7682 = vmatpush.bf16.msra.mxu2 %v13158_v56  ;;  %v5430_v12 = vadd.f32 %v5429_v9, %v5411_v24  ;;  %v5413_v6 = vpop.f32.mrf.mxu1  ;;  %v13155_v56 = vld [vmem:[%s19066_s3 + $0x890] sm:$0xff] }
 0x770   :  { %v5394_v40 = vpop.f32.mrf.mxu0  ;;  %7663 = vmatpush.bf16.msra.mxu1 %v13150_v39  ;;  %v13147_v9 = vld [vmem:[%s19066_s3 + $0x850] sm:$0xff] }
 0x771   :  { %v5449_v4 = vadd.f32 %v5448_v20, %v5430_v12  ;;  %v5414_v0 = vadd.f32 %v5413_v6, %v5394_v40  ;;  %v13163_v12 = vld [vmem:[%s19066_s3 + $0x8d0] sm:$0xff]  ;;  %v13154_v40 = vld [vmem:[%s19066_s3 + $0x888] sm:$0xff] }
 0x772   :  { %7644 = vmatpush.bf16.msra.mxu0 %v13142_v10  ;;  %7701 = vmatpush.bf16.msra.mxu3 %v13166_v30  ;;  %v13139_v10 = vld [vmem:[%s19066_s3 + $0x810] sm:$0xff]  ;;  %v13138_v6 = vld [vmem:[%s19066_s3 + $0x808] sm:$0xff] }
 0x773   :  { %7683 = vmatpush.bf16.msra.mxu2 %v13157_v3  ;;  %v18395_v38 = vadd.f32 %v5449_v4, %v18273_v22  ;;  %6958 = vmatmul.bf16.gmra.mxu3 %v20303_v50  ;;  %v13148_v22 = vld [vmem:[%s19066_s3 + $0x858] sm:$0xff]  ;;  %v13146_v3 = vld [vmem:[%s19066_s3 + $0x848] sm:$0xff] }
 0x774   :  { %6901 = vmatmul.bf16.gmra.mxu0 %v20300_v17  ;;  %7664 = vmatpush.bf16.msra.mxu1 %v13149_v47  ;;  %v13153_v17 = vld [vmem:[%s19066_s3 + $0x880] sm:$0xff] }
 0x775   :  { %6920 = vmatmul.bf16.gmra.mxu1 %v20301_v15  ;;  %6939 = vmatmul.bf16.gmra.mxu2 %v20302_v63  ;;  %v13137_v15 = vld [vmem:[%s19066_s3 + $0x800] sm:$0xff] }
 0x776   :  { %7645 = vmatpush.bf16.msra.mxu0 %v13141_v28  ;;  %7702 = vmatpush.bf16.msra.mxu3 %v13165_v51  ;;  %v5432_v62 = vpop.f32.mrf.mxu2  ;;  %v5451_v48 = vpop.f32.mrf.mxu3 }
 0x777   :  { %7684 = vmatpush.bf16.msra.mxu2 %v13156_v14  ;;  %v5433_v49 = vadd.f32 %v5432_v62, %v5414_v0  ;;  %v5415_v41 = vpop.f32.mrf.mxu1  ;;  %v13145_v14 = vld [vmem:[%s19066_s3 + $0x840] sm:$0xff]  ;;  %v20305_v62 = vld [vmem:[#allocation404_spill] sm:$0xff] }
 0x778   :  { %v5396_v24 = vpop.f32.mrf.mxu0  ;;  %7665 = vmatpush.bf16.msra.mxu1 %v13148_v22  ;;  %v20304_v22 = vld [vmem:[#allocation207_spill] sm:$0xff] }
 0x779   :  { %v5452_v39 = vadd.f32 %v5451_v48, %v5433_v49  ;;  %v5416_v30 = vadd.f32 %v5415_v41, %v5396_v24  ;;  %v13192_v49 = vld [vmem:[%s19066_s3 + $0x9b8] sm:$0xff] }
 0x77a   :  { %7646 = vmatpush.bf16.msra.mxu0 %v13140_v61  ;;  %7703 = vmatpush.bf16.msra.mxu3 %v13164_v46  ;;  %v13161_v61 = vld [vmem:[%s19066_s3 + $0x8c0] sm:$0xff]  ;;  %v13176_v48 = vld [vmem:[%s19066_s3 + $0x938] sm:$0xff] }
 0x77b   :  { %7685 = vmatpush.bf16.msra.mxu2 %v13155_v56  ;;  %v18425_v20 = vadd.f32 %v5452_v39, %v18304_v53  ;;  %v13162_v53 = vld [vmem:[%s19066_s3 + $0x8c8] sm:$0xff]  ;;  %v13191_v39 = vld [vmem:[%s19066_s3 + $0x9b0] sm:$0xff] }
 0x77c   :  { %7666 = vmatpush.bf16.msra.mxu1 %v13147_v9  ;;  %v13183_v9 = vld [vmem:[%s19066_s3 + $0x970] sm:$0xff] }
 0x77e   :  { %7647 = vmatpush.bf16.msra.mxu0 %v13139_v10  ;;  %7704 = vmatpush.bf16.msra.mxu3 %v13163_v12  ;;  %v5434_v28 = vpop.f32.mrf.mxu2  ;;  %v5453_v0 = vpop.f32.mrf.mxu3 }
 0x77f   :  { %7686 = vmatpush.bf16.msra.mxu2 %v13154_v40  ;;  %v5435_v4 = vadd.f32 %v5434_v28, %v5416_v30  ;;  %v13175_v30 = vld [vmem:[%s19066_s3 + $0x930] sm:$0xff]  ;;  %v13174_v28 = vld [vmem:[%s19066_s3 + $0x928] sm:$0xff] }
 0x780   :  { %7667 = vmatpush.bf16.msra.mxu1 %v13146_v3 }
 0x781   :  { %v5766_v47 = vpop.f32.mrf.mxu0  ;;  %v5454_v63 = vadd.f32 %v5453_v0, %v5435_v4  ;;  %v13182_v4 = vld [vmem:[%s19066_s3 + $0x968] sm:$0xff] }
 0x782   :  { %v5785_v51 = vpop.f32.mrf.mxu1  ;;  %7648 = vmatpush.bf16.msra.mxu0 %v13138_v6  ;;  %7705 = vmatpush.bf16.msra.mxu3 %v13162_v53  ;;  %v13199_v6 = vld [vmem:[%s19066_s3 + $0x9f0] sm:$0xff]  ;;  %v13190_v53 = vld [vmem:[%s19066_s3 + $0x9a8] sm:$0xff] }
 0x783   :  { %v5786_v50 = vadd.f32 %v5785_v51, %v5766_v47  ;;  %7687 = vmatpush.bf16.msra.mxu2 %v13153_v17  ;;  %v18453_v46 = vadd.f32 %v5454_v63, %v18330_v43  ;;  %7330 = vmatmul.bf16.vlgmr.msrb.gmra.mxu3 %v17081_v1  ;;  %v13184_v43 = vld [vmem:[%s19066_s3 + $0x978] sm:$0xff]  ;;  %v13198_v0 = vld [vmem:[%s19066_s3 + $0x9e8] sm:$0xff]  ;;  %v13189_v63 = vld [vmem:[%s19066_s3 + $0x9a0] sm:$0xff] }
 0x784   :  { %7273 = vmatmul.bf16.vlgmr.msrb.gmra.mxu0 %v20304_v22  ;;  %7668 = vmatpush.bf16.msra.mxu1 %v13145_v14  ;;  %v13181_v22 = vld [vmem:[%s19066_s3 + $0x960] sm:$0xff] }
 0x785   :  { %7292 = vmatmul.bf16.vlgmr.msrb.gmra.mxu1 %v20305_v62  ;;  %7311 = vmatmul.bf16.vlgmr.msrb.gmra.mxu2 %v17079_v19  ;;  %v13200_v19 = vld [vmem:[%s19066_s3 + $0x9f8] sm:$0xff]  ;;  %v13197_v62 = vld [vmem:[%s19066_s3 + $0x9e0] sm:$0xff] }
 0x786   :  { %7649 = vmatpush.bf16.msra.mxu0 %v13137_v15  ;;  %7706 = vmatpush.bf16.msra.mxu3 %v13161_v61  ;;  %v5804_v1 = vpop.f32.mrf.mxu2  ;;  %v5823_v41 = vpop.f32.mrf.mxu3 }
 0x787   :  { %8057 = vmatpush.bf16.msrb.mxu2 %v13192_v49  ;;  %v5805_v24 = vadd.f32 %v5804_v1, %v5786_v50  ;;  %v13173_v50 = vld [vmem:[%s19066_s3 + $0x920] sm:$0xff]  ;;  %v20306_v49 = vld [vmem:[#allocation12_spill] sm:$0xff]  ;;  %v20309_v1 = vld [vmem:[#allocation405_spill] sm:$0xff] }
 0x788   :  { %8038 = vmatpush.bf16.msrb.mxu1 %v13184_v43  ;;  %v20307_v43 = vld [vmem:[#allocation208_spill] sm:$0xff] }
 0x789   :  { %v5768_v56 = vpop.f32.mrf.mxu0  ;;  %v5824_v12 = vadd.f32 %v5823_v41, %v5805_v24  ;;  %v13188_v24 = vld [vmem:[%s19066_s3 + $0x998] sm:$0xff] }
 0x78a   :  { %8019 = vmatpush.bf16.msrb.mxu0 %v13176_v48  ;;  %8076 = vmatpush.bf16.msrb.mxu3 %v13200_v19  ;;  %v5787_v10 = vpop.f32.mrf.mxu1  ;;  %v20308_v19 = vld [vmem:[#allocation209_spill] sm:$0xff] }
 0x78b   :  { %v5788_v40 = vadd.f32 %v5787_v10, %v5768_v56  ;;  %8058 = vmatpush.bf16.msrb.mxu2 %v13191_v39  ;;  %v18483_v3 = vadd.f32 %v5824_v12, %v18367_v60  ;;  %v13172_v41 = vld [vmem:[%s19066_s3 + $0x918] sm:$0xff] }
 0x78c   :  { %8039 = vmatpush.bf16.msrb.mxu1 %v13183_v9  ;;  %v13196_v56 = vld [vmem:[%s19066_s3 + $0x9d8] sm:$0xff] }
 0x78e   :  { %8020 = vmatpush.bf16.msrb.mxu0 %v13175_v30  ;;  %8077 = vmatpush.bf16.msrb.mxu3 %v13199_v6  ;;  %v5806_v60 = vpop.f32.mrf.mxu2  ;;  %v5825_v51 = vpop.f32.mrf.mxu3  ;;  %v13171_v6 = vld [vmem:[%s19066_s3 + $0x910] sm:$0xff] }
 0x78f   :  { %8059 = vmatpush.bf16.msrb.mxu2 %v13190_v53  ;;  %v5807_v47 = vadd.f32 %v5806_v60, %v5788_v40  ;;  %v13187_v40 = vld [vmem:[%s19066_s3 + $0x990] sm:$0xff] }
 0x790   :  { %8040 = vmatpush.bf16.msrb.mxu1 %v13182_v4  ;;  %v13179_v4 = vld [vmem:[%s19066_s3 + $0x950] sm:$0xff] }
 0x791   :  { %v5771_v17 = vpop.f32.mrf.mxu0  ;;  %v5826_v14 = vadd.f32 %v5825_v51, %v5807_v47  ;;  %v13186_v47 = vld [vmem:[%s19066_s3 + $0x988] sm:$0xff] }
 0x792   :  { %8021 = vmatpush.bf16.msrb.mxu0 %v13174_v28  ;;  %8078 = vmatpush.bf16.msrb.mxu3 %v13198_v0  ;;  %v5790_v15 = vpop.f32.mrf.mxu1  ;;  %v13195_v0 = vld [vmem:[%s19066_s3 + $0x9d0] sm:$0xff]  ;;  %v13170_v51 = vld [vmem:[%s19066_s3 + $0x908] sm:$0xff] }
 0x793   :  { %v5791_v61 = vadd.f32 %v5790_v15, %v5771_v17  ;;  %8060 = vmatpush.bf16.msrb.mxu2 %v13189_v63  ;;  %v18511_v48 = vadd.f32 %v5826_v14, %v18395_v38  ;;  %7335 = vmatmul.bf16.gmra.mxu3 %v20309_v1  ;;  %v13180_v38 = vld [vmem:[%s19066_s3 + $0x958] sm:$0xff]  ;;  %v13178_v17 = vld [vmem:[%s19066_s3 + $0x948] sm:$0xff]  ;;  %v13193_v1 = vld [vmem:[%s19066_s3 + $0x9c0] sm:$0xff] }
 0x794   :  { %7278 = vmatmul.bf16.gmra.mxu0 %v20306_v49  ;;  %8041 = vmatpush.bf16.msrb.mxu1 %v13181_v22  ;;  %v13185_v22 = vld [vmem:[%s19066_s3 + $0x980] sm:$0xff] }
 0x795   :  { %7297 = vmatmul.bf16.gmra.mxu1 %v20307_v43  ;;  %7316 = vmatmul.bf16.gmra.mxu2 %v20308_v19  ;;  %v13177_v19 = vld [vmem:[%s19066_s3 + $0x940] sm:$0xff] }
 0x796   :  { %8022 = vmatpush.bf16.msrb.mxu0 %v13173_v50  ;;  %8079 = vmatpush.bf16.msrb.mxu3 %v13197_v62  ;;  %v5828_v30 = vpop.f32.mrf.mxu3  ;;  %v13169_v62 = vld [vmem:[%s19066_s3 + $0x900] sm:$0xff] }
 0x797   :  { %8061 = vmatpush.bf16.msrb.mxu2 %v13188_v24  ;;  %v20310_v24 = vld [vmem:[#allocation13_spill] sm:$0xff] }
 0x798   :  { %v5809_v10 = vpop.f32.mrf.mxu2  ;;  %8042 = vmatpush.bf16.msrb.mxu1 %v13180_v38  ;;  %v20311_v38 = vld [vmem:[#allocation210_spill] sm:$0xff] }
 0x799   :  { %v5810_v39 = vadd.f32 %v5809_v10, %v5791_v61  ;;  %v5773_v9 = vpop.f32.mrf.mxu0  ;;  %v20313_v10 = vld [vmem:[#allocation14_spill] sm:$0xff] }
 0x79a   :  { %v5792_v12 = vpop.f32.mrf.mxu1  ;;  %8023 = vmatpush.bf16.msrb.mxu0 %v13172_v41  ;;  %8080 = vmatpush.bf16.msrb.mxu3 %v13196_v56  ;;  %v20312_v56 = vld [vmem:[#allocation406_spill] sm:$0xff] }
 0x79b   :  { %v5829_v53 = vadd.f32 %v5828_v30, %v5810_v39  ;;  %v5793_v28 = vadd.f32 %v5792_v12, %v5773_v9  ;;  %8062 = vmatpush.bf16.msrb.mxu2 %v13187_v40  ;;  %v13224_v39 = vld [vmem:[%s19066_s3 + $0xab8] sm:$0xff] }
 0x79c   :  { %8043 = vmatpush.bf16.msrb.mxu1 %v13179_v4  ;;  %v13208_v30 = vld [vmem:[%s19066_s3 + $0xa38] sm:$0xff]  ;;  %v13223_v4 = vld [vmem:[%s19066_s3 + $0xab0] sm:$0xff] }
 0x79d   :  { %v18541_v60 = vadd.f32 %v5829_v53, %v18425_v20  ;;  %v13194_v20 = vld [vmem:[%s19066_s3 + $0x9c8] sm:$0xff]  ;;  %v13232_v9 = vld [vmem:[%s19066_s3 + $0xaf8] sm:$0xff] }
 0x79e   :  { %8024 = vmatpush.bf16.msrb.mxu0 %v13171_v6  ;;  %8081 = vmatpush.bf16.msrb.mxu3 %v13195_v0  ;;  %v5830_v50 = vpop.f32.mrf.mxu3  ;;  %v13207_v0 = vld [vmem:[%s19066_s3 + $0xa30] sm:$0xff] }
 0x79f   :  { %8063 = vmatpush.bf16.msrb.mxu2 %v13186_v47  ;;  %v13215_v47 = vld [vmem:[%s19066_s3 + $0xa70] sm:$0xff] }
 0x7a0   :  { %v5811_v15 = vpop.f32.mrf.mxu2  ;;  %8044 = vmatpush.bf16.msrb.mxu1 %v13178_v17 }
 0x7a1   :  { %v5812_v63 = vadd.f32 %v5811_v15, %v5793_v28  ;;  %v6143_v14 = vpop.f32.mrf.mxu0 }
 0x7a2   :  { %v6162_v61 = vpop.f32.mrf.mxu1  ;;  %8025 = vmatpush.bf16.msrb.mxu0 %v13170_v51  ;;  %8082 = vmatpush.bf16.msrb.mxu3 %v13194_v20  ;;  %v13231_v20 = vld [vmem:[%s19066_s3 + $0xaf0] sm:$0xff] }
 0x7a3   :  { %v5831_v49 = vadd.f32 %v5830_v50, %v5812_v63  ;;  %v6163_v43 = vadd.f32 %v6162_v61, %v6143_v14  ;;  %8064 = vmatpush.bf16.msrb.mxu2 %v13185_v22  ;;  %7707 = vmatmul.bf16.vlgmr.msra.gmra.mxu3 %v20313_v10  ;;  %v13222_v63 = vld [vmem:[%s19066_s3 + $0xaa8] sm:$0xff]  ;;  %v13229_v10 = vld [vmem:[%s19066_s3 + $0xae0] sm:$0xff] }
 0x7a4   :  { %7650 = vmatmul.bf16.vlgmr.msra.gmra.mxu0 %v20310_v24  ;;  %8045 = vmatpush.bf16.msrb.mxu1 %v13177_v19  ;;  %v13206_v50 = vld [vmem:[%s19066_s3 + $0xa28] sm:$0xff]  ;;  %v13221_v19 = vld [vmem:[%s19066_s3 + $0xaa0] sm:$0xff] }
 0x7a5   :  { %v18569_v41 = vadd.f32 %v5831_v49, %v18453_v46  ;;  %7669 = vmatmul.bf16.vlgmr.msra.gmra.mxu1 %v20311_v38  ;;  %7688 = vmatmul.bf16.vlgmr.msra.gmra.mxu2 %v20312_v56  ;;  %v13216_v46 = vld [vmem:[%s19066_s3 + $0xa78] sm:$0xff]  ;;  %v13214_v14 = vld [vmem:[%s19066_s3 + $0xa68] sm:$0xff]  ;;  %v13213_v56 = vld [vmem:[%s19066_s3 + $0xa60] sm:$0xff] }
 0x7a6   :  { %8026 = vmatpush.bf16.msrb.mxu0 %v13169_v62  ;;  %8083 = vmatpush.bf16.msrb.mxu3 %v13193_v1  ;;  %v6200_v6 = vpop.f32.mrf.mxu3  ;;  %v13230_v61 = vld [vmem:[%s19066_s3 + $0xae8] sm:$0xff]  ;;  %v13205_v1 = vld [vmem:[%s19066_s3 + $0xa20] sm:$0xff] }
 0x7a7   :  { %8434 = vmatpush.bf16.msra.mxu2 %v13224_v39 }
 0x7a8   :  { %v6181_v12 = vpop.f32.mrf.mxu2  ;;  %8415 = vmatpush.bf16.msra.mxu1 %v13216_v46  ;;  %v13204_v46 = vld [vmem:[%s19066_s3 + $0xa18] sm:$0xff] }
 0x7a9   :  { %v6182_v40 = vadd.f32 %v6181_v12, %v6163_v43  ;;  %v6145_v53 = vpop.f32.mrf.mxu0 }
 0x7aa   :  { %8396 = vmatpush.bf16.msra.mxu0 %v13208_v30  ;;  %8453 = vmatpush.bf16.msra.mxu3 %v13232_v9  ;;  %v6164_v28 = vpop.f32.mrf.mxu1  ;;  %v13220_v30 = vld [vmem:[%s19066_s3 + $0xa98] sm:$0xff] }
 0x7ab   :  { %v6201_v51 = vadd.f32 %v6200_v6, %v6182_v40  ;;  %v6165_v17 = vadd.f32 %v6164_v28, %v6145_v53  ;;  %8435 = vmatpush.bf16.msra.mxu2 %v13223_v4  ;;  %v13219_v40 = vld [vmem:[%s19066_s3 + $0xa90] sm:$0xff] }
 0x7ac   :  { %8416 = vmatpush.bf16.msra.mxu1 %v13215_v47  ;;  %v13203_v6 = vld [vmem:[%s19066_s3 + $0xa10] sm:$0xff] }
 0x7ad   :  { %v18599_v15 = vadd.f32 %v6201_v51, %v18483_v3  ;;  %v13211_v4 = vld [vmem:[%s19066_s3 + $0xa50] sm:$0xff]  ;;  %v13218_v51 = vld [vmem:[%s19066_s3 + $0xa88] sm:$0xff] }
 0x7ae   :  { %8397 = vmatpush.bf16.msra.mxu0 %v13207_v0  ;;  %8454 = vmatpush.bf16.msra.mxu3 %v13231_v20  ;;  %v6202_v62 = vpop.f32.mrf.mxu3  ;;  %v13227_v0 = vld [vmem:[%s19066_s3 + $0xad0] sm:$0xff]  ;;  %v13210_v20 = vld [vmem:[%s19066_s3 + $0xa48] sm:$0xff] }
 0x7af   :  { %8436 = vmatpush.bf16.msra.mxu2 %v13222_v63 }
 0x7b0   :  { %v6183_v3 = vpop.f32.mrf.mxu2  ;;  %8417 = vmatpush.bf16.msra.mxu1 %v13214_v14 }
 0x7b1   :  { %v6184_v22 = vadd.f32 %v6183_v3, %v6165_v17  ;;  %v6148_v49 = vpop.f32.mrf.mxu0  ;;  %v13202_v17 = vld [vmem:[%s19066_s3 + $0xa08] sm:$0xff] }
 0x7b2   :  { %8398 = vmatpush.bf16.msra.mxu0 %v13206_v50  ;;  %8455 = vmatpush.bf16.msra.mxu3 %v13230_v61  ;;  %v6167_v43 = vpop.f32.mrf.mxu1 }
 0x7b3   :  { %v6203_v24 = vadd.f32 %v6202_v62, %v6184_v22  ;;  %v6168_v38 = vadd.f32 %v6167_v43, %v6148_v49  ;;  %8437 = vmatpush.bf16.msra.mxu2 %v13221_v19  ;;  %7712 = vmatmul.bf16.gmra.mxu3 %v17370_v32  ;;  %v13217_v22 = vld [vmem:[%s19066_s3 + $0xa80] sm:$0xff] }
 0x7b4   :  { %7655 = vmatmul.bf16.gmra.mxu0 %v17324_v37  ;;  %8418 = vmatpush.bf16.msra.mxu1 %v13213_v56  ;;  %v13212_v37 = vld [vmem:[%s19066_s3 + $0xa58] sm:$0xff]  ;;  %v13201_v62 = vld [vmem:[%s19066_s3 + $0xa00] sm:$0xff] }
 0x7b5   :  { %v18627_v39 = vadd.f32 %v6203_v24, %v18511_v48  ;;  %7674 = vmatmul.bf16.gmra.mxu1 %v17326_v16  ;;  %7693 = vmatmul.bf16.gmra.mxu2 %v17368_v59  ;;  %v13228_v16 = vld [vmem:[%s19066_s3 + $0xad8] sm:$0xff]  ;;  %v13209_v19 = vld [vmem:[%s19066_s3 + $0xa40] sm:$0xff] }
 0x7b6   :  { %8399 = vmatpush.bf16.msra.mxu0 %v13205_v1  ;;  %8456 = vmatpush.bf16.msra.mxu3 %v13229_v10  ;;  %v6205_v48 = vpop.f32.mrf.mxu3  ;;  %v13225_v1 = vld [vmem:[%s19066_s3 + $0xac0] sm:$0xff]  ;;  %v13240_v56 = vld [vmem:[%s19066_s3 + $0xb38] sm:$0xff] }
 0x7b7   :  { %8438 = vmatpush.bf16.msra.mxu2 %v13220_v30 }
 0x7b8   :  { %v6186_v59 = vpop.f32.mrf.mxu2  ;;  %8419 = vmatpush.bf16.msra.mxu1 %v13212_v37  ;;  %v13239_v37 = vld [vmem:[%s19066_s3 + $0xb30] sm:$0xff] }
 0x7b9   :  { %v6187_v32 = vadd.f32 %v6186_v59, %v6168_v38  ;;  %v6150_v9 = vpop.f32.mrf.mxu0  ;;  %v13256_v38 = vld [vmem:[%s19066_s3 + $0xbb8] sm:$0xff] }
 0x7ba   :  { %v6169_v12 = vpop.f32.mrf.mxu1  ;;  %8400 = vmatpush.bf16.msra.mxu0 %v13204_v46  ;;  %8457 = vmatpush.bf16.msra.mxu3 %v13228_v16  ;;  %v13255_v46 = vld [vmem:[%s19066_s3 + $0xbb0] sm:$0xff] }
 0x7bb   :  { %v6206_v53 = vadd.f32 %v6205_v48, %v6187_v32  ;;  %v6170_v28 = vadd.f32 %v6169_v12, %v6150_v9  ;;  %8439 = vmatpush.bf16.msra.mxu2 %v13219_v40  ;;  %v13247_v16 = vld [vmem:[%s19066_s3 + $0xb70] sm:$0xff]  ;;  %v13254_v12 = vld [vmem:[%s19066_s3 + $0xba8] sm:$0xff] }
 0x7bc   :  { %8420 = vmatpush.bf16.msra.mxu1 %v13211_v4  ;;  %v13263_v48 = vld [vmem:[%s19066_s3 + $0xbf0] sm:$0xff]  ;;  %v13238_v40 = vld [vmem:[%s19066_s3 + $0xb28] sm:$0xff] }
 0x7bd   :  { %v18657_v47 = vadd.f32 %v6206_v53, %v18541_v60  ;;  %v13226_v60 = vld [vmem:[%s19066_s3 + $0xac8] sm:$0xff] }
 0x7be   :  { %8401 = vmatpush.bf16.msra.mxu0 %v13203_v6  ;;  %8458 = vmatpush.bf16.msra.mxu3 %v13227_v0  ;;  %v6207_v14 = vpop.f32.mrf.mxu3  ;;  %v13246_v6 = vld [vmem:[%s19066_s3 + $0xb68] sm:$0xff] }
 0x7bf   :  { %8440 = vmatpush.bf16.msra.mxu2 %v13218_v51  ;;  %v13262_v53 = vld [vmem:[%s19066_s3 + $0xbe8] sm:$0xff] }
 0x7c0   :  { %v6188_v63 = vpop.f32.mrf.mxu2  ;;  %8421 = vmatpush.bf16.msra.mxu1 %v13210_v20  ;;  %v13237_v20 = vld [vmem:[%s19066_s3 + $0xb20] sm:$0xff] }
 0x7c1   :  { %v6189_v50 = vadd.f32 %v6188_v63, %v6170_v28  ;;  %v6520_v61 = vpop.f32.mrf.mxu0 }
 0x7c2   :  { %v6539_v3 = vpop.f32.mrf.mxu1  ;;  %8402 = vmatpush.bf16.msra.mxu0 %v13202_v17  ;;  %8459 = vmatpush.bf16.msra.mxu3 %v13226_v60  ;;  %v13253_v17 = vld [vmem:[%s19066_s3 + $0xba0] sm:$0xff] }
 0x7c3   :  { %v6208_v49 = vadd.f32 %v6207_v14, %v6189_v50  ;;  %v6540_v43 = vadd.f32 %v6539_v3, %v6520_v61  ;;  %8441 = vmatpush.bf16.msra.mxu2 %v13217_v22  ;;  %8084 = vmatmul.bf16.vlgmr.msrb.gmra.mxu3 %v17467_v44  ;;  %v13245_v50 = vld [vmem:[%s19066_s3 + $0xb60] sm:$0xff]  ;;  %v13252_v3 = vld [vmem:[%s19066_s3 + $0xb98] sm:$0xff] }
 0x7c4   :  { %8027 = vmatmul.bf16.vlgmr.msrb.gmra.mxu0 %v17424_v54  ;;  %v13248_v54 = vld [vmem:[%s19066_s3 + $0xb78] sm:$0xff]  ;;  %8422 = vmatpush.bf16.msra.mxu1 %v13209_v19  ;;  %v13261_v14 = vld [vmem:[%s19066_s3 + $0xbe0] sm:$0xff]  ;;  %v13235_v19 = vld [vmem:[%s19066_s3 + $0xb10] sm:$0xff] }
 0x7c5   :  { %v18685_v24 = vadd.f32 %v6208_v49, %v18569_v41  ;;  %8046 = vmatmul.bf16.vlgmr.msrb.gmra.mxu1 %v17426_v52  ;;  %8065 = vmatmul.bf16.vlgmr.msrb.gmra.mxu2 %v17465_v34  ;;  %v13264_v52 = vld [vmem:[%s19066_s3 + $0xbf8] sm:$0xff] }
 0x7c6   :  { %8403 = vmatpush.bf16.msra.mxu0 %v13201_v62  ;;  %8460 = vmatpush.bf16.msra.mxu3 %v13225_v1  ;;  %v6577_v41 = vpop.f32.mrf.mxu3  ;;  %v13236_v22 = vld [vmem:[%s19066_s3 + $0xb18] sm:$0xff] }
 0x7c7   :  { %8811 = vmatpush.bf16.msrb.mxu2 %v13256_v38 }
 0x7c8   :  { %v6558_v34 = vpop.f32.mrf.mxu2  ;;  %8792 = vmatpush.bf16.msrb.mxu1 %v13248_v54  ;;  %v13259_v54 = vld [vmem:[%s19066_s3 + $0xbd0] sm:$0xff] }
 0x7c9   :  { %v6559_v44 = vadd.f32 %v6558_v34, %v6540_v43  ;;  %v6522_v10 = vpop.f32.mrf.mxu0  ;;  %v13251_v43 = vld [vmem:[%s19066_s3 + $0xb90] sm:$0xff]  ;;  %v13250_v34 = vld [vmem:[%s19066_s3 + $0xb88] sm:$0xff] }
 0x7ca   :  { %8773 = vmatpush.bf16.msrb.mxu0 %v13240_v56  ;;  %8830 = vmatpush.bf16.msrb.mxu3 %v13264_v52  ;;  %v6541_v30 = vpop.f32.mrf.mxu1  ;;  %v13243_v56 = vld [vmem:[%s19066_s3 + $0xb50] sm:$0xff] }
 0x7cb   :  { %v6578_v59 = vadd.f32 %v6577_v41, %v6559_v44  ;;  %v6542_v32 = vadd.f32 %v6541_v30, %v6522_v10  ;;  %8812 = vmatpush.bf16.msrb.mxu2 %v13255_v46  ;;  %v13234_v44 = vld [vmem:[%s19066_s3 + $0xb08] sm:$0xff] }
 0x7cc   :  { %8793 = vmatpush.bf16.msrb.mxu1 %v13247_v16  ;;  %v13242_v41 = vld [vmem:[%s19066_s3 + $0xb48] sm:$0xff] }
 0x7cd   :  { %v18715_v9 = vadd.f32 %v6578_v59, %v18599_v15  ;;  %v13249_v59 = vld [vmem:[%s19066_s3 + $0xb80] sm:$0xff] }
 0x7ce   :  { %8774 = vmatpush.bf16.msrb.mxu0 %v13239_v37  ;;  %8831 = vmatpush.bf16.msrb.mxu3 %v13263_v48  ;;  %v6579_v4 = vpop.f32.mrf.mxu3 }
 0x7cf   :  { %8813 = vmatpush.bf16.msrb.mxu2 %v13254_v12 }
 0x7d0   :  { %v6560_v15 = vpop.f32.mrf.mxu2  ;;  %8794 = vmatpush.bf16.msrb.mxu1 %v13246_v6  ;;  %v13257_v6 = vld [vmem:[%s19066_s3 + $0xbc0] sm:$0xff] }
 0x7d1   :  { %v6561_v28 = vadd.f32 %v6560_v15, %v6542_v32  ;;  %v6525_v0 = vpop.f32.mrf.mxu0  ;;  %v13233_v32 = vld [vmem:[%s19066_s3 + $0xb00] sm:$0xff]  ;;  %v13288_v15 = vld [vmem:[%s19066_s3 + $0xcb8] sm:$0xff] }
 0x7d2   :  { %8775 = vmatpush.bf16.msrb.mxu0 %v13238_v40  ;;  %8832 = vmatpush.bf16.msrb.mxu3 %v13262_v53  ;;  %v6544_v51 = vpop.f32.mrf.mxu1  ;;  %v13241_v40 = vld [vmem:[%s19066_s3 + $0xb40] sm:$0xff] }
 0x7d3   :  { %v6580_v60 = vadd.f32 %v6579_v4, %v6561_v28  ;;  %v6545_v63 = vadd.f32 %v6544_v51, %v6525_v0  ;;  %8814 = vmatpush.bf16.msrb.mxu2 %v13253_v17  ;;  %8089 = vmatmul.bf16.gmra.mxu3 %v17570_v23  ;;  %v13272_v28 = vld [vmem:[%s19066_s3 + $0xc38] sm:$0xff]  ;;  %v13287_v51 = vld [vmem:[%s19066_s3 + $0xcb0] sm:$0xff] }
 0x7d4   :  { %8032 = vmatmul.bf16.gmra.mxu0 %v17524_v31  ;;  %8795 = vmatpush.bf16.msrb.mxu1 %v13245_v50  ;;  %v13244_v31 = vld [vmem:[%s19066_s3 + $0xb58] sm:$0xff]  ;;  %v13271_v17 = vld [vmem:[%s19066_s3 + $0xc30] sm:$0xff] }
 0x7d5   :  { %v18743_v61 = vadd.f32 %v6580_v60, %v18627_v39  ;;  %8051 = vmatmul.bf16.gmra.mxu1 %v17526_v18  ;;  %8070 = vmatmul.bf16.gmra.mxu2 %v17568_v36  ;;  %v13260_v18 = vld [vmem:[%s19066_s3 + $0xbd8] sm:$0xff]  ;;  %v13295_v50 = vld [vmem:[%s19066_s3 + $0xcf0] sm:$0xff] }
 0x7d6   :  { %8776 = vmatpush.bf16.msrb.mxu0 %v13237_v20  ;;  %8833 = vmatpush.bf16.msrb.mxu3 %v13261_v14  ;;  %v6582_v39 = vpop.f32.mrf.mxu3  ;;  %v13279_v20 = vld [vmem:[%s19066_s3 + $0xc70] sm:$0xff] }
 0x7d7   :  { %8815 = vmatpush.bf16.msrb.mxu2 %v13252_v3  ;;  %v13286_v3 = vld [vmem:[%s19066_s3 + $0xca8] sm:$0xff] }
 0x7d8   :  { %v6563_v36 = vpop.f32.mrf.mxu2  ;;  %8796 = vmatpush.bf16.msrb.mxu1 %v13244_v31  ;;  %v13278_v31 = vld [vmem:[%s19066_s3 + $0xc68] sm:$0xff] }
 0x7d9   :  { %v6564_v23 = vadd.f32 %v6563_v36, %v6545_v63  ;;  %v6527_v62 = vpop.f32.mrf.mxu0 }
 0x7da   :  { %v6546_v49 = vpop.f32.mrf.mxu1  ;;  %8777 = vmatpush.bf16.msrb.mxu0 %v13236_v22  ;;  %8834 = vmatpush.bf16.msrb.mxu3 %v13260_v18  ;;  %v13270_v22 = vld [vmem:[%s19066_s3 + $0xc28] sm:$0xff] }
 0x7db   :  { %v6583_v1 = vadd.f32 %v6582_v39, %v6564_v23  ;;  %v6547_v38 = vadd.f32 %v6546_v49, %v6527_v62  ;;  %8816 = vmatpush.bf16.msrb.mxu2 %v13251_v43  ;;  %v13294_v18 = vld [vmem:[%s19066_s3 + $0xce8] sm:$0xff]  ;;  %v13285_v49 = vld [vmem:[%s19066_s3 + $0xca0] sm:$0xff] }
 0x7dc   :  { %8797 = vmatpush.bf16.msrb.mxu1 %v13243_v56  ;;  %v13269_v43 = vld [vmem:[%s19066_s3 + $0xc20] sm:$0xff] }
 0x7dd   :  { %v18773_v52 = vadd.f32 %v6583_v1, %v18657_v47  ;;  %v13258_v47 = vld [vmem:[%s19066_s3 + $0xbc8] sm:$0xff]  ;;  %v13293_v56 = vld [vmem:[%s19066_s3 + $0xce0] sm:$0xff] }
 0x7de   :  { %8778 = vmatpush.bf16.msrb.mxu0 %v13235_v19  ;;  %8835 = vmatpush.bf16.msrb.mxu3 %v13259_v54  ;;  %v6584_v46 = vpop.f32.mrf.mxu3 }
 0x7df   :  { %8817 = vmatpush.bf16.msrb.mxu2 %v13250_v34  ;;  %v13284_v34 = vld [vmem:[%s19066_s3 + $0xc98] sm:$0xff] }
 0x7e0   :  { %v6565_v10 = vpop.f32.mrf.mxu2  ;;  %8798 = vmatpush.bf16.msrb.mxu1 %v13242_v41 }
 0x7e1   :  { %v6566_v30 = vadd.f32 %v6565_v10, %v6547_v38  ;;  %v6897_v37 = vpop.f32.mrf.mxu0  ;;  %v13277_v38 = vld [vmem:[%s19066_s3 + $0xc60] sm:$0xff]  ;;  %v13283_v10 = vld [vmem:[%s19066_s3 + $0xc90] sm:$0xff] }
 0x7e2   :  { %v6916_v16 = vpop.f32.mrf.mxu1  ;;  %8779 = vmatpush.bf16.msrb.mxu0 %v13234_v44  ;;  %8836 = vmatpush.bf16.msrb.mxu3 %v13258_v47  ;;  %v13268_v44 = vld [vmem:[%s19066_s3 + $0xc18] sm:$0xff] }
 0x7e3   :  { %v6585_v48 = vadd.f32 %v6584_v46, %v6566_v30  ;;  %v6917_v12 = vadd.f32 %v6916_v16, %v6897_v37  ;;  %8818 = vmatpush.bf16.msrb.mxu2 %v13249_v59  ;;  %8461 = vmatmul.bf16.vlgmr.msra.gmra.mxu3 %v17667_v33  ;;  %v13267_v30 = vld [vmem:[%s19066_s3 + $0xc10] sm:$0xff] }
 0x7e4   :  { %8404 = vmatmul.bf16.vlgmr.msra.gmra.mxu0 %v17624_v5  ;;  %v13280_v5 = vld [vmem:[%s19066_s3 + $0xc78] sm:$0xff]  ;;  %8799 = vmatpush.bf16.msrb.mxu1 %v13241_v40  ;;  %v13275_v16 = vld [vmem:[%s19066_s3 + $0xc50] sm:$0xff]  ;;  %v13274_v40 = vld [vmem:[%s19066_s3 + $0xc48] sm:$0xff] }
 0x7e5   :  { %v18801_v53 = vadd.f32 %v6585_v48, %v18685_v24  ;;  %8423 = vmatmul.bf16.vlgmr.msra.gmra.mxu1 %v17626_v21  ;;  %8442 = vmatmul.bf16.vlgmr.msra.gmra.mxu2 %v17665_v11  ;;  %v13296_v21 = vld [vmem:[%s19066_s3 + $0xcf8] sm:$0xff]  ;;  %v13291_v59 = vld [vmem:[%s19066_s3 + $0xcd0] sm:$0xff]  ;;  %v13282_v48 = vld [vmem:[%s19066_s3 + $0xc88] sm:$0xff] }
 0x7e6   :  { %8780 = vmatpush.bf16.msrb.mxu0 %v13233_v32  ;;  %8837 = vmatpush.bf16.msrb.mxu3 %v13257_v6  ;;  %v6954_v24 = vpop.f32.mrf.mxu3  ;;  %v13290_v6 = vld [vmem:[%s19066_s3 + $0xcc8] sm:$0xff] }
 0x7e7   :  { %9188 = vmatpush.bf16.msra.mxu2 %v13288_v15 }
 0x7e8   :  { %v6935_v11 = vpop.f32.mrf.mxu2  ;;  %9169 = vmatpush.bf16.msra.mxu1 %v13280_v5 }
 0x7e9   :  { %v6936_v33 = vadd.f32 %v6935_v11, %v6917_v12  ;;  %v6899_v4 = vpop.f32.mrf.mxu0  ;;  %v13266_v12 = vld [vmem:[%s19066_s3 + $0xc08] sm:$0xff]  ;;  %v13281_v11 = vld [vmem:[%s19066_s3 + $0xc80] sm:$0xff] }
 0x7ea   :  { %9150 = vmatpush.bf16.msra.mxu0 %v13272_v28  ;;  %9207 = vmatpush.bf16.msra.mxu3 %v13296_v21  ;;  %v6918_v0 = vpop.f32.mrf.mxu1 }
 0x7eb   :  { %v6955_v60 = vadd.f32 %v6954_v24, %v6936_v33  ;;  %v6919_v63 = vadd.f32 %v6918_v0, %v6899_v4  ;;  %9189 = vmatpush.bf16.msra.mxu2 %v13287_v51  ;;  %v13265_v33 = vld [vmem:[%s19066_s3 + $0xc00] sm:$0xff] }
 0x7ec   :  { %9170 = vmatpush.bf16.msra.mxu1 %v13279_v20  ;;  %v13273_v4 = vld [vmem:[%s19066_s3 + $0xc40] sm:$0xff] }
 0x7ed   :  { %v18831_v14 = vadd.f32 %v6955_v60, %v18715_v9  ;;  %v13289_v0 = vld [vmem:[%s19066_s3 + $0xcc0] sm:$0xff] }
 0x7ee   :  { %9151 = vmatpush.bf16.msra.mxu0 %v13271_v17  ;;  %9208 = vmatpush.bf16.msra.mxu3 %v13295_v50  ;;  %v6956_v23 = vpop.f32.mrf.mxu3 }
 0x7ef   :  { %9190 = vmatpush.bf16.msra.mxu2 %v13286_v3 }
 0x7f0   :  { %v6937_v9 = vpop.f32.mrf.mxu2  ;;  %9171 = vmatpush.bf16.msra.mxu1 %v13278_v31 }
 0x7f1   :  { %v6938_v36 = vadd.f32 %v6937_v9, %v6919_v63  ;;  %v6902_v39 = vpop.f32.mrf.mxu0 }
 0x7f2   :  { %9152 = vmatpush.bf16.msra.mxu0 %v13270_v22  ;;  %9209 = vmatpush.bf16.msra.mxu3 %v13294_v18  ;;  %v6921_v62 = vpop.f32.mrf.mxu1 }
 0x7f3   :  { %v6957_v19 = vadd.f32 %v6956_v23, %v6938_v36  ;;  %v6922_v1 = vadd.f32 %v6921_v62, %v6902_v39  ;;  %9191 = vmatpush.bf16.msra.mxu2 %v13285_v49  ;;  %8466 = vmatmul.bf16.gmra.mxu3 %v17770_v7  ;;  %v20316_v36 = vld [vmem:[#allocation408_spill] sm:$0xff] }
 0x7f4   :  { %8409 = vmatmul.bf16.gmra.mxu0 %v17724_v13  ;;  %9172 = vmatpush.bf16.msra.mxu1 %v13277_v38  ;;  %v13276_v13 = vld [vmem:[%s19066_s3 + $0xc58] sm:$0xff]  ;;  %v20317_v23 = vld [vmem:[#allocation16_spill] sm:$0xff] }
 0x7f5   :  { %v18859_v54 = vadd.f32 %v6957_v19, %v18743_v61  ;;  %8428 = vmatmul.bf16.gmra.mxu1 %v17726_v26  ;;  %8447 = vmatmul.bf16.gmra.mxu2 %v17768_v58  ;;  %v13292_v26 = vld [vmem:[%s19066_s3 + $0xcd8] sm:$0xff] }
 0x7f6   :  { %9153 = vmatpush.bf16.msra.mxu0 %v13269_v43  ;;  %9210 = vmatpush.bf16.msra.mxu3 %v13293_v56  ;;  %v6959_v61 = vpop.f32.mrf.mxu3 }
 0x7f7   :  { %9192 = vmatpush.bf16.msra.mxu2 %v13284_v34 }
 0x7f8   :  { %v6940_v58 = vpop.f32.mrf.mxu2  ;;  %9173 = vmatpush.bf16.msra.mxu1 %v13276_v13 }
 0x7f9   :  { %v6941_v7 = vadd.f32 %v6940_v58, %v6922_v1  ;;  %v6904_v41 = vpop.f32.mrf.mxu0 }
 0x7fa   :  { %v6923_v47 = vpop.f32.mrf.mxu1  ;;  %9154 = vmatpush.bf16.msra.mxu0 %v13268_v44  ;;  %9211 = vmatpush.bf16.msra.mxu3 %v13292_v26 }
 0x7fb   :  { %v6960_v46 = vadd.f32 %v6959_v61, %v6941_v7  ;;  %v6924_v37 = vadd.f32 %v6923_v47, %v6904_v41  ;;  %9193 = vmatpush.bf16.msra.mxu2 %v13283_v10  ;;  %v20318_v47 = vld [vmem:[#allocation211_spill] sm:$0xff] }
 0x7fc   :  { %9174 = vmatpush.bf16.msra.mxu1 %v13275_v16 }
 0x7fd   :  { %v6966_v32 = vadd.f32 %v6960_v46, %v18773_v52 }
 0x7fe   :  { %9155 = vmatpush.bf16.msra.mxu0 %v13267_v30  ;;  %9212 = vmatpush.bf16.msra.mxu3 %v13291_v59  ;;  %v6961_v28 = vpop.f32.mrf.mxu3  ;;  %v20319_v30 = vld [vmem:[#allocation409_spill] sm:$0xff] }
 0x7ff   :  { %9194 = vmatpush.bf16.msra.mxu2 %v13282_v48 }
 0x800   :  { %v6942_v52 = vpop.f32.mrf.mxu2  ;;  %9175 = vmatpush.bf16.msra.mxu1 %v13274_v40 }
 0x801   :  { %v6943_v15 = vadd.f32 %v6942_v52, %v6924_v37  ;;  %v7274_v5 = vpop.f32.mrf.mxu0 }
 0x802   :  { %v7293_v21 = vpop.f32.mrf.mxu1  ;;  %9156 = vmatpush.bf16.msra.mxu0 %v13266_v12  ;;  %9213 = vmatpush.bf16.msra.mxu3 %v13290_v6 }
 0x803   :  { %v6962_v24 = vadd.f32 %v6961_v28, %v6943_v15  ;;  %9195 = vmatpush.bf16.msra.mxu2 %v13281_v11  ;;  %8838 = vmatmul.bf16.vlgmr.msrb.gmra.mxu3 %v17867_v25  ;;  %v20315_v25 = vld [vmem:[#allocation15_spill] sm:$0xff]  ;;  %v7294_v44 = vadd.f32 %v7293_v21, %v7274_v5 }
 0x804   :  { %8781 = vmatmul.bf16.vlgmr.msrb.gmra.mxu0 %v17824_v42  ;;  %9176 = vmatpush.bf16.msra.mxu1 %v13273_v4 }
 0x805   :  { %v6967_v51 = vadd.f32 %v6962_v24, %v18801_v53  ;;  %8800 = vmatmul.bf16.vlgmr.msrb.gmra.mxu1 %v17826_v8  ;;  %8819 = vmatmul.bf16.vlgmr.msrb.gmra.mxu2 %v17865_v45  ;;  %v20314_v8 = vld [vmem:[#allocation407_spill] sm:$0xff] }
 0x806   :  { %9157 = vmatpush.bf16.msra.mxu0 %v13265_v33  ;;  %9214 = vmatpush.bf16.msra.mxu3 %v13289_v0  ;;  %v7331_v20 = vpop.f32.mrf.mxu3 }
 0x808   :  { %v7312_v17 = vpop.f32.mrf.mxu2 }
 0x809   :  { %v7276_v60 = vpop.f32.mrf.mxu0  ;;  %v7313_v7 = vadd.f32 %v7312_v17, %v7294_v44 }
 0x80a   :  { %v7295_v63 = vpop.f32.mrf.mxu1 }
 0x80b   :  { %v7296_v50 = vadd.f32 %v7295_v63, %v7276_v60  ;;  %v7332_v46 = vadd.f32 %v7331_v20, %v7313_v7 }
 0x80d   :  { %v7341_v12 = vadd.f32 %v7332_v46, %v18831_v14 }
 0x80e   :  { %v7333_v42 = vpop.f32.mrf.mxu3 }
 0x810   :  { %v7314_v3 = vpop.f32.mrf.mxu2 }
 0x811   :  { %v7315_v22 = vadd.f32 %v7314_v3, %v7296_v50  ;;  %v7279_v31 = vpop.f32.mrf.mxu0 }
 0x812   :  { %v7298_v18 = vpop.f32.mrf.mxu1 }
 0x813   :  { %v7334_v53 = vadd.f32 %v7333_v42, %v7315_v22  ;;  %v7299_v9 = vadd.f32 %v7298_v18, %v7279_v31  ;;  %8843 = vmatmul.bf16.gmra.mxu3 %v20317_v23 }
 0x814   :  { %8786 = vmatmul.bf16.gmra.mxu0 %v20314_v8 }
 0x815   :  { %v7342_v45 = vadd.f32 %v7334_v53, %v18859_v54  ;;  %8805 = vmatmul.bf16.gmra.mxu1 %v20315_v25  ;;  %8824 = vmatmul.bf16.gmra.mxu2 %v20316_v36 }
 0x816   :  { %v7336_v49 = vpop.f32.mrf.mxu3 }
 0x818   :  { %v7317_v39 = vpop.f32.mrf.mxu2 }
 0x819   :  { %v7318_v62 = vadd.f32 %v7317_v39, %v7299_v9  ;;  %v7281_v43 = vpop.f32.mrf.mxu0 }
 0x81a   :  { %v7300_v19 = vpop.f32.mrf.mxu1 }
 0x81b   :  { %v7337_v1 = vadd.f32 %v7336_v49, %v7318_v62  ;;  %v7301_v38 = vadd.f32 %v7300_v19, %v7281_v43 }
 0x81d   :  { %v7343_v56 = vadd.f32 %v7337_v1, %v6966_v32 }
 0x81e   :  { %v7338_v26 = vpop.f32.mrf.mxu3 }
 0x820   :  { %v7319_v34 = vpop.f32.mrf.mxu2 }
 0x821   :  { %v7320_v13 = vadd.f32 %v7319_v34, %v7301_v38  ;;  %v7651_v58 = vpop.f32.mrf.mxu0 }
 0x822   :  { %v7670_v54 = vpop.f32.mrf.mxu1 }
 0x823   :  { %v7339_v61 = vadd.f32 %v7338_v26, %v7320_v13  ;;  %v7671_v41 = vadd.f32 %v7670_v54, %v7651_v58  ;;  %9215 = vmatmul.bf16.vlgmr.msra.gmra.mxu3 %v18067_v27 }
 0x824   :  { %9158 = vmatmul.bf16.vlgmr.msra.gmra.mxu0 %v20318_v47 }
 0x825   :  { %v7344_v10 = vadd.f32 %v7339_v61, %v6967_v51  ;;  %9177 = vmatmul.bf16.vlgmr.msra.gmra.mxu1 %v20319_v30  ;;  %9196 = vmatmul.bf16.vlgmr.msra.gmra.mxu2 %v18065_v2 }
 0x826   :  { %v7708_v59 = vpop.f32.mrf.mxu3 }
 0x828   :  { %v7689_v37 = vpop.f32.mrf.mxu2 }
 0x829   :  { %v7690_v16 = vadd.f32 %v7689_v37, %v7671_v41  ;;  %v7653_v32 = vpop.f32.mrf.mxu0 }
 0x82a   :  { %v7672_v48 = vpop.f32.mrf.mxu1 }
 0x82b   :  { %v7709_v40 = vadd.f32 %v7708_v59, %v7690_v16  ;;  %v7673_v6 = vadd.f32 %v7672_v48, %v7653_v32 }
 0x82d   :  { %v7718_v52 = vadd.f32 %v7709_v40, %v7341_v12 }
 0x82e   :  { %v7710_v5 = vpop.f32.mrf.mxu3 }
 0x830   :  { %v7691_v15 = vpop.f32.mrf.mxu2 }
 0x831   :  { %v7692_v28 = vadd.f32 %v7691_v15, %v7673_v6  ;;  %v7656_v21 = vpop.f32.mrf.mxu0  ;;  %v9256_v15 = vld [vmem:[%s19070_s5 + $0x70] sm:$0xff] }
 0x832   :  { %v7675_v11 = vpop.f32.mrf.mxu1 }
 0x833   :  { %v7711_v33 = vadd.f32 %v7710_v5, %v7692_v28  ;;  %v7676_v2 = vadd.f32 %v7675_v11, %v7656_v21  ;;  %9220 = vmatmul.bf16.gmra.mxu3 %v18150_v35  ;;  %v9255_v11 = vld [vmem:[%s19070_s5 + $0x68] sm:$0xff] }
 0x834   :  { %9163 = vmatmul.bf16.gmra.mxu0 %v18116_v55 }
 0x835   :  { %v7719_v27 = vadd.f32 %v7711_v33, %v7342_v45  ;;  %9182 = vmatmul.bf16.gmra.mxu1 %v18118_v29  ;;  %9201 = vmatmul.bf16.gmra.mxu2 %v18148_v57 }
 0x836   :  { %v7713_v4 = vpop.f32.mrf.mxu3 }
 0x838   :  { %v7694_v14 = vpop.f32.mrf.mxu2 }
 0x839   :  { %v7695_v24 = vadd.f32 %v7694_v14, %v7676_v2  ;;  %v7658_v0 = vpop.f32.mrf.mxu0  ;;  %v9254_v2 = vld [vmem:[%s19070_s5 + $0x60] sm:$0xff]  ;;  %v9252_v14 = vld [vmem:[%s19070_s5 + $0x50] sm:$0xff] }
 0x83a   :  { %v7677_v51 = vpop.f32.mrf.mxu1 }
 0x83b   :  { %v7714_v17 = vadd.f32 %v7713_v4, %v7695_v24  ;;  %v7678_v20 = vadd.f32 %v7677_v51, %v7658_v0  ;;  %v9251_v51 = vld [vmem:[%s19070_s5 + $0x48] sm:$0xff] }
 0x83d   :  { %v7720_v60 = vadd.f32 %v7714_v17, %v7343_v56 }
 0x83e   :  { %v7715_v3 = vpop.f32.mrf.mxu3 }
 0x840   :  { %v7696_v63 = vpop.f32.mrf.mxu2 }
 0x841   :  { %v7697_v50 = vadd.f32 %v7696_v63, %v7678_v20  ;;  %v8028_v22 = vpop.f32.mrf.mxu0  ;;  %v9250_v20 = vld [vmem:[%s19070_s5 + $0x40] sm:$0xff]  ;;  %v9248_v63 = vld [vmem:[%s19070_s5 + $0x30] sm:$0xff] }
 0x842   :  { %v8047_v55 = vpop.f32.mrf.mxu1 }
 0x843   :  { %v7716_v42 = vadd.f32 %v7715_v3, %v7697_v50  ;;  %v8048_v31 = vadd.f32 %v8047_v55, %v8028_v22  ;;  %v9247_v55 = vld [vmem:[%s19070_s5 + $0x28] sm:$0xff] }
 0x845   :  { %v7721_v29 = vadd.f32 %v7716_v42, %v7344_v10 }
 0x846   :  { %v8085_v53 = vpop.f32.mrf.mxu3 }
 0x848   :  { %v8066_v18 = vpop.f32.mrf.mxu2 }
 0x849   :  { %v8067_v57 = vadd.f32 %v8066_v18, %v8048_v31  ;;  %v8030_v35 = vpop.f32.mrf.mxu0  ;;  %v9246_v31 = vld [vmem:[%s19070_s5 + $0x20] sm:$0xff]  ;;  %v9244_v18 = vld [vmem:[%s19070_s5 + $0x10] sm:$0xff] }
 0x84a   :  { %v8049_v9 = vpop.f32.mrf.mxu1 }
 0x84b   :  { %v8086_v8 = vadd.f32 %v8085_v53, %v8067_v57  ;;  %v8050_v45 = vadd.f32 %v8049_v9, %v8030_v35  ;;  %v9243_v9 = vld [vmem:[%s19070_s5 + $0x8] sm:$0xff] }
 0x84d   :  { %v18932_v25 = vadd.f32 %v8086_v8, %v7718_v52  ;;  %v9257_v52 = vld [vmem:[%s19070_s5 + $0x78] sm:$0xff] }
 0x84e   :  { %v8087_v39 = vpop.f32.mrf.mxu3  ;;  %9262 = vmatpush.msrb.mxu0 %v9257_v52  ;;  %13297 = vmatpush.msrb.mxu1 %v9257_v52 }
 0x84f   :  { %13298 = vmatpush.msrb.mxu2 %v9257_v52  ;;  %13299 = vmatpush.msrb.mxu3 %v9257_v52 }
 0x850   :  { %v8068_v36 = vpop.f32.mrf.mxu2  ;;  %9263 = vmatpush.msrb.mxu0 %v9256_v15  ;;  %13300 = vmatpush.msrb.mxu1 %v9256_v15 }
 0x851   :  { %v8069_v23 = vadd.f32 %v8068_v36, %v8050_v45  ;;  %v8033_v62 = vpop.f32.mrf.mxu0  ;;  %13301 = vmatpush.msrb.mxu2 %v9256_v15  ;;  %13302 = vmatpush.msrb.mxu3 %v9256_v15  ;;  %v9242_v45 = vld [vmem:[%s19070_s5] sm:$0xff] }
 0x852   :  { %v8052_v49 = vpop.f32.mrf.mxu1  ;;  %9264 = vmatpush.msrb.mxu0 %v9255_v11  ;;  %13303 = vmatpush.msrb.mxu1 %v9255_v11 }
 0x853   :  { %v8088_v43 = vadd.f32 %v8087_v39, %v8069_v23  ;;  %v8053_v19 = vadd.f32 %v8052_v49, %v8033_v62  ;;  %13304 = vmatpush.msrb.mxu2 %v9255_v11  ;;  %13305 = vmatpush.msrb.mxu3 %v9255_v11 }
 0x854   :  { %9265 = vmatpush.msrb.mxu0 %v9254_v2  ;;  %13306 = vmatpush.msrb.mxu1 %v9254_v2 }
 0x855   :  { %v18934_v1 = vadd.f32 %v8088_v43, %v7719_v27  ;;  %v9253_v27 = vld [vmem:[%s19070_s5 + $0x58] sm:$0xff]  ;;  %13307 = vmatpush.msrb.mxu2 %v9254_v2  ;;  %13308 = vmatpush.msrb.mxu3 %v9254_v2 }
 0x856   :  { %v8090_v34 = vpop.f32.mrf.mxu3  ;;  %9266 = vmatpush.msrb.mxu0 %v9253_v27  ;;  %13309 = vmatpush.msrb.mxu1 %v9253_v27 }
 0x857   :  { %13310 = vmatpush.msrb.mxu2 %v9253_v27  ;;  %13311 = vmatpush.msrb.mxu3 %v9253_v27 }
 0x858   :  { %v8071_v38 = vpop.f32.mrf.mxu2  ;;  %9267 = vmatpush.msrb.mxu0 %v9252_v14  ;;  %13312 = vmatpush.msrb.mxu1 %v9252_v14 }
 0x859   :  { %v8072_v56 = vadd.f32 %v8071_v38, %v8053_v19  ;;  %v8035_v44 = vpop.f32.mrf.mxu0  ;;  %13313 = vmatpush.msrb.mxu2 %v9252_v14  ;;  %13314 = vmatpush.msrb.mxu3 %v9252_v14 }
 0x85a   :  { %v8054_v13 = vpop.f32.mrf.mxu1  ;;  %9268 = vmatpush.msrb.mxu0 %v9251_v51  ;;  %13315 = vmatpush.msrb.mxu1 %v9251_v51 }
 0x85b   :  { %v8091_v26 = vadd.f32 %v8090_v34, %v8072_v56  ;;  %v8055_v58 = vadd.f32 %v8054_v13, %v8035_v44  ;;  %13316 = vmatpush.msrb.mxu2 %v9251_v51  ;;  %13317 = vmatpush.msrb.mxu3 %v9251_v51 }
 0x85c   :  { %9269 = vmatpush.msrb.mxu0 %v9250_v20  ;;  %13318 = vmatpush.msrb.mxu1 %v9250_v20 }
 0x85d   :  { %v18936_v54 = vadd.f32 %v8091_v26, %v7720_v60  ;;  %v9249_v60 = vld [vmem:[%s19070_s5 + $0x38] sm:$0xff]  ;;  %13319 = vmatpush.msrb.mxu2 %v9250_v20  ;;  %13320 = vmatpush.msrb.mxu3 %v9250_v20 }
 0x85e   :  { %v8092_v41 = vpop.f32.mrf.mxu3  ;;  %9270 = vmatpush.msrb.mxu0 %v9249_v60  ;;  %13321 = vmatpush.msrb.mxu1 %v9249_v60 }
 0x85f   :  { %13322 = vmatpush.msrb.mxu2 %v9249_v60  ;;  %13323 = vmatpush.msrb.mxu3 %v9249_v60 }
 0x860   :  { %v8073_v7 = vpop.f32.mrf.mxu2  ;;  %9271 = vmatpush.msrb.mxu0 %v9248_v63  ;;  %13324 = vmatpush.msrb.mxu1 %v9248_v63 }
 0x861   :  { %v8074_v61 = vadd.f32 %v8073_v7, %v8055_v58  ;;  %v18938_v47 = vpop.f32.mrf.mxu0  ;;  %13325 = vmatpush.msrb.mxu2 %v9248_v63  ;;  %13326 = vmatpush.msrb.mxu3 %v9248_v63 }
 0x862   :  { %v18940_v10 = vpop.f32.mrf.mxu1  ;;  %9272 = vmatpush.msrb.mxu0 %v9247_v55  ;;  %13327 = vmatpush.msrb.mxu1 %v9247_v55 }
 0x863   :  { %v8093_v30 = vadd.f32 %v8092_v41, %v8074_v61  ;;  %13328 = vmatpush.msrb.mxu2 %v9247_v55  ;;  %13329 = vmatpush.msrb.mxu3 %v9247_v55  ;;  %v8425_v49 = vadd.f32 %v18940_v10, %v18938_v47 }
 0x864   :  { %9273 = vmatpush.msrb.mxu0 %v9246_v31  ;;  %13330 = vmatpush.msrb.mxu1 %v9246_v31 }
 0x865   :  { %v18942_v46 = vadd.f32 %v8093_v30, %v7721_v29  ;;  %v9245_v29 = vld [vmem:[%s19070_s5 + $0x18] sm:$0xff]  ;;  %13331 = vmatpush.msrb.mxu2 %v9246_v31  ;;  %13332 = vmatpush.msrb.mxu3 %v9246_v31 }
 0x866   :  { %v18946_v16 = vpop.f32.mrf.mxu3  ;;  %9274 = vmatpush.msrb.mxu0 %v9245_v29  ;;  %13333 = vmatpush.msrb.mxu1 %v9245_v29 }
 0x867   :  { %13334 = vmatpush.msrb.mxu2 %v9245_v29  ;;  %13335 = vmatpush.msrb.mxu3 %v9245_v29 }
 0x868   :  { %v18944_v37 = vpop.f32.mrf.mxu2  ;;  %9275 = vmatpush.msrb.mxu0 %v9244_v18  ;;  %13336 = vmatpush.msrb.mxu1 %v9244_v18 }
 0x869   :  { %v18948_v59 = vpop.f32.mrf.mxu0  ;;  %13337 = vmatpush.msrb.mxu2 %v9244_v18  ;;  %13338 = vmatpush.msrb.mxu3 %v9244_v18  ;;  %v8444_v19 = vadd.f32 %v18944_v37, %v8425_v49 }
 0x86a   :  { %v18950_v32 = vpop.f32.mrf.mxu1  ;;  %9276 = vmatpush.msrb.mxu0 %v9243_v9  ;;  %13339 = vmatpush.msrb.mxu1 %v9243_v9 }
 0x86b   :  { %13340 = vmatpush.msrb.mxu2 %v9243_v9  ;;  %13341 = vmatpush.msrb.mxu3 %v9243_v9  ;;  %v8463_v26 = vadd.f32 %v18946_v16, %v8444_v19  ;;  %v8427_v58 = vadd.f32 %v18950_v32, %v18948_v59  ;;  %v13345_v16 = vld [vmem:[%s19068_s4] ss:$0 sm:$0xff] }
 0x86c   :  { %9277 = vmatpush.msrb.mxu0 %v9242_v45  ;;  %13342 = vmatpush.msrb.mxu1 %v9242_v45 }
 0x86d   :  { %13343 = vmatpush.msrb.mxu2 %v9242_v45  ;;  %13344 = vmatpush.msrb.mxu3 %v9242_v45  ;;  %v8472_v47 = vadd.f32 %v8463_v26, %v18932_v25 }
 0x86e   :  { %v18954_v12 = vpop.f32.mrf.mxu3 }
 0x870   :  { %v18952_v48 = vpop.f32.mrf.mxu2 }
 0x871   :  { %v18956_v40 = vpop.f32.mrf.mxu0  ;;  %v8446_v10 = vadd.f32 %v18952_v48, %v8427_v58 }
 0x872   :  { %v18958_v6 = vpop.f32.mrf.mxu1 }
 0x873   :  { %v8465_v59 = vadd.f32 %v18954_v12, %v8446_v10  ;;  %v8430_v25 = vadd.f32 %v18958_v6, %v18956_v40 }
 0x875   :  { %v8473_v60 = vadd.f32 %v8465_v59, %v18934_v1 }
 0x876   :  { %v18968_v5 = vpop.f32.mrf.mxu3 }
 0x878   :  { %v18966_v28 = vpop.f32.mrf.mxu2 }
 0x879   :  { %v18970_v21 = vpop.f32.mrf.mxu0 }
 0x87a   :  { %v18975_v33 = vpop.f32.mrf.mxu1 }
 0x87b   :  { %v8432_v18 = vadd.f32 %v18975_v33, %v18970_v21 }
 0x87e   :  { %v18988_v4 = vpop.f32.mrf.mxu3 }
 0x880   :  { %v18986_v24 = vpop.f32.mrf.mxu2 }
 0x881   :  { %v18990_v0 = vpop.f32.mrf.mxu0  ;;  %v8451_v9 = vadd.f32 %v18986_v24, %v8432_v18 }
 0x882   :  { %v18995_v17 = vpop.f32.mrf.mxu1 }
 0x883   :  { %v8802_v38 = vadd.f32 %v18995_v17, %v18990_v0  ;;  %v8449_v17 = vadd.f32 %v18966_v28, %v8430_v25  ;;  %v8470_v21 = vadd.f32 %v18988_v4, %v8451_v9  ;;  %v13346_v4 = vld [vmem:[%s19069_s6] ss:$0 sm:$0xff] }
 0x885   :  { %v8468_v40 = vadd.f32 %v18968_v5, %v8449_v17  ;;  %v8475_v58 = vadd.f32 %v8470_v21, %v18942_v46 }
 0x886   :  { %v8839_v3 = vpop.f32.mrf.mxu3 }
 0x887   :  { %v8474_v1 = vadd.f32 %v8468_v40, %v18936_v54 }
 0x888   :  { %v8820_v50 = vpop.f32.mrf.mxu2 }
 0x889   :  { %v8784_v22 = vpop.f32.mrf.mxu0  ;;  %v8821_v13 = vadd.f32 %v8820_v50, %v8802_v38 }
 0x88a   :  { %v8803_v42 = vpop.f32.mrf.mxu1 }
 0x88b   :  { %v8840_v7 = vadd.f32 %v8839_v3, %v8821_v13  ;;  %v8804_v30 = vadd.f32 %v8803_v42, %v8784_v22 }
 0x88d   :  { %v8849_v2 = vadd.f32 %v8840_v7, %v8472_v47 }
 0x88e   :  { %v8841_v53 = vpop.f32.mrf.mxu3 }
 0x890   :  { %v8822_v57 = vpop.f32.mrf.mxu2 }
 0x891   :  { %v8787_v35 = vpop.f32.mrf.mxu0  ;;  %v8823_v27 = vadd.f32 %v8822_v57, %v8804_v30 }
 0x892   :  { %v8806_v8 = vpop.f32.mrf.mxu1 }
 0x893   :  { %v8842_v0 = vadd.f32 %v8841_v53, %v8823_v27  ;;  %v8807_v63 = vadd.f32 %v8806_v8, %v8787_v35 }
 0x895   :  { %v8850_v31 = vadd.f32 %v8842_v0, %v8473_v60 }
 0x896   :  { %v8844_v23 = vpop.f32.mrf.mxu3 }
 0x898   :  { %v8825_v36 = vpop.f32.mrf.mxu2 }
 0x899   :  { %v8789_v39 = vpop.f32.mrf.mxu0  ;;  %v8826_v12 = vadd.f32 %v8825_v36, %v8807_v63 }
 0x89a   :  { %v8808_v62 = vpop.f32.mrf.mxu1 }
 0x89b   :  { %v8845_v28 = vadd.f32 %v8844_v23, %v8826_v12  ;;  %v8809_v8 = vadd.f32 %v8808_v62, %v8789_v39 }
 0x89d   :  { %v8851_v19 = vadd.f32 %v8845_v28, %v8474_v1 }
 0x89e   :  { %v8846_v56 = vpop.f32.mrf.mxu3 }
 0x8a0   :  { %v8827_v43 = vpop.f32.mrf.mxu2 }
 0x8a1   :  { %v9159_v34 = vpop.f32.mrf.mxu0  ;;  %v8828_v38 = vadd.f32 %v8827_v43, %v8809_v8 }
 0x8a2   :  { %v9178_v44 = vpop.f32.mrf.mxu1 }
 0x8a3   :  { %v9179_v61 = vadd.f32 %v9178_v44, %v9159_v34  ;;  %v8847_v23 = vadd.f32 %v8846_v56, %v8828_v38 }
 0x8a5   :  { %v8852_v7 = vadd.f32 %v8847_v23, %v8475_v58 }
 0x8a6   :  { %v9216_v52 = vpop.f32.mrf.mxu3 }
 0x8a8   :  { %v9197_v41 = vpop.f32.mrf.mxu2 }
 0x8a9   :  { %v9198_v37 = vadd.f32 %v9197_v41, %v9179_v61  ;;  %v9161_v15 = vpop.f32.mrf.mxu0 }
 0x8aa   :  { %v9180_v11 = vpop.f32.mrf.mxu1 }
 0x8ab   :  { %v9217_v14 = vadd.f32 %v9216_v52, %v9198_v37  ;;  %v9181_v51 = vadd.f32 %v9180_v11, %v9161_v15 }
 0x8ad   :  { %v9226_v32 = vadd.f32 %v9217_v14, %v8849_v2 }
 0x8ae   :  { %v9218_v22 = vpop.f32.mrf.mxu3 }
 0x8af   :  { %v9234_v48 = vadd.f32 %v13345_v16, %v9226_v32 }
 0x8b0   :  { %v9199_v20 = vpop.f32.mrf.mxu2 }
 0x8b1   :  { %v9238_v50 = vmax.f32 %v9234_v48, 0.0  ;;  %v9200_v3 = vadd.f32 %v9199_v20, %v9181_v51  ;;  %v9164_v55 = vpop.f32.mrf.mxu0 }
 0x8b2   :  { %v9183_v42 = vpop.f32.mrf.mxu1 }
 0x8b3   :  { %v9219_v29 = vadd.f32 %v9218_v22, %v9200_v3  ;;  %9278 = vmatmul.f32.vlgmr.msrb.gmra.mxu0 %v9238_v50  ;;  %v9184_v53 = vadd.f32 %v9183_v42, %v9164_v55 }
 0x8b5   :  { %v9227_v6 = vadd.f32 %v9219_v29, %v8850_v31 }
 0x8b6   :  { %v9221_v36 = vpop.f32.mrf.mxu3 }
 0x8b7   :  { %v9235_v57 = vadd.f32 %v13345_v16, %v9227_v6 }
 0x8b8   :  { %v9202_v35 = vpop.f32.mrf.mxu2 }
 0x8b9   :  { %v9239_v45 = vmax.f32 %v9235_v57, 0.0  ;;  %v9203_v49 = vadd.f32 %v9202_v35, %v9184_v53  ;;  %v9166_v5 = vpop.f32.mrf.mxu0 }
 0x8ba   :  { %v9185_v44 = vpop.f32.mrf.mxu1 }
 0x8bb   :  { %v9222_v34 = vadd.f32 %v9221_v36, %v9203_v49  ;;  %9281 = vmatmul.f32.vlgmr.msrb.gmra.mxu1 %v9239_v45  ;;  %v9186_v26 = vadd.f32 %v9185_v44, %v9166_v5 }
 0x8bd   :  { %v9228_v33 = vadd.f32 %v9222_v34, %v8851_v19 }
 0x8be   :  { %v9223_v62 = vpop.f32.mrf.mxu3 }
 0x8bf   :  { %v9236_v13 = vadd.f32 %v13345_v16, %v9228_v33 }
 0x8c0   :  { %v9204_v54 = vpop.f32.mrf.mxu2 }
 0x8c1   :  { %v9240_v24 = vmax.f32 %v9236_v13, 0.0  ;;  %v9205_v39 = vadd.f32 %v9204_v54, %v9186_v26 }
 0x8c3   :  { %v9224_v61 = vadd.f32 %v9223_v62, %v9205_v39  ;;  %9284 = vmatmul.f32.vlgmr.msrb.gmra.mxu2 %v9240_v24 }
 0x8c5   :  { %v9229_v43 = vadd.f32 %v9224_v61, %v8852_v7 }
 0x8c7   :  { %v9237_v41 = vadd.f32 %v13345_v16, %v9229_v43 }
 0x8c9   :  { %v9241_v47 = vmax.f32 %v9237_v41, 0.0 }
 0x8cb   :  { %9287 = vmatmul.f32.vlgmr.msrb.gmra.mxu3 %v9241_v47 }
 0x930   :  { %v9279_v56 = vpop.f32.mrf.mxu0 }
 0x931   :  { %v9280_v10 = vadd.f32 %v13346_v4, %v9279_v56 }
 0x933   :  { %9291 = vmax.xlane.f32.xlu0 %v9280_v10 }
 0x938   :  { %v9282_v30 = vpop.f32.mrf.mxu1 }
 0x939   :  { %v9283_v37 = vadd.f32 %v13346_v4, %v9282_v30 }
 0x93b   :  { %9293 = vmax.xlane.f32.xlu0 %v9283_v37 }
 0x946   :  { %v9285_v46 = vpop.f32.mrf.mxu2 }
 0x947   :  { %v9286_v52 = vadd.f32 %v13346_v4, %v9285_v46 }
 0x949   :  { %9295 = vmax.xlane.f32.xlu1 %v9286_v52 }
 0x94e   :  { %v9288_v15 = vpop.f32.mrf.mxu3 }
 0x94f   :  { %v9289_v11 = vadd.f32 %v13346_v4, %v9288_v15 }
 0x951   :  { %9297 = vmax.xlane.f32.xlu1 %v9289_v11 }
 0x9a6   :  { %v9292_v2 = vpop.xlane.xlu0 %9291 }
 0x9a7   :  { %v9299_v27 = vsub.f32 %v9280_v10, %v9292_v2 }
 0x9a9   :  { %v9303_v14 = vmul.f32 1.442695, %v9299_v27 }
 0x9ab   :  { %13347 = vpow2.f32 %v9303_v14 }
 0x9ae   :  { %v9294_v16 = vpop.xlane.xlu0 %9293 }
 0x9af   :  { %v9300_v59 = vsub.f32 %v9283_v37, %v9294_v16 }
 0x9b1   :  { %v13348_v32 = vpop.eup %13347  ;;  %v9305_v25 = vmul.f32 1.442695, %v9300_v59 }
 0x9b2   :  { %9311 = vadd.xlane.f32.xlu2 %v13348_v32 }
 0x9b3   :  { %13349 = vpow2.f32 %v9305_v25 }
 0x9b9   :  { %v13350_v0 = vpop.eup %13349 }
 0x9ba   :  { %9313 = vadd.xlane.f32.xlu2 %v13350_v0 }
 0x9bc   :  { %v9296_v48 = vpop.xlane.xlu1 %9295 }
 0x9bd   :  { %v9301_v51 = vsub.f32 %v9286_v52, %v9296_v48 }
 0x9bf   :  { %v9307_v17 = vmul.f32 1.442695, %v9301_v51 }
 0x9c1   :  { %13351 = vpow2.f32 %v9307_v17 }
 0x9c4   :  { %v9298_v20 = vpop.xlane.xlu1 %9297 }
 0x9c5   :  { %v9302_v60 = vsub.f32 %v9289_v11, %v9298_v20 }
 0x9c7   :  { %v13352_v63 = vpop.eup %13351  ;;  %v9309_v50 = vmul.f32 1.442695, %v9302_v60 }
 0x9c8   :  { %9315 = vadd.xlane.f32.xlu0 %v13352_v63 }
 0x9c9   :  { %13353 = vpow2.f32 %v9309_v50 }
 0x9cf   :  { %v13354_v3 = vpop.eup %13353 }
 0x9d0   :  { %9317 = vadd.xlane.f32.xlu1 %v13354_v3 }
 0xa25   :  { %v9312_v22 = vpop.xlane.xlu2 %9311 }
 0xa26   :  { %13355 = vlog2.f32 %v9312_v22 }
 0xa2c   :  { %v13356_v55 = vpop.eup %13355 }
 0xa2d   :  { %v9320_v42 = vmul.f32 0.6931472, %v13356_v55  ;;  %v9314_v31 = vpop.xlane.xlu2 %9313 }
 0xa2e   :  { %13357 = vlog2.f32 %v9314_v31 }
 0xa2f   :  { %v9327_v12 = vadd.f32 %v9320_v42, %v9292_v2 }
 0xa31   :  { %v9331_v29 = vsub.f32 %v9280_v10, %v9327_v12 }
 0xa33   :  { %9335 = vst [vmem:[%s19071_s7] sm:$0xff] %v9331_v29 }
 0xa34   :  { %v13358_v40 = vpop.eup %13357 }
 0xa35   :  { %v9322_v6 = vmul.f32 0.6931472, %v13358_v40 }
 0xa37   :  { %v9328_v18 = vadd.f32 %v9322_v6, %v9294_v16 }
 0xa39   :  { %v9332_v28 = vsub.f32 %v9283_v37, %v9328_v18 }
 0xa3b   :  { %9336 = vst [vmem:[%s19071_s7 + $0x8] sm:$0xff] %v9332_v28  ;;  %v9316_v57 = vpop.xlane.xlu0 %9315 }
 0xa3c   :  { %13359 = vlog2.f32 %v9316_v57 }
 0xa42   :  { %v13360_v53 = vpop.eup %13359 }
 0xa43   :  { %v9324_v1 = vmul.f32 0.6931472, %v13360_v53  ;;  %v9318_v35 = vpop.xlane.xlu1 %9317 }
 0xa44   :  { %13361 = vlog2.f32 %v9318_v35 }
 0xa45   :  { %v9329_v9 = vadd.f32 %v9324_v1, %v9296_v48 }
 0xa47   :  { %v9333_v8 = vsub.f32 %v9286_v52, %v9329_v9 }
 0xa49   :  { %9337 = vst [vmem:[%s19071_s7 + $0x10] sm:$0xff] %v9333_v8 }
 0xa4a   :  { %v13362_v45 = vpop.eup %13361 }
 0xa4b   :  { %v9326_v49 = vmul.f32 0.6931472, %v13362_v45 }
 0xa4d   :  { %v9330_v36 = vadd.f32 %v9326_v49, %v9298_v20 }
 0xa4f   :  { %v9334_v19 = vsub.f32 %v9289_v11, %v9330_v36 }
 0xa51   :  { %9338 = vst [vmem:[%s19071_s7 + $0x18] sm:$0xff] %v9334_v19 }

</bundles_post_ra>
